<compile_context>
chip_gen: v7x
topology: tpu7x:2x2x1
jax: 0.10.0
libtpu: 0.0.40
codegen_flags: <defaults>
</compile_context>

<pallas_src>
import jax
import jax.numpy as jnp
import numpy as np
from jax.experimental import pallas as pl
from jax.experimental.pallas import tpu as pltpu


# ---------------------------------------------------------------------------
# shared math helpers (used inside the Pallas kernel AND by the JAX references)
# ---------------------------------------------------------------------------
def _mm(x, w):
    return jnp.dot(x, w, preferred_element_type=jnp.float32)


def _layernorm(x, g, b, eps=1e-5):
    m = jnp.mean(x, axis=-1, keepdims=True)
    c = x - m
    v = jnp.mean(c * c, axis=-1, keepdims=True)
    return c * jax.lax.rsqrt(v + eps) * g + b


def _gru_from_gates(gi, gh, h):
    # PyTorch nn.GRUCell semantics, gate order [r, z, n]
    Hd = h.shape[-1]
    r = jax.nn.sigmoid(gi[:, :Hd] + gh[:, :Hd])
    z = jax.nn.sigmoid(gi[:, Hd:2 * Hd] + gh[:, Hd:2 * Hd])
    n = jnp.tanh(gi[:, 2 * Hd:] + r * gh[:, 2 * Hd:])
    return (1.0 - z) * n + z * h


def _tile_rows(a, k):
    # (R, F) -> (k*R, F), k-major rows (sublane-axis tile)
    return jnp.concatenate([a] * k, axis=0) if k > 1 else a


def _lln_relu(P, name, v):
    # Linear + LayerNorm + ReLU block
    return jnp.maximum(
        _layernorm(_mm(v, P(name + '_w')) + P(name + '_b'),
                   P(name + '_g'), P(name + '_lb')), 0.0)


# ---------------------------------------------------------------------------
# parameter construction (deterministic; mirrors the nn.Module __init__ shapes)
# ---------------------------------------------------------------------------
def init_params(key, D_in, H, H4, L, D_pred):
    params = {}
    keys = iter(jax.random.split(key, 256))

    def rnd(shape, scale=0.1):
        return (scale * jax.random.normal(next(keys), shape)).astype(jnp.float32)

    def lin(name, din, dout):
        params[name + '_w'] = rnd((din, dout))
        params[name + '_b'] = rnd((1, dout), 0.05)

    def lin_ln(name, din, dout):
        lin(name, din, dout)
        params[name + '_g'] = (1.0 + rnd((1, dout))).astype(jnp.float32)
        params[name + '_lb'] = rnd((1, dout), 0.05)

    def gru(name, din, dh):
        params[name + '_wih'] = rnd((din, 3 * dh))
        params[name + '_whh'] = rnd((dh, 3 * dh))
        params[name + '_bih'] = rnd((1, 3 * dh), 0.05)
        params[name + '_bhh'] = rnd((1, 3 * dh), 0.05)

    lin('fe', D_in, H)          # feature_extractor: Linear(input_dim, hidden) + ReLU
    gru('enc', H + H4, H)       # traj_enc_cell: GRUCell(hidden + hidden//4, hidden)
    lin_ln('e2g', H, H4)        # enc_to_goal_hidden
    gru('goal', H4, H4)         # goal_cell
    lin_ln('gh2i', H4, H4)      # goal_hidden_to_input
    lin_ln('gh2t', H4, H)       # goal_hidden_to_traj
    lin('reg', H, D_pred)       # regressor
    lin_ln('g2e', H4, H4)       # goal_to_enc
    lin_ln('g2d', H4, H4)       # goal_to_dec
    lin_ln('eattn', H4, 1)      # enc_goal_attn (Linear + LayerNorm(1) + ReLU)
    lin_ln('dattn', H4, 1)      # dec_goal_attn
    lin_ln('e2d', H, H)         # enc_to_dec_hidden
    lin('pz1', H, 128)          # BiTraPNP.p_z_x MLP
    lin('pz2', 128, 64)
    lin('pz3', 64, 2 * L)
    lin_ln('c2d', H + L, H)     # cvae_to_dec_hidden
    lin_ln('dh2i', H, H)        # dec_hidden_to_input
    gru('dec', H4 + H, H)       # dec_cell: GRUCell(hidden + hidden//4, hidden)
    return params


def make_kernel_params(params, H, H4):
    """Kernel-side parameter dict: split concat-input weights where the concat
    would happen per K sample, fuse shared-LHS weights on the serial decoder
    path, and drop the algebraically inert attention heads (LayerNorm over one
    feature -> constant logits -> uniform softmax)."""
    drop = {'eattn_w', 'eattn_b', 'eattn_g', 'eattn_lb',
            'dattn_w', 'dattn_b', 'dattn_g', 'dattn_lb',
            'c2d_w', 'dec_wih', 'dec_whh', 'dh2i_w'}
    kp = {k: v for k, v in params.items() if k not in drop}
    kp['c2d_wh'] = params['c2d_w'][:H, :]        # dec_hidden part (shared by K)
    kp['c2d_wz'] = params['c2d_w'][H:, :]        # latent-sample part
    kp['dec_wih_g'] = params['dec_wih'][:H4, :]  # goal_dec_input part (hoisted)
    kp['dec_wih_d'] = params['dec_wih'][H4:, :]  # dec_dec_input part
    # fused [dec_hidden_to_input | dec GRU W_hh] -> one (H, 4H) matmul per step
    kp['dhf_w'] = jnp.concatenate([params['dh2i_w'], params['dec_whh']], axis=1)
    return kp


def pack_param_slab(kp):
    """Pack every parameter into ONE (rows, 128) f32 slab: a single DMA at
    kernel start, and static point-of-use slices inside the kernel."""
    order = sorted(kp.keys())
    layout, off, maxc = {}, 0, 0
    for name in order:
        r, c = kp[name].shape
        layout[name] = (off, r, c)
        off += ((r + 7) // 8) * 8          # 8-sublane aligned row blocks
        maxc = max(maxc, c)
    lanes = ((maxc + 127) // 128) * 128
    slab = np.zeros((off, lanes), np.float32)
    for name in order:
        o, r, c = layout[name]
        slab[o:o + r, :c] = np.asarray(kp[name], np.float32)
    return jnp.asarray(slab), layout


# ---------------------------------------------------------------------------
# phase A: one encoder timestep (the ONLY true recurrence over enc_steps)
# ---------------------------------------------------------------------------
def phase_a_step(P, x_t, genc, henc, T_dec):
    """Returns (h_enc, [goal_hidden_d for d in range(T_dec)], goal_for_enc_new)."""
    B, H4 = genc.shape

    # feature extractor (Linear + ReLU)
    feat = jnp.maximum(_mm(x_t, P('fe_w')) + P('fe_b'), 0.0)               # (B, H)

    # traj_enc_cell: single fused input matmul on concat([feat, goal_for_enc])
    gi = _mm(jnp.concatenate([feat, genc], axis=1), P('enc_wih')) + P('enc_bih')
    gh = _mm(henc, P('enc_whh')) + P('enc_bhh')
    h_enc = _gru_from_gates(gi, gh, henc)                                   # (B, H)

    # SGE: serial goal GRU
    gstate = _lln_relu(P, 'e2g', h_enc)                                     # (B, H4)
    ginput = jnp.zeros((B, H4), jnp.float32)
    gh_steps = []
    for _ in range(T_dec):
        gi_g = _mm(ginput, P('goal_wih')) + P('goal_bih')
        gh_g = _mm(gstate, P('goal_whh')) + P('goal_bhh')
        gstate = _gru_from_gates(gi_g, gh_g, gstate)
        ginput = _lln_relu(P, 'gh2i', gstate)
        gh_steps.append(gstate)

    # goal_for_enc: LayerNorm(1) attention head is constant -> uniform softmax
    # -> exact mean of goal_to_enc over the T_dec goal states.
    gfe = _lln_relu(P, 'g2e', jnp.concatenate(gh_steps, axis=0))            # (T_dec*B, H4)
    s = gfe[0:B]
    for d in range(1, T_dec):
        s = s + gfe[d * B:(d + 1) * B]
    genc_new = s * (1.0 / T_dec)
    return h_enc, gh_steps, genc_new


# ---------------------------------------------------------------------------
# phase B: everything downstream of the encoder carry, batched over ALL
# enc_steps (rows ordered (d, t, b) for goals and (k, t, b) for CVAE samples)
# ---------------------------------------------------------------------------
def phase_b(P, h_all, gh_all, noise_all):
    TB, H = h_all.shape                 # TB = T_enc * B
    H4 = gh_all.shape[1]
    T_dec = gh_all.shape[0] // TB
    L = noise_all.shape[1]
    K = noise_all.shape[0] // TB
    inv_td = 1.0 / T_dec

    # goal trajectories: ONE gh2t + ONE regressor matmul for all (t, d)
    goal_flat = _mm(_lln_relu(P, 'gh2t', gh_all), P('reg_w')) + P('reg_b')  # (T_dec*TB, 2)

    # goal_to_dec + suffix sums (uniform dec attention over zero-padded goals)
    gfd = _lln_relu(P, 'g2d', gh_all)                                       # (T_dec*TB, H4)
    sfx = [None] * T_dec
    acc = gfd[(T_dec - 1) * TB:T_dec * TB]
    sfx[T_dec - 1] = acc
    for d in range(T_dec - 2, -1, -1):
        acc = acc + gfd[d * TB:(d + 1) * TB]
        sfx[d] = acc
    # goal contribution to the decoder GRU input gates: does not depend on
    # dec_hidden, so it is computed ONCE here, off the serial decoder chain.
    gg_all = _mm(jnp.concatenate(sfx, axis=0) * inv_td, P('dec_wih_g'))     # (T_dec*TB, 3H)

    # CVAE prior (BiTraPNP.p_z_x) on all timesteps at once
    dec_h0 = _lln_relu(P, 'e2d', h_all)                                     # (TB, H)
    z = jnp.maximum(_mm(dec_h0, P('pz1_w')) + P('pz1_b'), 0.0)
    z = jnp.maximum(_mm(z, P('pz2_w')) + P('pz2_b'), 0.0)
    z = _mm(z, P('pz3_w')) + P('pz3_b')                                     # (TB, 2L)
    mu, logvar = z[:, :L], z[:, L:]
    std = jnp.exp(0.5 * logvar)
    Z = _tile_rows(mu, K) + noise_all * _tile_rows(std, K)                  # (K*TB, L)

    # cvae_to_dec_hidden with pre-split weight; the dec_h0 half is shared by K
    cv = _tile_rows(_mm(dec_h0, P('c2d_wh')), K) + _mm(Z, P('c2d_wz')) + P('c2d_b')
    dec_h = jnp.maximum(_layernorm(cv, P('c2d_g'), P('c2d_lb')), 0.0)       # (K*TB, H)

    # CVAE decoder: serial only over T_dec; every (t, k, b) row batched.
    # dec_hidden_to_input and the GRU W_hh share dec_h as LHS -> fused matmul.
    cvae_blocks = []
    for d in range(T_dec):
        fused = _mm(dec_h, P('dhf_w'))                                      # (K*TB, 4H)
        ddi = jnp.maximum(_layernorm(fused[:, :H] + P('dh2i_b'),
                                     P('dh2i_g'), P('dh2i_lb')), 0.0)
        gh = fused[:, H:] + P('dec_bhh')
        gi = (_tile_rows(gg_all[d * TB:(d + 1) * TB], K)
              + _mm(ddi, P('dec_wih_d')) + P('dec_bih'))
        dec_h = _gru_from_gates(gi, gh, dec_h)
        cvae_blocks.append(_mm(dec_h, P('reg_w')) + P('reg_b'))             # (K*TB, 2)
    return goal_flat, cvae_blocks


# ---------------------------------------------------------------------------
# the Pallas kernel: one invocation; phase A fori_loop + batched phase B
# ---------------------------------------------------------------------------
def make_kernel(layout, T_enc, T_dec, K, B):
    TB = T_enc * B
    KTB = K * TB

    def kernel(x_ref, noise_ref, slab_ref, goal_ref, cvae_ref, h_all_s, gh_all_s):
        def P(name):
            off, r, c = layout[name]
            return slab_ref[off:off + r, :c]    # static point-of-use slice

        H = h_all_s.shape[1]
        H4 = gh_all_s.shape[1]

        # ---- phase A: sequential over enc_steps (the only real recurrence) ----
        def body(t, carry):
            genc, henc = carry
            h_enc, gh_steps, genc_new = phase_a_step(P, x_ref[t], genc, henc, T_dec)
            h_all_s[pl.ds(t * B, B), :] = h_enc
            for d in range(T_dec):
                gh_all_s[pl.ds(d * TB + t * B, B), :] = gh_steps[d]
            return genc_new, h_enc

        jax.lax.fori_loop(
            0, T_enc, body,
            (jnp.zeros((B, H4), jnp.float32), jnp.zeros((B, H), jnp.float32)))

        # ---- phase B: batched over all enc_steps and K samples ----
        goal_flat, cvae_blocks = phase_b(P, h_all_s[...], gh_all_s[...], noise_ref[...])
        goal_ref[...] = goal_flat
        for d in range(T_dec):
            cvae_ref[pl.ds(d * KTB, KTB), :] = cvae_blocks[d]

    return kernel


def _to_torch_layout(goal_flat, cvae_flat, T_enc, T_dec, K, B, D_pred=2):
    # goal_flat rows ordered (d, t, b); cvae_flat rows ordered (d, k, t, b)
    goal = goal_flat.reshape(T_dec, T_enc, B, D_pred).transpose(2, 1, 0, 3)
    cvae = cvae_flat.reshape(T_dec, K, T_enc, B, D_pred).transpose(3, 2, 0, 1, 4)
    return goal, cvae


# ---------------------------------------------------------------------------
# wrapper
# ---------------------------------------------------------------------------
def sgnet_cvae_forward(params, inputs_tbd, noise, *, dec_steps, K, hidden, latent):
    # inputs_tbd: (enc_steps, B, input_dim) — time-major (PyTorch layout before
    #             its internal permute(1, 0, 2)).
    # noise     : (enc_steps, K, B, latent) — precomputed N(nu, sigma) samples.
    T_enc, B, D_in = inputs_tbd.shape
    H, H4, L, D_pred = hidden, hidden // 4, latent, 2
    TB, KTB = T_enc * B, K * T_enc * B

    kp = make_kernel_params(params, H, H4)
    slab, layout = pack_param_slab(kp)
    noise_ktb = jnp.transpose(noise, (1, 0, 2, 3)).reshape(KTB, L)   # (k, t, b) rows

    kernel = make_kernel(layout, T_enc, dec_steps, K, B)

    # Single grid step; every operand is a whole-array resident VMEM block
    # (one DMA each).  Working set ~0.7 MiB -> no VMEM tuning needed.
    goal_flat, cvae_flat = pl.pallas_call(
        kernel,
        out_shape=[jax.ShapeDtypeStruct((dec_steps * TB, D_pred), jnp.float32),
                   jax.ShapeDtypeStruct((dec_steps * KTB, D_pred), jnp.float32)],
        grid=(1,),
        in_specs=[pl.BlockSpec((T_enc, B, D_in), lambda i: (0, 0, 0)),
                  pl.BlockSpec((KTB, L), lambda i: (0, 0)),
                  pl.BlockSpec(slab.shape, lambda i: (0, 0))],
        out_specs=[pl.BlockSpec((dec_steps * TB, D_pred), lambda i: (0, 0)),
                   pl.BlockSpec((dec_steps * KTB, D_pred), lambda i: (0, 0))],
        scratch_shapes=[pltpu.VMEM((TB, H), jnp.float32),                 # h_enc, all t
                        pltpu.VMEM((dec_steps * TB, H4), jnp.float32)],   # goal states
        compiler_params=pltpu.CompilerParams(
            dimension_semantics=("arbitrary",)),
    )(inputs_tbd, noise_ktb, slab)

    all_goal_traj, all_cvae_dec_traj = _to_torch_layout(
        goal_flat, cvae_flat, T_enc, dec_steps, K, B, D_pred)
    total_KLD = jnp.float32(0.0)                                  # inference: KLD == 0
    total_probabilities = jnp.zeros((B, T_enc, K), jnp.float32)   # BiTraPNP zeros
    return all_goal_traj, all_cvae_dec_traj, total_KLD, total_probabilities


# ---------------------------------------------------------------------------
# plain-JAX "mirror" of the kernel math (same phase_a_step / phase_b), used to
# verify the algebraic rewrites in the same compiler/precision environment
# ---------------------------------------------------------------------------
def mirror_forward(kp, x_tm, noise_ktb, *, dec_steps, K, hidden):
    T_enc, B, _ = x_tm.shape
    H, H4 = hidden, hidden // 4
    P = lambda n: kp[n]
    genc = jnp.zeros((B, H4), jnp.float32)
    henc = jnp.zeros((B, H), jnp.float32)
    h_rows, gh_rows = [], [[] for _ in range(dec_steps)]
    for t in range(T_enc):
        h_new, gh_steps, genc = phase_a_step(P, x_tm[t], genc, henc, dec_steps)
        henc = h_new
        h_rows.append(h_new)
        for d in range(dec_steps):
            gh_rows[d].append(gh_steps[d])
    h_all = jnp.concatenate(h_rows, axis=0)
    gh_all = jnp.concatenate([blk for d in range(dec_steps) for blk in gh_rows[d]], axis=0)
    goal_flat, cvae_blocks = phase_b(P, h_all, gh_all, noise_ktb)
    return _to_torch_layout(goal_flat, jnp.concatenate(cvae_blocks, axis=0),
                            T_enc, dec_steps, K, B)


# ---------------------------------------------------------------------------
# faithful plain-JAX port of the PyTorch forward (concat GRU inputs, full
# softmax attention through the LayerNorm(1) heads) — for verification
# ---------------------------------------------------------------------------
def ref_forward(params, x_tm, noise, *, dec_steps, K, hidden, latent):
    T_enc, B, _ = x_tm.shape
    H, H4, L = hidden, hidden // 4, latent
    P = lambda n: params[n]

    def lin(v, name):
        return _mm(v, P(name + '_w')) + P(name + '_b')

    def llr(v, name):
        return jnp.maximum(_layernorm(lin(v, name), P(name + '_g'), P(name + '_lb')), 0.0)

    def gru(x, h, name):
        gi = _mm(x, P(name + '_wih')) + P(name + '_bih')
        gh = _mm(h, P(name + '_whh')) + P(name + '_bhh')
        return _gru_from_gates(gi, gh, h)

    def attn_pool(vecs, name):
        logits = []
        for g in vecs:
            a = lin(jnp.tanh(g), name)
            a = _layernorm(a, P(name + '_g'), P(name + '_lb'))
            logits.append(jnp.maximum(a, 0.0))
        w = jax.nn.softmax(jnp.concatenate(logits, axis=-1), axis=-1)
        out = jnp.zeros_like(vecs[0])
        for j, g in enumerate(vecs):
            out = out + w[:, j:j + 1] * g
        return out

    genc = jnp.zeros((B, H4), jnp.float32)
    henc = jnp.zeros((B, H), jnp.float32)
    all_goal, all_cvae = [], []
    for t in range(T_enc):
        feat = jnp.maximum(lin(x_tm[t], 'fe'), 0.0)
        henc = gru(jnp.concatenate([feat, genc], axis=-1), henc, 'enc')
        gh = llr(henc, 'e2g')
        goal_input = jnp.zeros((B, H4), jnp.float32)
        goal_list, gt = [], []
        for d in range(dec_steps):
            gh = gru(goal_input, gh, 'goal')
            goal_input = llr(gh, 'gh2i')
            goal_list.append(gh)
            gt.append(lin(llr(gh, 'gh2t'), 'reg'))
        all_goal.append(jnp.stack(gt, axis=1))
        gfd = [llr(g, 'g2d') for g in goal_list]
        gfe = [llr(g, 'g2e') for g in goal_list]
        genc = attn_pool(gfe, 'eattn')
        dec_h0 = llr(henc, 'e2d')
        z = jnp.maximum(lin(dec_h0, 'pz1'), 0.0)
        z = jnp.maximum(lin(z, 'pz2'), 0.0)
        z = lin(z, 'pz3')
        mu, logvar = z[:, :L], z[:, L:]
        std = jnp.exp(0.5 * logvar)
        dec_hs = [llr(jnp.concatenate([dec_h0, mu + noise[t, k] * std], axis=-1), 'c2d')
                  for k in range(K)]
        step = []
        for d in range(dec_steps):
            vecs = [gfd[j] if j >= d else jnp.zeros((B, H4), jnp.float32)
                    for j in range(dec_steps)]
            gdi = attn_pool(vecs, 'dattn')
            ks = []
            for k in range(K):
                din = jnp.concatenate([gdi, llr(dec_hs[k], 'dh2i')], axis=-1)
                dec_hs[k] = gru(din, dec_hs[k], 'dec')
                ks.append(lin(dec_hs[k], 'reg'))
            step.append(jnp.stack(ks, axis=1))
        all_cvae.append(jnp.stack(step, axis=1))
    return jnp.stack(all_goal, axis=1), jnp.stack(all_cvae, axis=1)


# ---------------------------------------------------------------------------
if __name__ == "__main__":
    # small config consistent with the SGNet_CVAE args
    B, T_ENC, T_DEC, K = 4, 8, 4, 4
    HIDDEN, LATENT, D_IN = 32, 16, 6
    NU, SIGMA = 0.0, 1.3

    root = jax.random.PRNGKey(0)
    k_par, k_x, k_n = jax.random.split(root, 3)

    params = init_params(k_par, D_IN, HIDDEN, HIDDEN // 4, LATENT, 2)
    inputs = jax.random.normal(k_x, (T_ENC, B, D_IN), jnp.float32)       # time-major
    noise = NU + SIGMA * jax.random.normal(k_n, (T_ENC, K, B, LATENT), jnp.float32)

    outs = sgnet_cvae_forward(params, inputs, noise,
                              dec_steps=T_DEC, K=K, hidden=HIDDEN, latent=LATENT)
    outs = jax.block_until_ready(outs)
    all_goal_traj, all_cvae_dec_traj, kld, probs = outs

    assert all_goal_traj.shape == (B, T_ENC, T_DEC, 2)
    assert all_cvae_dec_traj.shape == (B, T_ENC, T_DEC, K, 2)
    assert probs.shape == (B, T_ENC, K)
    assert bool(jnp.all(jnp.isfinite(all_goal_traj)))
    assert bool(jnp.all(jnp.isfinite(all_cvae_dec_traj)))

    # (1) faithful plain-JAX port of the PyTorch math (concat GRU inputs, full
    #     softmax attention through the LayerNorm(1) heads).
    ref_goal, ref_cvae = ref_forward(params, inputs, noise,
                                     dec_steps=T_DEC, K=K,
                                     hidden=HIDDEN, latent=LATENT)

    # (2) plain-JAX mirror of the kernel's rewritten/batched math (uniform
    #     attention, phase A/B split, fused weights).  Comparing (1) vs (2) in
    #     the SAME compiler/precision environment shows the rewrites are exact
    #     up to float-summation reassociation.
    kp = make_kernel_params(params, HIDDEN, HIDDEN // 4)
    noise_ktb = jnp.transpose(noise, (1, 0, 2, 3)).reshape(K * T_ENC * B, LATENT)
    mir_goal, mir_cvae = mirror_forward(kp, inputs, noise_ktb,
                                        dec_steps=T_DEC, K=K, hidden=HIDDEN)
    d_alg = max(float(jnp.max(jnp.abs(mir_goal - ref_goal))),
                float(jnp.max(jnp.abs(mir_cvae - ref_cvae))))
    assert d_alg < 5e-4, d_alg

    # (3) Pallas kernel vs the faithful reference.  The residual gap is the
    #     XLA-vs-Mosaic f32 matmul emulation difference accumulated through the
    #     enc_steps recurrence; the algebra itself is verified in (2).
    d_goal = float(jnp.max(jnp.abs(all_goal_traj - ref_goal)))
    d_cvae = float(jnp.max(jnp.abs(all_cvae_dec_traj - ref_cvae)))
    assert d_goal < 5e-2 and d_cvae < 5e-2, (d_goal, d_cvae)

    print("KERNEL_OK")
</pallas_src>

<mosaic_0001>
module attributes {stable_mosaic.version = 11 : i64} {
  func.func @kernel(%arg0: i32, %arg1: memref<8x4x6xf32, #tpu.memory_space<vmem>>, %arg2: memref<128x16xf32, #tpu.memory_space<vmem>>, %arg3: memref<848x128xf32, #tpu.memory_space<vmem>>, %arg4: memref<128x2xf32, #tpu.memory_space<vmem>>, %arg5: memref<512x2xf32, #tpu.memory_space<vmem>>, %arg6: memref<32x32xf32, #tpu.memory_space<vmem>>, %arg7: memref<128x8xf32, #tpu.memory_space<vmem>>) attributes {dimension_semantics = [#tpu.dimension_semantics<arbitrary>], iteration_bounds = array<i64: 1>, scalar_prefetch = 0 : i64, scratch_operands = 2 : i64, tpu.core_type = #tpu.core_type<tc>, window_params = [{pipeline_mode = #tpu.pipeline_mode<synchronous>, transform_indices = @transform_0, window_bounds = array<i64: 8, 4, 6>}, {pipeline_mode = #tpu.pipeline_mode<synchronous>, transform_indices = @transform_1, window_bounds = array<i64: 128, 16>}, {pipeline_mode = #tpu.pipeline_mode<synchronous>, transform_indices = @transform_2, window_bounds = array<i64: 848, 128>}, {pipeline_mode = #tpu.pipeline_mode<synchronous>, transform_indices = @transform_3, window_bounds = array<i64: 128, 2>}, {pipeline_mode = #tpu.pipeline_mode<synchronous>, transform_indices = @transform_4, window_bounds = array<i64: 512, 2>}]} {
    %cst = arith.constant 0.000000e+00 : f32
    %0 = vector.broadcast %cst : f32 to vector<4x8xf32>
    %cst_0 = arith.constant 0.000000e+00 : f32
    %1 = vector.broadcast %cst_0 : f32 to vector<4x32xf32>
    %c0_i32 = arith.constant 0 : i32
    %c8_i32 = arith.constant 8 : i32
    %2 = arith.addi %c0_i32, %c8_i32 : i32
    %c1_i32 = arith.constant 1 : i32
    %3:2 = scf.for %arg8 = %c0_i32 to %2 step %c1_i32 iter_args(%arg9 = %0, %arg10 = %1) -> (vector<4x8xf32>, vector<4x32xf32>)  : i32 {
      %469 = arith.index_cast %arg8 : i32 to index
      %c0_193 = arith.constant 0 : index
      %c0_194 = arith.constant 0 : index
      %470 = vector.load %arg1[%469, %c0_193, %c0_194] : memref<8x4x6xf32, #tpu.memory_space<vmem>>, vector<1x4x6xf32>
      %471 = vector.shape_cast %470 : vector<1x4x6xf32> to vector<4x6xf32>
      %c392 = arith.constant 392 : index
      %c0_195 = arith.constant 0 : index
      %472 = vector.load %arg3[%c392, %c0_195] : memref<848x128xf32, #tpu.memory_space<vmem>>, vector<6x32xf32>
      %cst_196 = arith.constant dense<0.000000e+00> : vector<4x32xf32>
      %473 = tpu.matmul %471, %472, %cst_196 {dimension_numbers = #tpu.dot_dimension_numbers<[1], [0], [0], [1], [0, 0, 1, 1], [], []>} : vector<4x6xf32>, vector<6x32xf32>, vector<4x32xf32> -> vector<4x32xf32>
      %c384_197 = arith.constant 384 : index
      %c0_198 = arith.constant 0 : index
      %474 = vector.load %arg3[%c384_197, %c0_198] : memref<848x128xf32, #tpu.memory_space<vmem>>, vector<1x32xf32>
      %475 = vector.broadcast %474 : vector<1x32xf32> to vector<4x32xf32>
      %476 = arith.addf %473, %475 : vector<4x32xf32>
      %cst_199 = arith.constant 0.000000e+00 : f32
      %477 = vector.broadcast %cst_199 : f32 to vector<4x32xf32>
      %478 = arith.maximumf %476, %477 : vector<4x32xf32>
      %479 = tpu.concatenate %478, %arg9 in 1 : vector<4x32xf32>, vector<4x8xf32> -> vector<4x40xf32>
      %c344 = arith.constant 344 : index
      %c0_200 = arith.constant 0 : index
      %480 = vector.load %arg3[%c344, %c0_200] : memref<848x128xf32, #tpu.memory_space<vmem>>, vector<40x96xf32>
      %cst_201 = arith.constant dense<0.000000e+00> : vector<4x96xf32>
      %481 = tpu.matmul %479, %480, %cst_201 {dimension_numbers = #tpu.dot_dimension_numbers<[1], [0], [0], [1], [0, 0, 1, 1], [], []>} : vector<4x40xf32>, vector<40x96xf32>, vector<4x96xf32> -> vector<4x96xf32>
      %c304 = arith.constant 304 : index
      %c0_202 = arith.constant 0 : index
      %482 = vector.load %arg3[%c304, %c0_202] : memref<848x128xf32, #tpu.memory_space<vmem>>, vector<1x96xf32>
      %483 = vector.broadcast %482 : vector<1x96xf32> to vector<4x96xf32>
      %484 = arith.addf %481, %483 : vector<4x96xf32>
      %c312 = arith.constant 312 : index
      %c0_203 = arith.constant 0 : index
      %485 = vector.load %arg3[%c312, %c0_203] : memref<848x128xf32, #tpu.memory_space<vmem>>, vector<32x96xf32>
      %cst_204 = arith.constant dense<0.000000e+00> : vector<4x96xf32>
      %486 = tpu.matmul %arg10, %485, %cst_204 {dimension_numbers = #tpu.dot_dimension_numbers<[1], [0], [0], [1], [0, 0, 1, 1], [], []>} : vector<4x32xf32>, vector<32x96xf32>, vector<4x96xf32> -> vector<4x96xf32>
      %c296 = arith.constant 296 : index
      %c0_205 = arith.constant 0 : index
      %487 = vector.load %arg3[%c296, %c0_205] : memref<848x128xf32, #tpu.memory_space<vmem>>, vector<1x96xf32>
      %488 = vector.broadcast %487 : vector<1x96xf32> to vector<4x96xf32>
      %489 = arith.addf %486, %488 : vector<4x96xf32>
      %490 = vector.extract_strided_slice %484 {offsets = [0, 0], sizes = [4, 32], strides = [1, 1]} : vector<4x96xf32> to vector<4x32xf32>
      %491 = vector.extract_strided_slice %489 {offsets = [0, 0], sizes = [4, 32], strides = [1, 1]} : vector<4x96xf32> to vector<4x32xf32>
      %492 = arith.addf %490, %491 : vector<4x32xf32>
      %493 = arith.negf %492 : vector<4x32xf32>
      %494 = math.exp %493 : vector<4x32xf32>
      %cst_206 = arith.constant 1.000000e+00 : f32
      %495 = vector.broadcast %cst_206 : f32 to vector<4x32xf32>
      %496 = arith.addf %495, %494 : vector<4x32xf32>
      %497 = arith.divf %495, %496 : vector<4x32xf32>
      %498 = vector.extract_strided_slice %484 {offsets = [0, 32], sizes = [4, 32], strides = [1, 1]} : vector<4x96xf32> to vector<4x32xf32>
      %499 = vector.extract_strided_slice %489 {offsets = [0, 32], sizes = [4, 32], strides = [1, 1]} : vector<4x96xf32> to vector<4x32xf32>
      %500 = arith.addf %498, %499 : vector<4x32xf32>
      %501 = arith.negf %500 : vector<4x32xf32>
      %502 = math.exp %501 : vector<4x32xf32>
      %cst_207 = arith.constant 1.000000e+00 : f32
      %503 = vector.broadcast %cst_207 : f32 to vector<4x32xf32>
      %504 = arith.addf %503, %502 : vector<4x32xf32>
      %505 = arith.divf %503, %504 : vector<4x32xf32>
      %506 = vector.extract_strided_slice %484 {offsets = [0, 64], sizes = [4, 32], strides = [1, 1]} : vector<4x96xf32> to vector<4x32xf32>
      %507 = vector.extract_strided_slice %489 {offsets = [0, 64], sizes = [4, 32], strides = [1, 1]} : vector<4x96xf32> to vector<4x32xf32>
      %508 = arith.mulf %497, %507 : vector<4x32xf32>
      %509 = arith.addf %506, %508 : vector<4x32xf32>
      %510 = math.tanh %509 : vector<4x32xf32>
      %cst_208 = arith.constant 1.000000e+00 : f32
      %511 = vector.broadcast %cst_208 : f32 to vector<4x32xf32>
      %512 = arith.subf %511, %505 : vector<4x32xf32>
      %513 = arith.mulf %512, %510 : vector<4x32xf32>
      %514 = arith.mulf %505, %arg10 : vector<4x32xf32>
      %515 = arith.addf %513, %514 : vector<4x32xf32>
      %c264 = arith.constant 264 : index
      %c0_209 = arith.constant 0 : index
      %516 = vector.load %arg3[%c264, %c0_209] : memref<848x128xf32, #tpu.memory_space<vmem>>, vector<32x8xf32>
      %cst_210 = arith.constant dense<0.000000e+00> : vector<4x8xf32>
      %517 = tpu.matmul %515, %516, %cst_210 {dimension_numbers = #tpu.dot_dimension_numbers<[1], [0], [0], [1], [0, 0, 1, 1], [], []>} : vector<4x32xf32>, vector<32x8xf32>, vector<4x8xf32> -> vector<4x8xf32>
      %c240 = arith.constant 240 : index
      %c0_211 = arith.constant 0 : index
      %518 = vector.load %arg3[%c240, %c0_211] : memref<848x128xf32, #tpu.memory_space<vmem>>, vector<1x8xf32>
      %519 = vector.broadcast %518 : vector<1x8xf32> to vector<4x8xf32>
      %520 = arith.addf %517, %519 : vector<4x8xf32>
      %c248 = arith.constant 248 : index
      %c0_212 = arith.constant 0 : index
      %521 = vector.load %arg3[%c248, %c0_212] : memref<848x128xf32, #tpu.memory_space<vmem>>, vector<1x8xf32>
      %c256_213 = arith.constant 256 : index
      %c0_214 = arith.constant 0 : index
      %522 = vector.load %arg3[%c256_213, %c0_214] : memref<848x128xf32, #tpu.memory_space<vmem>>, vector<1x8xf32>
      %cst_215 = arith.constant dense<0.000000e+00> : vector<4xf32>
      %523 = vector.multi_reduction <add>, %520, %cst_215 [1] : vector<4x8xf32> to vector<4xf32>
      %524 = vector.shape_cast %523 : vector<4xf32> to vector<4x1xf32>
      %cst_216 = arith.constant 8.000000e+00 : f32
      %525 = vector.broadcast %cst_216 : f32 to vector<4x1xf32>
      %526 = arith.divf %524, %525 : vector<4x1xf32>
      %527 = vector.broadcast %526 : vector<4x1xf32> to vector<4x8xf32>
      %528 = arith.subf %520, %527 : vector<4x8xf32>
      %529 = arith.mulf %528, %528 : vector<4x8xf32>
      %cst_217 = arith.constant dense<0.000000e+00> : vector<4xf32>
      %530 = vector.multi_reduction <add>, %529, %cst_217 [1] : vector<4x8xf32> to vector<4xf32>
      %531 = vector.shape_cast %530 : vector<4xf32> to vector<4x1xf32>
      %cst_218 = arith.constant 8.000000e+00 : f32
      %532 = vector.broadcast %cst_218 : f32 to vector<4x1xf32>
      %533 = arith.divf %531, %532 : vector<4x1xf32>
      %cst_219 = arith.constant 9.99999974E-6 : f32
      %534 = vector.broadcast %cst_219 : f32 to vector<4x1xf32>
      %535 = arith.addf %533, %534 : vector<4x1xf32>
      %536 = math.rsqrt %535 : vector<4x1xf32>
      %537 = vector.broadcast %536 : vector<4x1xf32> to vector<4x8xf32>
      %538 = arith.mulf %528, %537 : vector<4x8xf32>
      %539 = vector.broadcast %521 : vector<1x8xf32> to vector<4x8xf32>
      %540 = arith.mulf %538, %539 : vector<4x8xf32>
      %541 = vector.broadcast %522 : vector<1x8xf32> to vector<4x8xf32>
      %542 = arith.addf %540, %541 : vector<4x8xf32>
      %cst_220 = arith.constant 0.000000e+00 : f32
      %543 = vector.broadcast %cst_220 : f32 to vector<4x8xf32>
      %544 = arith.maximumf %542, %543 : vector<4x8xf32>
      %cst_221 = arith.constant 0.000000e+00 : f32
      %545 = vector.broadcast %cst_221 : f32 to vector<4x8xf32>
      %c552 = arith.constant 552 : index
      %c0_222 = arith.constant 0 : index
      %546 = vector.load %arg3[%c552, %c0_222] : memref<848x128xf32, #tpu.memory_space<vmem>>, vector<8x24xf32>
      %cst_223 = arith.constant dense<0.000000e+00> : vector<4x24xf32>
      %547 = tpu.matmul %545, %546, %cst_223 {dimension_numbers = #tpu.dot_dimension_numbers<[1], [0], [0], [1], [0, 0, 1, 1], [], []>} : vector<4x8xf32>, vector<8x24xf32>, vector<4x24xf32> -> vector<4x24xf32>
      %c536 = arith.constant 536 : index
      %c0_224 = arith.constant 0 : index
      %548 = vector.load %arg3[%c536, %c0_224] : memref<848x128xf32, #tpu.memory_space<vmem>>, vector<1x24xf32>
      %549 = vector.broadcast %548 : vector<1x24xf32> to vector<4x24xf32>
      %550 = arith.addf %547, %549 : vector<4x24xf32>
      %c544 = arith.constant 544 : index
      %c0_225 = arith.constant 0 : index
      %551 = vector.load %arg3[%c544, %c0_225] : memref<848x128xf32, #tpu.memory_space<vmem>>, vector<8x24xf32>
      %cst_226 = arith.constant dense<0.000000e+00> : vector<4x24xf32>
      %552 = tpu.matmul %544, %551, %cst_226 {dimension_numbers = #tpu.dot_dimension_numbers<[1], [0], [0], [1], [0, 0, 1, 1], [], []>} : vector<4x8xf32>, vector<8x24xf32>, vector<4x24xf32> -> vector<4x24xf32>
      %c528 = arith.constant 528 : index
      %c0_227 = arith.constant 0 : index
      %553 = vector.load %arg3[%c528, %c0_227] : memref<848x128xf32, #tpu.memory_space<vmem>>, vector<1x24xf32>
      %554 = vector.broadcast %553 : vector<1x24xf32> to vector<4x24xf32>
      %555 = arith.addf %552, %554 : vector<4x24xf32>
      %556 = vector.extract_strided_slice %550 {offsets = [0, 0], sizes = [4, 8], strides = [1, 1]} : vector<4x24xf32> to vector<4x8xf32>
      %557 = vector.extract_strided_slice %555 {offsets = [0, 0], sizes = [4, 8], strides = [1, 1]} : vector<4x24xf32> to vector<4x8xf32>
      %558 = arith.addf %556, %557 : vector<4x8xf32>
      %559 = arith.negf %558 : vector<4x8xf32>
      %560 = math.exp %559 : vector<4x8xf32>
      %cst_228 = arith.constant 1.000000e+00 : f32
      %561 = vector.broadcast %cst_228 : f32 to vector<4x8xf32>
      %562 = arith.addf %561, %560 : vector<4x8xf32>
      %563 = arith.divf %561, %562 : vector<4x8xf32>
      %564 = vector.extract_strided_slice %550 {offsets = [0, 8], sizes = [4, 8], strides = [1, 1]} : vector<4x24xf32> to vector<4x8xf32>
      %565 = vector.extract_strided_slice %555 {offsets = [0, 8], sizes = [4, 8], strides = [1, 1]} : vector<4x24xf32> to vector<4x8xf32>
      %566 = arith.addf %564, %565 : vector<4x8xf32>
      %567 = arith.negf %566 : vector<4x8xf32>
      %568 = math.exp %567 : vector<4x8xf32>
      %cst_229 = arith.constant 1.000000e+00 : f32
      %569 = vector.broadcast %cst_229 : f32 to vector<4x8xf32>
      %570 = arith.addf %569, %568 : vector<4x8xf32>
      %571 = arith.divf %569, %570 : vector<4x8xf32>
      %572 = vector.extract_strided_slice %550 {offsets = [0, 16], sizes = [4, 8], strides = [1, 1]} : vector<4x24xf32> to vector<4x8xf32>
      %573 = vector.extract_strided_slice %555 {offsets = [0, 16], sizes = [4, 8], strides = [1, 1]} : vector<4x24xf32> to vector<4x8xf32>
      %574 = arith.mulf %563, %573 : vector<4x8xf32>
      %575 = arith.addf %572, %574 : vector<4x8xf32>
      %576 = math.tanh %575 : vector<4x8xf32>
      %cst_230 = arith.constant 1.000000e+00 : f32
      %577 = vector.broadcast %cst_230 : f32 to vector<4x8xf32>
      %578 = arith.subf %577, %571 : vector<4x8xf32>
      %579 = arith.mulf %578, %576 : vector<4x8xf32>
      %580 = arith.mulf %571, %544 : vector<4x8xf32>
      %581 = arith.addf %579, %580 : vector<4x8xf32>
      %c488 = arith.constant 488 : index
      %c0_231 = arith.constant 0 : index
      %582 = vector.load %arg3[%c488, %c0_231] : memref<848x128xf32, #tpu.memory_space<vmem>>, vector<8x8xf32>
      %cst_232 = arith.constant dense<0.000000e+00> : vector<4x8xf32>
      %583 = tpu.matmul %581, %582, %cst_232 {dimension_numbers = #tpu.dot_dimension_numbers<[1], [0], [0], [1], [0, 0, 1, 1], [], []>} : vector<4x8xf32>, vector<8x8xf32>, vector<4x8xf32> -> vector<4x8xf32>
      %c464 = arith.constant 464 : index
      %c0_233 = arith.constant 0 : index
      %584 = vector.load %arg3[%c464, %c0_233] : memref<848x128xf32, #tpu.memory_space<vmem>>, vector<1x8xf32>
      %585 = vector.broadcast %584 : vector<1x8xf32> to vector<4x8xf32>
      %586 = arith.addf %583, %585 : vector<4x8xf32>
      %c472 = arith.constant 472 : index
      %c0_234 = arith.constant 0 : index
      %587 = vector.load %arg3[%c472, %c0_234] : memref<848x128xf32, #tpu.memory_space<vmem>>, vector<1x8xf32>
      %c480 = arith.constant 480 : index
      %c0_235 = arith.constant 0 : index
      %588 = vector.load %arg3[%c480, %c0_235] : memref<848x128xf32, #tpu.memory_space<vmem>>, vector<1x8xf32>
      %cst_236 = arith.constant dense<0.000000e+00> : vector<4xf32>
      %589 = vector.multi_reduction <add>, %586, %cst_236 [1] : vector<4x8xf32> to vector<4xf32>
      %590 = vector.shape_cast %589 : vector<4xf32> to vector<4x1xf32>
      %cst_237 = arith.constant 8.000000e+00 : f32
      %591 = vector.broadcast %cst_237 : f32 to vector<4x1xf32>
      %592 = arith.divf %590, %591 : vector<4x1xf32>
      %593 = vector.broadcast %592 : vector<4x1xf32> to vector<4x8xf32>
      %594 = arith.subf %586, %593 : vector<4x8xf32>
      %595 = arith.mulf %594, %594 : vector<4x8xf32>
      %cst_238 = arith.constant dense<0.000000e+00> : vector<4xf32>
      %596 = vector.multi_reduction <add>, %595, %cst_238 [1] : vector<4x8xf32> to vector<4xf32>
      %597 = vector.shape_cast %596 : vector<4xf32> to vector<4x1xf32>
      %cst_239 = arith.constant 8.000000e+00 : f32
      %598 = vector.broadcast %cst_239 : f32 to vector<4x1xf32>
      %599 = arith.divf %597, %598 : vector<4x1xf32>
      %cst_240 = arith.constant 9.99999974E-6 : f32
      %600 = vector.broadcast %cst_240 : f32 to vector<4x1xf32>
      %601 = arith.addf %599, %600 : vector<4x1xf32>
      %602 = math.rsqrt %601 : vector<4x1xf32>
      %603 = vector.broadcast %602 : vector<4x1xf32> to vector<4x8xf32>
      %604 = arith.mulf %594, %603 : vector<4x8xf32>
      %605 = vector.broadcast %587 : vector<1x8xf32> to vector<4x8xf32>
      %606 = arith.mulf %604, %605 : vector<4x8xf32>
      %607 = vector.broadcast %588 : vector<1x8xf32> to vector<4x8xf32>
      %608 = arith.addf %606, %607 : vector<4x8xf32>
      %cst_241 = arith.constant 0.000000e+00 : f32
      %609 = vector.broadcast %cst_241 : f32 to vector<4x8xf32>
      %610 = arith.maximumf %608, %609 : vector<4x8xf32>
      %c552_242 = arith.constant 552 : index
      %c0_243 = arith.constant 0 : index
      %611 = vector.load %arg3[%c552_242, %c0_243] : memref<848x128xf32, #tpu.memory_space<vmem>>, vector<8x24xf32>
      %cst_244 = arith.constant dense<0.000000e+00> : vector<4x24xf32>
      %612 = tpu.matmul %610, %611, %cst_244 {dimension_numbers = #tpu.dot_dimension_numbers<[1], [0], [0], [1], [0, 0, 1, 1], [], []>} : vector<4x8xf32>, vector<8x24xf32>, vector<4x24xf32> -> vector<4x24xf32>
      %c536_245 = arith.constant 536 : index
      %c0_246 = arith.constant 0 : index
      %613 = vector.load %arg3[%c536_245, %c0_246] : memref<848x128xf32, #tpu.memory_space<vmem>>, vector<1x24xf32>
      %614 = vector.broadcast %613 : vector<1x24xf32> to vector<4x24xf32>
      %615 = arith.addf %612, %614 : vector<4x24xf32>
      %c544_247 = arith.constant 544 : index
      %c0_248 = arith.constant 0 : index
      %616 = vector.load %arg3[%c544_247, %c0_248] : memref<848x128xf32, #tpu.memory_space<vmem>>, vector<8x24xf32>
      %cst_249 = arith.constant dense<0.000000e+00> : vector<4x24xf32>
      %617 = tpu.matmul %581, %616, %cst_249 {dimension_numbers = #tpu.dot_dimension_numbers<[1], [0], [0], [1], [0, 0, 1, 1], [], []>} : vector<4x8xf32>, vector<8x24xf32>, vector<4x24xf32> -> vector<4x24xf32>
      %c528_250 = arith.constant 528 : index
      %c0_251 = arith.constant 0 : index
      %618 = vector.load %arg3[%c528_250, %c0_251] : memref<848x128xf32, #tpu.memory_space<vmem>>, vector<1x24xf32>
      %619 = vector.broadcast %618 : vector<1x24xf32> to vector<4x24xf32>
      %620 = arith.addf %617, %619 : vector<4x24xf32>
      %621 = vector.extract_strided_slice %615 {offsets = [0, 0], sizes = [4, 8], strides = [1, 1]} : vector<4x24xf32> to vector<4x8xf32>
      %622 = vector.extract_strided_slice %620 {offsets = [0, 0], sizes = [4, 8], strides = [1, 1]} : vector<4x24xf32> to vector<4x8xf32>
      %623 = arith.addf %621, %622 : vector<4x8xf32>
      %624 = arith.negf %623 : vector<4x8xf32>
      %625 = math.exp %624 : vector<4x8xf32>
      %cst_252 = arith.constant 1.000000e+00 : f32
      %626 = vector.broadcast %cst_252 : f32 to vector<4x8xf32>
      %627 = arith.addf %626, %625 : vector<4x8xf32>
      %628 = arith.divf %626, %627 : vector<4x8xf32>
      %629 = vector.extract_strided_slice %615 {offsets = [0, 8], sizes = [4, 8], strides = [1, 1]} : vector<4x24xf32> to vector<4x8xf32>
      %630 = vector.extract_strided_slice %620 {offsets = [0, 8], sizes = [4, 8], strides = [1, 1]} : vector<4x24xf32> to vector<4x8xf32>
      %631 = arith.addf %629, %630 : vector<4x8xf32>
      %632 = arith.negf %631 : vector<4x8xf32>
      %633 = math.exp %632 : vector<4x8xf32>
      %cst_253 = arith.constant 1.000000e+00 : f32
      %634 = vector.broadcast %cst_253 : f32 to vector<4x8xf32>
      %635 = arith.addf %634, %633 : vector<4x8xf32>
      %636 = arith.divf %634, %635 : vector<4x8xf32>
      %637 = vector.extract_strided_slice %615 {offsets = [0, 16], sizes = [4, 8], strides = [1, 1]} : vector<4x24xf32> to vector<4x8xf32>
      %638 = vector.extract_strided_slice %620 {offsets = [0, 16], sizes = [4, 8], strides = [1, 1]} : vector<4x24xf32> to vector<4x8xf32>
      %639 = arith.mulf %628, %638 : vector<4x8xf32>
      %640 = arith.addf %637, %639 : vector<4x8xf32>
      %641 = math.tanh %640 : vector<4x8xf32>
      %cst_254 = arith.constant 1.000000e+00 : f32
      %642 = vector.broadcast %cst_254 : f32 to vector<4x8xf32>
      %643 = arith.subf %642, %636 : vector<4x8xf32>
      %644 = arith.mulf %643, %641 : vector<4x8xf32>
      %645 = arith.mulf %636, %581 : vector<4x8xf32>
      %646 = arith.addf %644, %645 : vector<4x8xf32>
      %c488_255 = arith.constant 488 : index
      %c0_256 = arith.constant 0 : index
      %647 = vector.load %arg3[%c488_255, %c0_256] : memref<848x128xf32, #tpu.memory_space<vmem>>, vector<8x8xf32>
      %cst_257 = arith.constant dense<0.000000e+00> : vector<4x8xf32>
      %648 = tpu.matmul %646, %647, %cst_257 {dimension_numbers = #tpu.dot_dimension_numbers<[1], [0], [0], [1], [0, 0, 1, 1], [], []>} : vector<4x8xf32>, vector<8x8xf32>, vector<4x8xf32> -> vector<4x8xf32>
      %c464_258 = arith.constant 464 : index
      %c0_259 = arith.constant 0 : index
      %649 = vector.load %arg3[%c464_258, %c0_259] : memref<848x128xf32, #tpu.memory_space<vmem>>, vector<1x8xf32>
      %650 = vector.broadcast %649 : vector<1x8xf32> to vector<4x8xf32>
      %651 = arith.addf %648, %650 : vector<4x8xf32>
      %c472_260 = arith.constant 472 : index
      %c0_261 = arith.constant 0 : index
      %652 = vector.load %arg3[%c472_260, %c0_261] : memref<848x128xf32, #tpu.memory_space<vmem>>, vector<1x8xf32>
      %c480_262 = arith.constant 480 : index
      %c0_263 = arith.constant 0 : index
      %653 = vector.load %arg3[%c480_262, %c0_263] : memref<848x128xf32, #tpu.memory_space<vmem>>, vector<1x8xf32>
      %cst_264 = arith.constant dense<0.000000e+00> : vector<4xf32>
      %654 = vector.multi_reduction <add>, %651, %cst_264 [1] : vector<4x8xf32> to vector<4xf32>
      %655 = vector.shape_cast %654 : vector<4xf32> to vector<4x1xf32>
      %cst_265 = arith.constant 8.000000e+00 : f32
      %656 = vector.broadcast %cst_265 : f32 to vector<4x1xf32>
      %657 = arith.divf %655, %656 : vector<4x1xf32>
      %658 = vector.broadcast %657 : vector<4x1xf32> to vector<4x8xf32>
      %659 = arith.subf %651, %658 : vector<4x8xf32>
      %660 = arith.mulf %659, %659 : vector<4x8xf32>
      %cst_266 = arith.constant dense<0.000000e+00> : vector<4xf32>
      %661 = vector.multi_reduction <add>, %660, %cst_266 [1] : vector<4x8xf32> to vector<4xf32>
      %662 = vector.shape_cast %661 : vector<4xf32> to vector<4x1xf32>
      %cst_267 = arith.constant 8.000000e+00 : f32
      %663 = vector.broadcast %cst_267 : f32 to vector<4x1xf32>
      %664 = arith.divf %662, %663 : vector<4x1xf32>
      %cst_268 = arith.constant 9.99999974E-6 : f32
      %665 = vector.broadcast %cst_268 : f32 to vector<4x1xf32>
      %666 = arith.addf %664, %665 : vector<4x1xf32>
      %667 = math.rsqrt %666 : vector<4x1xf32>
      %668 = vector.broadcast %667 : vector<4x1xf32> to vector<4x8xf32>
      %669 = arith.mulf %659, %668 : vector<4x8xf32>
      %670 = vector.broadcast %652 : vector<1x8xf32> to vector<4x8xf32>
      %671 = arith.mulf %669, %670 : vector<4x8xf32>
      %672 = vector.broadcast %653 : vector<1x8xf32> to vector<4x8xf32>
      %673 = arith.addf %671, %672 : vector<4x8xf32>
      %cst_269 = arith.constant 0.000000e+00 : f32
      %674 = vector.broadcast %cst_269 : f32 to vector<4x8xf32>
      %675 = arith.maximumf %673, %674 : vector<4x8xf32>
      %c552_270 = arith.constant 552 : index
      %c0_271 = arith.constant 0 : index
      %676 = vector.load %arg3[%c552_270, %c0_271] : memref<848x128xf32, #tpu.memory_space<vmem>>, vector<8x24xf32>
      %cst_272 = arith.constant dense<0.000000e+00> : vector<4x24xf32>
      %677 = tpu.matmul %675, %676, %cst_272 {dimension_numbers = #tpu.dot_dimension_numbers<[1], [0], [0], [1], [0, 0, 1, 1], [], []>} : vector<4x8xf32>, vector<8x24xf32>, vector<4x24xf32> -> vector<4x24xf32>
      %c536_273 = arith.constant 536 : index
      %c0_274 = arith.constant 0 : index
      %678 = vector.load %arg3[%c536_273, %c0_274] : memref<848x128xf32, #tpu.memory_space<vmem>>, vector<1x24xf32>
      %679 = vector.broadcast %678 : vector<1x24xf32> to vector<4x24xf32>
      %680 = arith.addf %677, %679 : vector<4x24xf32>
      %c544_275 = arith.constant 544 : index
      %c0_276 = arith.constant 0 : index
      %681 = vector.load %arg3[%c544_275, %c0_276] : memref<848x128xf32, #tpu.memory_space<vmem>>, vector<8x24xf32>
      %cst_277 = arith.constant dense<0.000000e+00> : vector<4x24xf32>
      %682 = tpu.matmul %646, %681, %cst_277 {dimension_numbers = #tpu.dot_dimension_numbers<[1], [0], [0], [1], [0, 0, 1, 1], [], []>} : vector<4x8xf32>, vector<8x24xf32>, vector<4x24xf32> -> vector<4x24xf32>
      %c528_278 = arith.constant 528 : index
      %c0_279 = arith.constant 0 : index
      %683 = vector.load %arg3[%c528_278, %c0_279] : memref<848x128xf32, #tpu.memory_space<vmem>>, vector<1x24xf32>
      %684 = vector.broadcast %683 : vector<1x24xf32> to vector<4x24xf32>
      %685 = arith.addf %682, %684 : vector<4x24xf32>
      %686 = vector.extract_strided_slice %680 {offsets = [0, 0], sizes = [4, 8], strides = [1, 1]} : vector<4x24xf32> to vector<4x8xf32>
      %687 = vector.extract_strided_slice %685 {offsets = [0, 0], sizes = [4, 8], strides = [1, 1]} : vector<4x24xf32> to vector<4x8xf32>
      %688 = arith.addf %686, %687 : vector<4x8xf32>
      %689 = arith.negf %688 : vector<4x8xf32>
      %690 = math.exp %689 : vector<4x8xf32>
      %cst_280 = arith.constant 1.000000e+00 : f32
      %691 = vector.broadcast %cst_280 : f32 to vector<4x8xf32>
      %692 = arith.addf %691, %690 : vector<4x8xf32>
      %693 = arith.divf %691, %692 : vector<4x8xf32>
      %694 = vector.extract_strided_slice %680 {offsets = [0, 8], sizes = [4, 8], strides = [1, 1]} : vector<4x24xf32> to vector<4x8xf32>
      %695 = vector.extract_strided_slice %685 {offsets = [0, 8], sizes = [4, 8], strides = [1, 1]} : vector<4x24xf32> to vector<4x8xf32>
      %696 = arith.addf %694, %695 : vector<4x8xf32>
      %697 = arith.negf %696 : vector<4x8xf32>
      %698 = math.exp %697 : vector<4x8xf32>
      %cst_281 = arith.constant 1.000000e+00 : f32
      %699 = vector.broadcast %cst_281 : f32 to vector<4x8xf32>
      %700 = arith.addf %699, %698 : vector<4x8xf32>
      %701 = arith.divf %699, %700 : vector<4x8xf32>
      %702 = vector.extract_strided_slice %680 {offsets = [0, 16], sizes = [4, 8], strides = [1, 1]} : vector<4x24xf32> to vector<4x8xf32>
      %703 = vector.extract_strided_slice %685 {offsets = [0, 16], sizes = [4, 8], strides = [1, 1]} : vector<4x24xf32> to vector<4x8xf32>
      %704 = arith.mulf %693, %703 : vector<4x8xf32>
      %705 = arith.addf %702, %704 : vector<4x8xf32>
      %706 = math.tanh %705 : vector<4x8xf32>
      %cst_282 = arith.constant 1.000000e+00 : f32
      %707 = vector.broadcast %cst_282 : f32 to vector<4x8xf32>
      %708 = arith.subf %707, %701 : vector<4x8xf32>
      %709 = arith.mulf %708, %706 : vector<4x8xf32>
      %710 = arith.mulf %701, %646 : vector<4x8xf32>
      %711 = arith.addf %709, %710 : vector<4x8xf32>
      %c488_283 = arith.constant 488 : index
      %c0_284 = arith.constant 0 : index
      %712 = vector.load %arg3[%c488_283, %c0_284] : memref<848x128xf32, #tpu.memory_space<vmem>>, vector<8x8xf32>
      %cst_285 = arith.constant dense<0.000000e+00> : vector<4x8xf32>
      %713 = tpu.matmul %711, %712, %cst_285 {dimension_numbers = #tpu.dot_dimension_numbers<[1], [0], [0], [1], [0, 0, 1, 1], [], []>} : vector<4x8xf32>, vector<8x8xf32>, vector<4x8xf32> -> vector<4x8xf32>
      %c464_286 = arith.constant 464 : index
      %c0_287 = arith.constant 0 : index
      %714 = vector.load %arg3[%c464_286, %c0_287] : memref<848x128xf32, #tpu.memory_space<vmem>>, vector<1x8xf32>
      %715 = vector.broadcast %714 : vector<1x8xf32> to vector<4x8xf32>
      %716 = arith.addf %713, %715 : vector<4x8xf32>
      %c472_288 = arith.constant 472 : index
      %c0_289 = arith.constant 0 : index
      %717 = vector.load %arg3[%c472_288, %c0_289] : memref<848x128xf32, #tpu.memory_space<vmem>>, vector<1x8xf32>
      %c480_290 = arith.constant 480 : index
      %c0_291 = arith.constant 0 : index
      %718 = vector.load %arg3[%c480_290, %c0_291] : memref<848x128xf32, #tpu.memory_space<vmem>>, vector<1x8xf32>
      %cst_292 = arith.constant dense<0.000000e+00> : vector<4xf32>
      %719 = vector.multi_reduction <add>, %716, %cst_292 [1] : vector<4x8xf32> to vector<4xf32>
      %720 = vector.shape_cast %719 : vector<4xf32> to vector<4x1xf32>
      %cst_293 = arith.constant 8.000000e+00 : f32
      %721 = vector.broadcast %cst_293 : f32 to vector<4x1xf32>
      %722 = arith.divf %720, %721 : vector<4x1xf32>
      %723 = vector.broadcast %722 : vector<4x1xf32> to vector<4x8xf32>
      %724 = arith.subf %716, %723 : vector<4x8xf32>
      %725 = arith.mulf %724, %724 : vector<4x8xf32>
      %cst_294 = arith.constant dense<0.000000e+00> : vector<4xf32>
      %726 = vector.multi_reduction <add>, %725, %cst_294 [1] : vector<4x8xf32> to vector<4xf32>
      %727 = vector.shape_cast %726 : vector<4xf32> to vector<4x1xf32>
      %cst_295 = arith.constant 8.000000e+00 : f32
      %728 = vector.broadcast %cst_295 : f32 to vector<4x1xf32>
      %729 = arith.divf %727, %728 : vector<4x1xf32>
      %cst_296 = arith.constant 9.99999974E-6 : f32
      %730 = vector.broadcast %cst_296 : f32 to vector<4x1xf32>
      %731 = arith.addf %729, %730 : vector<4x1xf32>
      %732 = math.rsqrt %731 : vector<4x1xf32>
      %733 = vector.broadcast %732 : vector<4x1xf32> to vector<4x8xf32>
      %734 = arith.mulf %724, %733 : vector<4x8xf32>
      %735 = vector.broadcast %717 : vector<1x8xf32> to vector<4x8xf32>
      %736 = arith.mulf %734, %735 : vector<4x8xf32>
      %737 = vector.broadcast %718 : vector<1x8xf32> to vector<4x8xf32>
      %738 = arith.addf %736, %737 : vector<4x8xf32>
      %cst_297 = arith.constant 0.000000e+00 : f32
      %739 = vector.broadcast %cst_297 : f32 to vector<4x8xf32>
      %740 = arith.maximumf %738, %739 : vector<4x8xf32>
      %c552_298 = arith.constant 552 : index
      %c0_299 = arith.constant 0 : index
      %741 = vector.load %arg3[%c552_298, %c0_299] : memref<848x128xf32, #tpu.memory_space<vmem>>, vector<8x24xf32>
      %cst_300 = arith.constant dense<0.000000e+00> : vector<4x24xf32>
      %742 = tpu.matmul %740, %741, %cst_300 {dimension_numbers = #tpu.dot_dimension_numbers<[1], [0], [0], [1], [0, 0, 1, 1], [], []>} : vector<4x8xf32>, vector<8x24xf32>, vector<4x24xf32> -> vector<4x24xf32>
      %c536_301 = arith.constant 536 : index
      %c0_302 = arith.constant 0 : index
      %743 = vector.load %arg3[%c536_301, %c0_302] : memref<848x128xf32, #tpu.memory_space<vmem>>, vector<1x24xf32>
      %744 = vector.broadcast %743 : vector<1x24xf32> to vector<4x24xf32>
      %745 = arith.addf %742, %744 : vector<4x24xf32>
      %c544_303 = arith.constant 544 : index
      %c0_304 = arith.constant 0 : index
      %746 = vector.load %arg3[%c544_303, %c0_304] : memref<848x128xf32, #tpu.memory_space<vmem>>, vector<8x24xf32>
      %cst_305 = arith.constant dense<0.000000e+00> : vector<4x24xf32>
      %747 = tpu.matmul %711, %746, %cst_305 {dimension_numbers = #tpu.dot_dimension_numbers<[1], [0], [0], [1], [0, 0, 1, 1], [], []>} : vector<4x8xf32>, vector<8x24xf32>, vector<4x24xf32> -> vector<4x24xf32>
      %c528_306 = arith.constant 528 : index
      %c0_307 = arith.constant 0 : index
      %748 = vector.load %arg3[%c528_306, %c0_307] : memref<848x128xf32, #tpu.memory_space<vmem>>, vector<1x24xf32>
      %749 = vector.broadcast %748 : vector<1x24xf32> to vector<4x24xf32>
      %750 = arith.addf %747, %749 : vector<4x24xf32>
      %751 = vector.extract_strided_slice %745 {offsets = [0, 0], sizes = [4, 8], strides = [1, 1]} : vector<4x24xf32> to vector<4x8xf32>
      %752 = vector.extract_strided_slice %750 {offsets = [0, 0], sizes = [4, 8], strides = [1, 1]} : vector<4x24xf32> to vector<4x8xf32>
      %753 = arith.addf %751, %752 : vector<4x8xf32>
      %754 = arith.negf %753 : vector<4x8xf32>
      %755 = math.exp %754 : vector<4x8xf32>
      %cst_308 = arith.constant 1.000000e+00 : f32
      %756 = vector.broadcast %cst_308 : f32 to vector<4x8xf32>
      %757 = arith.addf %756, %755 : vector<4x8xf32>
      %758 = arith.divf %756, %757 : vector<4x8xf32>
      %759 = vector.extract_strided_slice %745 {offsets = [0, 8], sizes = [4, 8], strides = [1, 1]} : vector<4x24xf32> to vector<4x8xf32>
      %760 = vector.extract_strided_slice %750 {offsets = [0, 8], sizes = [4, 8], strides = [1, 1]} : vector<4x24xf32> to vector<4x8xf32>
      %761 = arith.addf %759, %760 : vector<4x8xf32>
      %762 = arith.negf %761 : vector<4x8xf32>
      %763 = math.exp %762 : vector<4x8xf32>
      %cst_309 = arith.constant 1.000000e+00 : f32
      %764 = vector.broadcast %cst_309 : f32 to vector<4x8xf32>
      %765 = arith.addf %764, %763 : vector<4x8xf32>
      %766 = arith.divf %764, %765 : vector<4x8xf32>
      %767 = vector.extract_strided_slice %745 {offsets = [0, 16], sizes = [4, 8], strides = [1, 1]} : vector<4x24xf32> to vector<4x8xf32>
      %768 = vector.extract_strided_slice %750 {offsets = [0, 16], sizes = [4, 8], strides = [1, 1]} : vector<4x24xf32> to vector<4x8xf32>
      %769 = arith.mulf %758, %768 : vector<4x8xf32>
      %770 = arith.addf %767, %769 : vector<4x8xf32>
      %771 = math.tanh %770 : vector<4x8xf32>
      %cst_310 = arith.constant 1.000000e+00 : f32
      %772 = vector.broadcast %cst_310 : f32 to vector<4x8xf32>
      %773 = arith.subf %772, %766 : vector<4x8xf32>
      %774 = arith.mulf %773, %771 : vector<4x8xf32>
      %775 = arith.mulf %766, %711 : vector<4x8xf32>
      %776 = arith.addf %774, %775 : vector<4x8xf32>
      %777 = tpu.concatenate %581, %646, %711, %776 in 0 : vector<4x8xf32>, vector<4x8xf32>, vector<4x8xf32>, vector<4x8xf32> -> vector<16x8xf32>
      %c456 = arith.constant 456 : index
      %c0_311 = arith.constant 0 : index
      %778 = vector.load %arg3[%c456, %c0_311] : memref<848x128xf32, #tpu.memory_space<vmem>>, vector<8x8xf32>
      %cst_312 = arith.constant dense<0.000000e+00> : vector<16x8xf32>
      %779 = tpu.matmul %777, %778, %cst_312 {dimension_numbers = #tpu.dot_dimension_numbers<[1], [0], [0], [1], [0, 0, 1, 1], [], []>} : vector<16x8xf32>, vector<8x8xf32>, vector<16x8xf32> -> vector<16x8xf32>
      %c432 = arith.constant 432 : index
      %c0_313 = arith.constant 0 : index
      %780 = vector.load %arg3[%c432, %c0_313] : memref<848x128xf32, #tpu.memory_space<vmem>>, vector<1x8xf32>
      %781 = vector.broadcast %780 : vector<1x8xf32> to vector<16x8xf32>
      %782 = arith.addf %779, %781 : vector<16x8xf32>
      %c440 = arith.constant 440 : index
      %c0_314 = arith.constant 0 : index
      %783 = vector.load %arg3[%c440, %c0_314] : memref<848x128xf32, #tpu.memory_space<vmem>>, vector<1x8xf32>
      %c448 = arith.constant 448 : index
      %c0_315 = arith.constant 0 : index
      %784 = vector.load %arg3[%c448, %c0_315] : memref<848x128xf32, #tpu.memory_space<vmem>>, vector<1x8xf32>
      %cst_316 = arith.constant dense<0.000000e+00> : vector<16xf32>
      %785 = vector.multi_reduction <add>, %782, %cst_316 [1] : vector<16x8xf32> to vector<16xf32>
      %786 = vector.shape_cast %785 : vector<16xf32> to vector<16x1xf32>
      %cst_317 = arith.constant 8.000000e+00 : f32
      %787 = vector.broadcast %cst_317 : f32 to vector<16x1xf32>
      %788 = arith.divf %786, %787 : vector<16x1xf32>
      %789 = vector.broadcast %788 : vector<16x1xf32> to vector<16x8xf32>
      %790 = arith.subf %782, %789 : vector<16x8xf32>
      %791 = arith.mulf %790, %790 : vector<16x8xf32>
      %cst_318 = arith.constant dense<0.000000e+00> : vector<16xf32>
      %792 = vector.multi_reduction <add>, %791, %cst_318 [1] : vector<16x8xf32> to vector<16xf32>
      %793 = vector.shape_cast %792 : vector<16xf32> to vector<16x1xf32>
      %cst_319 = arith.constant 8.000000e+00 : f32
      %794 = vector.broadcast %cst_319 : f32 to vector<16x1xf32>
      %795 = arith.divf %793, %794 : vector<16x1xf32>
      %cst_320 = arith.constant 9.99999974E-6 : f32
      %796 = vector.broadcast %cst_320 : f32 to vector<16x1xf32>
      %797 = arith.addf %795, %796 : vector<16x1xf32>
      %798 = math.rsqrt %797 : vector<16x1xf32>
      %799 = vector.broadcast %798 : vector<16x1xf32> to vector<16x8xf32>
      %800 = arith.mulf %790, %799 : vector<16x8xf32>
      %801 = vector.broadcast %783 : vector<1x8xf32> to vector<16x8xf32>
      %802 = arith.mulf %800, %801 : vector<16x8xf32>
      %803 = vector.broadcast %784 : vector<1x8xf32> to vector<16x8xf32>
      %804 = arith.addf %802, %803 : vector<16x8xf32>
      %cst_321 = arith.constant 0.000000e+00 : f32
      %805 = vector.broadcast %cst_321 : f32 to vector<16x8xf32>
      %806 = arith.maximumf %804, %805 : vector<16x8xf32>
      %807 = vector.extract_strided_slice %806 {offsets = [0, 0], sizes = [4, 8], strides = [1, 1]} : vector<16x8xf32> to vector<4x8xf32>
      %808 = vector.extract_strided_slice %806 {offsets = [4, 0], sizes = [4, 8], strides = [1, 1]} : vector<16x8xf32> to vector<4x8xf32>
      %809 = arith.addf %807, %808 : vector<4x8xf32>
      %810 = vector.extract_strided_slice %806 {offsets = [8, 0], sizes = [4, 8], strides = [1, 1]} : vector<16x8xf32> to vector<4x8xf32>
      %811 = arith.addf %809, %810 : vector<4x8xf32>
      %812 = vector.extract_strided_slice %806 {offsets = [12, 0], sizes = [4, 8], strides = [1, 1]} : vector<16x8xf32> to vector<4x8xf32>
      %813 = arith.addf %811, %812 : vector<4x8xf32>
      %cst_322 = arith.constant 2.500000e-01 : f32
      %814 = vector.broadcast %cst_322 : f32 to vector<4x8xf32>
      %815 = arith.mulf %813, %814 : vector<4x8xf32>
      %c4_i32 = arith.constant 4 : i32
      %816 = arith.muli %arg8, %c4_i32 : i32
      %817 = arith.index_cast %816 : i32 to index
      %c0_323 = arith.constant 0 : index
      %818 = vector.load %arg6[%817, %c0_323] : memref<32x32xf32, #tpu.memory_space<vmem>>, vector<4x32xf32>
      tpu.vector_store %arg6[%817, %c0_323], %515 {strides = array<i32>} : memref<32x32xf32, #tpu.memory_space<vmem>>, vector<4x32xf32>,
      %c4_i32_324 = arith.constant 4 : i32
      %819 = arith.muli %arg8, %c4_i32_324 : i32
      %c0_i32_325 = arith.constant 0 : i32
      %820 = arith.addi %c0_i32_325, %819 : i32
      %821 = arith.index_cast %820 : i32 to index
      %c0_326 = arith.constant 0 : index
      %822 = vector.load %arg7[%821, %c0_326] : memref<128x8xf32, #tpu.memory_space<vmem>>, vector<4x8xf32>
      tpu.vector_store %arg7[%821, %c0_326], %581 {strides = array<i32>} : memref<128x8xf32, #tpu.memory_space<vmem>>, vector<4x8xf32>,
      %c4_i32_327 = arith.constant 4 : i32
      %823 = arith.muli %arg8, %c4_i32_327 : i32
      %c32_i32 = arith.constant 32 : i32
      %824 = arith.addi %c32_i32, %823 : i32
      %825 = arith.index_cast %824 : i32 to index
      %c0_328 = arith.constant 0 : index
      %826 = vector.load %arg7[%825, %c0_328] : memref<128x8xf32, #tpu.memory_space<vmem>>, vector<4x8xf32>
      tpu.vector_store %arg7[%825, %c0_328], %646 {strides = array<i32>} : memref<128x8xf32, #tpu.memory_space<vmem>>, vector<4x8xf32>,
      %c4_i32_329 = arith.constant 4 : i32
      %827 = arith.muli %arg8, %c4_i32_329 : i32
      %c64_i32 = arith.constant 64 : i32
      %828 = arith.addi %c64_i32, %827 : i32
      %829 = arith.index_cast %828 : i32 to index
      %c0_330 = arith.constant 0 : index
      %830 = vector.load %arg7[%829, %c0_330] : memref<128x8xf32, #tpu.memory_space<vmem>>, vector<4x8xf32>
      tpu.vector_store %arg7[%829, %c0_330], %711 {strides = array<i32>} : memref<128x8xf32, #tpu.memory_space<vmem>>, vector<4x8xf32>,
      %c4_i32_331 = arith.constant 4 : i32
      %831 = arith.muli %arg8, %c4_i32_331 : i32
      %c96_i32 = arith.constant 96 : i32
      %832 = arith.addi %c96_i32, %831 : i32
      %833 = arith.index_cast %832 : i32 to index
      %c0_332 = arith.constant 0 : index
      %834 = vector.load %arg7[%833, %c0_332] : memref<128x8xf32, #tpu.memory_space<vmem>>, vector<4x8xf32>
      tpu.vector_store %arg7[%833, %c0_332], %776 {strides = array<i32>} : memref<128x8xf32, #tpu.memory_space<vmem>>, vector<4x8xf32>,
      scf.yield %815, %515 : vector<4x8xf32>, vector<4x32xf32>
    }
    %c8_i32_1 = arith.constant 8 : i32
    %c0 = arith.constant 0 : index
    %c0_2 = arith.constant 0 : index
    %4 = vector.load %arg6[%c0, %c0_2] : memref<32x32xf32, #tpu.memory_space<vmem>>, vector<32x32xf32>
    %c0_3 = arith.constant 0 : index
    %c0_4 = arith.constant 0 : index
    %5 = vector.load %arg7[%c0_3, %c0_4] : memref<128x8xf32, #tpu.memory_space<vmem>>, vector<128x8xf32>
    %c0_5 = arith.constant 0 : index
    %c0_6 = arith.constant 0 : index
    %6 = vector.load %arg2[%c0_5, %c0_6] : memref<128x16xf32, #tpu.memory_space<vmem>>, vector<128x16xf32>
    %c520 = arith.constant 520 : index
    %c0_7 = arith.constant 0 : index
    %7 = vector.load %arg3[%c520, %c0_7] : memref<848x128xf32, #tpu.memory_space<vmem>>, vector<8x32xf32>
    %cst_8 = arith.constant dense<0.000000e+00> : vector<128x32xf32>
    %8 = tpu.matmul %5, %7, %cst_8 {dimension_numbers = #tpu.dot_dimension_numbers<[1], [0], [0], [1], [0, 0, 1, 1], [], []>} : vector<128x8xf32>, vector<8x32xf32>, vector<128x32xf32> -> vector<128x32xf32>
    %c496 = arith.constant 496 : index
    %c0_9 = arith.constant 0 : index
    %9 = vector.load %arg3[%c496, %c0_9] : memref<848x128xf32, #tpu.memory_space<vmem>>, vector<1x32xf32>
    %10 = vector.broadcast %9 : vector<1x32xf32> to vector<128x32xf32>
    %11 = arith.addf %8, %10 : vector<128x32xf32>
    %c504 = arith.constant 504 : index
    %c0_10 = arith.constant 0 : index
    %12 = vector.load %arg3[%c504, %c0_10] : memref<848x128xf32, #tpu.memory_space<vmem>>, vector<1x32xf32>
    %c512 = arith.constant 512 : index
    %c0_11 = arith.constant 0 : index
    %13 = vector.load %arg3[%c512, %c0_11] : memref<848x128xf32, #tpu.memory_space<vmem>>, vector<1x32xf32>
    %cst_12 = arith.constant dense<0.000000e+00> : vector<128xf32>
    %14 = vector.multi_reduction <add>, %11, %cst_12 [1] : vector<128x32xf32> to vector<128xf32>
    %15 = vector.shape_cast %14 : vector<128xf32> to vector<128x1xf32>
    %cst_13 = arith.constant 3.200000e+01 : f32
    %16 = vector.broadcast %cst_13 : f32 to vector<128x1xf32>
    %17 = arith.divf %15, %16 : vector<128x1xf32>
    %18 = vector.broadcast %17 : vector<128x1xf32> to vector<128x32xf32>
    %19 = arith.subf %11, %18 : vector<128x32xf32>
    %20 = arith.mulf %19, %19 : vector<128x32xf32>
    %cst_14 = arith.constant dense<0.000000e+00> : vector<128xf32>
    %21 = vector.multi_reduction <add>, %20, %cst_14 [1] : vector<128x32xf32> to vector<128xf32>
    %22 = vector.shape_cast %21 : vector<128xf32> to vector<128x1xf32>
    %cst_15 = arith.constant 3.200000e+01 : f32
    %23 = vector.broadcast %cst_15 : f32 to vector<128x1xf32>
    %24 = arith.divf %22, %23 : vector<128x1xf32>
    %cst_16 = arith.constant 9.99999974E-6 : f32
    %25 = vector.broadcast %cst_16 : f32 to vector<128x1xf32>
    %26 = arith.addf %24, %25 : vector<128x1xf32>
    %27 = math.rsqrt %26 : vector<128x1xf32>
    %28 = vector.broadcast %27 : vector<128x1xf32> to vector<128x32xf32>
    %29 = arith.mulf %19, %28 : vector<128x32xf32>
    %30 = vector.broadcast %12 : vector<1x32xf32> to vector<128x32xf32>
    %31 = arith.mulf %29, %30 : vector<128x32xf32>
    %32 = vector.broadcast %13 : vector<1x32xf32> to vector<128x32xf32>
    %33 = arith.addf %31, %32 : vector<128x32xf32>
    %cst_17 = arith.constant 0.000000e+00 : f32
    %34 = vector.broadcast %cst_17 : f32 to vector<128x32xf32>
    %35 = arith.maximumf %33, %34 : vector<128x32xf32>
    %c816 = arith.constant 816 : index
    %c0_18 = arith.constant 0 : index
    %36 = vector.load %arg3[%c816, %c0_18] : memref<848x128xf32, #tpu.memory_space<vmem>>, vector<32x2xf32>
    %cst_19 = arith.constant dense<0.000000e+00> : vector<128x2xf32>
    %37 = tpu.matmul %35, %36, %cst_19 {dimension_numbers = #tpu.dot_dimension_numbers<[1], [0], [0], [1], [0, 0, 1, 1], [], []>} : vector<128x32xf32>, vector<32x2xf32>, vector<128x2xf32> -> vector<128x2xf32>
    %c808 = arith.constant 808 : index
    %c0_20 = arith.constant 0 : index
    %38 = vector.load %arg3[%c808, %c0_20] : memref<848x128xf32, #tpu.memory_space<vmem>>, vector<1x2xf32>
    %39 = vector.broadcast %38 : vector<1x2xf32> to vector<128x2xf32>
    %40 = arith.addf %37, %39 : vector<128x2xf32>
    %c424 = arith.constant 424 : index
    %c0_21 = arith.constant 0 : index
    %41 = vector.load %arg3[%c424, %c0_21] : memref<848x128xf32, #tpu.memory_space<vmem>>, vector<8x8xf32>
    %cst_22 = arith.constant dense<0.000000e+00> : vector<128x8xf32>
    %42 = tpu.matmul %5, %41, %cst_22 {dimension_numbers = #tpu.dot_dimension_numbers<[1], [0], [0], [1], [0, 0, 1, 1], [], []>} : vector<128x8xf32>, vector<8x8xf32>, vector<128x8xf32> -> vector<128x8xf32>
    %c400 = arith.constant 400 : index
    %c0_23 = arith.constant 0 : index
    %43 = vector.load %arg3[%c400, %c0_23] : memref<848x128xf32, #tpu.memory_space<vmem>>, vector<1x8xf32>
    %44 = vector.broadcast %43 : vector<1x8xf32> to vector<128x8xf32>
    %45 = arith.addf %42, %44 : vector<128x8xf32>
    %c408 = arith.constant 408 : index
    %c0_24 = arith.constant 0 : index
    %46 = vector.load %arg3[%c408, %c0_24] : memref<848x128xf32, #tpu.memory_space<vmem>>, vector<1x8xf32>
    %c416 = arith.constant 416 : index
    %c0_25 = arith.constant 0 : index
    %47 = vector.load %arg3[%c416, %c0_25] : memref<848x128xf32, #tpu.memory_space<vmem>>, vector<1x8xf32>
    %cst_26 = arith.constant dense<0.000000e+00> : vector<128xf32>
    %48 = vector.multi_reduction <add>, %45, %cst_26 [1] : vector<128x8xf32> to vector<128xf32>
    %49 = vector.shape_cast %48 : vector<128xf32> to vector<128x1xf32>
    %cst_27 = arith.constant 8.000000e+00 : f32
    %50 = vector.broadcast %cst_27 : f32 to vector<128x1xf32>
    %51 = arith.divf %49, %50 : vector<128x1xf32>
    %52 = vector.broadcast %51 : vector<128x1xf32> to vector<128x8xf32>
    %53 = arith.subf %45, %52 : vector<128x8xf32>
    %54 = arith.mulf %53, %53 : vector<128x8xf32>
    %cst_28 = arith.constant dense<0.000000e+00> : vector<128xf32>
    %55 = vector.multi_reduction <add>, %54, %cst_28 [1] : vector<128x8xf32> to vector<128xf32>
    %56 = vector.shape_cast %55 : vector<128xf32> to vector<128x1xf32>
    %cst_29 = arith.constant 8.000000e+00 : f32
    %57 = vector.broadcast %cst_29 : f32 to vector<128x1xf32>
    %58 = arith.divf %56, %57 : vector<128x1xf32>
    %cst_30 = arith.constant 9.99999974E-6 : f32
    %59 = vector.broadcast %cst_30 : f32 to vector<128x1xf32>
    %60 = arith.addf %58, %59 : vector<128x1xf32>
    %61 = math.rsqrt %60 : vector<128x1xf32>
    %62 = vector.broadcast %61 : vector<128x1xf32> to vector<128x8xf32>
    %63 = arith.mulf %53, %62 : vector<128x8xf32>
    %64 = vector.broadcast %46 : vector<1x8xf32> to vector<128x8xf32>
    %65 = arith.mulf %63, %64 : vector<128x8xf32>
    %66 = vector.broadcast %47 : vector<1x8xf32> to vector<128x8xf32>
    %67 = arith.addf %65, %66 : vector<128x8xf32>
    %cst_31 = arith.constant 0.000000e+00 : f32
    %68 = vector.broadcast %cst_31 : f32 to vector<128x8xf32>
    %69 = arith.maximumf %67, %68 : vector<128x8xf32>
    %70 = vector.extract_strided_slice %69 {offsets = [96, 0], sizes = [32, 8], strides = [1, 1]} : vector<128x8xf32> to vector<32x8xf32>
    %71 = vector.extract_strided_slice %69 {offsets = [64, 0], sizes = [32, 8], strides = [1, 1]} : vector<128x8xf32> to vector<32x8xf32>
    %72 = arith.addf %70, %71 : vector<32x8xf32>
    %73 = vector.extract_strided_slice %69 {offsets = [32, 0], sizes = [32, 8], strides = [1, 1]} : vector<128x8xf32> to vector<32x8xf32>
    %74 = arith.addf %72, %73 : vector<32x8xf32>
    %75 = vector.extract_strided_slice %69 {offsets = [0, 0], sizes = [32, 8], strides = [1, 1]} : vector<128x8xf32> to vector<32x8xf32>
    %76 = arith.addf %74, %75 : vector<32x8xf32>
    %77 = tpu.concatenate %76, %74, %72, %70 in 0 : vector<32x8xf32>, vector<32x8xf32>, vector<32x8xf32>, vector<32x8xf32> -> vector<128x8xf32>
    %cst_32 = arith.constant 2.500000e-01 : f32
    %78 = vector.broadcast %cst_32 : f32 to vector<128x8xf32>
    %79 = arith.mulf %77, %78 : vector<128x8xf32>
    %c120 = arith.constant 120 : index
    %c0_33 = arith.constant 0 : index
    %80 = vector.load %arg3[%c120, %c0_33] : memref<848x128xf32, #tpu.memory_space<vmem>>, vector<8x96xf32>
    %cst_34 = arith.constant dense<0.000000e+00> : vector<128x96xf32>
    %81 = tpu.matmul %79, %80, %cst_34 {dimension_numbers = #tpu.dot_dimension_numbers<[1], [0], [0], [1], [0, 0, 1, 1], [], []>} : vector<128x8xf32>, vector<8x96xf32>, vector<128x96xf32> -> vector<128x96xf32>
    %c208 = arith.constant 208 : index
    %c0_35 = arith.constant 0 : index
    %82 = vector.load %arg3[%c208, %c0_35] : memref<848x128xf32, #tpu.memory_space<vmem>>, vector<32x32xf32>
    %cst_36 = arith.constant dense<0.000000e+00> : vector<32x32xf32>
    %83 = tpu.matmul %4, %82, %cst_36 {dimension_numbers = #tpu.dot_dimension_numbers<[1], [0], [0], [1], [0, 0, 1, 1], [], []>} : vector<32x32xf32>, vector<32x32xf32>, vector<32x32xf32> -> vector<32x32xf32>
    %c184 = arith.constant 184 : index
    %c0_37 = arith.constant 0 : index
    %84 = vector.load %arg3[%c184, %c0_37] : memref<848x128xf32, #tpu.memory_space<vmem>>, vector<1x32xf32>
    %85 = vector.broadcast %84 : vector<1x32xf32> to vector<32x32xf32>
    %86 = arith.addf %83, %85 : vector<32x32xf32>
    %c192 = arith.constant 192 : index
    %c0_38 = arith.constant 0 : index
    %87 = vector.load %arg3[%c192, %c0_38] : memref<848x128xf32, #tpu.memory_space<vmem>>, vector<1x32xf32>
    %c200 = arith.constant 200 : index
    %c0_39 = arith.constant 0 : index
    %88 = vector.load %arg3[%c200, %c0_39] : memref<848x128xf32, #tpu.memory_space<vmem>>, vector<1x32xf32>
    %cst_40 = arith.constant dense<0.000000e+00> : vector<32xf32>
    %89 = vector.multi_reduction <add>, %86, %cst_40 [1] : vector<32x32xf32> to vector<32xf32>
    %90 = vector.shape_cast %89 : vector<32xf32> to vector<32x1xf32>
    %cst_41 = arith.constant 3.200000e+01 : f32
    %91 = vector.broadcast %cst_41 : f32 to vector<32x1xf32>
    %92 = arith.divf %90, %91 : vector<32x1xf32>
    %93 = vector.broadcast %92 : vector<32x1xf32> to vector<32x32xf32>
    %94 = arith.subf %86, %93 : vector<32x32xf32>
    %95 = arith.mulf %94, %94 : vector<32x32xf32>
    %cst_42 = arith.constant dense<0.000000e+00> : vector<32xf32>
    %96 = vector.multi_reduction <add>, %95, %cst_42 [1] : vector<32x32xf32> to vector<32xf32>
    %97 = vector.shape_cast %96 : vector<32xf32> to vector<32x1xf32>
    %cst_43 = arith.constant 3.200000e+01 : f32
    %98 = vector.broadcast %cst_43 : f32 to vector<32x1xf32>
    %99 = arith.divf %97, %98 : vector<32x1xf32>
    %cst_44 = arith.constant 9.99999974E-6 : f32
    %100 = vector.broadcast %cst_44 : f32 to vector<32x1xf32>
    %101 = arith.addf %99, %100 : vector<32x1xf32>
    %102 = math.rsqrt %101 : vector<32x1xf32>
    %103 = vector.broadcast %102 : vector<32x1xf32> to vector<32x32xf32>
    %104 = arith.mulf %94, %103 : vector<32x32xf32>
    %105 = vector.broadcast %87 : vector<1x32xf32> to vector<32x32xf32>
    %106 = arith.mulf %104, %105 : vector<32x32xf32>
    %107 = vector.broadcast %88 : vector<1x32xf32> to vector<32x32xf32>
    %108 = arith.addf %106, %107 : vector<32x32xf32>
    %cst_45 = arith.constant 0.000000e+00 : f32
    %109 = vector.broadcast %cst_45 : f32 to vector<32x32xf32>
    %110 = arith.maximumf %108, %109 : vector<32x32xf32>
    %c568 = arith.constant 568 : index
    %c0_46 = arith.constant 0 : index
    %111 = vector.load %arg3[%c568, %c0_46] : memref<848x128xf32, #tpu.memory_space<vmem>>, vector<32x128xf32>
    %cst_47 = arith.constant dense<0.000000e+00> : vector<32x128xf32>
    %112 = tpu.matmul %110, %111, %cst_47 {dimension_numbers = #tpu.dot_dimension_numbers<[1], [0], [0], [1], [0, 0, 1, 1], [], []>} : vector<32x32xf32>, vector<32x128xf32>, vector<32x128xf32> -> vector<32x128xf32>
    %c560 = arith.constant 560 : index
    %c0_48 = arith.constant 0 : index
    %113 = vector.load %arg3[%c560, %c0_48] : memref<848x128xf32, #tpu.memory_space<vmem>>, vector<1x128xf32>
    %114 = vector.broadcast %113 : vector<1x128xf32> to vector<32x128xf32>
    %115 = arith.addf %112, %114 : vector<32x128xf32>
    %cst_49 = arith.constant 0.000000e+00 : f32
    %116 = vector.broadcast %cst_49 : f32 to vector<32x128xf32>
    %117 = arith.maximumf %115, %116 : vector<32x128xf32>
    %c608 = arith.constant 608 : index
    %c0_50 = arith.constant 0 : index
    %118 = vector.load %arg3[%c608, %c0_50] : memref<848x128xf32, #tpu.memory_space<vmem>>, vector<128x64xf32>
    %cst_51 = arith.constant dense<0.000000e+00> : vector<32x64xf32>
    %119 = tpu.matmul %117, %118, %cst_51 {dimension_numbers = #tpu.dot_dimension_numbers<[1], [0], [0], [1], [0, 0, 1, 1], [], []>} : vector<32x128xf32>, vector<128x64xf32>, vector<32x64xf32> -> vector<32x64xf32>
    %c600 = arith.constant 600 : index
    %c0_52 = arith.constant 0 : index
    %120 = vector.load %arg3[%c600, %c0_52] : memref<848x128xf32, #tpu.memory_space<vmem>>, vector<1x64xf32>
    %121 = vector.broadcast %120 : vector<1x64xf32> to vector<32x64xf32>
    %122 = arith.addf %119, %121 : vector<32x64xf32>
    %cst_53 = arith.constant 0.000000e+00 : f32
    %123 = vector.broadcast %cst_53 : f32 to vector<32x64xf32>
    %124 = arith.maximumf %122, %123 : vector<32x64xf32>
    %c744 = arith.constant 744 : index
    %c0_54 = arith.constant 0 : index
    %125 = vector.load %arg3[%c744, %c0_54] : memref<848x128xf32, #tpu.memory_space<vmem>>, vector<64x32xf32>
    %cst_55 = arith.constant dense<0.000000e+00> : vector<32x32xf32>
    %126 = tpu.matmul %124, %125, %cst_55 {dimension_numbers = #tpu.dot_dimension_numbers<[1], [0], [0], [1], [0, 0, 1, 1], [], []>} : vector<32x64xf32>, vector<64x32xf32>, vector<32x32xf32> -> vector<32x32xf32>
    %c736 = arith.constant 736 : index
    %c0_56 = arith.constant 0 : index
    %127 = vector.load %arg3[%c736, %c0_56] : memref<848x128xf32, #tpu.memory_space<vmem>>, vector<1x32xf32>
    %128 = vector.broadcast %127 : vector<1x32xf32> to vector<32x32xf32>
    %129 = arith.addf %126, %128 : vector<32x32xf32>
    %130 = vector.extract_strided_slice %129 {offsets = [0, 0], sizes = [32, 16], strides = [1, 1]} : vector<32x32xf32> to vector<32x16xf32>
    %131 = vector.extract_strided_slice %129 {offsets = [0, 16], sizes = [32, 16], strides = [1, 1]} : vector<32x32xf32> to vector<32x16xf32>
    %cst_57 = arith.constant 5.000000e-01 : f32
    %132 = vector.broadcast %cst_57 : f32 to vector<32x16xf32>
    %133 = arith.mulf %132, %131 : vector<32x16xf32>
    %134 = math.exp %133 : vector<32x16xf32>
    %135 = tpu.concatenate %130, %130, %130, %130 in 0 : vector<32x16xf32>, vector<32x16xf32>, vector<32x16xf32>, vector<32x16xf32> -> vector<128x16xf32>
    %136 = tpu.concatenate %134, %134, %134, %134 in 0 : vector<32x16xf32>, vector<32x16xf32>, vector<32x16xf32>, vector<32x16xf32> -> vector<128x16xf32>
    %137 = arith.mulf %6, %136 : vector<128x16xf32>
    %138 = arith.addf %135, %137 : vector<128x16xf32>
    %c24 = arith.constant 24 : index
    %c0_58 = arith.constant 0 : index
    %139 = vector.load %arg3[%c24, %c0_58] : memref<848x128xf32, #tpu.memory_space<vmem>>, vector<32x32xf32>
    %cst_59 = arith.constant dense<0.000000e+00> : vector<32x32xf32>
    %140 = tpu.matmul %110, %139, %cst_59 {dimension_numbers = #tpu.dot_dimension_numbers<[1], [0], [0], [1], [0, 0, 1, 1], [], []>} : vector<32x32xf32>, vector<32x32xf32>, vector<32x32xf32> -> vector<32x32xf32>
    %141 = tpu.concatenate %140, %140, %140, %140 in 0 : vector<32x32xf32>, vector<32x32xf32>, vector<32x32xf32>, vector<32x32xf32> -> vector<128x32xf32>
    %c56 = arith.constant 56 : index
    %c0_60 = arith.constant 0 : index
    %142 = vector.load %arg3[%c56, %c0_60] : memref<848x128xf32, #tpu.memory_space<vmem>>, vector<16x32xf32>
    %cst_61 = arith.constant dense<0.000000e+00> : vector<128x32xf32>
    %143 = tpu.matmul %138, %142, %cst_61 {dimension_numbers = #tpu.dot_dimension_numbers<[1], [0], [0], [1], [0, 0, 1, 1], [], []>} : vector<128x16xf32>, vector<16x32xf32>, vector<128x32xf32> -> vector<128x32xf32>
    %144 = arith.addf %141, %143 : vector<128x32xf32>
    %c0_62 = arith.constant 0 : index
    %c0_63 = arith.constant 0 : index
    %145 = vector.load %arg3[%c0_62, %c0_63] : memref<848x128xf32, #tpu.memory_space<vmem>>, vector<1x32xf32>
    %146 = vector.broadcast %145 : vector<1x32xf32> to vector<128x32xf32>
    %147 = arith.addf %144, %146 : vector<128x32xf32>
    %c8 = arith.constant 8 : index
    %c0_64 = arith.constant 0 : index
    %148 = vector.load %arg3[%c8, %c0_64] : memref<848x128xf32, #tpu.memory_space<vmem>>, vector<1x32xf32>
    %c16 = arith.constant 16 : index
    %c0_65 = arith.constant 0 : index
    %149 = vector.load %arg3[%c16, %c0_65] : memref<848x128xf32, #tpu.memory_space<vmem>>, vector<1x32xf32>
    %cst_66 = arith.constant dense<0.000000e+00> : vector<128xf32>
    %150 = vector.multi_reduction <add>, %147, %cst_66 [1] : vector<128x32xf32> to vector<128xf32>
    %151 = vector.shape_cast %150 : vector<128xf32> to vector<128x1xf32>
    %cst_67 = arith.constant 3.200000e+01 : f32
    %152 = vector.broadcast %cst_67 : f32 to vector<128x1xf32>
    %153 = arith.divf %151, %152 : vector<128x1xf32>
    %154 = vector.broadcast %153 : vector<128x1xf32> to vector<128x32xf32>
    %155 = arith.subf %147, %154 : vector<128x32xf32>
    %156 = arith.mulf %155, %155 : vector<128x32xf32>
    %cst_68 = arith.constant dense<0.000000e+00> : vector<128xf32>
    %157 = vector.multi_reduction <add>, %156, %cst_68 [1] : vector<128x32xf32> to vector<128xf32>
    %158 = vector.shape_cast %157 : vector<128xf32> to vector<128x1xf32>
    %cst_69 = arith.constant 3.200000e+01 : f32
    %159 = vector.broadcast %cst_69 : f32 to vector<128x1xf32>
    %160 = arith.divf %158, %159 : vector<128x1xf32>
    %cst_70 = arith.constant 9.99999974E-6 : f32
    %161 = vector.broadcast %cst_70 : f32 to vector<128x1xf32>
    %162 = arith.addf %160, %161 : vector<128x1xf32>
    %163 = math.rsqrt %162 : vector<128x1xf32>
    %164 = vector.broadcast %163 : vector<128x1xf32> to vector<128x32xf32>
    %165 = arith.mulf %155, %164 : vector<128x32xf32>
    %166 = vector.broadcast %148 : vector<1x32xf32> to vector<128x32xf32>
    %167 = arith.mulf %165, %166 : vector<128x32xf32>
    %168 = vector.broadcast %149 : vector<1x32xf32> to vector<128x32xf32>
    %169 = arith.addf %167, %168 : vector<128x32xf32>
    %cst_71 = arith.constant 0.000000e+00 : f32
    %170 = vector.broadcast %cst_71 : f32 to vector<128x32xf32>
    %171 = arith.maximumf %169, %170 : vector<128x32xf32>
    %c152 = arith.constant 152 : index
    %c0_72 = arith.constant 0 : index
    %172 = vector.load %arg3[%c152, %c0_72] : memref<848x128xf32, #tpu.memory_space<vmem>>, vector<32x128xf32>
    %cst_73 = arith.constant dense<0.000000e+00> : vector<128x128xf32>
    %173 = tpu.matmul %171, %172, %cst_73 {dimension_numbers = #tpu.dot_dimension_numbers<[1], [0], [0], [1], [0, 0, 1, 1], [], []>} : vector<128x32xf32>, vector<32x128xf32>, vector<128x128xf32> -> vector<128x128xf32>
    %174 = vector.extract_strided_slice %173 {offsets = [0, 0], sizes = [128, 32], strides = [1, 1]} : vector<128x128xf32> to vector<128x32xf32>
    %c128 = arith.constant 128 : index
    %c0_74 = arith.constant 0 : index
    %175 = vector.load %arg3[%c128, %c0_74] : memref<848x128xf32, #tpu.memory_space<vmem>>, vector<1x32xf32>
    %176 = vector.broadcast %175 : vector<1x32xf32> to vector<128x32xf32>
    %177 = arith.addf %174, %176 : vector<128x32xf32>
    %c136 = arith.constant 136 : index
    %c0_75 = arith.constant 0 : index
    %178 = vector.load %arg3[%c136, %c0_75] : memref<848x128xf32, #tpu.memory_space<vmem>>, vector<1x32xf32>
    %c144 = arith.constant 144 : index
    %c0_76 = arith.constant 0 : index
    %179 = vector.load %arg3[%c144, %c0_76] : memref<848x128xf32, #tpu.memory_space<vmem>>, vector<1x32xf32>
    %cst_77 = arith.constant dense<0.000000e+00> : vector<128xf32>
    %180 = vector.multi_reduction <add>, %177, %cst_77 [1] : vector<128x32xf32> to vector<128xf32>
    %181 = vector.shape_cast %180 : vector<128xf32> to vector<128x1xf32>
    %cst_78 = arith.constant 3.200000e+01 : f32
    %182 = vector.broadcast %cst_78 : f32 to vector<128x1xf32>
    %183 = arith.divf %181, %182 : vector<128x1xf32>
    %184 = vector.broadcast %183 : vector<128x1xf32> to vector<128x32xf32>
    %185 = arith.subf %177, %184 : vector<128x32xf32>
    %186 = arith.mulf %185, %185 : vector<128x32xf32>
    %cst_79 = arith.constant dense<0.000000e+00> : vector<128xf32>
    %187 = vector.multi_reduction <add>, %186, %cst_79 [1] : vector<128x32xf32> to vector<128xf32>
    %188 = vector.shape_cast %187 : vector<128xf32> to vector<128x1xf32>
    %cst_80 = arith.constant 3.200000e+01 : f32
    %189 = vector.broadcast %cst_80 : f32 to vector<128x1xf32>
    %190 = arith.divf %188, %189 : vector<128x1xf32>
    %cst_81 = arith.constant 9.99999974E-6 : f32
    %191 = vector.broadcast %cst_81 : f32 to vector<128x1xf32>
    %192 = arith.addf %190, %191 : vector<128x1xf32>
    %193 = math.rsqrt %192 : vector<128x1xf32>
    %194 = vector.broadcast %193 : vector<128x1xf32> to vector<128x32xf32>
    %195 = arith.mulf %185, %194 : vector<128x32xf32>
    %196 = vector.broadcast %178 : vector<1x32xf32> to vector<128x32xf32>
    %197 = arith.mulf %195, %196 : vector<128x32xf32>
    %198 = vector.broadcast %179 : vector<1x32xf32> to vector<128x32xf32>
    %199 = arith.addf %197, %198 : vector<128x32xf32>
    %cst_82 = arith.constant 0.000000e+00 : f32
    %200 = vector.broadcast %cst_82 : f32 to vector<128x32xf32>
    %201 = arith.maximumf %199, %200 : vector<128x32xf32>
    %202 = vector.extract_strided_slice %173 {offsets = [0, 32], sizes = [128, 96], strides = [1, 1]} : vector<128x128xf32> to vector<128x96xf32>
    %c72 = arith.constant 72 : index
    %c0_83 = arith.constant 0 : index
    %203 = vector.load %arg3[%c72, %c0_83] : memref<848x128xf32, #tpu.memory_space<vmem>>, vector<1x96xf32>
    %204 = vector.broadcast %203 : vector<1x96xf32> to vector<128x96xf32>
    %205 = arith.addf %202, %204 : vector<128x96xf32>
    %206 = vector.extract_strided_slice %81 {offsets = [0, 0], sizes = [32, 96], strides = [1, 1]} : vector<128x96xf32> to vector<32x96xf32>
    %207 = tpu.concatenate %206, %206, %206, %206 in 0 : vector<32x96xf32>, vector<32x96xf32>, vector<32x96xf32>, vector<32x96xf32> -> vector<128x96xf32>
    %c88 = arith.constant 88 : index
    %c0_84 = arith.constant 0 : index
    %208 = vector.load %arg3[%c88, %c0_84] : memref<848x128xf32, #tpu.memory_space<vmem>>, vector<32x96xf32>
    %cst_85 = arith.constant dense<0.000000e+00> : vector<128x96xf32>
    %209 = tpu.matmul %201, %208, %cst_85 {dimension_numbers = #tpu.dot_dimension_numbers<[1], [0], [0], [1], [0, 0, 1, 1], [], []>} : vector<128x32xf32>, vector<32x96xf32>, vector<128x96xf32> -> vector<128x96xf32>
    %210 = arith.addf %207, %209 : vector<128x96xf32>
    %c80 = arith.constant 80 : index
    %c0_86 = arith.constant 0 : index
    %211 = vector.load %arg3[%c80, %c0_86] : memref<848x128xf32, #tpu.memory_space<vmem>>, vector<1x96xf32>
    %212 = vector.broadcast %211 : vector<1x96xf32> to vector<128x96xf32>
    %213 = arith.addf %210, %212 : vector<128x96xf32>
    %214 = vector.extract_strided_slice %213 {offsets = [0, 0], sizes = [128, 32], strides = [1, 1]} : vector<128x96xf32> to vector<128x32xf32>
    %215 = vector.extract_strided_slice %205 {offsets = [0, 0], sizes = [128, 32], strides = [1, 1]} : vector<128x96xf32> to vector<128x32xf32>
    %216 = arith.addf %214, %215 : vector<128x32xf32>
    %217 = arith.negf %216 : vector<128x32xf32>
    %218 = math.exp %217 : vector<128x32xf32>
    %cst_87 = arith.constant 1.000000e+00 : f32
    %219 = vector.broadcast %cst_87 : f32 to vector<128x32xf32>
    %220 = arith.addf %219, %218 : vector<128x32xf32>
    %221 = arith.divf %219, %220 : vector<128x32xf32>
    %222 = vector.extract_strided_slice %213 {offsets = [0, 32], sizes = [128, 32], strides = [1, 1]} : vector<128x96xf32> to vector<128x32xf32>
    %223 = vector.extract_strided_slice %205 {offsets = [0, 32], sizes = [128, 32], strides = [1, 1]} : vector<128x96xf32> to vector<128x32xf32>
    %224 = arith.addf %222, %223 : vector<128x32xf32>
    %225 = arith.negf %224 : vector<128x32xf32>
    %226 = math.exp %225 : vector<128x32xf32>
    %cst_88 = arith.constant 1.000000e+00 : f32
    %227 = vector.broadcast %cst_88 : f32 to vector<128x32xf32>
    %228 = arith.addf %227, %226 : vector<128x32xf32>
    %229 = arith.divf %227, %228 : vector<128x32xf32>
    %230 = vector.extract_strided_slice %213 {offsets = [0, 64], sizes = [128, 32], strides = [1, 1]} : vector<128x96xf32> to vector<128x32xf32>
    %231 = vector.extract_strided_slice %205 {offsets = [0, 64], sizes = [128, 32], strides = [1, 1]} : vector<128x96xf32> to vector<128x32xf32>
    %232 = arith.mulf %221, %231 : vector<128x32xf32>
    %233 = arith.addf %230, %232 : vector<128x32xf32>
    %234 = math.tanh %233 : vector<128x32xf32>
    %cst_89 = arith.constant 1.000000e+00 : f32
    %235 = vector.broadcast %cst_89 : f32 to vector<128x32xf32>
    %236 = arith.subf %235, %229 : vector<128x32xf32>
    %237 = arith.mulf %236, %234 : vector<128x32xf32>
    %238 = arith.mulf %229, %171 : vector<128x32xf32>
    %239 = arith.addf %237, %238 : vector<128x32xf32>
    %c816_90 = arith.constant 816 : index
    %c0_91 = arith.constant 0 : index
    %240 = vector.load %arg3[%c816_90, %c0_91] : memref<848x128xf32, #tpu.memory_space<vmem>>, vector<32x2xf32>
    %cst_92 = arith.constant dense<0.000000e+00> : vector<128x2xf32>
    %241 = tpu.matmul %239, %240, %cst_92 {dimension_numbers = #tpu.dot_dimension_numbers<[1], [0], [0], [1], [0, 0, 1, 1], [], []>} : vector<128x32xf32>, vector<32x2xf32>, vector<128x2xf32> -> vector<128x2xf32>
    %c808_93 = arith.constant 808 : index
    %c0_94 = arith.constant 0 : index
    %242 = vector.load %arg3[%c808_93, %c0_94] : memref<848x128xf32, #tpu.memory_space<vmem>>, vector<1x2xf32>
    %243 = vector.broadcast %242 : vector<1x2xf32> to vector<128x2xf32>
    %244 = arith.addf %241, %243 : vector<128x2xf32>
    %c152_95 = arith.constant 152 : index
    %c0_96 = arith.constant 0 : index
    %245 = vector.load %arg3[%c152_95, %c0_96] : memref<848x128xf32, #tpu.memory_space<vmem>>, vector<32x128xf32>
    %cst_97 = arith.constant dense<0.000000e+00> : vector<128x128xf32>
    %246 = tpu.matmul %239, %245, %cst_97 {dimension_numbers = #tpu.dot_dimension_numbers<[1], [0], [0], [1], [0, 0, 1, 1], [], []>} : vector<128x32xf32>, vector<32x128xf32>, vector<128x128xf32> -> vector<128x128xf32>
    %247 = vector.extract_strided_slice %246 {offsets = [0, 0], sizes = [128, 32], strides = [1, 1]} : vector<128x128xf32> to vector<128x32xf32>
    %c128_98 = arith.constant 128 : index
    %c0_99 = arith.constant 0 : index
    %248 = vector.load %arg3[%c128_98, %c0_99] : memref<848x128xf32, #tpu.memory_space<vmem>>, vector<1x32xf32>
    %249 = vector.broadcast %248 : vector<1x32xf32> to vector<128x32xf32>
    %250 = arith.addf %247, %249 : vector<128x32xf32>
    %c136_100 = arith.constant 136 : index
    %c0_101 = arith.constant 0 : index
    %251 = vector.load %arg3[%c136_100, %c0_101] : memref<848x128xf32, #tpu.memory_space<vmem>>, vector<1x32xf32>
    %c144_102 = arith.constant 144 : index
    %c0_103 = arith.constant 0 : index
    %252 = vector.load %arg3[%c144_102, %c0_103] : memref<848x128xf32, #tpu.memory_space<vmem>>, vector<1x32xf32>
    %cst_104 = arith.constant dense<0.000000e+00> : vector<128xf32>
    %253 = vector.multi_reduction <add>, %250, %cst_104 [1] : vector<128x32xf32> to vector<128xf32>
    %254 = vector.shape_cast %253 : vector<128xf32> to vector<128x1xf32>
    %cst_105 = arith.constant 3.200000e+01 : f32
    %255 = vector.broadcast %cst_105 : f32 to vector<128x1xf32>
    %256 = arith.divf %254, %255 : vector<128x1xf32>
    %257 = vector.broadcast %256 : vector<128x1xf32> to vector<128x32xf32>
    %258 = arith.subf %250, %257 : vector<128x32xf32>
    %259 = arith.mulf %258, %258 : vector<128x32xf32>
    %cst_106 = arith.constant dense<0.000000e+00> : vector<128xf32>
    %260 = vector.multi_reduction <add>, %259, %cst_106 [1] : vector<128x32xf32> to vector<128xf32>
    %261 = vector.shape_cast %260 : vector<128xf32> to vector<128x1xf32>
    %cst_107 = arith.constant 3.200000e+01 : f32
    %262 = vector.broadcast %cst_107 : f32 to vector<128x1xf32>
    %263 = arith.divf %261, %262 : vector<128x1xf32>
    %cst_108 = arith.constant 9.99999974E-6 : f32
    %264 = vector.broadcast %cst_108 : f32 to vector<128x1xf32>
    %265 = arith.addf %263, %264 : vector<128x1xf32>
    %266 = math.rsqrt %265 : vector<128x1xf32>
    %267 = vector.broadcast %266 : vector<128x1xf32> to vector<128x32xf32>
    %268 = arith.mulf %258, %267 : vector<128x32xf32>
    %269 = vector.broadcast %251 : vector<1x32xf32> to vector<128x32xf32>
    %270 = arith.mulf %268, %269 : vector<128x32xf32>
    %271 = vector.broadcast %252 : vector<1x32xf32> to vector<128x32xf32>
    %272 = arith.addf %270, %271 : vector<128x32xf32>
    %cst_109 = arith.constant 0.000000e+00 : f32
    %273 = vector.broadcast %cst_109 : f32 to vector<128x32xf32>
    %274 = arith.maximumf %272, %273 : vector<128x32xf32>
    %275 = vector.extract_strided_slice %246 {offsets = [0, 32], sizes = [128, 96], strides = [1, 1]} : vector<128x128xf32> to vector<128x96xf32>
    %c72_110 = arith.constant 72 : index
    %c0_111 = arith.constant 0 : index
    %276 = vector.load %arg3[%c72_110, %c0_111] : memref<848x128xf32, #tpu.memory_space<vmem>>, vector<1x96xf32>
    %277 = vector.broadcast %276 : vector<1x96xf32> to vector<128x96xf32>
    %278 = arith.addf %275, %277 : vector<128x96xf32>
    %279 = vector.extract_strided_slice %81 {offsets = [32, 0], sizes = [32, 96], strides = [1, 1]} : vector<128x96xf32> to vector<32x96xf32>
    %280 = tpu.concatenate %279, %279, %279, %279 in 0 : vector<32x96xf32>, vector<32x96xf32>, vector<32x96xf32>, vector<32x96xf32> -> vector<128x96xf32>
    %c88_112 = arith.constant 88 : index
    %c0_113 = arith.constant 0 : index
    %281 = vector.load %arg3[%c88_112, %c0_113] : memref<848x128xf32, #tpu.memory_space<vmem>>, vector<32x96xf32>
    %cst_114 = arith.constant dense<0.000000e+00> : vector<128x96xf32>
    %282 = tpu.matmul %274, %281, %cst_114 {dimension_numbers = #tpu.dot_dimension_numbers<[1], [0], [0], [1], [0, 0, 1, 1], [], []>} : vector<128x32xf32>, vector<32x96xf32>, vector<128x96xf32> -> vector<128x96xf32>
    %283 = arith.addf %280, %282 : vector<128x96xf32>
    %c80_115 = arith.constant 80 : index
    %c0_116 = arith.constant 0 : index
    %284 = vector.load %arg3[%c80_115, %c0_116] : memref<848x128xf32, #tpu.memory_space<vmem>>, vector<1x96xf32>
    %285 = vector.broadcast %284 : vector<1x96xf32> to vector<128x96xf32>
    %286 = arith.addf %283, %285 : vector<128x96xf32>
    %287 = vector.extract_strided_slice %286 {offsets = [0, 0], sizes = [128, 32], strides = [1, 1]} : vector<128x96xf32> to vector<128x32xf32>
    %288 = vector.extract_strided_slice %278 {offsets = [0, 0], sizes = [128, 32], strides = [1, 1]} : vector<128x96xf32> to vector<128x32xf32>
    %289 = arith.addf %287, %288 : vector<128x32xf32>
    %290 = arith.negf %289 : vector<128x32xf32>
    %291 = math.exp %290 : vector<128x32xf32>
    %cst_117 = arith.constant 1.000000e+00 : f32
    %292 = vector.broadcast %cst_117 : f32 to vector<128x32xf32>
    %293 = arith.addf %292, %291 : vector<128x32xf32>
    %294 = arith.divf %292, %293 : vector<128x32xf32>
    %295 = vector.extract_strided_slice %286 {offsets = [0, 32], sizes = [128, 32], strides = [1, 1]} : vector<128x96xf32> to vector<128x32xf32>
    %296 = vector.extract_strided_slice %278 {offsets = [0, 32], sizes = [128, 32], strides = [1, 1]} : vector<128x96xf32> to vector<128x32xf32>
    %297 = arith.addf %295, %296 : vector<128x32xf32>
    %298 = arith.negf %297 : vector<128x32xf32>
    %299 = math.exp %298 : vector<128x32xf32>
    %cst_118 = arith.constant 1.000000e+00 : f32
    %300 = vector.broadcast %cst_118 : f32 to vector<128x32xf32>
    %301 = arith.addf %300, %299 : vector<128x32xf32>
    %302 = arith.divf %300, %301 : vector<128x32xf32>
    %303 = vector.extract_strided_slice %286 {offsets = [0, 64], sizes = [128, 32], strides = [1, 1]} : vector<128x96xf32> to vector<128x32xf32>
    %304 = vector.extract_strided_slice %278 {offsets = [0, 64], sizes = [128, 32], strides = [1, 1]} : vector<128x96xf32> to vector<128x32xf32>
    %305 = arith.mulf %294, %304 : vector<128x32xf32>
    %306 = arith.addf %303, %305 : vector<128x32xf32>
    %307 = math.tanh %306 : vector<128x32xf32>
    %cst_119 = arith.constant 1.000000e+00 : f32
    %308 = vector.broadcast %cst_119 : f32 to vector<128x32xf32>
    %309 = arith.subf %308, %302 : vector<128x32xf32>
    %310 = arith.mulf %309, %307 : vector<128x32xf32>
    %311 = arith.mulf %302, %239 : vector<128x32xf32>
    %312 = arith.addf %310, %311 : vector<128x32xf32>
    %c816_120 = arith.constant 816 : index
    %c0_121 = arith.constant 0 : index
    %313 = vector.load %arg3[%c816_120, %c0_121] : memref<848x128xf32, #tpu.memory_space<vmem>>, vector<32x2xf32>
    %cst_122 = arith.constant dense<0.000000e+00> : vector<128x2xf32>
    %314 = tpu.matmul %312, %313, %cst_122 {dimension_numbers = #tpu.dot_dimension_numbers<[1], [0], [0], [1], [0, 0, 1, 1], [], []>} : vector<128x32xf32>, vector<32x2xf32>, vector<128x2xf32> -> vector<128x2xf32>
    %c808_123 = arith.constant 808 : index
    %c0_124 = arith.constant 0 : index
    %315 = vector.load %arg3[%c808_123, %c0_124] : memref<848x128xf32, #tpu.memory_space<vmem>>, vector<1x2xf32>
    %316 = vector.broadcast %315 : vector<1x2xf32> to vector<128x2xf32>
    %317 = arith.addf %314, %316 : vector<128x2xf32>
    %c152_125 = arith.constant 152 : index
    %c0_126 = arith.constant 0 : index
    %318 = vector.load %arg3[%c152_125, %c0_126] : memref<848x128xf32, #tpu.memory_space<vmem>>, vector<32x128xf32>
    %cst_127 = arith.constant dense<0.000000e+00> : vector<128x128xf32>
    %319 = tpu.matmul %312, %318, %cst_127 {dimension_numbers = #tpu.dot_dimension_numbers<[1], [0], [0], [1], [0, 0, 1, 1], [], []>} : vector<128x32xf32>, vector<32x128xf32>, vector<128x128xf32> -> vector<128x128xf32>
    %320 = vector.extract_strided_slice %319 {offsets = [0, 0], sizes = [128, 32], strides = [1, 1]} : vector<128x128xf32> to vector<128x32xf32>
    %c128_128 = arith.constant 128 : index
    %c0_129 = arith.constant 0 : index
    %321 = vector.load %arg3[%c128_128, %c0_129] : memref<848x128xf32, #tpu.memory_space<vmem>>, vector<1x32xf32>
    %322 = vector.broadcast %321 : vector<1x32xf32> to vector<128x32xf32>
    %323 = arith.addf %320, %322 : vector<128x32xf32>
    %c136_130 = arith.constant 136 : index
    %c0_131 = arith.constant 0 : index
    %324 = vector.load %arg3[%c136_130, %c0_131] : memref<848x128xf32, #tpu.memory_space<vmem>>, vector<1x32xf32>
    %c144_132 = arith.constant 144 : index
    %c0_133 = arith.constant 0 : index
    %325 = vector.load %arg3[%c144_132, %c0_133] : memref<848x128xf32, #tpu.memory_space<vmem>>, vector<1x32xf32>
    %cst_134 = arith.constant dense<0.000000e+00> : vector<128xf32>
    %326 = vector.multi_reduction <add>, %323, %cst_134 [1] : vector<128x32xf32> to vector<128xf32>
    %327 = vector.shape_cast %326 : vector<128xf32> to vector<128x1xf32>
    %cst_135 = arith.constant 3.200000e+01 : f32
    %328 = vector.broadcast %cst_135 : f32 to vector<128x1xf32>
    %329 = arith.divf %327, %328 : vector<128x1xf32>
    %330 = vector.broadcast %329 : vector<128x1xf32> to vector<128x32xf32>
    %331 = arith.subf %323, %330 : vector<128x32xf32>
    %332 = arith.mulf %331, %331 : vector<128x32xf32>
    %cst_136 = arith.constant dense<0.000000e+00> : vector<128xf32>
    %333 = vector.multi_reduction <add>, %332, %cst_136 [1] : vector<128x32xf32> to vector<128xf32>
    %334 = vector.shape_cast %333 : vector<128xf32> to vector<128x1xf32>
    %cst_137 = arith.constant 3.200000e+01 : f32
    %335 = vector.broadcast %cst_137 : f32 to vector<128x1xf32>
    %336 = arith.divf %334, %335 : vector<128x1xf32>
    %cst_138 = arith.constant 9.99999974E-6 : f32
    %337 = vector.broadcast %cst_138 : f32 to vector<128x1xf32>
    %338 = arith.addf %336, %337 : vector<128x1xf32>
    %339 = math.rsqrt %338 : vector<128x1xf32>
    %340 = vector.broadcast %339 : vector<128x1xf32> to vector<128x32xf32>
    %341 = arith.mulf %331, %340 : vector<128x32xf32>
    %342 = vector.broadcast %324 : vector<1x32xf32> to vector<128x32xf32>
    %343 = arith.mulf %341, %342 : vector<128x32xf32>
    %344 = vector.broadcast %325 : vector<1x32xf32> to vector<128x32xf32>
    %345 = arith.addf %343, %344 : vector<128x32xf32>
    %cst_139 = arith.constant 0.000000e+00 : f32
    %346 = vector.broadcast %cst_139 : f32 to vector<128x32xf32>
    %347 = arith.maximumf %345, %346 : vector<128x32xf32>
    %348 = vector.extract_strided_slice %319 {offsets = [0, 32], sizes = [128, 96], strides = [1, 1]} : vector<128x128xf32> to vector<128x96xf32>
    %c72_140 = arith.constant 72 : index
    %c0_141 = arith.constant 0 : index
    %349 = vector.load %arg3[%c72_140, %c0_141] : memref<848x128xf32, #tpu.memory_space<vmem>>, vector<1x96xf32>
    %350 = vector.broadcast %349 : vector<1x96xf32> to vector<128x96xf32>
    %351 = arith.addf %348, %350 : vector<128x96xf32>
    %352 = vector.extract_strided_slice %81 {offsets = [64, 0], sizes = [32, 96], strides = [1, 1]} : vector<128x96xf32> to vector<32x96xf32>
    %353 = tpu.concatenate %352, %352, %352, %352 in 0 : vector<32x96xf32>, vector<32x96xf32>, vector<32x96xf32>, vector<32x96xf32> -> vector<128x96xf32>
    %c88_142 = arith.constant 88 : index
    %c0_143 = arith.constant 0 : index
    %354 = vector.load %arg3[%c88_142, %c0_143] : memref<848x128xf32, #tpu.memory_space<vmem>>, vector<32x96xf32>
    %cst_144 = arith.constant dense<0.000000e+00> : vector<128x96xf32>
    %355 = tpu.matmul %347, %354, %cst_144 {dimension_numbers = #tpu.dot_dimension_numbers<[1], [0], [0], [1], [0, 0, 1, 1], [], []>} : vector<128x32xf32>, vector<32x96xf32>, vector<128x96xf32> -> vector<128x96xf32>
    %356 = arith.addf %353, %355 : vector<128x96xf32>
    %c80_145 = arith.constant 80 : index
    %c0_146 = arith.constant 0 : index
    %357 = vector.load %arg3[%c80_145, %c0_146] : memref<848x128xf32, #tpu.memory_space<vmem>>, vector<1x96xf32>
    %358 = vector.broadcast %357 : vector<1x96xf32> to vector<128x96xf32>
    %359 = arith.addf %356, %358 : vector<128x96xf32>
    %360 = vector.extract_strided_slice %359 {offsets = [0, 0], sizes = [128, 32], strides = [1, 1]} : vector<128x96xf32> to vector<128x32xf32>
    %361 = vector.extract_strided_slice %351 {offsets = [0, 0], sizes = [128, 32], strides = [1, 1]} : vector<128x96xf32> to vector<128x32xf32>
    %362 = arith.addf %360, %361 : vector<128x32xf32>
    %363 = arith.negf %362 : vector<128x32xf32>
    %364 = math.exp %363 : vector<128x32xf32>
    %cst_147 = arith.constant 1.000000e+00 : f32
    %365 = vector.broadcast %cst_147 : f32 to vector<128x32xf32>
    %366 = arith.addf %365, %364 : vector<128x32xf32>
    %367 = arith.divf %365, %366 : vector<128x32xf32>
    %368 = vector.extract_strided_slice %359 {offsets = [0, 32], sizes = [128, 32], strides = [1, 1]} : vector<128x96xf32> to vector<128x32xf32>
    %369 = vector.extract_strided_slice %351 {offsets = [0, 32], sizes = [128, 32], strides = [1, 1]} : vector<128x96xf32> to vector<128x32xf32>
    %370 = arith.addf %368, %369 : vector<128x32xf32>
    %371 = arith.negf %370 : vector<128x32xf32>
    %372 = math.exp %371 : vector<128x32xf32>
    %cst_148 = arith.constant 1.000000e+00 : f32
    %373 = vector.broadcast %cst_148 : f32 to vector<128x32xf32>
    %374 = arith.addf %373, %372 : vector<128x32xf32>
    %375 = arith.divf %373, %374 : vector<128x32xf32>
    %376 = vector.extract_strided_slice %359 {offsets = [0, 64], sizes = [128, 32], strides = [1, 1]} : vector<128x96xf32> to vector<128x32xf32>
    %377 = vector.extract_strided_slice %351 {offsets = [0, 64], sizes = [128, 32], strides = [1, 1]} : vector<128x96xf32> to vector<128x32xf32>
    %378 = arith.mulf %367, %377 : vector<128x32xf32>
    %379 = arith.addf %376, %378 : vector<128x32xf32>
    %380 = math.tanh %379 : vector<128x32xf32>
    %cst_149 = arith.constant 1.000000e+00 : f32
    %381 = vector.broadcast %cst_149 : f32 to vector<128x32xf32>
    %382 = arith.subf %381, %375 : vector<128x32xf32>
    %383 = arith.mulf %382, %380 : vector<128x32xf32>
    %384 = arith.mulf %375, %312 : vector<128x32xf32>
    %385 = arith.addf %383, %384 : vector<128x32xf32>
    %c816_150 = arith.constant 816 : index
    %c0_151 = arith.constant 0 : index
    %386 = vector.load %arg3[%c816_150, %c0_151] : memref<848x128xf32, #tpu.memory_space<vmem>>, vector<32x2xf32>
    %cst_152 = arith.constant dense<0.000000e+00> : vector<128x2xf32>
    %387 = tpu.matmul %385, %386, %cst_152 {dimension_numbers = #tpu.dot_dimension_numbers<[1], [0], [0], [1], [0, 0, 1, 1], [], []>} : vector<128x32xf32>, vector<32x2xf32>, vector<128x2xf32> -> vector<128x2xf32>
    %c808_153 = arith.constant 808 : index
    %c0_154 = arith.constant 0 : index
    %388 = vector.load %arg3[%c808_153, %c0_154] : memref<848x128xf32, #tpu.memory_space<vmem>>, vector<1x2xf32>
    %389 = vector.broadcast %388 : vector<1x2xf32> to vector<128x2xf32>
    %390 = arith.addf %387, %389 : vector<128x2xf32>
    %c152_155 = arith.constant 152 : index
    %c0_156 = arith.constant 0 : index
    %391 = vector.load %arg3[%c152_155, %c0_156] : memref<848x128xf32, #tpu.memory_space<vmem>>, vector<32x128xf32>
    %cst_157 = arith.constant dense<0.000000e+00> : vector<128x128xf32>
    %392 = tpu.matmul %385, %391, %cst_157 {dimension_numbers = #tpu.dot_dimension_numbers<[1], [0], [0], [1], [0, 0, 1, 1], [], []>} : vector<128x32xf32>, vector<32x128xf32>, vector<128x128xf32> -> vector<128x128xf32>
    %393 = vector.extract_strided_slice %392 {offsets = [0, 0], sizes = [128, 32], strides = [1, 1]} : vector<128x128xf32> to vector<128x32xf32>
    %c128_158 = arith.constant 128 : index
    %c0_159 = arith.constant 0 : index
    %394 = vector.load %arg3[%c128_158, %c0_159] : memref<848x128xf32, #tpu.memory_space<vmem>>, vector<1x32xf32>
    %395 = vector.broadcast %394 : vector<1x32xf32> to vector<128x32xf32>
    %396 = arith.addf %393, %395 : vector<128x32xf32>
    %c136_160 = arith.constant 136 : index
    %c0_161 = arith.constant 0 : index
    %397 = vector.load %arg3[%c136_160, %c0_161] : memref<848x128xf32, #tpu.memory_space<vmem>>, vector<1x32xf32>
    %c144_162 = arith.constant 144 : index
    %c0_163 = arith.constant 0 : index
    %398 = vector.load %arg3[%c144_162, %c0_163] : memref<848x128xf32, #tpu.memory_space<vmem>>, vector<1x32xf32>
    %cst_164 = arith.constant dense<0.000000e+00> : vector<128xf32>
    %399 = vector.multi_reduction <add>, %396, %cst_164 [1] : vector<128x32xf32> to vector<128xf32>
    %400 = vector.shape_cast %399 : vector<128xf32> to vector<128x1xf32>
    %cst_165 = arith.constant 3.200000e+01 : f32
    %401 = vector.broadcast %cst_165 : f32 to vector<128x1xf32>
    %402 = arith.divf %400, %401 : vector<128x1xf32>
    %403 = vector.broadcast %402 : vector<128x1xf32> to vector<128x32xf32>
    %404 = arith.subf %396, %403 : vector<128x32xf32>
    %405 = arith.mulf %404, %404 : vector<128x32xf32>
    %cst_166 = arith.constant dense<0.000000e+00> : vector<128xf32>
    %406 = vector.multi_reduction <add>, %405, %cst_166 [1] : vector<128x32xf32> to vector<128xf32>
    %407 = vector.shape_cast %406 : vector<128xf32> to vector<128x1xf32>
    %cst_167 = arith.constant 3.200000e+01 : f32
    %408 = vector.broadcast %cst_167 : f32 to vector<128x1xf32>
    %409 = arith.divf %407, %408 : vector<128x1xf32>
    %cst_168 = arith.constant 9.99999974E-6 : f32
    %410 = vector.broadcast %cst_168 : f32 to vector<128x1xf32>
    %411 = arith.addf %409, %410 : vector<128x1xf32>
    %412 = math.rsqrt %411 : vector<128x1xf32>
    %413 = vector.broadcast %412 : vector<128x1xf32> to vector<128x32xf32>
    %414 = arith.mulf %404, %413 : vector<128x32xf32>
    %415 = vector.broadcast %397 : vector<1x32xf32> to vector<128x32xf32>
    %416 = arith.mulf %414, %415 : vector<128x32xf32>
    %417 = vector.broadcast %398 : vector<1x32xf32> to vector<128x32xf32>
    %418 = arith.addf %416, %417 : vector<128x32xf32>
    %cst_169 = arith.constant 0.000000e+00 : f32
    %419 = vector.broadcast %cst_169 : f32 to vector<128x32xf32>
    %420 = arith.maximumf %418, %419 : vector<128x32xf32>
    %421 = vector.extract_strided_slice %392 {offsets = [0, 32], sizes = [128, 96], strides = [1, 1]} : vector<128x128xf32> to vector<128x96xf32>
    %c72_170 = arith.constant 72 : index
    %c0_171 = arith.constant 0 : index
    %422 = vector.load %arg3[%c72_170, %c0_171] : memref<848x128xf32, #tpu.memory_space<vmem>>, vector<1x96xf32>
    %423 = vector.broadcast %422 : vector<1x96xf32> to vector<128x96xf32>
    %424 = arith.addf %421, %423 : vector<128x96xf32>
    %425 = vector.extract_strided_slice %81 {offsets = [96, 0], sizes = [32, 96], strides = [1, 1]} : vector<128x96xf32> to vector<32x96xf32>
    %426 = tpu.concatenate %425, %425, %425, %425 in 0 : vector<32x96xf32>, vector<32x96xf32>, vector<32x96xf32>, vector<32x96xf32> -> vector<128x96xf32>
    %c88_172 = arith.constant 88 : index
    %c0_173 = arith.constant 0 : index
    %427 = vector.load %arg3[%c88_172, %c0_173] : memref<848x128xf32, #tpu.memory_space<vmem>>, vector<32x96xf32>
    %cst_174 = arith.constant dense<0.000000e+00> : vector<128x96xf32>
    %428 = tpu.matmul %420, %427, %cst_174 {dimension_numbers = #tpu.dot_dimension_numbers<[1], [0], [0], [1], [0, 0, 1, 1], [], []>} : vector<128x32xf32>, vector<32x96xf32>, vector<128x96xf32> -> vector<128x96xf32>
    %429 = arith.addf %426, %428 : vector<128x96xf32>
    %c80_175 = arith.constant 80 : index
    %c0_176 = arith.constant 0 : index
    %430 = vector.load %arg3[%c80_175, %c0_176] : memref<848x128xf32, #tpu.memory_space<vmem>>, vector<1x96xf32>
    %431 = vector.broadcast %430 : vector<1x96xf32> to vector<128x96xf32>
    %432 = arith.addf %429, %431 : vector<128x96xf32>
    %433 = vector.extract_strided_slice %432 {offsets = [0, 0], sizes = [128, 32], strides = [1, 1]} : vector<128x96xf32> to vector<128x32xf32>
    %434 = vector.extract_strided_slice %424 {offsets = [0, 0], sizes = [128, 32], strides = [1, 1]} : vector<128x96xf32> to vector<128x32xf32>
    %435 = arith.addf %433, %434 : vector<128x32xf32>
    %436 = arith.negf %435 : vector<128x32xf32>
    %437 = math.exp %436 : vector<128x32xf32>
    %cst_177 = arith.constant 1.000000e+00 : f32
    %438 = vector.broadcast %cst_177 : f32 to vector<128x32xf32>
    %439 = arith.addf %438, %437 : vector<128x32xf32>
    %440 = arith.divf %438, %439 : vector<128x32xf32>
    %441 = vector.extract_strided_slice %432 {offsets = [0, 32], sizes = [128, 32], strides = [1, 1]} : vector<128x96xf32> to vector<128x32xf32>
    %442 = vector.extract_strided_slice %424 {offsets = [0, 32], sizes = [128, 32], strides = [1, 1]} : vector<128x96xf32> to vector<128x32xf32>
    %443 = arith.addf %441, %442 : vector<128x32xf32>
    %444 = arith.negf %443 : vector<128x32xf32>
    %445 = math.exp %444 : vector<128x32xf32>
    %cst_178 = arith.constant 1.000000e+00 : f32
    %446 = vector.broadcast %cst_178 : f32 to vector<128x32xf32>
    %447 = arith.addf %446, %445 : vector<128x32xf32>
    %448 = arith.divf %446, %447 : vector<128x32xf32>
    %449 = vector.extract_strided_slice %432 {offsets = [0, 64], sizes = [128, 32], strides = [1, 1]} : vector<128x96xf32> to vector<128x32xf32>
    %450 = vector.extract_strided_slice %424 {offsets = [0, 64], sizes = [128, 32], strides = [1, 1]} : vector<128x96xf32> to vector<128x32xf32>
    %451 = arith.mulf %440, %450 : vector<128x32xf32>
    %452 = arith.addf %449, %451 : vector<128x32xf32>
    %453 = math.tanh %452 : vector<128x32xf32>
    %cst_179 = arith.constant 1.000000e+00 : f32
    %454 = vector.broadcast %cst_179 : f32 to vector<128x32xf32>
    %455 = arith.subf %454, %448 : vector<128x32xf32>
    %456 = arith.mulf %455, %453 : vector<128x32xf32>
    %457 = arith.mulf %448, %385 : vector<128x32xf32>
    %458 = arith.addf %456, %457 : vector<128x32xf32>
    %c816_180 = arith.constant 816 : index
    %c0_181 = arith.constant 0 : index
    %459 = vector.load %arg3[%c816_180, %c0_181] : memref<848x128xf32, #tpu.memory_space<vmem>>, vector<32x2xf32>
    %cst_182 = arith.constant dense<0.000000e+00> : vector<128x2xf32>
    %460 = tpu.matmul %458, %459, %cst_182 {dimension_numbers = #tpu.dot_dimension_numbers<[1], [0], [0], [1], [0, 0, 1, 1], [], []>} : vector<128x32xf32>, vector<32x2xf32>, vector<128x2xf32> -> vector<128x2xf32>
    %c808_183 = arith.constant 808 : index
    %c0_184 = arith.constant 0 : index
    %461 = vector.load %arg3[%c808_183, %c0_184] : memref<848x128xf32, #tpu.memory_space<vmem>>, vector<1x2xf32>
    %462 = vector.broadcast %461 : vector<1x2xf32> to vector<128x2xf32>
    %463 = arith.addf %460, %462 : vector<128x2xf32>
    %c0_185 = arith.constant 0 : index
    %c0_186 = arith.constant 0 : index
    %464 = vector.load %arg4[%c0_185, %c0_186] : memref<128x2xf32, #tpu.memory_space<vmem>>, vector<128x2xf32>
    tpu.vector_store %arg4[%c0_185, %c0_186], %40 {strides = array<i32>} : memref<128x2xf32, #tpu.memory_space<vmem>>, vector<128x2xf32>,
    %c0_187 = arith.constant 0 : index
    %c0_188 = arith.constant 0 : index
    %465 = vector.load %arg5[%c0_187, %c0_188] : memref<512x2xf32, #tpu.memory_space<vmem>>, vector<128x2xf32>
    tpu.vector_store %arg5[%c0_187, %c0_188], %244 {strides = array<i32>} : memref<512x2xf32, #tpu.memory_space<vmem>>, vector<128x2xf32>,
    %c128_189 = arith.constant 128 : index
    %c0_190 = arith.constant 0 : index
    %466 = vector.load %arg5[%c128_189, %c0_190] : memref<512x2xf32, #tpu.memory_space<vmem>>, vector<128x2xf32>
    tpu.vector_store %arg5[%c128_189, %c0_190], %317 {strides = array<i32>} : memref<512x2xf32, #tpu.memory_space<vmem>>, vector<128x2xf32>,
    %c256 = arith.constant 256 : index
    %c0_191 = arith.constant 0 : index
    %467 = vector.load %arg5[%c256, %c0_191] : memref<512x2xf32, #tpu.memory_space<vmem>>, vector<128x2xf32>
    tpu.vector_store %arg5[%c256, %c0_191], %390 {strides = array<i32>} : memref<512x2xf32, #tpu.memory_space<vmem>>, vector<128x2xf32>,
    %c384 = arith.constant 384 : index
    %c0_192 = arith.constant 0 : index
    %468 = vector.load %arg5[%c384, %c0_192] : memref<512x2xf32, #tpu.memory_space<vmem>>, vector<128x2xf32>
    tpu.vector_store %arg5[%c384, %c0_192], %463 {strides = array<i32>} : memref<512x2xf32, #tpu.memory_space<vmem>>, vector<128x2xf32>,
    return
  }
  func.func @transform_0(%arg0: i32) -> (i32, i32, i32) {
    %c0_i32 = arith.constant 0 : i32
    %c0_i32_0 = arith.constant 0 : i32
    %c0_i32_1 = arith.constant 0 : i32
    %c0_i32_2 = arith.constant 0 : i32
    return %c0_i32, %c0_i32_0, %c0_i32_1 : i32, i32, i32
  }
  func.func @transform_1(%arg0: i32) -> (i32, i32) {
    %c0_i32 = arith.constant 0 : i32
    %c0_i32_0 = arith.constant 0 : i32
    %c0_i32_1 = arith.constant 0 : i32
    return %c0_i32, %c0_i32_0 : i32, i32
  }
  func.func @transform_2(%arg0: i32) -> (i32, i32) {
    %c0_i32 = arith.constant 0 : i32
    %c0_i32_0 = arith.constant 0 : i32
    %c0_i32_1 = arith.constant 0 : i32
    return %c0_i32, %c0_i32_0 : i32, i32
  }
  func.func @transform_3(%arg0: i32) -> (i32, i32) {
    %c0_i32 = arith.constant 0 : i32
    %c0_i32_0 = arith.constant 0 : i32
    %c0_i32_1 = arith.constant 0 : i32
    return %c0_i32, %c0_i32_0 : i32, i32
  }
  func.func @transform_4(%arg0: i32) -> (i32, i32) {
    %c0_i32 = arith.constant 0 : i32
    %c0_i32_0 = arith.constant 0 : i32
    %c0_i32_1 = arith.constant 0 : i32
    return %c0_i32, %c0_i32_0 : i32, i32
  }
}

</mosaic_0001>

<bundles_post_ra>
// kernel: tpu_custom_call.1
= control target key start
LH: loop header
LB: loop body
LE: loop exit
PB: predicated region body
PF: predicated region fallthrough
CT: control target
= control target key end

     0   :  { %10 = vsyncpa [#allocation5], 0  ;;  %s12273_s15 = smov [#allocation4]   ;;  %s16963_s0 = inlined_call_operand.vmem [shape: f32[8,4,6], index: 0, kind: input, shape index: {}]   ;;  %s16964_s1 = inlined_call_operand.vmem [shape: f32[128,16], index: 1, kind: input, shape index: {}]   ;;  %s16965_s2 = inlined_call_operand.hbm [shape: f32[848,128], index: 2, kind: input, shape index: {}]   ;;  %s16966_s3 = inlined_call_operand.vmem [shape: f32[128,2], index: 3, kind: output, shape index: {0}]   ;;  %s16967_s4 = inlined_call_operand.vmem [shape: f32[512,2], index: 4, kind: output, shape index: {1}]  }
   0x1   :  { %s20_s16 = sshll.u32 %s12273_s15, 4  ;;  %s12225_s19 = scalar_lea.hbm %s16965_s2, 13568  ;;  %s21_s16 = int_to_ptr.vmem [resolvable:$true] %s20_s16 }
   0x2   :  { %p12226_p0 = scmp.ne.s32.totalorder %s16965_s2, %s12225_s19  ;;  %p12229_p1 = scmp.lt.u32.totalorder %s12225_s19, %s16965_s2 }
   0x4   :  { %p12231_p2 = pnand %p12229_p1, %p12226_p0 }
   0x6   :  { %12234 = shalt.err (!%p12231_p2)
}
   0x7   :  { %s12235_s24 = scalar_lea.vmem %s21_s16, 13568  ;;  %p12240_p4 = scmp.lt.s32.totalorder %s21_s16, %s21_s16 }
   0x8   :  { %p12236_p3 = scmp.ne.s32.totalorder %s21_s16, %s12235_s24  ;;  %p12241_p5 = scmp.lt.s32.totalorder %s12235_s24, %s12235_s24 }
   0xa   :  { %p12242_p6 = por %p12241_p5, %p12240_p4 }
   0xc   :  { %p12243_p7 = pnand %p12242_p6, %p12236_p3 }
   0xe   :  { %12246 = shalt.err (!%p12243_p7)
}
   0xf   :  { %s12274_s25 = smov 128   ;;  %s12275_s26 = smov 8  }
  0x10   :  { %26 = dma.hbm_to_vmem [thread:$0]  %s16965_s2, 13568, %s21_s16, [#allocation5], %s12274_s25, %s12274_s25, %s12275_s26  }
  0x11   :  { %12259 = dma.done.wait [#allocation5], 13568  }
  0x12   :  { %12260 = vsyncadd [#allocation5], 4294953728  ;;  %v12327_v0 = vmov 0.0   ;;  %v12329_v1 = vmov 0.0   ;;  %s12331_s29 = smov 0  }
  0x13 LB: > { %v41_v2 = vld [vmem:[#allocation4 + $0x188] sm:$0x3f]  ;;  %vm51_vm0 = vcmask 1045504   ;;  %v12276_v3 = vmov 0.0   ;;  %vm12277_vm1 = vmmov 0   ;;  %v216_v4 = vld [vmem:[#allocation4 + $0x138] sm:$0xff]  ;;  %s12271_s29 = sphi %s12331_s29, %s35_s29   ;;  %v12267_v1 = vphi %v12329_v1, %v1572_v1   ;;  %v12263_v0 = vphi %v12327_v0, %v12373_v0  }
  0x14   : > { %10580 = vmatprep.subr.mxu0 %v12276_v3  ;;  %10582 = vmatprep.mubr.msk.f32.mxu0 %vm12277_vm1, %v12276_v3  ;;  %v217_v5 = vld [vmem:[#allocation4 + $0x140] sm:$0xff]  ;;  %s12344_s2 = sshll.u32 %s12271_s29, 2  ;;  %vm47_vm2 = vcmask 48128   ;;  %v12278_v7 = vmov 0.0|0.0   ;;  %v132_v8 = vld [vmem:[#allocation4 + $0x158] sm:$0xff]  ;;  %s12279_s7 = smov 96  }
  0x15   : > { %10581 = vmatpush3.msk.msra.mxu0 %vm51_vm0, %v41_v2  ;;  %v11311_v6 = vpack.c.bf16 %v217_v5, %v216_v4  ;;  %11304 = vmatprep.subr.bf16.mxu1 %v12278_v7  ;;  %v133_v9 = vld [vmem:[#allocation4 + $0x160] sm:$0xff]  ;;  %s39_s6 = scalar_lea.vmem %s16963_s0, %s12344_s2  ;;  %v218_v10 = vld [vmem:[#allocation4 + $0x148] sm:$0xff]  ;;  %v219_v11 = vld [vmem:[#allocation4 + $0x150] sm:$0xff]  ;;  %s12280_s8 = smov 32   ;;  %vm130_vm3 = vcmask 261120   ;;  %vm142_vm4 = vcmask 326656  }
  0x16   : > { %226 = vrot.lane.b32.xlu0 %v12263_v0, %s12279_s7  ;;  %11310 = vmatprep.subr.bf16.mxu0 %v12278_v7  ;;  %v11305_v12 = vpack.c.bf16 %v133_v9, %v132_v8  ;;  %v40_v13 = vld [vmem:[%s39_s6] sm:$0xf]  ;;  %v11314_v14 = vpack.c.bf16 %v219_v11, %v218_v10  ;;  %v134_v15 = vld [vmem:[#allocation4 + $0x168] sm:$0xff]  ;;  %v135_v16 = vld [vmem:[#allocation4 + $0x170] sm:$0xff]  ;;  %s12281_s9 = smov 64   ;;  %vm1575_vm5 = vcmask 257024  }
  0x17   : > { %10595 = vmatprep.mubr.msk.f32.mxu1 %vm12277_vm1, %v12276_v3  ;;  %10583 = vmatmul.mubr.msk.f32.vlgmr.msra.gmra.mrb[0].mxu0 %vm47_vm2, %v40_v13  ;;  %v11308_v17 = vpack.c.bf16 %v135_v16, %v134_v15  ;;  %v136_v18 = vld [vmem:[#allocation4 + $0x178] sm:$0xff]  ;;  %v9737_v20 = vld [vmem:[#allocation4 + $0x180] ss:$0 sm:$0xff]  ;;  %v9742_v27 = vld [vmem:[#allocation4 + $0x128] ss:$0 sm:$0xff]  ;;  %s1574_s10 = scalar_lea.vmem [#allocation2], %s12344_s2 }
  0x18   : > { %11306 = vmatpush3.bf16.msra.mxu1 %v11305_v12  ;;  %11312 = vmatpush3.bf16.msra.mxu0 %v11311_v6  ;;  %v9740_v31 = vld [vmem:[#allocation4 + $0x130] ss:$0 sm:$0xff]  ;;  %v326_v44 = vld [vmem:[#allocation4 + $0x108] sm:$0xff]  ;;  %v328_v46 = vld [vmem:[#allocation4 + $0x118] sm:$0xff]  ;;  %vm412_vm6 = vcmask 60416   ;;  %vm444_vm7 = vcmask 64512  }
  0x19   : > { %10606 = vmatprep.mubr.msk.f32.mxu0 %vm12277_vm1, %v12276_v3  ;;  %11313 = vmatprep.subr.bf16.mxu0 %v12278_v7  ;;  %v327_v45 = vld [vmem:[#allocation4 + $0x110] sm:$0xff]  ;;  %v329_v48 = vld [vmem:[#allocation4 + $0x120] sm:$0xff]  ;;  %v12383_v4 = vld [vmem:[#allocation4 + $0x228] sm:$0xff]  ;;  %s12282_s11 = smov 112   ;;  %s12283_s12 = smov 16   ;;  %vm1427_vm8 = vcmask 1043456  }
  0x1a   : > { %127 = vrot.lane.b32.xlu0 %v12267_v1, %s12280_s8  ;;  %11307 = vmatprep.subr.bf16.mxu1 %v12278_v7  ;;  %v11317_v47 = vpack.c.bf16 %v327_v45, %v326_v44  ;;  %v11320_v49 = vpack.c.bf16 %v329_v48, %v328_v46  ;;  %v9745_v56 = vld [vmem:[#allocation4 + $0xf0] ss:$0 sm:$0xff]  ;;  %v12385_v5 = vld [vmem:[#allocation4 + $0x220] sm:$0xff]  ;;  %v9747_v10 = vld [vmem:[#allocation4 + $0xf8] ss:$0 sm:$0xff]  ;;  %s12284_s13 = smov 8  }
  0x1b   : > { %v9748_v12 = vld [vmem:[#allocation4 + $0x100] ss:$0 sm:$0xff]  ;;  %s12285_s14 = smov 120   ;;  %s12417_s15 = scalar_lea.vmem [#allocation3], %s12344_s2 }
  0x1c   : > { %11315 = vmatpush3.bf16.msra.mxu0 %v11314_v14  ;;  %11309 = vmatpush3.bf16.msra.mxu1 %v11308_v17  ;;  %s35_s29 = sadd.s32 1, %s12271_s29  }
  0x1d   : > { %11316 = vmatprep.subr.bf16.mxu0 %v12278_v7  ;;  %10593 = vmatprep.subr.mxu1 %v12276_v3  ;;  %p32_p8 = scmp.ge.s32.totalorder %s35_s29, 8  }
  0x1e   :  { %vm9620_vm9 = vcmask (%p32_p8), 15360   ;;  %vm3353_vm10 = vcmask (%p32_p8), 523264   ;;  %vm3602_vm11 = vcmask (%p32_p8), 130048   ;;  %s12288_s22 = smov (%p32_p8), 96   ;;  %s12289_s23 = smov (%p32_p8), 64  }
  0x20   : > { %10594 = vmatpush3.msra.mxu1 %v136_v18  ;;  %v12399_v18 = vld [vmem:[#allocation4 + $0x210] ss:$0 sm:$0xff] }
  0x21   : > { %10620 = vmatprep.subr.mxu1 %v12276_v3 }
  0x88   : > { %v227_v19 = vpop.permute.xlu0 %226 }
  0x89   : > { %10607 = vmatmul.mubr.msk.f32.vlgmr.msra.gmra.mrb[2].mxu0 %vm130_vm3, %v227_v19 }
  0x8a   : > { %10617 = vmatprep.mubr.msk.f32.mxu0 %vm12277_vm1, %v12276_v3  ;;  %11318 = vmatpush3.bf16.msra.mxu0 %v11317_v47 }
  0x8b   : > { %11319 = vmatprep.subr.bf16.mxu0 %v12278_v7 }
  0x8c   : > { %v128_v24 = vpop.permute.xlu0 %127 }
  0x8e   : > { %11321 = vmatpush3.bf16.msra.mxu0 %v11320_v49 }
  0x8f   : > { %10630 = vmatprep.subr.mxu0 %v12276_v3 }
  0xea   : > { %v121_v21 = vpop.f32.mrb[0].mxu0 }
  0xeb   : > { %v122_v22 = vadd.f32 %v9737_v20, %v121_v21  ;;  %v10584_v23 = vpop.f32.mrb[1].mxu0 }
  0xed   : > { %v125_v25 = vmax.f32 %v122_v22, 0.0  ;;  %v12403_v22 = vld [vmem:[#allocation4 + $0x218] ss:$0 sm:$0xff] }
  0xef   : > { %v131_v26 = vsel %vm130_vm3, %v125_v25, %v128_v24 }
  0xf0   : > { %10596 = vmatmul.mubr.msk.f32.vlgmr.msra.gmra.mrb[0].mxu1 %vm142_vm4, %v131_v26 }
  0xf1   : > { %10622 = vmatprep.mubr.msk.f32.mxu1 %vm12277_vm1, %v12276_v3  ;;  %10621 = vmatpush3.msra.mxu1 %v12383_v4 }
  0xf2   : > { %10625 = vmatprep.subr.mxu1 %v12276_v3 }
  0xf4   : > { %10623 = vmatmul.mubr.f32.vlgmr.msra.gmra.mrb[2].mxu1 %v12276_v3 }
  0xf5   : > { %10626 = vmatpush3.msra.mxu1 %v12385_v5  ;;  %10627 = vmatprep.mubr.msk.f32.mxu1 %vm12277_vm1, %v12276_v3 }
  0xf6   : > { %10635 = vmatprep.subr.mxu1 %v12276_v3 }
 0x15c   : > { %v296_v28 = vpop.f32.mrb[2].mxu0 }
 0x15d   : > { %v297_v29 = vadd.f32 %v9742_v27, %v296_v28  ;;  %v10608_v30 = vpop.f32.mrb[3].mxu0 }
 0x15f   : > { %308 = vrot.lane.b32.xlu1 %v297_v29, %s12281_s9 }
 0x1c3   : > { %v212_v32 = vpop.f32.mrb[0].mxu1 }
 0x1c4   : > { %v213_v33 = vadd.f32 %v9740_v31, %v212_v32  ;;  %v10597_v34 = vpop.f32.mrb[1].mxu1 }
 0x1c6   : > { %v300_v35 = vadd.f32 %v297_v29, %v213_v33 }
 0x1c7   : > { %v514_v16 = vpop.f32.mrb[2].mxu1 }
 0x1c8   : > { %v9744_v36 = vmul.f32 -1.442695, %v300_v35  ;;  %v10624_v17 = vpop.f32.mrb[3].mxu1  ;;  %v515_v23 = vadd.f32 %v12403_v22, %v514_v16 }
 0x1ca   : > { %11543 = vpow2.f32 %v9744_v36 }
 0x1d1   : > { %v309_v39 = vpop.permute.xlu1 %308 }
 0x1d4   : > { %v11544_v37 = vpop.eup %11543 }
 0x1d5   : > { %v304_v38 = vadd.f32 1.0, %v11544_v37 }
 0x1d7   : > { %11545 = vrcp.f32 %v304_v38 }
 0x1e1   : > { %v11546_v40 = vpop.eup %11545 }
 0x1e2   : > { %v311_v41 = vmul.f32 %v11546_v40, %v309_v39  ;;  %v318_v51 = vsub.f32 1.0, %v11546_v40  ;;  %v324_v53 = vmul.f32 %v12263_v0, %v11546_v40 }
 0x1e4   : > { %313 = vrot.lane.b32.xlu1 %v311_v41, %s12281_s9 }
 0x256   : > { %v314_v42 = vpop.permute.xlu1 %313 }
 0x257   : > { %v316_v43 = vadd.f32 %v314_v42, %v213_v33  ;;  %v12407_v33 = vld [vmem:[#allocation4 + $0x1e8] sm:$0xff]  ;;  %v12431_v42 = vld [vmem:[#allocation4 + $0x1d0] ss:$0 sm:$0xff] }
 0x259   : > { %11547 = vtanh.f32 %v316_v43 }
 0x263   : > { %v11548_v50 = vpop.eup %11547 }
 0x264   : > { %320 = vrot.lane.b32.xlu0 %v11548_v50, %s12279_s7 }
 0x2d6   : > { %v321_v52 = vpop.permute.xlu0 %320 }
 0x2d7   : > { %v323_v54 = vmul.f32 %v321_v52, %v318_v51 }
 0x2d9   : > { %v12373_v0 = vadd.f32 %v324_v53, %v323_v54  }
 0x2db   : > { %336 = vrot.lane.b32.xlu1 %v12373_v0, %s12279_s7 }
 0x34d   : > { %v337_v55 = vpop.permute.xlu1 %336 }
 0x34e   : > { %1576 = vst.msk [vmem:[%s1574_s10] sm:$0xf] %vm1575_vm5, %v337_v55  ;;  %10618 = vmatmul.mubr.msk.f32.vlgmr.msra.gmra.mrb[4].mxu0 %vm130_vm3, %v337_v55 }
 0x34f   : > { %10632 = vmatprep.mubr.msk.f32.mxu0 %vm12277_vm1, %v12276_v3  ;;  %10631 = vmatpush3.msra.mxu0 %v12407_v33 }
 0x350   : > { %10640 = vmatprep.subr.mxu0 %v12276_v3 }
 0x421   : > { %v406_v57 = vpop.f32.mrb[4].mxu0 }
 0x422   : > { %v407_v58 = vadd.f32 %v9745_v56, %v406_v57  ;;  %v10619_v59 = vpop.f32.mrb[5].mxu0 }
 0x423   : > { %v12438_v59 = vld [vmem:[#allocation4 + $0x1d8] ss:$0 sm:$0xff] }
 0x424   : > { %v413_v60 = vsel %vm412_vm6, %v407_v58, 0.0 }
 0x425   : > { %414 = vadd.xlane.f32.xlu0 %v413_v60 }
 0x4b2   : > { %v415_v61 = vpop.xlane.xlu0 %414 }
 0x4b3   : > { %v417_v62 = vmul.f32 0.125, %v415_v61  ;;  %v12440_v61 = vld [vmem:[#allocation4 + $0x1e0] ss:$0 sm:$0xff] }
 0x4b5   : > { %v418_v63 = vsub.f32 %v407_v58, %v417_v62 }
 0x4b7   : > { %v419_v1 = vmul.f32 %v418_v63, %v418_v63 }
 0x4b9   : > { %v420_v2 = vsel %vm412_vm6, %v419_v1, 0.0 }
 0x4ba   : > { %421 = vadd.xlane.f32.xlu1 %v420_v2 }
 0x547   : > { %v422_v6 = vpop.xlane.xlu1 %421 }
 0x548   : > { %v423_v7 = vmul.f32 0.125, %v422_v6 }
 0x54a   : > { %v424_v8 = vadd.f32 1e-05, %v423_v7 }
 0x54c   : > { %11549 = vrsqrt.f32 %v424_v8 }
 0x556   : > { %v11550_v9 = vpop.eup %11549 }
 0x557   : > { %v426_v11 = vmul.f32 %v11550_v9, %v418_v63 }
 0x559   : > { %v431_v13 = vmul.f32 %v9747_v10, %v426_v11 }
 0x55b   : > { %v436_v14 = vadd.f32 %v9748_v12, %v431_v13 }
 0x55d   : > { %v437_v15 = vmax.f32 %v436_v14, 0.0 }
 0x55f   : > { %10628 = vmatmul.mubr.msk.f32.vlgmr.msra.gmra.mrb[4].mxu1 %vm444_vm7, %v437_v15 }
 0x560   : > { %10636 = vmatpush3.msra.mxu1 %v12383_v4  ;;  %10637 = vmatprep.mubr.msk.f32.mxu1 %vm12277_vm1, %v12276_v3 }
 0x561   : > { %10645 = vmatprep.subr.mxu1 %v12276_v3 }
 0x632   : > { %v593_v19 = vpop.f32.mrb[4].mxu1 }
 0x633   : > { %v594_v20 = vadd.f32 %v12399_v18, %v593_v19  ;;  %v10629_v21 = vpop.f32.mrb[5].mxu1 }
 0x635   : > { %605 = vrot.lane.b32.xlu0 %v594_v20, %s12282_s11  ;;  %v597_v24 = vadd.f32 %v594_v20, %v515_v23 }
 0x637   : > { %v9752_v25 = vmul.f32 -1.442695, %v597_v24 }
 0x639   : > { %11551 = vpow2.f32 %v9752_v25 }
 0x643   : > { %v11552_v26 = vpop.eup %11551 }
 0x644   : > { %v601_v27 = vadd.f32 1.0, %v11552_v26 }
 0x646   : > { %11553 = vrcp.f32 %v601_v27 }
 0x650   : > { %v11554_v28 = vpop.eup %11553 }
 0x651   : > { %v615_v36 = vsub.f32 1.0, %v11554_v28 }
 0x6a7   : > { %v606_v29 = vpop.permute.xlu0 %605 }
 0x6a8   : > { %v608_v30 = vmul.f32 %v11554_v28, %v606_v29 }
 0x6aa   : > { %610 = vrot.lane.b32.xlu1 %v608_v30, %s12283_s12 }
 0x6ae   : > { %621 = vrot.lane.b32.xlu1 %v437_v15, %s12284_s13 }
 0x71c   : > { %v611_v31 = vpop.permute.xlu1 %610 }
 0x71d   : > { %v613_v32 = vadd.f32 %v611_v31, %v515_v23 }
 0x71f   : > { %11555 = vtanh.f32 %v613_v32 }
 0x720   : > { %v622_v35 = vpop.permute.xlu1 %621 }
 0x721   : > { %v624_v38 = vmul.f32 %v11554_v28, %v622_v35 }
 0x729   : > { %v11556_v34 = vpop.eup %11555 }
 0x72a   : > { %617 = vrot.lane.b32.xlu0 %v11556_v34, %s12285_s14 }
 0x79c   : > { %v618_v37 = vpop.permute.xlu0 %617 }
 0x79d   : > { %v620_v39 = vmul.f32 %v618_v37, %v615_v36 }
 0x79f   : > { %v12412_v40 = vadd.f32 %v624_v38, %v620_v39 }
 0x7a1   : > { %633 = vrot.lane.b32.xlu0 %v12412_v40, %s12285_s14 }
 0x813   : > { %v634_v41 = vpop.permute.xlu0 %633 }
 0x814   : > { %1579 = vst.msk [vmem:[%s12417_s15] sm:$0xf] %vm412_vm6, %v634_v41  ;;  %10633 = vmatmul.mubr.msk.f32.vlgmr.msra.gmra.mrb[6].mxu0 %vm444_vm7, %v634_v41 }
 0x815   : > { %10641 = vmatpush3.msra.mxu0 %v12385_v5  ;;  %10642 = vmatprep.mubr.msk.f32.mxu0 %vm12277_vm1, %v12276_v3 }
 0x816   : > { %10650 = vmatprep.subr.mxu0 %v12276_v3 }
 0x818   : > { %10643 = vmatmul.mubr.msk.f32.vlgmr.msra.gmra.mrb[8].mxu0 %vm444_vm7, %v634_v41 }
 0x819   : > { %10651 = vmatpush3.msra.mxu0 %v12383_v4  ;;  %10652 = vmatprep.mubr.msk.f32.mxu0 %vm12277_vm1, %v12276_v3 }
 0x81a   : > { %10660 = vmatprep.subr.mxu0 %v12276_v3 }
 0x8e7   : > { %v703_v43 = vpop.f32.mrb[6].mxu0 }
 0x8e8   : > { %v704_v44 = vadd.f32 %v12431_v42, %v703_v43  ;;  %v10634_v45 = vpop.f32.mrb[7].mxu0 }
 0x8ea   : > { %v709_v46 = vsel %vm412_vm6, %v704_v44, 0.0 }
 0x8eb   : > { %710 = vadd.xlane.f32.xlu1 %v709_v46  ;;  %v872_v47 = vpop.f32.mrb[8].mxu0 }
 0x8ec   : > { %v10644_v48 = vpop.f32.mrb[9].mxu0  ;;  %v873_v54 = vadd.f32 %v12399_v18, %v872_v47 }
 0x978   : > { %v711_v49 = vpop.xlane.xlu1 %710 }
 0x979   : > { %v712_v50 = vmul.f32 0.125, %v711_v49 }
 0x97b   : > { %v713_v51 = vsub.f32 %v704_v44, %v712_v50 }
 0x97d   : > { %v714_v52 = vmul.f32 %v713_v51, %v713_v51 }
 0x97f   : > { %v715_v53 = vsel %vm412_vm6, %v714_v52, 0.0 }
 0x980   : > { %716 = vadd.xlane.f32.xlu0 %v715_v53 }
 0x996   : > { %884 = vrot.lane.b32.xlu0 %v873_v54, %s12282_s11 }
 0xa0d   : > { %v717_v55 = vpop.xlane.xlu0 %716 }
 0xa0e   : > { %v718_v56 = vmul.f32 0.125, %v717_v55 }
 0xa10   : > { %v719_v57 = vadd.f32 1e-05, %v718_v56 }
 0xa11   : > { %v885_v13 = vpop.permute.xlu0 %884 }
 0xa12   : > { %11557 = vrsqrt.f32 %v719_v57 }
 0xa1c   : > { %v11558_v58 = vpop.eup %11557 }
 0xa1d   : > { %v721_v60 = vmul.f32 %v11558_v58, %v713_v51 }
 0xa1f   : > { %v726_v62 = vmul.f32 %v12438_v59, %v721_v60 }
 0xa21   : > { %v731_v63 = vadd.f32 %v12440_v61, %v726_v62 }
 0xa23   : > { %v732_v1 = vmax.f32 %v731_v63, 0.0 }
 0xa25   : > { %10638 = vmatmul.mubr.msk.f32.vlgmr.msra.gmra.mrb[6].mxu1 %vm444_vm7, %v732_v1 }
 0xa26   : > { %10646 = vmatpush3.msra.mxu1 %v12407_v33  ;;  %10647 = vmatprep.mubr.msk.f32.mxu1 %vm12277_vm1, %v12276_v3 }
 0xa27   : > { %10655 = vmatprep.subr.mxu1 %v12276_v3 }
 0xaf8   : > { %v802_v2 = vpop.f32.mrb[6].mxu1 }
 0xaf9   : > { %v803_v6 = vadd.f32 %v12403_v22, %v802_v2  ;;  %v10639_v7 = vpop.f32.mrb[7].mxu1 }
 0xafb   : > { %v876_v8 = vadd.f32 %v873_v54, %v803_v6 }
 0xafd   : > { %v9759_v9 = vmul.f32 -1.442695, %v876_v8 }
 0xaff   : > { %11559 = vpow2.f32 %v9759_v9 }
 0xb09   : > { %v11560_v10 = vpop.eup %11559 }
 0xb0a   : > { %v880_v11 = vadd.f32 1.0, %v11560_v10 }
 0xb0c   : > { %11561 = vrcp.f32 %v880_v11 }
 0xb16   : > { %v11562_v12 = vpop.eup %11561 }
 0xb17   : > { %v887_v14 = vmul.f32 %v11562_v12, %v885_v13  ;;  %v894_v19 = vsub.f32 1.0, %v11562_v12  ;;  %v900_v21 = vmul.f32 %v11562_v12, %v12412_v40 }
 0xb19   : > { %889 = vrot.lane.b32.xlu1 %v887_v14, %s12283_s12 }
 0xb8b   : > { %v890_v15 = vpop.permute.xlu1 %889 }
 0xb8c   : > { %v892_v16 = vadd.f32 %v890_v15, %v803_v6 }
 0xb8e   : > { %11563 = vtanh.f32 %v892_v16 }
 0xb98   : > { %v11564_v17 = vpop.eup %11563 }
 0xb99   : > { %896 = vrot.lane.b32.xlu1 %v11564_v17, %s12285_s14 }
 0xc0b   : > { %v897_v20 = vpop.permute.xlu1 %896 }
 0xc0c   : > { %v899_v23 = vmul.f32 %v897_v20, %v894_v19 }
 0xc0e   : > { %v12453_v24 = vadd.f32 %v900_v21, %v899_v23 }
 0xc10   : > { %903 = vrot.lane.b32.xlu0 %v12453_v24, %s12285_s14  ;;  %v1422_v19 = vrot.slane %v12453_v24, 4 }
 0xc82   : > { %v904_v25 = vpop.permute.xlu0 %903 }
 0xc83   : > { %9774 = vst.msk [vmem:[%s12417_s15 + $0x20] sm:$0xf] %vm412_vm6, %v904_v25  ;;  %10648 = vmatmul.mubr.msk.f32.vlgmr.msra.gmra.mrb[8].mxu1 %vm444_vm7, %v904_v25 }
 0xc84   : > { %10656 = vmatpush3.msra.mxu1 %v12385_v5  ;;  %10657 = vmatprep.mubr.msk.f32.mxu1 %vm12277_vm1, %v12276_v3 }
 0xc85   : > { %10665 = vmatprep.subr.mxu1 %v12276_v3 }
 0xc87   : > { %10658 = vmatmul.mubr.msk.f32.vlgmr.msra.gmra.mrb[10].mxu1 %vm444_vm7, %v904_v25 }
 0xc88   : > { %10666 = vmatpush3.msra.mxu1 %v12383_v4  ;;  %10667 = vmatprep.mubr.msk.f32.mxu1 %vm12277_vm1, %v12276_v3 }
 0xd56   : > { %v973_v26 = vpop.f32.mrb[8].mxu1 }
 0xd57   : > { %v974_v27 = vadd.f32 %v12431_v42, %v973_v26  ;;  %v10649_v28 = vpop.f32.mrb[9].mxu1 }
 0xd59   : > { %v977_v29 = vsel %vm412_vm6, %v974_v27, 0.0 }
 0xd5a   : > { %978 = vadd.xlane.f32.xlu1 %v977_v29  ;;  %v1132_v30 = vpop.f32.mrb[10].mxu1 }
 0xd5b   : > { %v10659_v31 = vpop.f32.mrb[11].mxu1  ;;  %v1133_v4 = vadd.f32 %v12399_v18, %v1132_v30 }
 0xde7   : > { %v979_v32 = vpop.xlane.xlu1 %978 }
 0xde8   : > { %v980_v34 = vmul.f32 0.125, %v979_v32 }
 0xdea   : > { %v981_v35 = vsub.f32 %v974_v27, %v980_v34 }
 0xdec   : > { %v982_v36 = vmul.f32 %v981_v35, %v981_v35 }
 0xdee   : > { %v983_v37 = vsel %vm412_vm6, %v982_v36, 0.0 }
 0xdef   : > { %984 = vadd.xlane.f32.xlu0 %v983_v37 }
 0xe05   : > { %1144 = vrot.lane.b32.xlu0 %v1133_v4, %s12282_s11 }
 0xe7c   : > { %v985_v38 = vpop.xlane.xlu0 %984 }
 0xe7d   : > { %v986_v39 = vmul.f32 0.125, %v985_v38  ;;  %v1430_v38 = vld [vmem:[#allocation4 + $0x1c8] sm:$0xff] }
 0xe7e   : > { %10675 = vmatprep.subr.mxu1 %v1430_v38 }
 0xe7f   : > { %v987_v41 = vadd.f32 1e-05, %v986_v39 }
 0xe80   : > { %v1145_v56 = vpop.permute.xlu0 %1144 }
 0xe81   : > { %11565 = vrsqrt.f32 %v987_v41 }
 0xe8b   : > { %v11566_v43 = vpop.eup %11565 }
 0xe8c   : > { %v989_v44 = vmul.f32 %v11566_v43, %v981_v35 }
 0xe8e   : > { %v990_v45 = vmul.f32 %v12438_v59, %v989_v44 }
 0xe90   : > { %v991_v46 = vadd.f32 %v12440_v61, %v990_v45 }
 0xe92   : > { %v992_v47 = vmax.f32 %v991_v46, 0.0 }
 0xe94   : > { %10653 = vmatmul.mubr.msk.f32.vlgmr.msra.gmra.mrb[10].mxu0 %vm444_vm7, %v992_v47 }
 0xe95   : > { %10661 = vmatpush3.msra.mxu0 %v12407_v33  ;;  %10662 = vmatprep.mubr.msk.f32.mxu0 %vm12277_vm1, %v12276_v3 }
 0xe96   : > { %10670 = vmatprep.subr.mxu0 %v12276_v3 }
 0xf67   : > { %v1062_v48 = vpop.f32.mrb[10].mxu0 }
 0xf68   : > { %v1063_v49 = vadd.f32 %v12403_v22, %v1062_v48  ;;  %v10654_v50 = vpop.f32.mrb[11].mxu0 }
 0xf6a   : > { %v1136_v51 = vadd.f32 %v1133_v4, %v1063_v49 }
 0xf6c   : > { %v9763_v52 = vmul.f32 -1.442695, %v1136_v51 }
 0xf6e   : > { %11567 = vpow2.f32 %v9763_v52 }
 0xf78   : > { %v11568_v53 = vpop.eup %11567 }
 0xf79   : > { %v1140_v54 = vadd.f32 1.0, %v11568_v53 }
 0xf7b   : > { %11569 = vrcp.f32 %v1140_v54 }
 0xf85   : > { %v11570_v55 = vpop.eup %11569 }
 0xf86   : > { %v1147_v57 = vmul.f32 %v11570_v55, %v1145_v56  ;;  %v1154_v62 = vsub.f32 1.0, %v11570_v55  ;;  %v1160_v1 = vmul.f32 %v11570_v55, %v12453_v24 }
 0xf88   : > { %1149 = vrot.lane.b32.xlu1 %v1147_v57, %s12283_s12 }
 0xffa   : > { %v1150_v33 = vpop.permute.xlu1 %1149 }
 0xffb   : > { %v1152_v58 = vadd.f32 %v1150_v33, %v1063_v49  ;;  %v9768_v49 = vld [vmem:[#allocation4 + $0x1b0] ss:$0 sm:$0xff] }
 0xffd   : > { %11571 = vtanh.f32 %v1152_v58 }
0x1007   : > { %v11572_v60 = vpop.eup %11571 }
0x1008   : > { %1156 = vrot.lane.b32.xlu1 %v11572_v60, %s12285_s14 }
0x107a   : > { %v1157_v63 = vpop.permute.xlu1 %1156 }
0x107b   : > { %v1159_v2 = vmul.f32 %v1157_v63, %v1154_v62 }
0x107d   : > { %v12484_v6 = vadd.f32 %v1160_v1, %v1159_v2 }
0x107f   : > { %1163 = vrot.lane.b32.xlu0 %v12484_v6, %s12285_s14 }
0x10f1   : > { %v1164_v7 = vpop.permute.xlu0 %1163 }
0x10f2   : > { %9776 = vst.msk [vmem:[%s12417_s15 + $0x40] sm:$0xf] %vm412_vm6, %v1164_v7  ;;  %10663 = vmatmul.mubr.msk.f32.vlgmr.msra.gmra.mrb[12].mxu0 %vm444_vm7, %v1164_v7 }
0x10f3   : > { %10671 = vmatpush3.msra.mxu0 %v12385_v5  ;;  %10672 = vmatprep.mubr.msk.f32.mxu0 %vm12277_vm1, %v12276_v3 }
0x10f6   : > { %10673 = vmatmul.mubr.msk.f32.vlgmr.msra.gmra.mrb[14].mxu0 %vm444_vm7, %v1164_v7 }
0x11c5   : > { %v1233_v8 = vpop.f32.mrb[12].mxu0 }
0x11c6   : > { %v1234_v9 = vadd.f32 %v12431_v42, %v1233_v8  ;;  %v10664_v10 = vpop.f32.mrb[13].mxu0  ;;  %v1428_v42 = vsel %vm1427_vm8, %v12412_v40, %v1422_v19 }
0x11c8   : > { %v1237_v11 = vsel %vm412_vm6, %v1234_v9, 0.0 }
0x11c9   : > { %1238 = vadd.xlane.f32.xlu1 %v1237_v11  ;;  %v1392_v12 = vpop.f32.mrb[14].mxu0 }
0x11ca   : > { %v10674_v13 = vpop.f32.mrb[15].mxu0  ;;  %v1393_v3 = vadd.f32 %v12399_v18, %v1392_v12 }
0x1256   : > { %v1239_v14 = vpop.xlane.xlu1 %1238 }
0x1257   : > { %v1240_v15 = vmul.f32 0.125, %v1239_v14 }
0x1259   : > { %v1241_v16 = vsub.f32 %v1234_v9, %v1240_v15  ;;  %v9771_v15 = vld [vmem:[#allocation4 + $0x1b8] ss:$0 sm:$0xff] }
0x125b   : > { %v1242_v17 = vmul.f32 %v1241_v16, %v1241_v16 }
0x125d   : > { %v1243_v5 = vsel %vm412_vm6, %v1242_v17, 0.0  ;;  %v9772_v17 = vld [vmem:[#allocation4 + $0x1c0] ss:$0 sm:$0xff] }
0x125e   : > { %1244 = vadd.xlane.f32.xlu0 %v1243_v5 }
0x1274   : > { %1404 = vrot.lane.b32.xlu0 %v1393_v3, %s12282_s11 }
0x1278   : > { %1438 = vrot.lane.b32.xlu0 %v1428_v42, %s12285_s14 }
0x12eb   : > { %v1245_v20 = vpop.xlane.xlu0 %1244 }
0x12ec   : > { %v1246_v21 = vmul.f32 0.125, %v1245_v20 }
0x12ee   : > { %v1247_v23 = vadd.f32 1e-05, %v1246_v21 }
0x12ef   : > { %v1405_v27 = vpop.permute.xlu0 %1404 }
0x12f0   : > { %11573 = vrsqrt.f32 %v1247_v23 }
0x12f3   : > { %v1439_v29 = vpop.permute.xlu0 %1438 }
0x12fa   : > { %v11574_v25 = vpop.eup %11573 }
0x12fb   : > { %v1249_v26 = vmul.f32 %v11574_v25, %v1241_v16 }
0x12fd   : > { %v1250_v28 = vmul.f32 %v12438_v59, %v1249_v26 }
0x12ff   : > { %v1251_v18 = vadd.f32 %v12440_v61, %v1250_v28 }
0x1301   : > { %v1252_v24 = vmax.f32 %v1251_v18, 0.0 }
0x1303   : > { %10668 = vmatmul.mubr.msk.f32.vlgmr.msra.gmra.mrb[12].mxu1 %vm444_vm7, %v1252_v24 }
0x1304   : > { %10677 = vmatprep.mubr.msk.f32.mxu1 %vm444_vm7, %v1439_v29  ;;  %10676 = vmatpush3.msra.mxu1 %v1430_v38  ;;  %v1630_v29 = vld [vmem:[#allocation4 + $0x208] sm:$0xff] (%p32_p8) }
0x1305   :  { %10680 = vmatprep.subr.mxu0 (%p32_p8), %v1630_v29 }
0x1306   :  { %10681 = vmatpush3.msra.mxu0 (%p32_p8), %v1630_v29 }
0x13d6   : > { %v1322_v40 = vpop.f32.mrb[12].mxu1 }
0x13d7   : > { %v1323_v30 = vadd.f32 %v12403_v22, %v1322_v40  ;;  %v10669_v31 = vpop.f32.mrb[13].mxu1 }
0x13d8   :  { %v2300_v31 = vld [vmem:[#allocation4 + $0x1a8] sm:$0xff] (%p32_p8) }
0x13d9   : > { %v1396_v32 = vadd.f32 %v1393_v3, %v1323_v30  ;;  %10738 = vmatprep.subr.mxu0 (%p32_p8), %v2300_v31 }
0x13db   : > { %v9767_v34 = vmul.f32 -1.442695, %v1396_v32 }
0x13dd   : > { %11575 = vpow2.f32 %v9767_v34 }
0x13e7   : > { %v11576_v35 = vpop.eup %11575 }
0x13e8   : > { %v1400_v36 = vadd.f32 1.0, %v11576_v35 }
0x13ea   : > { %11577 = vrcp.f32 %v1400_v36  ;;  %v2940_v36 = vld [vmem:[#allocation4 + $0xd0] sm:$0xff] (%p32_p8) }
0x13f4   : > { %v11578_v37 = vpop.eup %11577 }
0x13f5   : > { %v1407_v59 = vmul.f32 %v11578_v37, %v1405_v27  ;;  %v1414_v22 = vsub.f32 1.0, %v11578_v37  ;;  %v1420_v43 = vmul.f32 %v11578_v37, %v12484_v6  ;;  %v2941_v37 = vld [vmem:[#allocation4 + $0xd8] sm:$0xff] (%p32_p8) }
0x13f6   :  { %v11330_v0 = vpack.c.bf16 (%p32_p8), %v2941_v37, %v2940_v36 }
0x13f7   : > { %1409 = vrot.lane.b32.xlu1 %v1407_v59, %s12283_s12 }
0x1469   : > { %v1410_v61 = vpop.permute.xlu1 %1409 }
0x146a   : > { %v1412_v4 = vadd.f32 %v1410_v61, %v1323_v30 }
0x146c   : > { %11579 = vtanh.f32 %v1412_v4 }
0x1476   : > { %v11580_v39 = vpop.eup %11579 }
0x1477   : > { %1416 = vrot.lane.b32.xlu1 %v11580_v39, %s12285_s14 }
0x14e9   : > { %v1417_v41 = vpop.permute.xlu1 %1416 }
0x14ea   : > { %v1419_v44 = vmul.f32 %v1417_v41, %v1414_v22 }
0x14ec   : > { %v1421_v45 = vadd.f32 %v1420_v43, %v1419_v44 }
0x14ee   : > { %v1425_v46 = vrot.slane %v1421_v45, 4 }
0x14f0   : > { %v1429_v47 = vsel %vm1427_vm8, %v12484_v6, %v1425_v46 }
0x14f1   : > { %1440 = vrot.lane.b32.xlu1 %v1429_v47, %s12285_s14  ;;  %v2942_v47 = vld [vmem:[#allocation4 + $0xe0] sm:$0xff] (%p32_p8) }
0x1563   : > { %v1441_v48 = vpop.permute.xlu1 %1440 }
0x1564   : > { %10678 = vmatmul.mubr.msk.f32.vlgmr.msra.gmra.mrb[14].mxu1 %vm444_vm7, %v1441_v48  ;;  %v2943_v48 = vld [vmem:[#allocation4 + $0xe8] sm:$0xff] (%p32_p8) }
0x1637   : > { %v10679_v50 = vpop.f32.mrb[14].mxu1 }
0x1638   : > { %v1518_v51 = vadd.f32 %v10679_v50, %v9768_v49  ;;  %v1512_v52 = vpop.f32.mrb[15].mxu1  ;;  %v1594_v50 = vld [vmem:[#allocation2] sm:$0xff] (%p32_p8) }
0x1639   : > { %v1513_v53 = vadd.f32 %v9768_v49, %v1512_v52  ;;  %v11334_v49 = vpack.c.bf16 (%p32_p8), %v2943_v48, %v2942_v47  ;;  %v1596_v52 = vld [vmem:[#allocation2 + $0x10] sm:$0xff] (%p32_p8) }
0x163a   : > { %v1526_v54 = vsel %vm444_vm7, %v1518_v51, 0.0 }
0x163b   : > { %1527 = vadd.xlane.f32.xlu1 %v1526_v54  ;;  %v1523_v55 = vsel %vm444_vm7, %v1513_v53, 0.0 }
0x163c   : > { %1524 = vadd.xlane.f32.xlu0 %v1523_v55 }
0x164c   : > { %1589 = vrot.lane.b32.xlu1 %v1421_v45, %s12285_s14 }
0x16c8   : > { %v1528_v56 = vpop.xlane.xlu1 %1527 }
0x16c9   : > { %v1530_v57 = vmul.f32 0.125, %v1528_v56  ;;  %v1525_v33 = vpop.xlane.xlu0 %1524 }
0x16ca   : > { %v1529_v58 = vmul.f32 0.125, %v1525_v33 }
0x16cb   : > { %v1532_v60 = vsub.f32 %v1518_v51, %v1530_v57  ;;  %v1595_v51 = vld [vmem:[#allocation2 + $0x8] sm:$0xff] (%p32_p8) }
0x16cc   : > { %v1531_v62 = vsub.f32 %v1513_v53, %v1529_v58  ;;  %v1590_v63 = vpop.permute.xlu1 %1589  ;;  %v1597_v53 = vld [vmem:[#allocation2 + $0x18] sm:$0xff] (%p32_p8) }
0x16cd   : > { %9778 = vst.msk [vmem:[%s12417_s15 + $0x60] sm:$0xf] %vm412_vm6, %v1590_v63  ;;  %v1534_v6 = vmul.f32 %v1532_v60, %v1532_v60 }
0x16ce   : > { %v1533_v1 = vmul.f32 %v1531_v62, %v1531_v62 }
0x16cf   : > { %v1538_v7 = vsel %vm444_vm7, %v1534_v6, 0.0 }
0x16d0   : > { %v1535_v2 = vsel %vm444_vm7, %v1533_v1, 0.0 }
0x16d1   : > { %1536 = vadd.xlane.f32.xlu0 %v1535_v2 }
0x16d4   :  { %v1598_v40 = vld [vmem:[#allocation3] sm:$0xff] (%p32_p8)  ;;  %v1599_v30 = vld [vmem:[#allocation3 + $0x8] sm:$0xff] (%p32_p8)  ;;  %v1600_v32 = vld [vmem:[#allocation3 + $0x10] sm:$0xff] (%p32_p8) }
0x16d5   : > { %1539 = vadd.xlane.f32.xlu0 %v1538_v7  ;;  %10682 = vmatprep.mubr.msk.f32.mxu0 (%p32_p8), %vm444_vm7, %v1598_v40  ;;  %v1601_v34 = vld [vmem:[#allocation3 + $0x18] sm:$0xff] (%p32_p8)  ;;  %v1602_v35 = vld [vmem:[#allocation3 + $0x20] sm:$0xff] (%p32_p8)  ;;  %v1603_v59 = vld [vmem:[#allocation3 + $0x28] sm:$0xff] (%p32_p8) }
0x16d6   :  { %10683 = vmatmul.mubr.msk.f32.vlgmr.msra.gmra.mrb[0].mxu0 (%p32_p8), %vm444_vm7, %v1599_v30  ;;  %v1604_v61 = vld [vmem:[#allocation3 + $0x30] sm:$0xff] (%p32_p8)  ;;  %v1605_v4 = vld [vmem:[#allocation3 + $0x38] sm:$0xff] (%p32_p8)  ;;  %v1606_v38 = vld [vmem:[#allocation3 + $0x40] sm:$0xff] (%p32_p8) }
0x16d7   :  { %10739 = vmatpush3.msra.mxu0 (%p32_p8), %v2300_v31  ;;  %10685 = vmatprep.mubr.msk.f32.mxu0 (%p32_p8), %vm444_vm7, %v1600_v32  ;;  %v1607_v39 = vld [vmem:[#allocation3 + $0x48] sm:$0xff] (%p32_p8)  ;;  %v1608_v22 = vld [vmem:[#allocation3 + $0x50] sm:$0xff] (%p32_p8)  ;;  %v1609_v41 = vld [vmem:[#allocation3 + $0x58] sm:$0xff] (%p32_p8) }
0x16d8   :  { %11331 = vmatprep.subr.bf16.mxu0 (%p32_p8), %v11330_v0  ;;  %v1610_v43 = vld [vmem:[#allocation3 + $0x60] sm:$0xff] (%p32_p8)  ;;  %v1611_v44 = vld [vmem:[#allocation3 + $0x68] sm:$0xff] (%p32_p8)  ;;  %v1612_v45 = vld [vmem:[#allocation3 + $0x70] sm:$0xff] (%p32_p8) }
0x16d9   :  { %v1613_v46 = vld [vmem:[#allocation3 + $0x78] sm:$0xff] (%p32_p8) }
0x16da   :  { %10686 = vmatmul.mubr.msk.f32.gmra.mrb[2].mxu0 (%p32_p8), %vm444_vm7, %v1601_v34 }
0x16db   :  { %10688 = vmatprep.mubr.msk.f32.mxu0 (%p32_p8), %vm444_vm7, %v1602_v35 }
0x16de   :  { %10689 = vmatmul.mubr.msk.f32.gmra.mrb[4].mxu0 (%p32_p8), %vm444_vm7, %v1603_v59 }
0x16df   :  { %10691 = vmatprep.mubr.msk.f32.mxu0 (%p32_p8), %vm444_vm7, %v1604_v61 }
0x16e2   :  { %10692 = vmatmul.mubr.msk.f32.gmra.mrb[6].mxu0 (%p32_p8), %vm444_vm7, %v1605_v4 }
0x16e3   :  { %10694 = vmatprep.mubr.msk.f32.mxu0 (%p32_p8), %vm444_vm7, %v1606_v38 }
0x16e6   :  { %10695 = vmatmul.mubr.msk.f32.gmra.mrb[8].mxu0 (%p32_p8), %vm444_vm7, %v1607_v39 }
0x16e7   :  { %10697 = vmatprep.mubr.msk.f32.mxu0 (%p32_p8), %vm444_vm7, %v1608_v22 }
0x16ea   :  { %10698 = vmatmul.mubr.msk.f32.gmra.mrb[10].mxu0 (%p32_p8), %vm444_vm7, %v1609_v41 }
0x16eb   :  { %10700 = vmatprep.mubr.msk.f32.mxu0 (%p32_p8), %vm444_vm7, %v1610_v43 }
0x16ee   :  { %10701 = vmatmul.mubr.msk.f32.gmra.mrb[12].mxu0 (%p32_p8), %vm444_vm7, %v1611_v44 }
0x16ef   :  { %10703 = vmatprep.mubr.msk.f32.mxu0 (%p32_p8), %vm444_vm7, %v1612_v45 }
0x16f2   :  { %10704 = vmatmul.mubr.msk.f32.gmra.mrb[14].mxu0 (%p32_p8), %vm444_vm7, %v1613_v46 }
0x16f3   :  { %10740 = vmatprep.mubr.msk.f32.mxu0 (%p32_p8), %vm444_vm7, %v1598_v40 }
0x16f6   :  { %10741 = vmatmul.mubr.msk.f32.vlgmr.msra.gmra.mrb[16].mxu0 (%p32_p8), %vm444_vm7, %v1599_v30 }
0x16f7   :  { %11333 = vmatpush3.bf16.msra.mxu0 (%p32_p8), %v11330_v0  ;;  %10743 = vmatprep.mubr.msk.f32.mxu0 (%p32_p8), %vm444_vm7, %v1600_v32 }
0x16f8   :  { %11335 = vmatprep.subr.bf16.mxu0 (%p32_p8), %v11334_v49 }
0x16fa   :  { %10744 = vmatmul.mubr.msk.f32.gmra.mrb[18].mxu0 (%p32_p8), %vm444_vm7, %v1601_v34 }
0x16fb   :  { %10746 = vmatprep.mubr.msk.f32.mxu0 (%p32_p8), %vm444_vm7, %v1602_v35  ;;  %11337 = vmatpush3.bf16.msra.mxu0 (%p32_p8), %v11334_v49 }
0x16fe   :  { %10747 = vmatmul.mubr.msk.f32.gmra.mrb[20].mxu0 (%p32_p8), %vm444_vm7, %v1603_v59 }
0x16ff   :  { %10749 = vmatprep.mubr.msk.f32.mxu0 (%p32_p8), %vm444_vm7, %v1604_v61 }
0x1702   :  { %10750 = vmatmul.mubr.msk.f32.gmra.mrb[22].mxu0 (%p32_p8), %vm444_vm7, %v1605_v4 }
0x1703   :  { %10752 = vmatprep.mubr.msk.f32.mxu0 (%p32_p8), %vm444_vm7, %v1606_v38 }
0x1706   :  { %10753 = vmatmul.mubr.msk.f32.gmra.mrb[24].mxu0 (%p32_p8), %vm444_vm7, %v1607_v39 }
0x1707   :  { %10755 = vmatprep.mubr.msk.f32.mxu0 (%p32_p8), %vm444_vm7, %v1608_v22 }
0x170a   :  { %10756 = vmatmul.mubr.msk.f32.gmra.mrb[26].mxu0 (%p32_p8), %vm444_vm7, %v1609_v41 }
0x170b   :  { %10758 = vmatprep.mubr.msk.f32.mxu0 (%p32_p8), %vm444_vm7, %v1610_v43 }
0x170e   :  { %10759 = vmatmul.mubr.msk.f32.gmra.mrb[28].mxu0 (%p32_p8), %vm444_vm7, %v1611_v44 }
0x170f   :  { %10761 = vmatprep.mubr.msk.f32.mxu0 (%p32_p8), %vm444_vm7, %v1612_v45 }
0x1712   :  { %10762 = vmatmul.mubr.msk.f32.gmra.mrb[30].mxu0 (%p32_p8), %vm444_vm7, %v1613_v46  ;;  %v12644_v46 = vld [vmem:[#allocation4 + $0x1f0] ss:$0 sm:$0xff] (%p32_p8) }
0x1713   :  { %10798 = vmatprep.mubr.msk.f32.mxu0 (%p32_p8), %vm130_vm3, %v1594_v50 }
0x1716   :  { %10799 = vmatmul.mubr.msk.f32.vlgmr.msra.gmra.mrb[32].mxu0 (%p32_p8), %vm130_vm3, %v1595_v51 }
0x1717   :  { %10801 = vmatprep.mubr.msk.f32.mxu0 (%p32_p8), %vm130_vm3, %v1596_v52 }
0x171a   :  { %10802 = vmatmul.mubr.msk.f32.gmra.mrb[34].mxu0 (%p32_p8), %vm130_vm3, %v1597_v53 }
0x175e   : > { %v1537_v8 = vpop.xlane.xlu0 %1536 }
0x175f   : > { %v1541_v9 = vmul.f32 0.125, %v1537_v8 }
0x1761   : > { %v1543_v10 = vadd.f32 1e-05, %v1541_v9 }
0x1762   : > { %v1540_v11 = vpop.xlane.xlu0 %1539 }
0x1763   : > { %11581 = vrsqrt.f32 %v1543_v10  ;;  %v1542_v12 = vmul.f32 0.125, %v1540_v11 }
0x1765   : > { %v1544_v13 = vadd.f32 1e-05, %v1542_v12 }
0x1767   : > { %11583 = vrsqrt.f32 %v1544_v13 }
0x176d   : > { %v11582_v14 = vpop.eup %11581 }
0x176e   : > { %v1547_v16 = vmul.f32 %v11582_v14, %v1531_v62 }
0x1770   : > { %v1553_v5 = vmul.f32 %v9771_v15, %v1547_v16 }
0x1771   : > { %v11584_v3 = vpop.eup %11583 }
0x1772   : > { %v1559_v19 = vadd.f32 %v9772_v17, %v1553_v5  ;;  %v1548_v42 = vmul.f32 %v11584_v3, %v1532_v60 }
0x1774   : > { %v1561_v20 = vmax.f32 %v1559_v19, 0.0  ;;  %v1554_v21 = vmul.f32 %v9771_v15, %v1548_v42 }
0x1776   : > { %v1564_v23 = vrot.slane %v1561_v20, 4  ;;  %v1560_v25 = vadd.f32 %v9772_v17, %v1554_v21 }
0x1778   : > { %v1566_v26 = vadd.f32 %v1564_v23, %v1561_v20  ;;  %v1562_v27 = vmax.f32 %v1560_v25, 0.0  ;;  %34 = sbr.rel (!%p32_p8) target bundleno = 19 (0x13), region = 57 }
0x177a   : > { %v1567_v28 = vadd.f32 %v1566_v26, %v1562_v27  ;;  %v1569_v18 = vrot.slane %v1562_v27, 4  ;;  %v9850_v27 = vld [vmem:[#allocation4 + $0xb8] ss:$0 sm:$0xff] (%p32_p8) }
0x177c   : > { %v1571_v24 = vadd.f32 %v1569_v18, %v1567_v28 }
0x177e   : > { %v1572_v1 = vmul.f32 0.25, %v1571_v24  }
0x17a9   :  { %v12567_v54 = vpop.f32.mrb[0].mxu0 }
0x17aa   :  { %v12569_v55 = vpop.f32.mrb[1].mxu0 }
0x17ab   :  { %v12652_v51 = vadd.f32 %v12644_v46, %v12569_v55 }
0x17ad   :  { %v12571_v56 = vpop.f32.mrb[2].mxu0  ;;  %v1833_v55 = vsel %vm130_vm3, %v12652_v51, 0.0 }
0x17ae   :  { %v12573_v57 = vpop.f32.mrb[3].mxu0 }
0x17b1   :  { %v12575_v33 = vpop.f32.mrb[4].mxu0 }
0x17b2   :  { %v12577_v58 = vpop.f32.mrb[5].mxu0 }
0x17b5   :  { %v12579_v60 = vpop.f32.mrb[6].mxu0 }
0x17b6   :  { %v12581_v62 = vpop.f32.mrb[7].mxu0 }
0x17b9   :  { %v12583_v63 = vpop.f32.mrb[8].mxu0 }
0x17ba   :  { %v12585_v1 = vpop.f32.mrb[9].mxu0 }
0x17bd   :  { %v12587_v2 = vpop.f32.mrb[10].mxu0 }
0x17be   :  { %v12589_v6 = vpop.f32.mrb[11].mxu0 }
0x17c1   :  { %v12591_v7 = vpop.f32.mrb[12].mxu0 }
0x17c2   :  { %v12593_v8 = vpop.f32.mrb[13].mxu0 }
0x17c5   :  { %v12595_v9 = vpop.f32.mrb[14].mxu0 }
0x17c6   :  { %v12597_v10 = vpop.f32.mrb[15].mxu0 }
0x17c9   :  { %v12599_v11 = vpop.f32.mrb[16].mxu0 }
0x17ca   :  { %v12601_v12 = vpop.f32.mrb[17].mxu0 }
0x17cd   :  { %v12603_v13 = vpop.f32.mrb[18].mxu0 }
0x17ce   :  { %v12605_v14 = vpop.f32.mrb[19].mxu0 }
0x17d1   :  { %v12607_v15 = vpop.f32.mrb[20].mxu0 }
0x17d2   :  { %v12609_v16 = vpop.f32.mrb[21].mxu0 }
0x17d5   :  { %v12611_v17 = vpop.f32.mrb[22].mxu0 }
0x17d6   :  { %v12613_v5 = vpop.f32.mrb[23].mxu0 }
0x17d9   :  { %v12615_v3 = vpop.f32.mrb[24].mxu0 }
0x17da   :  { %v12617_v19 = vpop.f32.mrb[25].mxu0 }
0x17dd   :  { %v12619_v42 = vpop.f32.mrb[26].mxu0 }
0x17de   :  { %v12621_v20 = vpop.f32.mrb[27].mxu0 }
0x17e1   :  { %v12623_v21 = vpop.f32.mrb[28].mxu0 }
0x17e2   :  { %v12625_v23 = vpop.f32.mrb[29].mxu0 }
0x17e5   :  { %v12627_v25 = vpop.f32.mrb[30].mxu0 }
0x17e6   :  { %v12629_v26 = vpop.f32.mrb[31].mxu0 }
0x17e9   :  { %v10800_v28 = vpop.f32.mrb[32].mxu0 }
0x17ea   :  { %v3027_v18 = vpop.f32.mrb[33].mxu0  ;;  %v3033_v29 = vadd.f32 %v10800_v28, %v9850_v27 }
0x17eb   :  { %v3028_v24 = vadd.f32 %v9850_v27, %v3027_v18  ;;  %v12662_v18 = vadd.f32 %v12567_v54, %v12644_v46 }
0x17ec   :  { %v3051_v36 = vsel %vm130_vm3, %v3033_v29, 0.0 }
0x17ed   :  { %v10803_v40 = vpop.f32.mrb[34].mxu0  ;;  %v3048_v30 = vsel %vm130_vm3, %v3028_v24, 0.0 }
0x17ee   :  { %v3037_v31 = vpop.f32.mrb[35].mxu0  ;;  %3049 = vadd.xlane.f32.xlu0 %v3048_v30  ;;  %v3043_v34 = vadd.f32 %v10803_v40, %v9850_v27  ;;  %v12673_v40 = vadd.f32 %v12571_v56, %v12644_v46  ;;  %v12677_v30 = vadd.f32 %v12644_v46, %v12577_v58  ;;  %v12689_v56 = vadd.f32 %v12644_v46, %v12581_v62 }
0x17ef   :  { %v3038_v32 = vadd.f32 %v9850_v27, %v3037_v31  ;;  %v12685_v31 = vadd.f32 %v12575_v33, %v12644_v46  ;;  %v12701_v33 = vadd.f32 %v12644_v46, %v12585_v1 }
0x17f0   :  { %v3057_v37 = vsel %vm130_vm3, %v3043_v34, 0.0  ;;  %v1845_v58 = vsel %vm130_vm3, %v12677_v30, 0.0  ;;  %v1851_v62 = vsel %vm130_vm3, %v12689_v56, 0.0 }
0x17f1   :  { %v3054_v35 = vsel %vm130_vm3, %v3038_v32, 0.0  ;;  %v1857_v1 = vsel %vm130_vm3, %v12701_v33, 0.0 }
0x17f2   :  { %3055 = vadd.xlane.f32.xlu1 %v3054_v35  ;;  %3052 = vadd.xlane.f32.xlu0 %v3051_v36  ;;  %v1848_v35 = vsel %vm130_vm3, %v12685_v31, 0.0  ;;  %v12709_v36 = vadd.f32 %v12583_v63, %v12644_v46  ;;  %v12725_v63 = vadd.f32 %v12644_v46, %v12593_v8 }
0x17f4   :  { %v1869_v8 = vsel %vm130_vm3, %v12725_v63, 0.0 }
0x17f6   :  { %3058 = vadd.xlane.f32.xlu1 %v3057_v37 }
0x187b   :  { %v3050_v0 = vpop.xlane.xlu0 %3049 }
0x187c   :  { %v3060_v59 = vmul.f32 0.03125, %v3050_v0  ;;  %v12721_v0 = vadd.f32 %v12587_v2, %v12644_v46 }
0x187e   :  { %v12635_v61 = vsub.f32 %v3028_v24, %v3060_v59  ;;  %v12666_v24 = vadd.f32 %v12644_v46, %v12573_v57  ;;  %v1836_v57 = vsel %vm130_vm3, %v12662_v18, 0.0  ;;  %v1860_v59 = vsel %vm130_vm3, %v12709_v36, 0.0 }
0x187f   :  { %v3056_v4 = vpop.xlane.xlu1 %3055  ;;  %v3053_v38 = vpop.xlane.xlu0 %3052 }
0x1880   :  { %v3062_v39 = vmul.f32 0.03125, %v3056_v4  ;;  %v3061_v22 = vmul.f32 0.03125, %v3053_v38  ;;  %v3068_v41 = vmul.f32 %v12635_v61, %v12635_v61  ;;  %v1839_v54 = vsel %vm130_vm3, %v12666_v24, 0.0  ;;  %v12731_v4 = vld [vmem:[#allocation4 + $0x190] ss:$0 sm:$0xff] }
0x1881   :  { %v12735_v38 = vadd.f32 %v12731_v4, %v12617_v19  ;;  %v12739_v2 = vadd.f32 %v12731_v4, %v12625_v23  ;;  %v3122_v19 = vld [vmem:[#allocation4 + $0x248] sm:$0xff]  ;;  %v12751_v23 = vadd.f32 %v12615_v3, %v12731_v4 }
0x1882   :  { %v3072_v43 = vsel %vm130_vm3, %v3068_v41, 0.0  ;;  %v12640_v44 = vsub.f32 %v3038_v32, %v3062_v39  ;;  %v12642_v45 = vsub.f32 %v3033_v29, %v3061_v22  ;;  %v1842_v32 = vsel %vm130_vm3, %v12673_v40, 0.0  ;;  %v3120_v22 = vld [vmem:[#allocation4 + $0x238] sm:$0xff]  ;;  %v3121_v41 = vld [vmem:[#allocation4 + $0x240] sm:$0xff] }
0x1883   :  { %v3059_v47 = vpop.xlane.xlu1 %3058  ;;  %3073 = vadd.xlane.f32.xlu0 %v3072_v43  ;;  %v1866_v39 = vsel %vm130_vm3, %v12721_v0, 0.0  ;;  %v11338_v43 = vpack.c.bf16 %v3121_v41, %v3120_v22  ;;  %v2480_v3 = vsel %vm444_vm7, %v12751_v23, 0.0 }
0x1884   :  { %v3063_v48 = vmul.f32 0.03125, %v3059_v47  ;;  %v3070_v49 = vmul.f32 %v12640_v44, %v12640_v44  ;;  %v3069_v50 = vmul.f32 %v12642_v45, %v12642_v45  ;;  %v12747_v47 = vadd.f32 %v12591_v7, %v12644_v46 }
0x1885   :  { %11339 = vmatprep.subr.bf16.mxu0 %v11338_v43  ;;  %v12759_v7 = vadd.f32 %v12731_v4, %v12609_v16  ;;  %v12775_v16 = vadd.f32 %v12607_v15, %v12731_v4 }
0x1886   :  { %v3078_v52 = vsel %vm130_vm3, %v3070_v49, 0.0  ;;  %v3075_v53 = vsel %vm130_vm3, %v3069_v50, 0.0  ;;  %v12656_v27 = vsub.f32 %v3043_v34, %v3063_v48  ;;  %v12697_v34 = vadd.f32 %v12579_v60, %v12644_v46  ;;  %v3123_v48 = vld [vmem:[#allocation4 + $0x250] sm:$0xff]  ;;  %11341 = vmatpush3.bf16.msra.mxu0 %v11338_v43 }
0x1887   :  { %3079 = vadd.xlane.f32.xlu0 %v3078_v52  ;;  %3076 = vadd.xlane.f32.xlu1 %v3075_v53  ;;  %v12713_v60 = vadd.f32 %v12644_v46, %v12589_v6  ;;  %v2489_v49 = vsel %vm444_vm7, %v12739_v2, 0.0  ;;  %v2477_v50 = vsel %vm444_vm7, %v12735_v38, 0.0  ;;  %v11342_v52 = vpack.c.bf16 %v3123_v48, %v3122_v19 }
0x1888   :  { %v3071_v28 = vmul.f32 %v12656_v27, %v12656_v27  ;;  %v1854_v37 = vsel %vm130_vm3, %v12697_v34, 0.0  ;;  %v12763_v53 = vadd.f32 %v12623_v21, %v12731_v4  ;;  %v2465_v21 = vsel %vm444_vm7, %v12759_v7, 0.0 }
0x1889   :  { %v1863_v6 = vsel %vm130_vm3, %v12713_v60, 0.0  ;;  %11343 = vmatprep.subr.bf16.mxu0 %v11342_v52 }
0x188a   :  { %v3081_v29 = vsel %vm130_vm3, %v3071_v28, 0.0  ;;  %v1872_v28 = vsel %vm130_vm3, %v12747_v47, 0.0  ;;  %11345 = vmatpush3.bf16.msra.mxu0 %v11342_v52 }
0x188b   :  { %1834 = vadd.xlane.f32.xlu0 %v1833_v55  ;;  %3082 = vadd.xlane.f32.xlu1 %v3081_v29  ;;  %v12771_v55 = vadd.f32 %v12644_v46, %v12597_v10  ;;  %v2492_v29 = vsel %vm444_vm7, %v12763_v53, 0.0  ;;  %v12787_v10 = vadd.f32 %v12731_v4, %v12621_v20 }
0x188d   :  { %v1875_v15 = vsel %vm130_vm3, %v12771_v55, 0.0  ;;  %v2483_v20 = vsel %vm444_vm7, %v12787_v10, 0.0 }
0x188f   :  { %1840 = vadd.xlane.f32.xlu0 %v1839_v54  ;;  %1837 = vadd.xlane.f32.xlu1 %v1836_v57  ;;  %v12783_v54 = vadd.f32 %v12731_v4, %v12601_v12  ;;  %v2468_v57 = vsel %vm444_vm7, %v12775_v16, 0.0  ;;  %v12799_v12 = vadd.f32 %v12731_v4, %v12629_v26 }
0x1893   :  { %1846 = vadd.xlane.f32.xlu0 %v1845_v58  ;;  %1843 = vadd.xlane.f32.xlu1 %v1842_v32  ;;  %v12795_v58 = vadd.f32 %v12595_v9, %v12644_v46  ;;  %v2453_v32 = vsel %vm444_vm7, %v12783_v54, 0.0  ;;  %v12811_v9 = vadd.f32 %v12619_v42, %v12731_v4  ;;  %v2495_v46 = vsel %vm444_vm7, %v12799_v12, 0.0 }
0x1895   :  { %v1878_v26 = vsel %vm130_vm3, %v12795_v58, 0.0  ;;  %v2486_v42 = vsel %vm444_vm7, %v12811_v9, 0.0 }
0x1897   :  { %1852 = vadd.xlane.f32.xlu0 %v1851_v62  ;;  %1849 = vadd.xlane.f32.xlu1 %v1848_v35  ;;  %v12807_v62 = vadd.f32 %v12599_v11, %v12731_v4  ;;  %v12819_v35 = vadd.f32 %v12731_v4, %v12613_v5  ;;  %v12823_v11 = vadd.f32 %v12627_v25, %v12731_v4 }
0x1898   :  { %v12835_v5 = vadd.f32 %v12611_v17, %v12731_v4 }
0x1899   :  { %v2471_v25 = vsel %vm444_vm7, %v12819_v35, 0.0 }
0x189b   :  { %1858 = vadd.xlane.f32.xlu0 %v1857_v1  ;;  %1855 = vadd.xlane.f32.xlu1 %v1854_v37  ;;  %v2456_v1 = vsel %vm444_vm7, %v12807_v62, 0.0  ;;  %v12831_v37 = vadd.f32 %v12731_v4, %v12605_v14 }
0x189d   :  { %v2459_v14 = vsel %vm444_vm7, %v12831_v37, 0.0 }
0x189f   :  { %1864 = vadd.xlane.f32.xlu0 %v1863_v6  ;;  %1861 = vadd.xlane.f32.xlu1 %v1860_v59  ;;  %v2498_v6 = vsel %vm444_vm7, %v12823_v11, 0.0  ;;  %v12843_v59 = vadd.f32 %v12603_v13, %v12731_v4 }
0x18a1   :  { %v2462_v17 = vsel %vm444_vm7, %v12843_v59, 0.0 }
0x18a3   :  { %1870 = vadd.xlane.f32.xlu0 %v1869_v8  ;;  %1867 = vadd.xlane.f32.xlu1 %v1866_v39  ;;  %v2474_v8 = vsel %vm444_vm7, %v12835_v5, 0.0 }
0x18a7   :  { %2490 = vadd.xlane.f32.xlu0 %v2489_v49  ;;  %2478 = vadd.xlane.f32.xlu1 %v2477_v50 }
0x18ab   :  { %2481 = vadd.xlane.f32.xlu0 %v2480_v3  ;;  %1873 = vadd.xlane.f32.xlu1 %v1872_v28 }
0x18af   :  { %2466 = vadd.xlane.f32.xlu0 %v2465_v21  ;;  %2493 = vadd.xlane.f32.xlu1 %v2492_v29 }
0x18b3   :  { %1876 = vadd.xlane.f32.xlu0 %v1875_v15  ;;  %2469 = vadd.xlane.f32.xlu1 %v2468_v57 }
0x18b7   :  { %2484 = vadd.xlane.f32.xlu0 %v2483_v20  ;;  %2454 = vadd.xlane.f32.xlu1 %v2453_v32 }
0x18bb   :  { %1879 = vadd.xlane.f32.xlu0 %v1878_v26  ;;  %2496 = vadd.xlane.f32.xlu1 %v2495_v46 }
0x18bf   :  { %2487 = vadd.xlane.f32.xlu0 %v2486_v42  ;;  %2457 = vadd.xlane.f32.xlu1 %v2456_v1 }
0x18c3   :  { %2472 = vadd.xlane.f32.xlu0 %v2471_v25  ;;  %2499 = vadd.xlane.f32.xlu1 %v2498_v6  ;;  %v9855_v6 = vld [vmem:[#allocation4 + $0xc0] ss:$0 sm:$0xff] }
0x18c7   :  { %2460 = vadd.xlane.f32.xlu0 %v2459_v14  ;;  %2475 = vadd.xlane.f32.xlu1 %v2474_v8 }
0x18cb   :  { %2463 = vadd.xlane.f32.xlu1 %v2462_v17 }
0x1910   :  { %v3074_v39 = vpop.xlane.xlu0 %3073 }
0x1911   :  { %v3084_v22 = vmul.f32 0.03125, %v3074_v39 }
0x1913   :  { %v3088_v41 = vadd.f32 1e-05, %v3084_v22 }
0x1914   :  { %v3077_v43 = vpop.xlane.xlu1 %3076  ;;  %v3080_v19 = vpop.xlane.xlu0 %3079 }
0x1915   :  { %11585 = vrsqrt.f32 %v3088_v41  ;;  %v3085_v13 = vmul.f32 0.03125, %v3077_v43  ;;  %v3086_v4 = vmul.f32 0.03125, %v3080_v19  ;;  %v9856_v43 = vld [vmem:[#allocation4 + $0xc8] ss:$0 sm:$0xff] }
0x1917   :  { %v3089_v48 = vadd.f32 1e-05, %v3085_v13  ;;  %v3090_v49 = vadd.f32 1e-05, %v3086_v4 }
0x1918   :  { %v3083_v50 = vpop.xlane.xlu1 %3082  ;;  %v1835_v52 = vpop.xlane.xlu0 %1834 }
0x1919   :  { %11587 = vrsqrt.f32 %v3089_v48  ;;  %v3087_v3 = vmul.f32 0.03125, %v3083_v50  ;;  %v1882_v28 = vmul.f32 0.03125, %v1835_v52 }
0x191a   :  { %11589 = vrsqrt.f32 %v3090_v49 }
0x191b   :  { %v3091_v21 = vadd.f32 1e-05, %v3087_v3  ;;  %v12852_v29 = vsub.f32 %v12652_v51, %v1882_v28 }
0x191c   :  { %v1838_v15 = vpop.xlane.xlu1 %1837  ;;  %v1841_v57 = vpop.xlane.xlu0 %1840 }
0x191d   :  { %11591 = vrsqrt.f32 %v3091_v21  ;;  %v1883_v20 = vmul.f32 0.03125, %v1838_v15  ;;  %v1884_v32 = vmul.f32 0.03125, %v1841_v57  ;;  %v1914_v26 = vmul.f32 %v12852_v29, %v12852_v29 }
0x191f   :  { %v11586_v46 = vpop.eup %11585  ;;  %v1930_v42 = vsel %vm130_vm3, %v1914_v26, 0.0  ;;  %v12858_v1 = vsub.f32 %v12662_v18, %v1883_v20  ;;  %v12861_v25 = vsub.f32 %v12666_v24, %v1884_v32 }
0x1920   :  { %v1844_v51 = vpop.xlane.xlu1 %1843  ;;  %1931 = vadd.xlane.f32.xlu0 %v1930_v42  ;;  %v1847_v14 = vpop.xlane.xlu0 %1846  ;;  %v3096_v8 = vmul.f32 %v11586_v46, %v12635_v61 }
0x1921   :  { %v1885_v17 = vmul.f32 0.03125, %v1844_v51  ;;  %v1886_v39 = vmul.f32 0.03125, %v1847_v14  ;;  %v1915_v22 = vmul.f32 %v12858_v1, %v12858_v1  ;;  %v1916_v41 = vmul.f32 %v12861_v25, %v12861_v25 }
0x1922   :  { %v3104_v18 = vmul.f32 %v9855_v6, %v3096_v8 }
0x1923   :  { %v11588_v19 = vpop.eup %11587  ;;  %v1933_v24 = vsel %vm130_vm3, %v1915_v22, 0.0  ;;  %v1936_v13 = vsel %vm130_vm3, %v1916_v41, 0.0  ;;  %v12871_v4 = vsub.f32 %v12673_v40, %v1885_v17  ;;  %v12874_v61 = vsub.f32 %v12677_v30, %v1886_v39 }
0x1924   :  { %v11590_v48 = vpop.eup %11589  ;;  %v3097_v49 = vmul.f32 %v11588_v19, %v12642_v45  ;;  %1934 = vadd.xlane.f32.xlu1 %v1933_v24  ;;  %v1850_v50 = vpop.xlane.xlu1 %1849  ;;  %1937 = vadd.xlane.f32.xlu0 %v1936_v13  ;;  %v12877_v3 = vadd.f32 %v9856_v43, %v3104_v18 }
0x1925   :  { %v1853_v52 = vpop.xlane.xlu0 %1852  ;;  %v1887_v28 = vmul.f32 0.03125, %v1850_v50  ;;  %v1917_v15 = vmul.f32 %v12871_v4, %v12871_v4  ;;  %v1918_v40 = vmul.f32 %v12874_v61, %v12874_v61  ;;  %v3098_v20 = vmul.f32 %v11590_v48, %v12640_v44 }
0x1926   :  { %v1888_v21 = vmul.f32 0.03125, %v1853_v52  ;;  %v3116_v30 = vmax.f32 %v12877_v3, 0.0  ;;  %v3105_v57 = vmul.f32 %v9855_v6, %v3097_v49 }
0x1927   :  { %v11592_v45 = vpop.eup %11591  ;;  %v1939_v32 = vsel %vm130_vm3, %v1917_v15, 0.0  ;;  %v1942_v26 = vsel %vm130_vm3, %v1918_v40, 0.0  ;;  %v12888_v46 = vsub.f32 %v12685_v31, %v1887_v28  ;;  %v3106_v44 = vmul.f32 %v9855_v6, %v3098_v20 }
0x1928   :  { %v12891_v42 = vsub.f32 %v12689_v56, %v1888_v21  ;;  %1940 = vadd.xlane.f32.xlu1 %v1939_v32  ;;  %v1856_v51 = vpop.xlane.xlu1 %1855  ;;  %10812 = vmatprep.mubr.msk.f32.mxu0 %vm130_vm3, %v3116_v30  ;;  %v12896_v8 = vadd.f32 %v9856_v43, %v3105_v57  ;;  %v3099_v17 = vmul.f32 %v11592_v45, %v12656_v27 }
0x1929   :  { %v1859_v14 = vpop.xlane.xlu0 %1858  ;;  %v1889_v39 = vmul.f32 0.03125, %v1856_v51  ;;  %1943 = vadd.xlane.f32.xlu0 %v1942_v26  ;;  %v1919_v31 = vmul.f32 %v12888_v46, %v12888_v46  ;;  %v12904_v18 = vadd.f32 %v9856_v43, %v3106_v44 }
0x192a   :  { %v1890_v22 = vmul.f32 0.03125, %v1859_v14  ;;  %v1920_v56 = vmul.f32 %v12891_v42, %v12891_v42  ;;  %v3117_v41 = vmax.f32 %v12896_v8, 0.0  ;;  %v3107_v19 = vmul.f32 %v9855_v6, %v3099_v17 }
0x192b   :  { %v1945_v24 = vsel %vm130_vm3, %v1919_v31, 0.0  ;;  %v12909_v27 = vsub.f32 %v12697_v34, %v1889_v39  ;;  %v3118_v52 = vmax.f32 %v12904_v18, 0.0 }
0x192c   :  { %v1948_v13 = vsel %vm130_vm3, %v1920_v56, 0.0  ;;  %v12912_v48 = vsub.f32 %v12701_v33, %v1890_v22  ;;  %1946 = vadd.xlane.f32.xlu1 %v1945_v24  ;;  %v1862_v49 = vpop.xlane.xlu1 %1861  ;;  %10813 = vmatmul.mubr.msk.f32.vlgmr.msra.gmra.mrb[36].mxu0 %vm130_vm3, %v3117_v41  ;;  %v12918_v6 = vadd.f32 %v9856_v43, %v3107_v19 }
0x192d   :  { %v1865_v50 = vpop.xlane.xlu0 %1864  ;;  %v1891_v28 = vmul.f32 0.03125, %v1862_v49  ;;  %1949 = vadd.xlane.f32.xlu0 %v1948_v13  ;;  %v1921_v34 = vmul.f32 %v12909_v27, %v12909_v27  ;;  %10815 = vmatprep.mubr.msk.f32.mxu0 %vm130_vm3, %v3118_v52 }
0x192e   :  { %v1892_v21 = vmul.f32 0.03125, %v1865_v50  ;;  %v1922_v33 = vmul.f32 %v12912_v48, %v12912_v48  ;;  %v3119_v15 = vmax.f32 %v12918_v6, 0.0 }
0x192f   :  { %v1951_v40 = vsel %vm130_vm3, %v1921_v34, 0.0  ;;  %v12931_v57 = vsub.f32 %v12709_v36, %v1891_v28 }
0x1930   :  { %v1954_v43 = vsel %vm130_vm3, %v1922_v33, 0.0  ;;  %v12934_v20 = vsub.f32 %v12713_v60, %v1892_v21  ;;  %1952 = vadd.xlane.f32.xlu1 %v1951_v40  ;;  %v1868_v45 = vpop.xlane.xlu1 %1867  ;;  %10816 = vmatmul.mubr.msk.f32.gmra.mrb[38].mxu0 %vm130_vm3, %v3119_v15 }
0x1931   :  { %v1871_v32 = vpop.xlane.xlu0 %1870  ;;  %v1893_v26 = vmul.f32 0.03125, %v1868_v45  ;;  %1955 = vadd.xlane.f32.xlu0 %v1954_v43  ;;  %v1923_v14 = vmul.f32 %v12931_v57, %v12931_v57 }
0x1932   :  { %v1894_v51 = vmul.f32 0.03125, %v1871_v32  ;;  %v1924_v36 = vmul.f32 %v12934_v20, %v12934_v20 }
0x1933   :  { %v1957_v44 = vsel %vm130_vm3, %v1923_v14, 0.0  ;;  %v12946_v17 = vsub.f32 %v12721_v0, %v1893_v26 }
0x1934   :  { %v1960_v60 = vsel %vm130_vm3, %v1924_v36, 0.0  ;;  %v12949_v39 = vsub.f32 %v12725_v63, %v1894_v51  ;;  %1958 = vadd.xlane.f32.xlu1 %v1957_v44  ;;  %v2479_v22 = vpop.xlane.xlu1 %2478 }
0x1935   :  { %v2491_v31 = vpop.xlane.xlu0 %2490  ;;  %v2510_v56 = vmul.f32 0.125, %v2479_v22  ;;  %1961 = vadd.xlane.f32.xlu0 %v1960_v60  ;;  %v1925_v24 = vmul.f32 %v12946_v17, %v12946_v17 }
0x1936   :  { %v2514_v19 = vmul.f32 0.125, %v2491_v31  ;;  %v1926_v13 = vmul.f32 %v12949_v39, %v12949_v39 }
0x1937   :  { %v1963_v49 = vsel %vm130_vm3, %v1925_v24, 0.0  ;;  %v12958_v50 = vsub.f32 %v12735_v38, %v2510_v56  ;;  %v2098_v24 = vld [vmem:[#allocation4 + $0x330] sm:$0xff] }
0x1938   :  { %v1966_v0 = vsel %vm130_vm3, %v1926_v13, 0.0  ;;  %v12961_v63 = vsub.f32 %v12739_v2, %v2514_v19  ;;  %1964 = vadd.xlane.f32.xlu1 %v1963_v49  ;;  %v1874_v28 = vpop.xlane.xlu1 %1873  ;;  %v2099_v13 = vld [vmem:[#allocation4 + $0x338] sm:$0xff] }
0x1939   :  { %v2482_v21 = vpop.xlane.xlu0 %2481  ;;  %v1895_v34 = vmul.f32 0.03125, %v1874_v28  ;;  %1967 = vadd.xlane.f32.xlu0 %v1966_v0  ;;  %v2542_v40 = vmul.f32 %v12958_v50, %v12958_v50 }
0x193a   :  { %v2511_v33 = vmul.f32 0.125, %v2482_v21  ;;  %v2546_v43 = vmul.f32 %v12961_v63, %v12961_v63 }
0x193b   :  { %v2574_v45 = vsel %vm444_vm7, %v2542_v40, 0.0  ;;  %v12970_v32 = vsub.f32 %v12747_v47, %v1895_v34  ;;  %v12991_v34 = vpack.c.bf16 %v2099_v13, %v2098_v24 }
0x193c   :  { %v2586_v38 = vsel %vm444_vm7, %v2546_v43, 0.0  ;;  %v12973_v2 = vsub.f32 %v12751_v23, %v2511_v33  ;;  %2575 = vadd.xlane.f32.xlu1 %v2574_v45  ;;  %v2494_v26 = vpop.xlane.xlu1 %2493 }
0x193d   :  { %v2467_v51 = vpop.xlane.xlu0 %2466  ;;  %v2515_v14 = vmul.f32 0.125, %v2494_v26  ;;  %2587 = vadd.xlane.f32.xlu0 %v2586_v38  ;;  %v1927_v44 = vmul.f32 %v12970_v32, %v12970_v32  ;;  %11323 = vmatprep.subr.bf16.mxu1 %v12991_v34  ;;  %v2100_v38 = vld [vmem:[#allocation4 + $0x340] sm:$0xff]  ;;  %v2101_v26 = vld [vmem:[#allocation4 + $0x348] sm:$0xff] }
0x193e   :  { %v2506_v36 = vmul.f32 0.125, %v2467_v51  ;;  %v2543_v60 = vmul.f32 %v12973_v2, %v12973_v2  ;;  %11325 = vmatpush3.bf16.msra.mxu1 %v12991_v34 }
0x193f   :  { %v1969_v22 = vsel %vm130_vm3, %v1927_v44, 0.0  ;;  %v12982_v31 = vsub.f32 %v12763_v53, %v2515_v14 }
0x1940   :  { %v2577_v47 = vsel %vm444_vm7, %v2543_v60, 0.0  ;;  %v12985_v23 = vsub.f32 %v12759_v7, %v2506_v36  ;;  %1970 = vadd.xlane.f32.xlu1 %v1969_v22  ;;  %v2470_v56 = vpop.xlane.xlu1 %2469 }
0x1941   :  { %v1877_v19 = vpop.xlane.xlu0 %1876  ;;  %v2507_v49 = vmul.f32 0.125, %v2470_v56  ;;  %2578 = vadd.xlane.f32.xlu0 %v2577_v47  ;;  %v2547_v28 = vmul.f32 %v12982_v31, %v12982_v31 }
0x1942   :  { %v1896_v0 = vmul.f32 0.03125, %v1877_v19  ;;  %v2538_v21 = vmul.f32 %v12985_v23, %v12985_v23 }
0x1943   :  { %v2589_v53 = vsel %vm444_vm7, %v2547_v28, 0.0  ;;  %v12996_v33 = vsub.f32 %v12775_v16, %v2507_v49 }
0x1944   :  { %v2562_v7 = vsel %vm444_vm7, %v2538_v21, 0.0  ;;  %v12999_v40 = vsub.f32 %v12771_v55, %v1896_v0  ;;  %2590 = vadd.xlane.f32.xlu1 %v2589_v53  ;;  %v2455_v43 = vpop.xlane.xlu1 %2454  ;;  %v13007_v55 = vpack.c.bf16 %v2101_v26, %v2100_v38 }
0x1945   :  { %v2485_v45 = vpop.xlane.xlu0 %2484  ;;  %v2502_v51 = vmul.f32 0.125, %v2455_v43  ;;  %2563 = vadd.xlane.f32.xlu0 %v2562_v7  ;;  %v2539_v36 = vmul.f32 %v12996_v33, %v12996_v33 }
0x1946   :  { %v2512_v14 = vmul.f32 0.125, %v2485_v45  ;;  %v1928_v16 = vmul.f32 %v12999_v40, %v12999_v40  ;;  %17019 = vst [vmem:[#allocation7_spill] sm:$0xff] %v13007_v55  ;;  %11327 = vmatprep.subr.bf16.mxu1 %v13007_v55 }
0x1947   :  { %v2565_v44 = vsel %vm444_vm7, %v2539_v36, 0.0  ;;  %v13012_v22 = vsub.f32 %v12783_v54, %v2502_v51  ;;  %11329 = vmatpush3.bf16.msra.mxu1 %v13007_v55 }
0x1948   :  { %v1972_v60 = vsel %vm130_vm3, %v1928_v16, 0.0  ;;  %v13015_v47 = vsub.f32 %v12787_v10, %v2512_v14  ;;  %2566 = vadd.xlane.f32.xlu1 %v2565_v44  ;;  %v2497_v56 = vpop.xlane.xlu1 %2496 }
0x1949   :  { %v1880_v19 = vpop.xlane.xlu0 %1879  ;;  %v2516_v24 = vmul.f32 0.125, %v2497_v56  ;;  %1973 = vadd.xlane.f32.xlu0 %v1972_v60  ;;  %v2534_v49 = vmul.f32 %v13012_v22, %v13012_v22 }
0x194a   :  { %v1897_v13 = vmul.f32 0.03125, %v1880_v19  ;;  %v2544_v0 = vmul.f32 %v13015_v47, %v13015_v47 }
0x194b   :  { %v2550_v54 = vsel %vm444_vm7, %v2534_v49, 0.0  ;;  %v13026_v28 = vsub.f32 %v12799_v12, %v2516_v24 }
0x194c   :  { %v2580_v10 = vsel %vm444_vm7, %v2544_v0, 0.0  ;;  %v13029_v21 = vsub.f32 %v12795_v58, %v1897_v13  ;;  %2551 = vadd.xlane.f32.xlu1 %v2550_v54  ;;  %v2458_v53 = vpop.xlane.xlu1 %2457 }
0x194d   :  { %v2488_v7 = vpop.xlane.xlu0 %2487  ;;  %v2503_v43 = vmul.f32 0.125, %v2458_v53  ;;  %2581 = vadd.xlane.f32.xlu0 %v2580_v10  ;;  %v2548_v38 = vmul.f32 %v13026_v28, %v13026_v28 }
0x194e   :  { %v2513_v45 = vmul.f32 0.125, %v2488_v7  ;;  %v1929_v26 = vmul.f32 %v13029_v21, %v13029_v21 }
0x194f   :  { %v2592_v51 = vsel %vm444_vm7, %v2548_v38, 0.0  ;;  %v13038_v14 = vsub.f32 %v12807_v62, %v2503_v43 }
0x1950   :  { %v1975_v12 = vsel %vm130_vm3, %v1929_v26, 0.0  ;;  %v13041_v58 = vsub.f32 %v12811_v9, %v2513_v45  ;;  %2593 = vadd.xlane.f32.xlu1 %v2592_v51  ;;  %v2500_v36 = vpop.xlane.xlu1 %2499 }
0x1951   :  { %v2473_v16 = vpop.xlane.xlu0 %2472  ;;  %v2517_v44 = vmul.f32 0.125, %v2500_v36  ;;  %1976 = vadd.xlane.f32.xlu0 %v1975_v12  ;;  %v2535_v56 = vmul.f32 %v13038_v14, %v13038_v14 }
0x1952   :  { %v2508_v60 = vmul.f32 0.125, %v2473_v16  ;;  %v2545_v19 = vmul.f32 %v13041_v58, %v13041_v58 }
0x1953   :  { %v2553_v24 = vsel %vm444_vm7, %v2535_v56, 0.0  ;;  %v13050_v13 = vsub.f32 %v12823_v11, %v2517_v44  ;;  %v3231_v56 = vld [vmem:[#allocation4 + $0x268] sm:$0xff] }
0x1954   :  { %v2583_v62 = vsel %vm444_vm7, %v2545_v19, 0.0  ;;  %v13053_v9 = vsub.f32 %v12819_v35, %v2508_v60  ;;  %2554 = vadd.xlane.f32.xlu1 %v2553_v24  ;;  %v2476_v49 = vpop.xlane.xlu1 %2475  ;;  %v3230_v60 = vld [vmem:[#allocation4 + $0x260] sm:$0xff]  ;;  %v3232_v24 = vld [vmem:[#allocation4 + $0x270] sm:$0xff] }
0x1955   :  { %v2461_v0 = vpop.xlane.xlu0 %2460  ;;  %v2509_v54 = vmul.f32 0.125, %v2476_v49  ;;  %2584 = vadd.xlane.f32.xlu0 %v2583_v62  ;;  %v2549_v53 = vmul.f32 %v13050_v13, %v13050_v13  ;;  %v11346_v19 = vpack.c.bf16 %v3231_v56, %v3230_v60  ;;  %v3233_v62 = vld [vmem:[#allocation4 + $0x278] sm:$0xff]  ;;  %v3244_v60 = vld [vmem:[#allocation4 + $0x2d0] sm:$0xff] }
0x1956   :  { %v2504_v10 = vmul.f32 0.125, %v2461_v0  ;;  %v2540_v7 = vmul.f32 %v13053_v9, %v13053_v9  ;;  %v11350_v49 = vpack.c.bf16 %v3233_v62, %v3232_v24  ;;  %v3235_v0 = vld [vmem:[#allocation4 + $0x288] sm:$0xff]  ;;  %v3245_v56 = vld [vmem:[#allocation4 + $0x2d8] sm:$0xff] }
0x1957   :  { %v2595_v43 = vsel %vm444_vm7, %v2549_v53, 0.0  ;;  %v13062_v45 = vsub.f32 %v12835_v5, %v2509_v54  ;;  %11347 = vmatprep.subr.bf16.mxu0 %v11346_v19  ;;  %v3237_v53 = vld [vmem:[#allocation4 + $0x298] sm:$0xff] }
0x1958   :  { %v2568_v11 = vsel %vm444_vm7, %v2540_v7, 0.0  ;;  %v13065_v35 = vsub.f32 %v12831_v37, %v2504_v10  ;;  %2596 = vadd.xlane.f32.xlu1 %v2595_v43  ;;  %v2464_v38 = vpop.xlane.xlu1 %2463  ;;  %11349 = vmatpush3.bf16.msra.mxu0 %v11346_v19  ;;  %v3236_v10 = vld [vmem:[#allocation4 + $0x290] sm:$0xff]  ;;  %v3238_v43 = vld [vmem:[#allocation4 + $0x2a0] sm:$0xff]  ;;  %v11374_v19 = vpack.c.bf16 %v3245_v56, %v3244_v60 }
0x1959   :  { %v2505_v26 = vmul.f32 0.125, %v2464_v38  ;;  %2569 = vadd.xlane.f32.xlu0 %v2568_v11  ;;  %v2541_v51 = vmul.f32 %v13062_v45, %v13062_v45  ;;  %11351 = vmatprep.subr.bf16.mxu0 %v11350_v49  ;;  %v11358_v7 = vpack.c.bf16 %v3237_v53, %v3236_v10  ;;  %v3239_v11 = vld [vmem:[#allocation4 + $0x2a8] sm:$0xff] }
0x195a   :  { %v2536_v12 = vmul.f32 %v13065_v35, %v13065_v35  ;;  %v11362_v38 = vpack.c.bf16 %v3239_v11, %v3238_v43 }
0x195b   :  { %v2571_v36 = vsel %vm444_vm7, %v2541_v51, 0.0  ;;  %v13074_v5 = vsub.f32 %v12843_v59, %v2505_v26  ;;  %v3234_v59 = vld [vmem:[#allocation4 + $0x280] sm:$0xff]  ;;  %v3240_v26 = vld [vmem:[#allocation4 + $0x2b0] sm:$0xff]  ;;  %v3241_v51 = vld [vmem:[#allocation4 + $0x2b8] sm:$0xff] }
0x195c   :  { %v2556_v16 = vsel %vm444_vm7, %v2536_v12, 0.0  ;;  %2572 = vadd.xlane.f32.xlu1 %v2571_v36  ;;  %11353 = vmatpush3.bf16.msra.mxu0 %v11350_v49  ;;  %v11354_v54 = vpack.c.bf16 %v3235_v0, %v3234_v59  ;;  %v13079_v12 = vld [vmem:[#allocation4 + $0x78] sm:$0xff]  ;;  %v11366_v36 = vpack.c.bf16 %v3241_v51, %v3240_v26 }
0x195d   :  { %2557 = vadd.xlane.f32.xlu0 %v2556_v16  ;;  %v2537_v37 = vmul.f32 %v13074_v5, %v13074_v5  ;;  %10764 = vmatprep.subr.mxu1 %v13079_v12  ;;  %v3242_v16 = vld [vmem:[#allocation4 + $0x2c0] sm:$0xff] }
0x195e   :  { %11355 = vmatprep.subr.bf16.mxu0 %v11354_v54 }
0x195f   :  { %v2559_v44 = vsel %vm444_vm7, %v2537_v37, 0.0  ;;  %v3243_v37 = vld [vmem:[#allocation4 + $0x2c8] sm:$0xff] }
0x1960   :  { %2560 = vadd.xlane.f32.xlu1 %v2559_v44  ;;  %11357 = vmatpush3.bf16.msra.mxu0 %v11354_v54  ;;  %v11370_v44 = vpack.c.bf16 %v3243_v37, %v3242_v16 }
0x1961   :  { %11359 = vmatprep.subr.bf16.mxu0 %v11358_v7 }
0x1964   :  { %11361 = vmatpush3.bf16.msra.mxu0 %v11358_v7 }
0x1965   :  { %11363 = vmatprep.subr.bf16.mxu0 %v11362_v38 }
0x1968   :  { %11365 = vmatpush3.bf16.msra.mxu0 %v11362_v38 }
0x1969   :  { %11367 = vmatprep.subr.bf16.mxu0 %v11366_v36 }
0x196c   :  { %11369 = vmatpush3.bf16.msra.mxu0 %v11366_v36 }
0x196d   :  { %11371 = vmatprep.subr.bf16.mxu0 %v11370_v44 }
0x1970   :  { %11373 = vmatpush3.bf16.msra.mxu0 %v11370_v44 }
0x1971   :  { %11375 = vmatprep.subr.bf16.mxu0 %v11374_v19 }
0x1974   :  { %11377 = vmatpush3.bf16.msra.mxu0 %v11374_v19 }
0x19ad   :  { %v1932_v24 = vpop.xlane.xlu0 %1931 }
0x19ae   :  { %v1978_v62 = vmul.f32 0.03125, %v1932_v24  ;;  %v13082_v24 = vld [vmem:[#allocation4 + $0x1f8] ss:$0 sm:$0xff] }
0x19b0   :  { %v1994_v49 = vadd.f32 1e-05, %v1978_v62 }
0x19b1   :  { %v1935_v59 = vpop.xlane.xlu1 %1934  ;;  %v1938_v0 = vpop.xlane.xlu0 %1937 }
0x19b2   :  { %11593 = vrsqrt.f32 %v1994_v49  ;;  %v1979_v54 = vmul.f32 0.03125, %v1935_v59  ;;  %v1980_v10 = vmul.f32 0.03125, %v1938_v0 }
0x19b4   :  { %v1995_v53 = vadd.f32 1e-05, %v1979_v54  ;;  %v1996_v7 = vadd.f32 1e-05, %v1980_v10  ;;  %v13085_v10 = vld [vmem:[#allocation4 + $0x200] ss:$0 sm:$0xff] }
0x19b5   :  { %v1941_v43 = vpop.xlane.xlu1 %1940 }
0x19b6   :  { %11595 = vrsqrt.f32 %v1995_v53  ;;  %v1981_v11 = vmul.f32 0.03125, %v1941_v43  ;;  %v1944_v38 = vpop.xlane.xlu0 %1943 }
0x19b7   :  { %11597 = vrsqrt.f32 %v1996_v7  ;;  %v1982_v26 = vmul.f32 0.03125, %v1944_v38 }
0x19b8   :  { %v1997_v51 = vadd.f32 1e-05, %v1981_v11 }
0x19b9   :  { %v1998_v36 = vadd.f32 1e-05, %v1982_v26  ;;  %v1947_v16 = vpop.xlane.xlu1 %1946 }
0x19ba   :  { %11599 = vrsqrt.f32 %v1997_v51  ;;  %v1983_v37 = vmul.f32 0.03125, %v1947_v16  ;;  %v1950_v44 = vpop.xlane.xlu0 %1949 }
0x19bb   :  { %11601 = vrsqrt.f32 %v1998_v36  ;;  %v1984_v60 = vmul.f32 0.03125, %v1950_v44 }
0x19bc   :  { %v11594_v56 = vpop.eup %11593  ;;  %v1999_v19 = vadd.f32 1e-05, %v1983_v37 }
0x19bd   :  { %v2000_v62 = vadd.f32 1e-05, %v1984_v60  ;;  %v1953_v49 = vpop.xlane.xlu1 %1952  ;;  %v2026_v59 = vmul.f32 %v11594_v56, %v12852_v29 }
0x19be   :  { %11603 = vrsqrt.f32 %v1999_v19  ;;  %v1985_v0 = vmul.f32 0.03125, %v1953_v49  ;;  %v1956_v54 = vpop.xlane.xlu0 %1955 }
0x19bf   :  { %11605 = vrsqrt.f32 %v2000_v62  ;;  %v1986_v53 = vmul.f32 0.03125, %v1956_v54  ;;  %v2046_v7 = vmul.f32 %v13082_v24, %v2026_v59 }
0x19c0   :  { %v11596_v43 = vpop.eup %11595  ;;  %v2001_v11 = vadd.f32 1e-05, %v1985_v0 }
0x19c1   :  { %v11598_v38 = vpop.eup %11597  ;;  %v2002_v26 = vadd.f32 1e-05, %v1986_v53  ;;  %v1959_v51 = vpop.xlane.xlu1 %1958  ;;  %v2066_v36 = vadd.f32 %v13085_v10, %v2046_v7  ;;  %v2027_v16 = vmul.f32 %v11596_v43, %v12858_v1 }
0x19c2   :  { %11607 = vrsqrt.f32 %v2001_v11  ;;  %v1987_v29 = vmul.f32 0.03125, %v1959_v51  ;;  %v1962_v37 = vpop.xlane.xlu0 %1961  ;;  %v2028_v44 = vmul.f32 %v11598_v38, %v12861_v25 }
0x19c3   :  { %11609 = vrsqrt.f32 %v2002_v26  ;;  %v1988_v60 = vmul.f32 0.03125, %v1962_v37  ;;  %v2082_v56 = vmax.f32 %v2066_v36, 0.0  ;;  %v2047_v19 = vmul.f32 %v13082_v24, %v2027_v16 }
0x19c4   :  { %v11600_v62 = vpop.eup %11599  ;;  %v2003_v49 = vadd.f32 1e-05, %v1987_v29  ;;  %v2048_v59 = vmul.f32 %v13082_v24, %v2028_v44 }
0x19c5   :  { %v11602_v0 = vpop.eup %11601  ;;  %v2004_v54 = vadd.f32 1e-05, %v1988_v60  ;;  %v1965_v53 = vpop.xlane.xlu1 %1964  ;;  %10714 = vmatprep.mubr.msk.f32.mxu1 %vm130_vm3, %v2082_v56  ;;  %v2067_v1 = vadd.f32 %v13085_v10, %v2047_v19  ;;  %v2029_v7 = vmul.f32 %v11600_v62, %v12871_v4 }
0x19c6   :  { %11611 = vrsqrt.f32 %v2003_v49  ;;  %v1989_v25 = vmul.f32 0.03125, %v1965_v53  ;;  %v1968_v43 = vpop.xlane.xlu0 %1967  ;;  %v2068_v11 = vadd.f32 %v13085_v10, %v2048_v59  ;;  %v2030_v38 = vmul.f32 %v11602_v0, %v12874_v61 }
0x19c7   :  { %11613 = vrsqrt.f32 %v2004_v54  ;;  %v1990_v26 = vmul.f32 0.03125, %v1968_v43  ;;  %v2083_v51 = vmax.f32 %v2067_v1, 0.0  ;;  %v2049_v36 = vmul.f32 %v13082_v24, %v2029_v7 }
0x19c8   :  { %v11604_v16 = vpop.eup %11603  ;;  %v2005_v29 = vadd.f32 1e-05, %v1989_v25  ;;  %v2084_v37 = vmax.f32 %v2068_v11, 0.0  ;;  %v2050_v44 = vmul.f32 %v13082_v24, %v2030_v38 }
0x19c9   :  { %v11606_v60 = vpop.eup %11605  ;;  %v2006_v56 = vadd.f32 1e-05, %v1990_v26  ;;  %v2576_v4 = vpop.xlane.xlu1 %2575  ;;  %10715 = vmatmul.mubr.msk.f32.vlgmr.msra.gmra.mrb[0].mxu1 %vm130_vm3, %v2083_v51  ;;  %v2069_v19 = vadd.f32 %v13085_v10, %v2049_v36  ;;  %v2031_v62 = vmul.f32 %v11604_v16, %v12888_v46 }
0x19ca   :  { %11615 = vrsqrt.f32 %v2005_v29  ;;  %v2606_v61 = vmul.f32 0.125, %v2576_v4  ;;  %v2588_v49 = vpop.xlane.xlu0 %2587  ;;  %10717 = vmatprep.mubr.msk.f32.mxu1 %vm130_vm3, %v2084_v37  ;;  %v2070_v59 = vadd.f32 %v13085_v10, %v2050_v44  ;;  %v2032_v0 = vmul.f32 %v11606_v60, %v12891_v42  ;;  %10765 = vmatpush3.msra.mxu1 %v13079_v12 }
0x19cb   :  { %11617 = vrsqrt.f32 %v2006_v56  ;;  %v2610_v54 = vmul.f32 0.125, %v2588_v49  ;;  %v2085_v53 = vmax.f32 %v2069_v19, 0.0  ;;  %v2051_v1 = vmul.f32 %v13082_v24, %v2031_v62 }
0x19cc   :  { %v11608_v7 = vpop.eup %11607  ;;  %v2622_v25 = vadd.f32 1e-05, %v2606_v61  ;;  %v2086_v43 = vmax.f32 %v2070_v59, 0.0  ;;  %v2052_v46 = vmul.f32 %v13082_v24, %v2032_v0 }
0x19cd   :  { %v11610_v11 = vpop.eup %11609  ;;  %v2626_v38 = vadd.f32 1e-05, %v2610_v54  ;;  %v1971_v26 = vpop.xlane.xlu1 %1970  ;;  %10718 = vmatmul.mubr.msk.f32.gmra.mrb[2].mxu1 %vm130_vm3, %v2085_v53  ;;  %v2071_v51 = vadd.f32 %v13085_v10, %v2051_v1  ;;  %v2033_v42 = vmul.f32 %v11608_v7, %v12909_v27 }
0x19ce   :  { %v1991_v12 = vmul.f32 0.03125, %v1971_v26  ;;  %v2579_v36 = vpop.xlane.xlu0 %2578  ;;  %10720 = vmatprep.mubr.msk.f32.mxu1 %vm130_vm3, %v2086_v43  ;;  %v2072_v16 = vadd.f32 %v13085_v10, %v2052_v46  ;;  %v2034_v29 = vmul.f32 %v11610_v11, %v12912_v48  ;;  %11619 = vrsqrt.f32 %v2622_v25 }
0x19cf   :  { %v2607_v37 = vmul.f32 0.125, %v2579_v36  ;;  %v2087_v44 = vmax.f32 %v2071_v51, 0.0  ;;  %v2053_v60 = vmul.f32 %v13082_v24, %v2033_v42  ;;  %11621 = vrsqrt.f32 %v2626_v38 }
0x19d0   :  { %v11612_v56 = vpop.eup %11611  ;;  %v2007_v4 = vadd.f32 1e-05, %v1991_v12  ;;  %v2088_v19 = vmax.f32 %v2072_v16, 0.0  ;;  %v2054_v62 = vmul.f32 %v13082_v24, %v2034_v29 }
0x19d1   :  { %v11614_v27 = vpop.eup %11613  ;;  %v2623_v61 = vadd.f32 1e-05, %v2607_v37  ;;  %v2591_v49 = vpop.xlane.xlu1 %2590  ;;  %10721 = vmatmul.mubr.msk.f32.gmra.mrb[4].mxu1 %vm130_vm3, %v2087_v44  ;;  %v2073_v59 = vadd.f32 %v13085_v10, %v2053_v60  ;;  %v2035_v48 = vmul.f32 %v11612_v56, %v12931_v57 }
0x19d2   :  { %11623 = vrsqrt.f32 %v2007_v4  ;;  %v2611_v0 = vmul.f32 0.125, %v2591_v49  ;;  %v2564_v54 = vpop.xlane.xlu0 %2563  ;;  %10723 = vmatprep.mubr.msk.f32.mxu1 %vm130_vm3, %v2088_v19  ;;  %v2074_v53 = vadd.f32 %v13085_v10, %v2054_v62  ;;  %v2036_v1 = vmul.f32 %v11614_v27, %v12934_v20 }
0x19d3   :  { %v2602_v7 = vmul.f32 0.125, %v2564_v54  ;;  %v2089_v25 = vmax.f32 %v2073_v59, 0.0  ;;  %v2055_v43 = vmul.f32 %v13082_v24, %v2035_v48  ;;  %11625 = vrsqrt.f32 %v2623_v61 }
0x19d4   :  { %v11616_v46 = vpop.eup %11615  ;;  %v2627_v11 = vadd.f32 1e-05, %v2611_v0  ;;  %v2090_v38 = vmax.f32 %v2074_v53, 0.0  ;;  %v2056_v26 = vmul.f32 %v13082_v24, %v2036_v1 }
0x19d5   :  { %v11618_v51 = vpop.eup %11617  ;;  %v2618_v57 = vadd.f32 1e-05, %v2602_v7  ;;  %v2567_v42 = vpop.xlane.xlu1 %2566  ;;  %10724 = vmatmul.mubr.msk.f32.gmra.mrb[6].mxu1 %vm130_vm3, %v2089_v25  ;;  %v2075_v12 = vadd.f32 %v13085_v10, %v2055_v43  ;;  %v2037_v36 = vmul.f32 %v11616_v46, %v12946_v17 }
0x19d6   :  { %v2603_v20 = vmul.f32 0.125, %v2567_v42  ;;  %v1974_v16 = vpop.xlane.xlu0 %1973  ;;  %10726 = vmatprep.mubr.msk.f32.mxu1 %vm130_vm3, %v2090_v38  ;;  %v2076_v29 = vadd.f32 %v13085_v10, %v2056_v26  ;;  %v2038_v37 = vmul.f32 %v11618_v51, %v12949_v39 }
0x19d7   :  { %11627 = vrsqrt.f32 %v2618_v57  ;;  %v1992_v44 = vmul.f32 0.03125, %v1974_v16  ;;  %v2091_v60 = vmax.f32 %v2075_v12, 0.0  ;;  %v2057_v56 = vmul.f32 %v13082_v24, %v2037_v36 }
0x19d8   :  { %11629 = vrsqrt.f32 %v2627_v11  ;;  %v2619_v4 = vadd.f32 1e-05, %v2603_v20  ;;  %v2092_v19 = vmax.f32 %v2076_v29, 0.0  ;;  %v2058_v62 = vmul.f32 %v13082_v24, %v2038_v37  ;;  %v11620_v17 = vpop.eup %11619  ;;  %v13139_v11 = vld [vmem:[#allocation4 + $0x198] ss:$0 sm:$0xff] }
0x19d9   :  { %v2008_v27 = vadd.f32 1e-05, %v1992_v44  ;;  %v2552_v61 = vpop.xlane.xlu1 %2551  ;;  %10727 = vmatmul.mubr.msk.f32.gmra.mrb[8].mxu1 %vm130_vm3, %v2091_v60  ;;  %v2077_v49 = vadd.f32 %v13085_v10, %v2057_v56  ;;  %v11622_v59 = vpop.eup %11621  ;;  %v2654_v7 = vmul.f32 %v11620_v17, %v12958_v50  ;;  %v13146_v29 = vld [vmem:[#allocation4 + $0x1a0] ss:$0 sm:$0xff] }
0x19da   :  { %11631 = vrsqrt.f32 %v2619_v4  ;;  %v2598_v39 = vmul.f32 0.125, %v2552_v61  ;;  %v2582_v48 = vpop.xlane.xlu0 %2581  ;;  %10729 = vmatprep.mubr.msk.f32.mxu1 %vm130_vm3, %v2092_v19  ;;  %v2078_v0 = vadd.f32 %v13085_v10, %v2058_v62  ;;  %v2658_v46 = vmul.f32 %v11622_v59, %v12961_v63 }
0x19db   :  { %11633 = vrsqrt.f32 %v2008_v27  ;;  %v2608_v54 = vmul.f32 0.125, %v2582_v48  ;;  %v2093_v53 = vmax.f32 %v2077_v49, 0.0  ;;  %v2674_v63 = vmul.f32 %v13139_v11, %v2654_v7 }
0x19dc   :  { %v11624_v1 = vpop.eup %11623  ;;  %v2614_v25 = vadd.f32 1e-05, %v2598_v39  ;;  %v2094_v43 = vmax.f32 %v2078_v0, 0.0  ;;  %v2678_v60 = vmul.f32 %v13139_v11, %v2658_v46 }
0x19dd   :  { %v2624_v38 = vadd.f32 1e-05, %v2608_v54  ;;  %v2594_v26 = vpop.xlane.xlu1 %2593  ;;  %10730 = vmatmul.mubr.msk.f32.gmra.mrb[10].mxu1 %vm130_vm3, %v2093_v53  ;;  %v2039_v51 = vmul.f32 %v11624_v1, %v12970_v32  ;;  %v11626_v36 = vpop.eup %11625  ;;  %v2694_v48 = vadd.f32 %v13146_v29, %v2674_v63 }
0x19de   :  { %11635 = vrsqrt.f32 %v2614_v25  ;;  %v2612_v57 = vmul.f32 0.125, %v2594_v26  ;;  %v1977_v42 = vpop.xlane.xlu0 %1976  ;;  %10732 = vmatprep.mubr.msk.f32.mxu1 %vm130_vm3, %v2094_v43  ;;  %v2655_v49 = vmul.f32 %v11626_v36, %v12973_v2 }
0x19df   :  { %v1993_v12 = vmul.f32 0.03125, %v1977_v42  ;;  %v2059_v50 = vmul.f32 %v13082_v24, %v2039_v51  ;;  %11637 = vrsqrt.f32 %v2624_v38  ;;  %v2710_v42 = vmax.f32 %v2694_v48, 0.0 }
0x19e0   :  { %v2628_v20 = vadd.f32 1e-05, %v2612_v57 }
0x19e1   :  { %v11628_v16 = vpop.eup %11627  ;;  %v2009_v37 = vadd.f32 1e-05, %v1993_v12  ;;  %v2555_v44 = vpop.xlane.xlu1 %2554  ;;  %v2079_v32 = vadd.f32 %v13085_v10, %v2059_v50 }
0x19e2   :  { %v11630_v56 = vpop.eup %11629  ;;  %11639 = vrsqrt.f32 %v2628_v20  ;;  %v2599_v4 = vmul.f32 0.125, %v2555_v44  ;;  %v2585_v19 = vpop.xlane.xlu0 %2584  ;;  %v2650_v62 = vmul.f32 %v11628_v16, %v12985_v23  ;;  %v13157_v23 = vadd.f32 %v13146_v29, %v2678_v60 }
0x19e3   :  { %11641 = vrsqrt.f32 %v2009_v37  ;;  %v2609_v17 = vmul.f32 0.125, %v2585_v19  ;;  %v2095_v27 = vmax.f32 %v2079_v32, 0.0  ;;  %v2659_v54 = vmul.f32 %v11630_v56, %v12982_v31 }
0x19e4   :  { %v11632_v61 = vpop.eup %11631  ;;  %v2615_v59 = vadd.f32 1e-05, %v2599_v4  ;;  %v2670_v39 = vmul.f32 %v13139_v11, %v2650_v62  ;;  %v2675_v31 = vmul.f32 %v13139_v11, %v2655_v49  ;;  %v2714_v20 = vmax.f32 %v13157_v23, 0.0  ;;  %v3341_v23 = vld [vmem:[#allocation4 + $0x2f0] sm:$0xff] }
0x19e5   :  { %v11634_v0 = vpop.eup %11633  ;;  %v2625_v53 = vadd.f32 1e-05, %v2609_v17  ;;  %v2597_v1 = vpop.xlane.xlu1 %2596  ;;  %10733 = vmatmul.mubr.msk.f32.gmra.mrb[12].mxu1 %vm130_vm3, %v2095_v27  ;;  %v2651_v7 = vmul.f32 %v11632_v61, %v12996_v33  ;;  %v2679_v12 = vmul.f32 %v13139_v11, %v2659_v54 }
0x19e6   :  { %11643 = vrsqrt.f32 %v2615_v59  ;;  %v2613_v25 = vmul.f32 0.125, %v2597_v1  ;;  %v2570_v2 = vpop.xlane.xlu0 %2569  ;;  %v2040_v43 = vmul.f32 %v11634_v0, %v12999_v40  ;;  %v2690_v38 = vadd.f32 %v13146_v29, %v2670_v39 }
0x19e7   :  { %11645 = vrsqrt.f32 %v2625_v53  ;;  %v2604_v46 = vmul.f32 0.125, %v2570_v2  ;;  %v2671_v40 = vmul.f32 %v13139_v11, %v2651_v7  ;;  %v2695_v19 = vadd.f32 %v13146_v29, %v2675_v31 }
0x19e8   :  { %v11636_v26 = vpop.eup %11635  ;;  %v2629_v51 = vadd.f32 1e-05, %v2613_v25  ;;  %v2060_v57 = vmul.f32 %v13082_v24, %v2040_v43  ;;  %v2706_v56 = vmax.f32 %v2690_v38, 0.0  ;;  %v13172_v27 = vadd.f32 %v13146_v29, %v2679_v12 }
0x19e9   :  { %v2620_v50 = vadd.f32 1e-05, %v2604_v46  ;;  %v2573_v33 = vpop.xlane.xlu1 %2572  ;;  %v2646_v36 = vmul.f32 %v11636_v26, %v13012_v22  ;;  %v11638_v44 = vpop.eup %11637  ;;  %v13177_v39 = vadd.f32 %v2714_v20, %v2710_v42  ;;  %v2691_v7 = vadd.f32 %v13146_v29, %v2671_v40 }
0x19ea   :  { %11647 = vrsqrt.f32 %v2629_v51  ;;  %v2605_v63 = vmul.f32 0.125, %v2573_v33  ;;  %v2558_v16 = vpop.xlane.xlu0 %2557  ;;  %v2080_v37 = vadd.f32 %v13085_v10, %v2060_v57  ;;  %v2656_v2 = vmul.f32 %v11638_v44, %v13015_v47 }
0x19eb   :  { %11649 = vrsqrt.f32 %v2620_v50  ;;  %v2600_v32 = vmul.f32 0.125, %v2558_v16  ;;  %v2666_v60 = vmul.f32 %v13139_v11, %v2646_v36  ;;  %v13183_v1 = vadd.f32 %v13177_v39, %v2706_v56 }
0x19ec   :  { %v11640_v4 = vpop.eup %11639  ;;  %v2621_v62 = vadd.f32 1e-05, %v2605_v63  ;;  %v2096_v22 = vmax.f32 %v2080_v37, 0.0  ;;  %v2715_v38 = vmax.f32 %v13172_v27, 0.0  ;;  %v2711_v31 = vmax.f32 %v2695_v19, 0.0  ;;  %v3344_v27 = vld [vmem:[#allocation4 + $0x308] sm:$0xff] }
0x19ed   :  { %v11642_v17 = vpop.eup %11641  ;;  %v2616_v61 = vadd.f32 1e-05, %v2600_v32  ;;  %v2561_v49 = vpop.xlane.xlu1 %2560  ;;  %v2686_v59 = vadd.f32 %v13146_v29, %v2666_v60  ;;  %v2660_v48 = vmul.f32 %v11640_v4, %v13026_v28  ;;  %v2707_v50 = vmax.f32 %v2691_v7, 0.0 }
0x19ee   :  { %11651 = vrsqrt.f32 %v2621_v62  ;;  %v2601_v0 = vmul.f32 0.125, %v2561_v49  ;;  %10735 = vmatprep.mubr.msk.f32.mxu1 %vm130_vm3, %v2096_v22  ;;  %v2041_v54 = vmul.f32 %v11642_v17, %v13029_v21  ;;  %v2676_v36 = vmul.f32 %v13139_v11, %v2656_v2 }
0x19ef   :  { %11653 = vrsqrt.f32 %v2616_v61  ;;  %v2702_v53 = vmax.f32 %v2686_v59, 0.0  ;;  %v2680_v57 = vmul.f32 %v13139_v11, %v2660_v48 }
0x19f0   :  { %v11644_v25 = vpop.eup %11643  ;;  %v2617_v43 = vadd.f32 1e-05, %v2601_v0  ;;  %v2061_v46 = vmul.f32 %v13082_v24, %v2041_v54  ;;  %v2696_v4 = vadd.f32 %v13146_v29, %v2676_v36 }
0x19f1   :  { %v11646_v28 = vpop.eup %11645  ;;  %v2647_v26 = vmul.f32 %v11644_v25, %v13038_v14  ;;  %v2726_v21 = vadd.f32 %v13183_v1, %v2702_v53 }
0x19f2   :  { %11655 = vrsqrt.f32 %v2617_v43  ;;  %v2081_v51 = vadd.f32 %v13085_v10, %v2061_v46  ;;  %v2657_v47 = vmul.f32 %v11646_v28, %v13041_v58  ;;  %v13200_v10 = vadd.f32 %v2715_v38, %v2711_v31 }
0x19f3   :  { %v2667_v42 = vmul.f32 %v13139_v11, %v2647_v26  ;;  %v2730_v12 = vmul.f32 0.25, %v2726_v21  ;;  %v13205_v58 = vadd.f32 %v13146_v29, %v2680_v57  ;;  %v2712_v25 = vmax.f32 %v2696_v4, 0.0 }
0x19f4   :  { %v11648_v24 = vpop.eup %11647  ;;  %v2097_v33 = vmax.f32 %v2081_v51, 0.0  ;;  %v2723_v44 = vadd.f32 %v13200_v10, %v2707_v50 }
0x19f5   :  { %v11650_v40 = vpop.eup %11649  ;;  %v2661_v14 = vmul.f32 %v11648_v24, %v13050_v13  ;;  %v2687_v63 = vadd.f32 %v13146_v29, %v2667_v42  ;;  %v2677_v13 = vmul.f32 %v13139_v11, %v2657_v47  ;;  %v2716_v49 = vmax.f32 %v13205_v58, 0.0 }
0x19f6   :  { %10736 = vmatmul.mubr.msk.f32.gmra.mrb[14].mxu1 %vm130_vm3, %v2097_v33  ;;  %v2652_v16 = vmul.f32 %v11650_v40, %v13053_v9 }
0x19f7   :  { %10766 = vmatprep.mubr.msk.f32.mxu1 %vm444_vm7, %v2730_v12  ;;  %v2703_v37 = vmax.f32 %v2687_v63, 0.0  ;;  %v2681_v32 = vmul.f32 %v13139_v11, %v2661_v14  ;;  %v2697_v0 = vadd.f32 %v13146_v29, %v2677_v13  ;;  %v2720_v28 = vadd.f32 %v2716_v49, %v2712_v25  ;;  %v3347_v25 = vld [vmem:[#allocation4 + $0x320] sm:$0xff] }
0x19f8   :  { %v11652_v60 = vpop.eup %11651  ;;  %v2672_v56 = vmul.f32 %v13139_v11, %v2652_v16 }
0x19f9   :  { %v11654_v19 = vpop.eup %11653  ;;  %v2727_v62 = vadd.f32 %v2723_v44, %v2703_v37  ;;  %v2653_v9 = vmul.f32 %v11652_v60, %v13062_v45  ;;  %v13215_v22 = vadd.f32 %v13146_v29, %v2681_v32  ;;  %v9857_v45 = vld [vmem:[#allocation4 + $0x230] ss:$0 sm:$0xff]  ;;  %v2713_v51 = vmax.f32 %v2697_v0, 0.0  ;;  %v3340_v0 = vld [vmem:[#allocation4 + $0x2e8] sm:$0xff] }
0x19fa   :  { %v2648_v17 = vmul.f32 %v11654_v19, %v13065_v35  ;;  %v2692_v61 = vadd.f32 %v13146_v29, %v2672_v56 }
0x19fb   :  { %v2731_v59 = vmul.f32 0.25, %v2727_v62  ;;  %v2673_v48 = vmul.f32 %v13139_v11, %v2653_v9  ;;  %v2717_v43 = vmax.f32 %v13215_v22, 0.0  ;;  %v2735_v62 = vmul.f32 0.25, %v2723_v44 }
0x19fc   :  { %v11656_v54 = vpop.eup %11655  ;;  %v2668_v53 = vmul.f32 %v13139_v11, %v2648_v17  ;;  %v2708_v7 = vmax.f32 %v2692_v61, 0.0  ;;  %v2738_v17 = vmul.f32 0.25, %v13177_v39  ;;  %v2740_v61 = vmul.f32 0.25, %v2720_v28 }
0x19fd   :  { %10767 = vmatmul.mubr.msk.f32.vlgmr.msra.gmra.mrb[16].mxu1 %vm444_vm7, %v2731_v59  ;;  %v2649_v2 = vmul.f32 %v11656_v54, %v13074_v5  ;;  %v2693_v35 = vadd.f32 %v13146_v29, %v2673_v48  ;;  %v2721_v24 = vadd.f32 %v2717_v43, %v2713_v51  ;;  %v2742_v59 = vmul.f32 0.25, %v2714_v20  ;;  %v3342_v54 = vld [vmem:[#allocation4 + $0x2f8] sm:$0xff] }
0x19fe   :  { %v2688_v46 = vadd.f32 %v13146_v29, %v2668_v53  ;;  %v2724_v12 = vadd.f32 %v2720_v28, %v2708_v7  ;;  %v2743_v39 = vmul.f32 0.25, %v2715_v38  ;;  %v2744_v48 = vmul.f32 0.25, %v2716_v49  ;;  %v3343_v53 = vld [vmem:[#allocation4 + $0x300] sm:$0xff]  ;;  %v3345_v38 = vld [vmem:[#allocation4 + $0x310] sm:$0xff]  ;;  %v3346_v49 = vld [vmem:[#allocation4 + $0x318] sm:$0xff] }
0x19ff   :  { %v10814_v26 = vpop.f32.mrb[36].mxu0  ;;  %v2669_v21 = vmul.f32 %v13139_v11, %v2649_v2  ;;  %v2709_v31 = vmax.f32 %v2693_v35, 0.0  ;;  %v2741_v44 = vmul.f32 0.25, %v2721_v24  ;;  %v11378_v20 = vpack.c.bf16 %v3341_v23, %v3340_v0  ;;  %v3511_v2 = vld [vmem:[#allocation4 + $0x18] sm:$0xff]  ;;  %v3512_v35 = vld [vmem:[#allocation4 + $0x20] sm:$0xff]  ;;  %v3513_v23 = vld [vmem:[#allocation4 + $0x28] sm:$0xff] }
0x1a00   :  { %v3213_v57 = vadd.f32 %v10814_v26, %v9857_v45  ;;  %v3207_v42 = vpop.f32.mrb[37].mxu0  ;;  %v2704_v47 = vmax.f32 %v2688_v46, 0.0  ;;  %v2736_v9 = vmul.f32 0.25, %v2724_v12  ;;  %v11382_v7 = vpack.c.bf16 %v3343_v53, %v3342_v54  ;;  %v9798_v46 = vld [vmem:[#allocation4 + $0x328] ss:$0 sm:$0xff] }
0x1a01   :  { %v3208_v50 = vadd.f32 %v9857_v45, %v3207_v42  ;;  %v2689_v5 = vadd.f32 %v13146_v29, %v2669_v21  ;;  %v2725_v63 = vadd.f32 %v2721_v24, %v2709_v31  ;;  %v2734_v29 = vmul.f32 0.25, %v13183_v1  ;;  %11379 = vmatprep.subr.bf16.mxu1 %v11378_v20 }
0x1a02   :  { %v2728_v33 = vadd.f32 %v2724_v12, %v2704_v47  ;;  %v3227_v16 = vmax.f32 %v3213_v57, 0.0  ;;  %v2739_v1 = vmul.f32 0.25, %v13200_v10  ;;  %v2745_v10 = vmul.f32 0.25, %v2717_v43  ;;  %11381 = vmatpush3.bf16.msra.mxu1 %v11378_v20  ;;  %v3514_v20 = vld [vmem:[#allocation4 + $0x30] sm:$0xff] }
0x1a03   :  { %v3226_v36 = vmax.f32 %v3208_v50, 0.0  ;;  %v10817_v40 = vpop.f32.mrb[38].mxu0  ;;  %v2705_v14 = vmax.f32 %v2689_v5, 0.0  ;;  %v2737_v22 = vmul.f32 0.25, %v2725_v63  ;;  %11383 = vmatprep.subr.bf16.mxu1 %v11382_v7  ;;  %v11386_v58 = vpack.c.bf16 %v3345_v38, %v3344_v27 }
0x1a04   :  { %v3223_v37 = vadd.f32 %v10817_v40, %v9857_v45  ;;  %v3217_v13 = vpop.f32.mrb[39].mxu0  ;;  %v2732_v32 = vmul.f32 0.25, %v2728_v33  ;;  %v13255_v43 = vpack.c.bf16 %v3512_v35, %v3511_v2 }
0x1a05   :  { %v3218_v11 = vadd.f32 %v9857_v45, %v3217_v13  ;;  %10850 = vmatprep.mubr.f32.mxu0 %v3226_v36  ;;  %v2729_v60 = vadd.f32 %v2725_v63, %v2705_v14  ;;  %v11390_v45 = vpack.c.bf16 %v3347_v25, %v3346_v49  ;;  %v11398_v25 = vpack.c.bf16 %v3514_v20, %v3513_v23 }
0x1a06   :  { %10769 = vmatprep.mubr.msk.f32.mxu1 %vm444_vm7, %v2732_v32  ;;  %10851 = vmatmul.mubr.f32.vlgmr.msra.gmra.mrb[40].mxu0 %v3227_v16  ;;  %v3229_v19 = vmax.f32 %v3223_v37, 0.0 }
0x1a07   :  { %v3228_v56 = vmax.f32 %v3218_v11, 0.0  ;;  %v2733_v4 = vmul.f32 0.25, %v2729_v60  ;;  %11385 = vmatpush3.bf16.msra.mxu1 %v11382_v7 }
0x1a08   :  { %11387 = vmatprep.subr.bf16.mxu1 %v11386_v58 }
0x1a09   :  { %10770 = vmatmul.mubr.msk.f32.gmra.mrb[18].mxu1 %vm444_vm7, %v2733_v4  ;;  %10853 = vmatprep.mubr.f32.mxu0 %v3228_v56 }
0x1a0a   :  { %10772 = vmatprep.mubr.msk.f32.mxu1 %vm444_vm7, %v2734_v29  ;;  %10854 = vmatmul.mubr.f32.gmra.mrb[42].mxu0 %v3229_v19 }
0x1a0b   :  { %11389 = vmatpush3.bf16.msra.mxu1 %v11386_v58 }
0x1a0c   :  { %11391 = vmatprep.subr.bf16.mxu1 %v11390_v45 }
0x1a0d   :  { %10773 = vmatmul.mubr.msk.f32.gmra.mrb[20].mxu1 %vm444_vm7, %v2735_v62 }
0x1a0e   :  { %10775 = vmatprep.mubr.msk.f32.mxu1 %vm444_vm7, %v2736_v9 }
0x1a0f   :  { %11393 = vmatpush3.bf16.msra.mxu1 %v11390_v45 }
0x1a10   :  { %11395 = vmatprep.subr.bf16.mxu1 %v13255_v43 }
0x1a11   :  { %10776 = vmatmul.mubr.msk.f32.gmra.mrb[22].mxu1 %vm444_vm7, %v2737_v22 }
0x1a12   :  { %10778 = vmatprep.mubr.msk.f32.mxu1 %vm444_vm7, %v2738_v17 }
0x1a15   :  { %10779 = vmatmul.mubr.msk.f32.gmra.mrb[24].mxu1 %vm444_vm7, %v2739_v1 }
0x1a16   :  { %10781 = vmatprep.mubr.msk.f32.mxu1 %vm444_vm7, %v2740_v61 }
0x1a19   :  { %10782 = vmatmul.mubr.msk.f32.gmra.mrb[26].mxu1 %vm444_vm7, %v2741_v44 }
0x1a1a   :  { %10784 = vmatprep.mubr.msk.f32.mxu1 %vm444_vm7, %v2742_v59  ;;  %v9862_v59 = vld [vmem:[#allocation4 + $0x258] ss:$0 sm:$0xff] }
0x1a1d   :  { %10785 = vmatmul.mubr.msk.f32.gmra.mrb[28].mxu1 %vm444_vm7, %v2743_v39 }
0x1a1e   :  { %10787 = vmatprep.mubr.msk.f32.mxu1 %vm444_vm7, %v2744_v48 }
0x1a21   :  { %10788 = vmatmul.mubr.msk.f32.gmra.mrb[30].mxu1 %vm444_vm7, %v2745_v10 }
0x1a9c   :  { %v10716_v28 = vpop.f32.mrb[0].mxu1 }
0x1a9d   :  { %v2227_v26 = vadd.f32 %v10716_v28, %v9798_v46  ;;  %v2221_v21 = vpop.f32.mrb[1].mxu1 }
0x1a9e   :  { %v2222_v31 = vadd.f32 %v9798_v46, %v2221_v21 }
0x1a9f   :  { %9622 = vst.msk [vmem:[%s16966_s3 + $0x8] sm:$0xff] %vm9620_vm9, %v2227_v26 }
0x1aa0   :  { %9621 = vst.msk [vmem:[%s16966_s3] sm:$0xff] %vm9620_vm9, %v2222_v31  ;;  %v10719_v51 = vpop.f32.mrb[2].mxu1 }
0x1aa1   :  { %v2237_v57 = vadd.f32 %v10719_v51, %v9798_v46  ;;  %v2231_v42 = vpop.f32.mrb[3].mxu1 }
0x1aa2   :  { %v2232_v47 = vadd.f32 %v9798_v46, %v2231_v42  ;;  %v9863_v42 = vld [vmem:[#allocation4 + $0x2e0] ss:$0 sm:$0xff] }
0x1aa3   :  { %9624 = vst.msk [vmem:[%s16966_s3 + $0x18] sm:$0xff] %vm9620_vm9, %v2237_v57 }
0x1aa4   :  { %9623 = vst.msk [vmem:[%s16966_s3 + $0x10] sm:$0xff] %vm9620_vm9, %v2232_v47  ;;  %v10722_v12 = vpop.f32.mrb[4].mxu1 }
0x1aa5   :  { %v2247_v50 = vadd.f32 %v10722_v12, %v9798_v46  ;;  %v2241_v5 = vpop.f32.mrb[5].mxu1 }
0x1aa6   :  { %v2242_v24 = vadd.f32 %v9798_v46, %v2241_v5 }
0x1aa7   :  { %9626 = vst.msk [vmem:[%s16966_s3 + $0x28] sm:$0xff] %vm9620_vm9, %v2247_v50 }
0x1aa8   :  { %9625 = vst.msk [vmem:[%s16966_s3 + $0x20] sm:$0xff] %vm9620_vm9, %v2242_v24  ;;  %v10725_v33 = vpop.f32.mrb[6].mxu1 }
0x1aa9   :  { %v2257_v36 = vadd.f32 %v10725_v33, %v9798_v46  ;;  %v2251_v40 = vpop.f32.mrb[7].mxu1 }
0x1aaa   :  { %v2252_v14 = vadd.f32 %v9798_v46, %v2251_v40 }
0x1aab   :  { %9628 = vst.msk [vmem:[%s16966_s3 + $0x38] sm:$0xff] %vm9620_vm9, %v2257_v36 }
0x1aac   :  { %9627 = vst.msk [vmem:[%s16966_s3 + $0x30] sm:$0xff] %vm9620_vm9, %v2252_v14  ;;  %v10728_v63 = vpop.f32.mrb[8].mxu1  ;;  %v3600_v14 = vld [vmem:[#allocation4 + $0x38] sm:$0xff] }
0x1aad   :  { %v2267_v16 = vadd.f32 %v10728_v63, %v9798_v46  ;;  %v2261_v37 = vpop.f32.mrb[9].mxu1  ;;  %v3601_v63 = vld [vmem:[#allocation4 + $0x40] sm:$0xff] }
0x1aae   :  { %v2262_v13 = vadd.f32 %v9798_v46, %v2261_v37 }
0x1aaf   :  { %9630 = vst.msk [vmem:[%s16966_s3 + $0x48] sm:$0xff] %vm9620_vm9, %v2267_v16 }
0x1ab0   :  { %9629 = vst.msk [vmem:[%s16966_s3 + $0x40] sm:$0xff] %vm9620_vm9, %v2262_v13  ;;  %v10731_v32 = vpop.f32.mrb[10].mxu1 }
0x1ab1   :  { %v2277_v11 = vadd.f32 %v10731_v32, %v9798_v46  ;;  %v2271_v60 = vpop.f32.mrb[11].mxu1  ;;  %v11402_v32 = vpack.c.bf16 %v3601_v63, %v3600_v14  ;;  %v1623_v14 = vld [vmem:[%s16964_s1 + $0x48] sm:$0xff] }
0x1ab2   :  { %v2272_v56 = vadd.f32 %v9798_v46, %v2271_v60 }
0x1ab3   :  { %9632 = vst.msk [vmem:[%s16966_s3 + $0x58] sm:$0xff] %vm9620_vm9, %v2277_v11 }
0x1ab4   :  { %9631 = vst.msk [vmem:[%s16966_s3 + $0x50] sm:$0xff] %vm9620_vm9, %v2272_v56 }
0x1ab8   :  { %v10734_v4 = vpop.f32.mrb[12].mxu1 }
0x1ab9   :  { %v2287_v19 = vadd.f32 %v10734_v4, %v9798_v46  ;;  %v2281_v29 = vpop.f32.mrb[13].mxu1 }
0x1aba   :  { %v2282_v62 = vadd.f32 %v9798_v46, %v2281_v29 }
0x1abb   :  { %9634 = vst.msk [vmem:[%s16966_s3 + $0x68] sm:$0xff] %vm9620_vm9, %v2287_v19 }
0x1abc   :  { %9633 = vst.msk [vmem:[%s16966_s3 + $0x60] sm:$0xff] %vm9620_vm9, %v2282_v62 }
0x1ac9   :  { %v10737_v9 = vpop.f32.mrb[14].mxu1 }
0x1aca   :  { %v2297_v22 = vadd.f32 %v10737_v9, %v9798_v46  ;;  %v2291_v17 = vpop.f32.mrb[15].mxu1 }
0x1acb   :  { %v2292_v1 = vadd.f32 %v9798_v46, %v2291_v17  ;;  %v1615_v17 = vld [vmem:[%s16964_s1 + $0x8] sm:$0xff] }
0x1acc   :  { %9636 = vst.msk [vmem:[%s16966_s3 + $0x78] sm:$0xff] %vm9620_vm9, %v2297_v22 }
0x1acd   :  { %9635 = vst.msk [vmem:[%s16966_s3 + $0x70] sm:$0xff] %vm9620_vm9, %v2292_v1  ;;  %s12286_s3 = smov 112   ;;  %v1614_v1 = vld [vmem:[%s16964_s1] sm:$0xff] }
0x1ad0   :  { %v13322_v61 = vpop.f32.mrb[16].mxu1 }
0x1ad1   :  { %v13324_v44 = vpop.f32.mrb[17].mxu1 }
0x1ad9   :  { %v10852_v39 = vpop.f32.mrb[40].mxu0 }
0x1ada   :  { %v3323_v48 = vadd.f32 %v10852_v39, %v9862_v59  ;;  %v3317_v10 = vpop.f32.mrb[41].mxu0 }
0x1adb   :  { %v3318_v0 = vadd.f32 %v9862_v59, %v3317_v10 }
0x1adc   :  { %v13326_v54 = vpop.f32.mrb[18].mxu1  ;;  %v3337_v38 = vmax.f32 %v3323_v48, 0.0 }
0x1add   :  { %v3336_v53 = vmax.f32 %v3318_v0, 0.0  ;;  %v13328_v7 = vpop.f32.mrb[19].mxu1  ;;  %v10855_v27 = vpop.f32.mrb[42].mxu0  ;;  %v1616_v0 = vld [vmem:[%s16964_s1 + $0x10] sm:$0xff] }
0x1ade   :  { %v3333_v58 = vadd.f32 %v10855_v27, %v9862_v59  ;;  %v3327_v49 = vpop.f32.mrb[43].mxu0  ;;  %v1618_v27 = vld [vmem:[%s16964_s1 + $0x20] sm:$0xff] }
0x1adf   :  { %v3328_v45 = vadd.f32 %v9862_v59, %v3327_v49  ;;  %10872 = vmatprep.mubr.msk.f32.mxu1 %vm3353_vm10, %v3336_v53 }
0x1ae0   :  { %v13331_v2 = vpop.f32.mrb[20].mxu1  ;;  %10873 = vmatmul.mubr.msk.f32.vlgmr.msra.gmra.mrb[32].mxu1 %vm3353_vm10, %v3337_v38  ;;  %v3339_v28 = vmax.f32 %v3333_v58, 0.0  ;;  %v1617_v58 = vld [vmem:[%s16964_s1 + $0x18] sm:$0xff] }
0x1ae1   :  { %17020 = vst [vmem:[#allocation8_spill] sm:$0xff] %v13331_v2  ;;  %v3338_v35 = vmax.f32 %v3328_v45, 0.0  ;;  %v13334_v46 = vpop.f32.mrb[21].mxu1  ;;  %11397 = vmatpush3.bf16.msra.mxu1 %v13255_v43 }
0x1ae2   :  { %17021 = vst [vmem:[#allocation9_spill] sm:$0xff] %v13334_v46  ;;  %11399 = vmatprep.subr.bf16.mxu1 %v11398_v25 }
0x1ae3   :  { %10875 = vmatprep.mubr.msk.f32.mxu1 %vm3353_vm10, %v3338_v35 }
0x1ae4   :  { %v13338_v26 = vpop.f32.mrb[22].mxu1  ;;  %10876 = vmatmul.mubr.msk.f32.gmra.mrb[34].mxu1 %vm3353_vm10, %v3339_v28  ;;  %v1620_v28 = vld [vmem:[%s16964_s1 + $0x30] sm:$0xff] }
0x1ae5   :  { %17022 = vst [vmem:[#allocation10_spill] sm:$0xff] %v13338_v26  ;;  %v13341_v21 = vpop.f32.mrb[23].mxu1  ;;  %11401 = vmatpush3.bf16.msra.mxu1 %v11398_v25  ;;  %10886 = vmatprep.mubr.msk.f32.mxu1 %vm130_vm3, %v3116_v30  ;;  %v1619_v25 = vld [vmem:[%s16964_s1 + $0x28] sm:$0xff]  ;;  %v4609_v26 = vld [vmem:[#allocation4 + $0x60] sm:$0xff] }
0x1ae6   :  { %17023 = vst [vmem:[#allocation11_spill] sm:$0xff] %v13341_v21  ;;  %11403 = vmatprep.subr.bf16.mxu1 %v11402_v32  ;;  %v4608_v21 = vld [vmem:[#allocation4 + $0x58] sm:$0xff] }
0x1ae7   :  { %v13937_v46 = vpack.c.bf16 %v4609_v26, %v4608_v21 }
0x1ae8   :  { %v13346_v31 = vpop.f32.mrb[24].mxu1  ;;  %10887 = vmatmul.mubr.msk.f32.vlgmr.msra.gmra.mrb[36].mxu1 %vm130_vm3, %v3117_v41 }
0x1ae9   :  { %17024 = vst [vmem:[#allocation12_spill] sm:$0xff] %v13346_v31  ;;  %v13351_v43 = vpop.f32.mrb[25].mxu1  ;;  %10889 = vmatprep.mubr.msk.f32.mxu1 %vm130_vm3, %v3118_v52  ;;  %11405 = vmatpush3.bf16.msra.mxu1 %v11402_v32  ;;  %17042 = vst [vmem:[#allocation30_spill] sm:$0xff] %v13937_v46 }
0x1aea   :  { %17025 = vst [vmem:[#allocation13_spill] sm:$0xff] %v13351_v43  ;;  %11415 = vmatprep.subr.bf16.mxu1 %v13937_v46 }
0x1aec   :  { %v13356_v51 = vpop.f32.mrb[26].mxu1  ;;  %10890 = vmatmul.mubr.msk.f32.gmra.mrb[38].mxu1 %vm130_vm3, %v3119_v15 }
0x1aed   :  { %17026 = vst [vmem:[#allocation14_spill] sm:$0xff] %v13356_v51  ;;  %v13361_v3 = vpop.f32.mrb[27].mxu1 }
0x1aee   :  { %17027 = vst [vmem:[#allocation15_spill] sm:$0xff] %v13361_v3 }
0x1af0   :  { %v13363_v30 = vpop.f32.mrb[28].mxu1 }
0x1af1   :  { %17028 = vst [vmem:[#allocation16_spill] sm:$0xff] %v13363_v30  ;;  %v13365_v57 = vpop.f32.mrb[29].mxu1 }
0x1af2   :  { %17029 = vst [vmem:[#allocation17_spill] sm:$0xff] %v13365_v57 }
0x1af4   :  { %v13367_v8 = vpop.f32.mrb[30].mxu1 }
0x1af5   :  { %17030 = vst [vmem:[#allocation18_spill] sm:$0xff] %v13367_v8  ;;  %v13369_v41 = vpop.f32.mrb[31].mxu1 }
0x1af6   :  { %17031 = vst [vmem:[#allocation19_spill] sm:$0xff] %v13369_v41 }
0x1bb3   :  { %v10874_v18 = vpop.f32.mrb[32].mxu1 }
0x1bb4   :  { %v13371_v47 = vadd.f32 %v10874_v18, %v9863_v42  ;;  %v3432_v52 = vpop.f32.mrb[33].mxu1 }
0x1bb5   :  { %v13373_v12 = vadd.f32 %v9863_v42, %v3432_v52 }
0x1bb6   :  { %v3452_v6 = vmul.f32 0.5, %v13371_v47 }
0x1bb7   :  { %v3451_v15 = vmul.f32 0.5, %v13373_v12  ;;  %v10877_v50 = vpop.f32.mrb[34].mxu1 }
0x1bb8   :  { %v3457_v5 = vmul.f32 1.442695, %v3452_v6  ;;  %v13377_v24 = vadd.f32 %v10877_v50, %v9863_v42  ;;  %v3442_v33 = vpop.f32.mrb[35].mxu1 }
0x1bb9   :  { %v3455_v36 = vmul.f32 1.442695, %v3451_v15  ;;  %v13379_v40 = vadd.f32 %v9863_v42, %v3442_v33  ;;  %v1621_v15 = vld [vmem:[%s16964_s1 + $0x38] sm:$0xff] }
0x1bba   :  { %11657 = vpow2.f32 %v3457_v5  ;;  %v3454_v16 = vmul.f32 0.5, %v13377_v24  ;;  %v1622_v5 = vld [vmem:[%s16964_s1 + $0x40] sm:$0xff] }
0x1bbb   :  { %11659 = vpow2.f32 %v3455_v36  ;;  %v3453_v37 = vmul.f32 0.5, %v13379_v40  ;;  %v13383_v13 = vpop.f32.mrb[36].mxu1 }
0x1bbc   :  { %v13385_v11 = vpop.f32.mrb[37].mxu1  ;;  %v3461_v56 = vmul.f32 1.442695, %v3454_v16 }
0x1bbd   :  { %v3459_v60 = vmul.f32 1.442695, %v3453_v37  ;;  %v1624_v37 = vld [vmem:[%s16964_s1 + $0x50] sm:$0xff] }
0x1bbf   :  { %11661 = vpow2.f32 %v3459_v60  ;;  %v13387_v4 = vpop.f32.mrb[38].mxu1 }
0x1bc0   :  { %v13389_v19 = vpop.f32.mrb[39].mxu1  ;;  %11663 = vpow2.f32 %v3461_v56 }
0x1bc4   :  { %v11658_v29 = vpop.eup %11657 }
0x1bc5   :  { %v11660_v62 = vpop.eup %11659  ;;  %3469 = vrot.lane.b32.xlu1 %v11658_v29, %s12286_s3  ;;  %v1625_v29 = vld [vmem:[%s16964_s1 + $0x58] sm:$0xff] }
0x1bc6   :  { %3467 = vrot.lane.b32.xlu0 %v11660_v62, %s12286_s3 }
0x1bc9   :  { %v11662_v9 = vpop.eup %11661 }
0x1bca   :  { %3471 = vrot.lane.b32.xlu1 %v11662_v9, %s12286_s3  ;;  %v11664_v22 = vpop.eup %11663  ;;  %v1626_v9 = vld [vmem:[%s16964_s1 + $0x60] sm:$0xff] }
0x1bce   :  { %3473 = vrot.lane.b32.xlu1 %v11664_v22, %s12286_s3 }
0x1c37   :  { %v3470_v59 = vpop.permute.xlu1 %3469 }
0x1c38   :  { %v3480_v39 = vmul.f32 %v3470_v59, %v1615_v17  ;;  %v3468_v48 = vpop.permute.xlu0 %3467  ;;  %v3484_v18 = vmul.f32 %v3470_v59, %v1619_v25  ;;  %v3488_v32 = vmul.f32 %v3470_v59, %v1623_v14 }
0x1c39   :  { %v3479_v10 = vmul.f32 %v3468_v48, %v1614_v1  ;;  %v3483_v45 = vmul.f32 %v3468_v48, %v1618_v27  ;;  %v3487_v63 = vmul.f32 %v3468_v48, %v1622_v5  ;;  %v1627_v1 = vld [vmem:[%s16964_s1 + $0x68] sm:$0xff] }
0x1c3a   :  { %v3496_v20 = vadd.f32 %v3480_v39, %v13371_v47  ;;  %v3500_v36 = vadd.f32 %v3484_v18, %v13371_v47  ;;  %v3504_v17 = vadd.f32 %v3488_v32, %v13371_v47  ;;  %v3491_v39 = vmul.f32 %v3468_v48, %v1626_v9 }
0x1c3b   :  { %v3495_v23 = vadd.f32 %v3479_v10, %v13373_v12  ;;  %v3499_v50 = vadd.f32 %v3483_v45, %v13373_v12  ;;  %v3503_v62 = vadd.f32 %v3487_v63, %v13373_v12  ;;  %v13471_v45 = vld [vmem:[#allocation4] ss:$0 sm:$0xff] }
0x1c3c   :  { %v3472_v53 = vpop.permute.xlu1 %3471  ;;  %v3507_v48 = vadd.f32 %v3491_v39, %v13373_v12 }
0x1c3d   :  { %v3481_v38 = vmul.f32 %v3472_v53, %v1616_v0  ;;  %10896 = vmatprep.mubr.msk.f32.mxu1 %vm3602_vm11, %v3495_v23  ;;  %v3485_v6 = vmul.f32 %v3472_v53, %v1620_v28  ;;  %v3489_v56 = vmul.f32 %v3472_v53, %v1624_v37  ;;  %v1628_v0 = vld [vmem:[%s16964_s1 + $0x70] sm:$0xff]  ;;  %v3492_v23 = vmul.f32 %v3470_v59, %v1627_v1 }
0x1c3e   :  { %10897 = vmatmul.mubr.msk.f32.vlgmr.msra.gmra.mrb[40].mxu1 %vm3602_vm11, %v3496_v20  ;;  %v3493_v27 = vmul.f32 %v3472_v53, %v1628_v0 }
0x1c3f   :  { %v3497_v49 = vadd.f32 %v3481_v38, %v13379_v40  ;;  %v3501_v16 = vadd.f32 %v3485_v6, %v13379_v40  ;;  %v3505_v10 = vadd.f32 %v3489_v56, %v13379_v40  ;;  %v1629_v38 = vld [vmem:[%s16964_s1 + $0x78] sm:$0xff]  ;;  %11417 = vmatpush3.bf16.msra.mxu1 %v13937_v46  ;;  %s12287_s1 = smov 32  }
0x1c40   :  { %v3474_v35 = vpop.permute.xlu1 %3473  ;;  %v3509_v25 = vadd.f32 %v3493_v27, %v13379_v40 }
0x1c41   :  { %v3482_v42 = vmul.f32 %v3474_v35, %v1617_v58  ;;  %10899 = vmatprep.mubr.msk.f32.mxu1 %vm3602_vm11, %v3497_v49  ;;  %v3486_v33 = vmul.f32 %v3474_v35, %v1621_v15  ;;  %v3490_v22 = vmul.f32 %v3474_v35, %v1625_v29  ;;  %v3494_v58 = vmul.f32 %v3474_v35, %v1629_v38 }
0x1c42   :  { %v3508_v49 = vadd.f32 %v3492_v23, %v13371_v47 }
0x1c43   :  { %v3498_v52 = vadd.f32 %v3482_v42, %v13377_v24  ;;  %v3502_v60 = vadd.f32 %v3486_v33, %v13377_v24  ;;  %v3506_v20 = vadd.f32 %v3490_v22, %v13377_v24  ;;  %v3510_v59 = vadd.f32 %v3494_v58, %v13377_v24 }
0x1c45   :  { %10900 = vmatmul.mubr.msk.f32.gmra.mrb[42].mxu1 %vm3602_vm11, %v3498_v52 }
0x1c46   :  { %10902 = vmatprep.mubr.msk.f32.mxu1 %vm3602_vm11, %v3499_v50 }
0x1c49   :  { %10903 = vmatmul.mubr.msk.f32.gmra.mrb[44].mxu1 %vm3602_vm11, %v3500_v36 }
0x1c4a   :  { %10905 = vmatprep.mubr.msk.f32.mxu1 %vm3602_vm11, %v3501_v16 }
0x1c4d   :  { %10906 = vmatmul.mubr.msk.f32.gmra.mrb[46].mxu1 %vm3602_vm11, %v3502_v60 }
0x1c4e   :  { %10908 = vmatprep.mubr.msk.f32.mxu1 %vm3602_vm11, %v3503_v62 }
0x1c51   :  { %10909 = vmatmul.mubr.msk.f32.gmra.mrb[48].mxu1 %vm3602_vm11, %v3504_v17 }
0x1c52   :  { %10911 = vmatprep.mubr.msk.f32.mxu1 %vm3602_vm11, %v3505_v10 }
0x1c55   :  { %10912 = vmatmul.mubr.msk.f32.gmra.mrb[50].mxu1 %vm3602_vm11, %v3506_v20 }
0x1c56   :  { %10914 = vmatprep.mubr.msk.f32.mxu1 %vm3602_vm11, %v3507_v48 }
0x1c59   :  { %10915 = vmatmul.mubr.msk.f32.gmra.mrb[52].mxu1 %vm3602_vm11, %v3508_v49 }
0x1c5a   :  { %10917 = vmatprep.mubr.msk.f32.mxu1 %vm3602_vm11, %v3509_v25 }
0x1c5d   :  { %10918 = vmatmul.mubr.msk.f32.gmra.mrb[54].mxu1 %vm3602_vm11, %v3510_v59 }
0x1d11   :  { %v10898_v53 = vpop.f32.mrb[40].mxu1 }
0x1d12   :  { %v3797_v12 = vadd.f32 %v10898_v53, %v13383_v13  ;;  %v3717_v28 = vpop.f32.mrb[41].mxu1 }
0x1d13   :  { %v3796_v35 = vadd.f32 %v3717_v28, %v13385_v11 }
0x1d14   :  { %v13476_v47 = vadd.f32 %v13471_v45, %v3797_v12 }
0x1d15   :  { %v13479_v40 = vadd.f32 %v13471_v45, %v3796_v35 }
0x1d16   :  { %v3838_v42 = vsel %vm130_vm3, %v13476_v47, 0.0 }
0x1d17   :  { %3839 = vadd.xlane.f32.xlu1 %v3838_v42  ;;  %v3835_v24 = vsel %vm130_vm3, %v13479_v40, 0.0 }
0x1d18   :  { %3836 = vadd.xlane.f32.xlu0 %v3835_v24  ;;  %v10901_v18 = vpop.f32.mrb[42].mxu1 }
0x1d19   :  { %v3799_v52 = vadd.f32 %v10901_v18, %v13387_v4  ;;  %v3727_v6 = vpop.f32.mrb[43].mxu1 }
0x1d1a   :  { %v3798_v15 = vadd.f32 %v3727_v6, %v13389_v19 }
0x1d1b   :  { %v13488_v50 = vadd.f32 %v13471_v45, %v3799_v52 }
0x1d1c   :  { %v10904_v5 = vpop.f32.mrb[44].mxu1  ;;  %v13494_v63 = vadd.f32 %v13471_v45, %v3798_v15 }
0x1d1d   :  { %v3801_v33 = vadd.f32 %v10904_v5, %v13383_v13  ;;  %v3737_v36 = vpop.f32.mrb[45].mxu1  ;;  %v3844_v14 = vsel %vm130_vm3, %v13488_v50, 0.0 }
0x1d1e   :  { %v3800_v16 = vadd.f32 %v3737_v36, %v13385_v11  ;;  %3845 = vadd.xlane.f32.xlu0 %v3844_v14  ;;  %v3841_v29 = vsel %vm130_vm3, %v13494_v63, 0.0 }
0x1d1f   :  { %v13498_v37 = vadd.f32 %v13471_v45, %v3801_v33 }
0x1d20   :  { %v10907_v32 = vpop.f32.mrb[46].mxu1  ;;  %v13506_v9 = vadd.f32 %v13471_v45, %v3800_v16 }
0x1d21   :  { %v3803_v60 = vadd.f32 %v10907_v32, %v13387_v4  ;;  %v3747_v56 = vpop.f32.mrb[47].mxu1  ;;  %v3850_v62 = vsel %vm130_vm3, %v13498_v37, 0.0 }
0x1d22   :  { %v3802_v22 = vadd.f32 %v3747_v56, %v13389_v19  ;;  %3842 = vadd.xlane.f32.xlu0 %v3841_v29  ;;  %3851 = vadd.xlane.f32.xlu1 %v3850_v62  ;;  %v3847_v0 = vsel %vm130_vm3, %v13506_v9, 0.0 }
0x1d23   :  { %v13510_v17 = vadd.f32 %v13471_v45, %v3803_v60 }
0x1d24   :  { %v10910_v1 = vpop.f32.mrb[48].mxu1  ;;  %v13518_v20 = vadd.f32 %v13471_v45, %v3802_v22 }
0x1d25   :  { %v3805_v39 = vadd.f32 %v10910_v1, %v13383_v13  ;;  %v3757_v10 = vpop.f32.mrb[49].mxu1  ;;  %v3856_v23 = vsel %vm130_vm3, %v13510_v17, 0.0 }
0x1d26   :  { %v3804_v27 = vadd.f32 %v3757_v10, %v13385_v11  ;;  %3848 = vadd.xlane.f32.xlu0 %v3847_v0  ;;  %3857 = vadd.xlane.f32.xlu1 %v3856_v23  ;;  %v3853_v25 = vsel %vm130_vm3, %v13518_v20, 0.0 }
0x1d27   :  { %v13522_v38 = vadd.f32 %v13471_v45, %v3805_v39 }
0x1d28   :  { %v10913_v48 = vpop.f32.mrb[50].mxu1  ;;  %v13530_v53 = vadd.f32 %v13471_v45, %v3804_v27 }
0x1d29   :  { %v3807_v58 = vadd.f32 %v10913_v48, %v13387_v4  ;;  %v3767_v49 = vpop.f32.mrb[51].mxu1  ;;  %v3862_v59 = vsel %vm130_vm3, %v13522_v38, 0.0 }
0x1d2a   :  { %v3806_v12 = vadd.f32 %v3767_v49, %v13389_v19  ;;  %3854 = vadd.xlane.f32.xlu0 %v3853_v25  ;;  %3863 = vadd.xlane.f32.xlu1 %v3862_v59  ;;  %v3859_v18 = vsel %vm130_vm3, %v13530_v53, 0.0 }
0x1d2b   :  { %v13534_v28 = vadd.f32 %v13471_v45, %v3807_v58 }
0x1d2c   :  { %v10916_v35 = vpop.f32.mrb[52].mxu1  ;;  %v13542_v6 = vadd.f32 %v13471_v45, %v3806_v12 }
0x1d2d   :  { %v3809_v42 = vadd.f32 %v10916_v35, %v13383_v13  ;;  %v3777_v24 = vpop.f32.mrb[53].mxu1  ;;  %v3868_v52 = vsel %vm130_vm3, %v13534_v28, 0.0 }
0x1d2e   :  { %v3808_v15 = vadd.f32 %v3777_v24, %v13385_v11  ;;  %3860 = vadd.xlane.f32.xlu0 %v3859_v18  ;;  %3869 = vadd.xlane.f32.xlu1 %v3868_v52  ;;  %v3865_v14 = vsel %vm130_vm3, %v13542_v6, 0.0 }
0x1d2f   :  { %v13546_v5 = vadd.f32 %v13471_v45, %v3809_v42 }
0x1d30   :  { %v10919_v33 = vpop.f32.mrb[54].mxu1  ;;  %v13554_v32 = vadd.f32 %v13471_v45, %v3808_v15 }
0x1d31   :  { %v3811_v13 = vadd.f32 %v10919_v33, %v13387_v4  ;;  %v3787_v36 = vpop.f32.mrb[55].mxu1  ;;  %v3874_v16 = vsel %vm130_vm3, %v13546_v5, 0.0 }
0x1d32   :  { %v3810_v11 = vadd.f32 %v3787_v36, %v13389_v19  ;;  %3866 = vadd.xlane.f32.xlu0 %v3865_v14  ;;  %3875 = vadd.xlane.f32.xlu1 %v3874_v16  ;;  %v3871_v4 = vsel %vm130_vm3, %v13554_v32, 0.0 }
0x1d33   :  { %v13558_v60 = vadd.f32 %v13471_v45, %v3811_v13 }
0x1d34   :  { %v13565_v29 = vadd.f32 %v13471_v45, %v3810_v11 }
0x1d35   :  { %v3880_v56 = vsel %vm130_vm3, %v13558_v60, 0.0 }
0x1d36   :  { %3872 = vadd.xlane.f32.xlu0 %v3871_v4  ;;  %3881 = vadd.xlane.f32.xlu1 %v3880_v56  ;;  %v3877_v62 = vsel %vm130_vm3, %v13565_v29, 0.0 }
0x1d3a   :  { %3878 = vadd.xlane.f32.xlu0 %v3877_v62 }
0x1da4   :  { %v3840_v19 = vpop.xlane.xlu1 %3839 }
0x1da5   :  { %v3884_v22 = vmul.f32 0.03125, %v3840_v19  ;;  %v3837_v1 = vpop.xlane.xlu0 %3836 }
0x1da6   :  { %v3883_v39 = vmul.f32 0.03125, %v3837_v1 }
0x1da7   :  { %v13570_v10 = vsub.f32 %v13476_v47, %v3884_v22 }
0x1da8   :  { %v13573_v0 = vsub.f32 %v13479_v40, %v3883_v39 }
0x1da9   :  { %v3916_v45 = vmul.f32 %v13570_v10, %v13570_v10 }
0x1daa   :  { %v3915_v23 = vmul.f32 %v13573_v0, %v13573_v0 }
0x1dab   :  { %v3846_v27 = vpop.xlane.xlu0 %3845  ;;  %v3934_v48 = vsel %vm130_vm3, %v3916_v45, 0.0 }
0x1dac   :  { %v3886_v58 = vmul.f32 0.03125, %v3846_v27  ;;  %3935 = vadd.xlane.f32.xlu1 %v3934_v48  ;;  %v3931_v49 = vsel %vm130_vm3, %v3915_v23, 0.0 }
0x1dad   :  { %3932 = vadd.xlane.f32.xlu0 %v3931_v49 }
0x1dae   :  { %v13582_v47 = vsub.f32 %v13488_v50, %v3886_v58 }
0x1daf   :  { %v3843_v25 = vpop.xlane.xlu0 %3842  ;;  %v3852_v40 = vpop.xlane.xlu1 %3851 }
0x1db0   :  { %v3885_v59 = vmul.f32 0.03125, %v3843_v25  ;;  %v3888_v12 = vmul.f32 0.03125, %v3852_v40  ;;  %v3918_v35 = vmul.f32 %v13582_v47, %v13582_v47 }
0x1db2   :  { %v3940_v42 = vsel %vm130_vm3, %v3918_v35, 0.0  ;;  %v13588_v24 = vsub.f32 %v13498_v37, %v3888_v12  ;;  %v13591_v18 = vsub.f32 %v13494_v63, %v3885_v59 }
0x1db3   :  { %v3849_v52 = vpop.xlane.xlu0 %3848  ;;  %v3858_v15 = vpop.xlane.xlu1 %3857  ;;  %3941 = vadd.xlane.f32.xlu1 %v3940_v42 }
0x1db4   :  { %v3887_v50 = vmul.f32 0.03125, %v3849_v52  ;;  %v3890_v33 = vmul.f32 0.03125, %v3858_v15  ;;  %v3920_v13 = vmul.f32 %v13588_v24, %v13588_v24  ;;  %v3917_v36 = vmul.f32 %v13591_v18, %v13591_v18 }
0x1db6   :  { %v13598_v14 = vsub.f32 %v13510_v17, %v3890_v33  ;;  %v3946_v37 = vsel %vm130_vm3, %v3920_v13, 0.0  ;;  %v3937_v16 = vsel %vm130_vm3, %v3917_v36, 0.0  ;;  %v13603_v63 = vsub.f32 %v13506_v9, %v3887_v50 }
0x1db7   :  { %v3855_v11 = vpop.xlane.xlu0 %3854  ;;  %v3864_v4 = vpop.xlane.xlu1 %3863  ;;  %3947 = vadd.xlane.f32.xlu1 %v3946_v37  ;;  %3938 = vadd.xlane.f32.xlu0 %v3937_v16 }
0x1db8   :  { %v3889_v56 = vmul.f32 0.03125, %v3855_v11  ;;  %v3892_v62 = vmul.f32 0.03125, %v3864_v4  ;;  %v3922_v19 = vmul.f32 %v13598_v14, %v13598_v14  ;;  %v3919_v17 = vmul.f32 %v13603_v63, %v13603_v63 }
0x1dba   :  { %v13610_v22 = vsub.f32 %v13518_v20, %v3889_v56  ;;  %v13613_v1 = vsub.f32 %v13522_v38, %v3892_v62  ;;  %v3952_v9 = vsel %vm130_vm3, %v3922_v19, 0.0  ;;  %v3943_v39 = vsel %vm130_vm3, %v3919_v17, 0.0 }
0x1dbb   :  { %v3861_v45 = vpop.xlane.xlu0 %3860  ;;  %v3870_v23 = vpop.xlane.xlu1 %3869  ;;  %3953 = vadd.xlane.f32.xlu1 %v3952_v9  ;;  %3944 = vadd.xlane.f32.xlu0 %v3943_v39 }
0x1dbc   :  { %v3891_v27 = vmul.f32 0.03125, %v3861_v45  ;;  %v3894_v48 = vmul.f32 0.03125, %v3870_v23  ;;  %v3924_v58 = vmul.f32 %v13613_v1, %v13613_v1  ;;  %v3921_v20 = vmul.f32 %v13610_v22, %v13610_v22 }
0x1dbe   :  { %v13622_v49 = vsub.f32 %v13530_v53, %v3891_v27  ;;  %v13625_v38 = vsub.f32 %v13534_v28, %v3894_v48  ;;  %v3958_v25 = vsel %vm130_vm3, %v3924_v58, 0.0  ;;  %v3949_v40 = vsel %vm130_vm3, %v3921_v20, 0.0  ;;  %v4099_v48 = vld [vmem:[#allocation4 + $0x98] sm:$0xff]  ;;  %v4100_v58 = vld [vmem:[#allocation4 + $0xa0] sm:$0xff] }
0x1dbf   :  { %v3867_v59 = vpop.xlane.xlu0 %3866  ;;  %v3876_v12 = vpop.xlane.xlu1 %3875  ;;  %3959 = vadd.xlane.f32.xlu1 %v3958_v25  ;;  %3950 = vadd.xlane.f32.xlu0 %v3949_v40  ;;  %v13665_v20 = vpack.c.bf16 %v4100_v58, %v4099_v48  ;;  %v4102_v25 = vld [vmem:[#allocation4 + $0xb0] sm:$0xff] }
0x1dc0   :  { %v3893_v35 = vmul.f32 0.03125, %v3867_v59  ;;  %v3896_v42 = vmul.f32 0.03125, %v3876_v12  ;;  %v3926_v52 = vmul.f32 %v13625_v38, %v13625_v38  ;;  %v3923_v53 = vmul.f32 %v13622_v49, %v13622_v49 }
0x1dc1   :  { %11407 = vmatprep.subr.bf16.mxu0 %v13665_v20 }
0x1dc2   :  { %v13634_v15 = vsub.f32 %v13542_v6, %v3893_v35  ;;  %v13637_v28 = vsub.f32 %v13546_v5, %v3896_v42  ;;  %v3964_v50 = vsel %vm130_vm3, %v3926_v52, 0.0  ;;  %v3955_v33 = vsel %vm130_vm3, %v3923_v53, 0.0  ;;  %11409 = vmatpush3.bf16.msra.mxu0 %v13665_v20 }
0x1dc3   :  { %v3873_v13 = vpop.xlane.xlu0 %3872  ;;  %3965 = vadd.xlane.f32.xlu1 %v3964_v50  ;;  %v3882_v36 = vpop.xlane.xlu1 %3881  ;;  %3956 = vadd.xlane.f32.xlu0 %v3955_v33 }
0x1dc4   :  { %v3895_v37 = vmul.f32 0.03125, %v3873_v13  ;;  %v3898_v16 = vmul.f32 0.03125, %v3882_v36  ;;  %v3928_v11 = vmul.f32 %v13637_v28, %v13637_v28  ;;  %v3925_v6 = vmul.f32 %v13634_v15, %v13634_v15 }
0x1dc6   :  { %v13646_v4 = vsub.f32 %v13554_v32, %v3895_v37  ;;  %v13649_v5 = vsub.f32 %v13558_v60, %v3898_v16  ;;  %v3970_v56 = vsel %vm130_vm3, %v3928_v11, 0.0  ;;  %v3961_v62 = vsel %vm130_vm3, %v3925_v6, 0.0 }
0x1dc7   :  { %3971 = vadd.xlane.f32.xlu1 %v3970_v56  ;;  %3962 = vadd.xlane.f32.xlu0 %v3961_v62  ;;  %v3879_v19 = vpop.xlane.xlu0 %3878 }
0x1dc8   :  { %v3897_v17 = vmul.f32 0.03125, %v3879_v19  ;;  %v3930_v9 = vmul.f32 %v13649_v5, %v13649_v5  ;;  %v3927_v39 = vmul.f32 %v13646_v4, %v13646_v4 }
0x1dca   :  { %v13658_v32 = vsub.f32 %v13565_v29, %v3897_v17  ;;  %v3976_v60 = vsel %vm130_vm3, %v3930_v9, 0.0  ;;  %v3967_v45 = vsel %vm130_vm3, %v3927_v39, 0.0  ;;  %v4101_v29 = vld [vmem:[#allocation4 + $0xa8] sm:$0xff] }
0x1dcb   :  { %3977 = vadd.xlane.f32.xlu1 %v3976_v60  ;;  %3968 = vadd.xlane.f32.xlu0 %v3967_v45  ;;  %v13669_v40 = vpack.c.bf16 %v4102_v25, %v4101_v29  ;;  %v13674_v9 = vld [vmem:[#allocation4 + $0x8] ss:$0 sm:$0xff] }
0x1dcc   :  { %v3929_v23 = vmul.f32 %v13658_v32, %v13658_v32 }
0x1dcd   :  { %11411 = vmatprep.subr.bf16.mxu0 %v13669_v40 }
0x1dce   :  { %v3973_v27 = vsel %vm130_vm3, %v3929_v23, 0.0  ;;  %11413 = vmatpush3.bf16.msra.mxu0 %v13669_v40 }
0x1dcf   :  { %3974 = vadd.xlane.f32.xlu0 %v3973_v27  ;;  %11423 = vmatprep.subr.bf16.mxu0 %v12991_v34  ;;  %v13677_v27 = vld [vmem:[#allocation4 + $0x10] ss:$0 sm:$0xff] }
0x1e39   :  { %v3936_v59 = vpop.xlane.xlu1 %3935 }
0x1e3a   :  { %v3980_v12 = vmul.f32 0.03125, %v3936_v59  ;;  %v3933_v35 = vpop.xlane.xlu0 %3932 }
0x1e3b   :  { %v3979_v42 = vmul.f32 0.03125, %v3933_v35 }
0x1e3c   :  { %v3996_v52 = vadd.f32 1e-05, %v3980_v12 }
0x1e3d   :  { %v3995_v53 = vadd.f32 1e-05, %v3979_v42 }
0x1e3e   :  { %11665 = vrsqrt.f32 %v3996_v52 }
0x1e3f   :  { %11667 = vrsqrt.f32 %v3995_v53 }
0x1e40   :  { %v3942_v50 = vpop.xlane.xlu1 %3941 }
0x1e41   :  { %v3982_v33 = vmul.f32 0.03125, %v3942_v50 }
0x1e43   :  { %v3998_v13 = vadd.f32 1e-05, %v3982_v33 }
0x1e44   :  { %v3948_v36 = vpop.xlane.xlu1 %3947  ;;  %v3939_v37 = vpop.xlane.xlu0 %3938 }
0x1e45   :  { %11669 = vrsqrt.f32 %v3998_v13  ;;  %v3984_v16 = vmul.f32 0.03125, %v3948_v36  ;;  %v3981_v11 = vmul.f32 0.03125, %v3939_v37 }
0x1e47   :  { %v4000_v6 = vadd.f32 1e-05, %v3984_v16  ;;  %v3997_v56 = vadd.f32 1e-05, %v3981_v11 }
0x1e48   :  { %v11666_v62 = vpop.eup %11665  ;;  %v3954_v19 = vpop.xlane.xlu1 %3953 }
0x1e49   :  { %v3945_v17 = vpop.xlane.xlu0 %3944  ;;  %v11668_v39 = vpop.eup %11667  ;;  %v4028_v60 = vmul.f32 %v11666_v62, %v13570_v10  ;;  %11671 = vrsqrt.f32 %v4000_v6  ;;  %v3986_v45 = vmul.f32 0.03125, %v3954_v19 }
0x1e4a   :  { %v3983_v23 = vmul.f32 0.03125, %v3945_v17  ;;  %11673 = vrsqrt.f32 %v3997_v56  ;;  %v4027_v48 = vmul.f32 %v11668_v39, %v13573_v0 }
0x1e4b   :  { %v4002_v58 = vadd.f32 1e-05, %v3986_v45  ;;  %v4048_v25 = vmul.f32 %v13674_v9, %v4028_v60 }
0x1e4c   :  { %v3999_v29 = vadd.f32 1e-05, %v3983_v23  ;;  %v3960_v59 = vpop.xlane.xlu1 %3959  ;;  %v4047_v35 = vmul.f32 %v13674_v9, %v4027_v48 }
0x1e4d   :  { %v3951_v12 = vpop.xlane.xlu0 %3950  ;;  %11675 = vrsqrt.f32 %v4002_v58  ;;  %v3988_v42 = vmul.f32 0.03125, %v3960_v59  ;;  %v13683_v10 = vadd.f32 %v13677_v27, %v4048_v25 }
0x1e4e   :  { %v3985_v52 = vmul.f32 0.03125, %v3951_v12  ;;  %11677 = vrsqrt.f32 %v3999_v29  ;;  %v13686_v53 = vadd.f32 %v13677_v27, %v4047_v35 }
0x1e4f   :  { %v11670_v50 = vpop.eup %11669  ;;  %v4004_v0 = vadd.f32 1e-05, %v3988_v42  ;;  %v16982_v56 = vmax.f32 %v13683_v10, 0.0 }
0x1e50   :  { %v4001_v33 = vadd.f32 1e-05, %v3985_v52  ;;  %v3966_v13 = vpop.xlane.xlu1 %3965  ;;  %v16983_v37 = vmax.f32 %v13686_v53, 0.0  ;;  %v4030_v16 = vmul.f32 %v11670_v50, %v13582_v47 }
0x1e51   :  { %v3957_v36 = vpop.xlane.xlu0 %3956  ;;  %11679 = vrsqrt.f32 %v4004_v0  ;;  %v3990_v11 = vmul.f32 0.03125, %v3966_v13 }
0x1e52   :  { %v3987_v6 = vmul.f32 0.03125, %v3957_v36  ;;  %11681 = vrsqrt.f32 %v4001_v33  ;;  %10928 = vmatprep.mubr.msk.f32.mxu0 %vm130_vm3, %v16983_v37  ;;  %v4050_v45 = vmul.f32 %v13674_v9, %v4030_v16 }
0x1e53   :  { %v11672_v62 = vpop.eup %11671  ;;  %v4006_v19 = vadd.f32 1e-05, %v3990_v11  ;;  %10929 = vmatmul.mubr.msk.f32.vlgmr.msra.gmra.mrb[44].mxu0 %vm130_vm3, %v16982_v56 }
0x1e54   :  { %v4003_v17 = vadd.f32 1e-05, %v3987_v6  ;;  %v11674_v39 = vpop.eup %11673  ;;  %v3972_v60 = vpop.xlane.xlu1 %3971  ;;  %v4032_v23 = vmul.f32 %v11672_v62, %v13588_v24  ;;  %11425 = vmatpush3.bf16.msra.mxu0 %v12991_v34  ;;  %v13704_v24 = vadd.f32 %v13677_v27, %v4050_v45 }
0x1e55   :  { %v3963_v47 = vpop.xlane.xlu0 %3962  ;;  %11683 = vrsqrt.f32 %v4006_v19  ;;  %v3992_v48 = vmul.f32 0.03125, %v3972_v60  ;;  %v4029_v29 = vmul.f32 %v11674_v39, %v13591_v18  ;;  %11427 = vmatprep.subr.bf16.mxu0 %v13007_v55 }
0x1e56   :  { %v3989_v58 = vmul.f32 0.03125, %v3963_v47  ;;  %11685 = vrsqrt.f32 %v4003_v17  ;;  %v4052_v0 = vmul.f32 %v13674_v9, %v4032_v23 }
0x1e57   :  { %v11676_v25 = vpop.eup %11675  ;;  %v4008_v59 = vadd.f32 1e-05, %v3992_v48  ;;  %v4049_v35 = vmul.f32 %v13674_v9, %v4029_v29 }
0x1e58   :  { %v4005_v12 = vadd.f32 1e-05, %v3989_v58  ;;  %v11678_v42 = vpop.eup %11677  ;;  %v3978_v52 = vpop.xlane.xlu1 %3977  ;;  %v4034_v33 = vmul.f32 %v11676_v25, %v13598_v14  ;;  %11429 = vmatpush3.bf16.msra.mxu0 %v13007_v55  ;;  %v16980_v14 = vmax.f32 %v13704_v24, 0.0  ;;  %v13717_v47 = vadd.f32 %v13677_v27, %v4052_v0 }
0x1e59   :  { %v3969_v50 = vpop.xlane.xlu0 %3968  ;;  %11687 = vrsqrt.f32 %v4008_v59  ;;  %v3994_v18 = vmul.f32 0.03125, %v3978_v52  ;;  %v13710_v36 = vadd.f32 %v13677_v27, %v4049_v35  ;;  %v4031_v16 = vmul.f32 %v11678_v42, %v13603_v63  ;;  %11439 = vmatprep.subr.bf16.mxu0 %v13937_v46 }
0x1e5a   :  { %v3991_v13 = vmul.f32 0.03125, %v3969_v50  ;;  %11689 = vrsqrt.f32 %v4005_v12  ;;  %v4054_v48 = vmul.f32 %v13674_v9, %v4034_v33  ;;  %v16978_v35 = vmax.f32 %v13717_v47, 0.0 }
0x1e5b   :  { %v11680_v11 = vpop.eup %11679  ;;  %v4010_v6 = vadd.f32 1e-05, %v3994_v18  ;;  %v16981_v19 = vmax.f32 %v13710_v36, 0.0  ;;  %v4051_v60 = vmul.f32 %v13674_v9, %v4031_v16 }
0x1e5c   :  { %v4007_v62 = vadd.f32 1e-05, %v3991_v13  ;;  %v11682_v17 = vpop.eup %11681  ;;  %v4036_v45 = vmul.f32 %v11680_v11, %v13613_v1  ;;  %v13740_v50 = vadd.f32 %v13677_v27, %v4054_v48 }
0x1e5d   :  { %v3975_v39 = vpop.xlane.xlu0 %3974  ;;  %11691 = vrsqrt.f32 %v4010_v6  ;;  %10931 = vmatprep.mubr.msk.f32.mxu0 %vm130_vm3, %v16981_v19  ;;  %v4033_v23 = vmul.f32 %v11682_v17, %v13610_v22  ;;  %v13729_v58 = vadd.f32 %v13677_v27, %v4051_v60 }
0x1e5e   :  { %v3993_v63 = vmul.f32 0.03125, %v3975_v39  ;;  %11693 = vrsqrt.f32 %v4007_v62  ;;  %10932 = vmatmul.mubr.msk.f32.gmra.mrb[46].mxu0 %vm130_vm3, %v16980_v14  ;;  %v4056_v22 = vmul.f32 %v13674_v9, %v4036_v45  ;;  %17033 = vst [vmem:[#allocation21_spill] sm:$0xff] %v13740_v50 }
0x1e5f   :  { %v11684_v29 = vpop.eup %11683  ;;  %v4053_v25 = vmul.f32 %v13674_v9, %v4033_v23  ;;  %v16979_v12 = vmax.f32 %v13729_v58, 0.0 }
0x1e60   :  { %v4009_v1 = vadd.f32 1e-05, %v3993_v63  ;;  %v11686_v59 = vpop.eup %11685  ;;  %v4038_v42 = vmul.f32 %v11684_v29, %v13625_v38  ;;  %v13752_v16 = vadd.f32 %v13677_v27, %v4056_v22 }
0x1e61   :  { %v13737_v52 = vadd.f32 %v13677_v27, %v4053_v25  ;;  %v4035_v0 = vmul.f32 %v11686_v59, %v13622_v49  ;;  %10934 = vmatprep.mubr.msk.f32.mxu0 %vm130_vm3, %v16979_v12  ;;  %v16976_v49 = vmax.f32 %v13740_v50, 0.0 }
0x1e62   :  { %11695 = vrsqrt.f32 %v4009_v1  ;;  %10935 = vmatmul.mubr.msk.f32.gmra.mrb[48].mxu0 %vm130_vm3, %v16978_v35  ;;  %17034 = vst [vmem:[#allocation22_spill] sm:$0xff] %v13752_v16  ;;  %v4058_v11 = vmul.f32 %v13674_v9, %v4038_v42  ;;  %v16974_v23 = vmax.f32 %v13752_v16, 0.0 }
0x1e63   :  { %17032 = vst [vmem:[#allocation20_spill] sm:$0xff] %v13737_v52  ;;  %v11688_v33 = vpop.eup %11687  ;;  %v16977_v38 = vmax.f32 %v13737_v52, 0.0  ;;  %v4055_v18 = vmul.f32 %v13674_v9, %v4035_v0 }
0x1e64   :  { %v11690_v13 = vpop.eup %11689  ;;  %v4040_v17 = vmul.f32 %v11688_v33, %v13637_v28  ;;  %v13771_v48 = vadd.f32 %v13677_v27, %v4058_v11 }
0x1e65   :  { %10937 = vmatprep.mubr.msk.f32.mxu0 %vm130_vm3, %v16977_v38  ;;  %v13760_v6 = vadd.f32 %v13677_v27, %v4055_v18  ;;  %v4037_v62 = vmul.f32 %v11690_v13, %v13634_v15 }
0x1e66   :  { %10938 = vmatmul.mubr.msk.f32.gmra.mrb[50].mxu0 %vm130_vm3, %v16976_v49  ;;  %17036 = vst [vmem:[#allocation24_spill] sm:$0xff] %v13771_v48  ;;  %v4060_v29 = vmul.f32 %v13674_v9, %v4040_v17 }
0x1e67   :  { %17035 = vst [vmem:[#allocation23_spill] sm:$0xff] %v13760_v6  ;;  %v11692_v39 = vpop.eup %11691  ;;  %v16975_v60 = vmax.f32 %v13760_v6, 0.0  ;;  %v4057_v45 = vmul.f32 %v13674_v9, %v4037_v62 }
0x1e68   :  { %v11694_v63 = vpop.eup %11693  ;;  %v4042_v1 = vmul.f32 %v11692_v39, %v13649_v5  ;;  %v13796_v5 = vadd.f32 %v13677_v27, %v4060_v29  ;;  %v9907_v39 = vld [vmem:[#allocation4 + $0x80] ss:$0 sm:$0xff] }
0x1e69   :  { %10940 = vmatprep.mubr.msk.f32.mxu0 %vm130_vm3, %v16975_v60  ;;  %v13777_v15 = vadd.f32 %v13677_v27, %v4057_v45  ;;  %v4039_v28 = vmul.f32 %v11694_v63, %v13646_v4  ;;  %v16972_v4 = vmax.f32 %v13771_v48, 0.0 }
0x1e6a   :  { %10941 = vmatmul.mubr.msk.f32.gmra.mrb[52].mxu0 %vm130_vm3, %v16974_v23  ;;  %17039 = vst [vmem:[#allocation27_spill] sm:$0xff] %v13796_v5  ;;  %v4062_v33 = vmul.f32 %v13674_v9, %v4042_v1  ;;  %v16970_v11 = vmax.f32 %v13796_v5, 0.0 }
0x1e6b   :  { %17037 = vst [vmem:[#allocation25_spill] sm:$0xff] %v13777_v15  ;;  %v16973_v59 = vmax.f32 %v13777_v15, 0.0  ;;  %v4059_v22 = vmul.f32 %v13674_v9, %v4039_v28 }
0x1e6c   :  { %v11696_v25 = vpop.eup %11695  ;;  %v13812_v62 = vadd.f32 %v13677_v27, %v4062_v33 }
0x1e6d   :  { %v4041_v42 = vmul.f32 %v11696_v25, %v13658_v32  ;;  %10943 = vmatprep.mubr.msk.f32.mxu0 %vm130_vm3, %v16973_v59  ;;  %v13793_v0 = vadd.f32 %v13677_v27, %v4059_v22 }
0x1e6e   :  { %10944 = vmatmul.mubr.msk.f32.gmra.mrb[54].mxu0 %vm130_vm3, %v16972_v4  ;;  %17041 = vst [vmem:[#allocation29_spill] sm:$0xff] %v13812_v62  ;;  %v16968_v17 = vmax.f32 %v13812_v62, 0.0 }
0x1e6f   :  { %17038 = vst [vmem:[#allocation26_spill] sm:$0xff] %v13793_v0  ;;  %v4061_v18 = vmul.f32 %v13674_v9, %v4041_v42  ;;  %v16971_v32 = vmax.f32 %v13793_v0, 0.0 }
0x1e71   :  { %v13805_v13 = vadd.f32 %v13677_v27, %v4061_v18  ;;  %10946 = vmatprep.mubr.msk.f32.mxu0 %vm130_vm3, %v16971_v32 }
0x1e72   :  { %10947 = vmatmul.mubr.msk.f32.gmra.mrb[56].mxu0 %vm130_vm3, %v16970_v11 }
0x1e73   :  { %17040 = vst [vmem:[#allocation28_spill] sm:$0xff] %v13805_v13  ;;  %v16969_v9 = vmax.f32 %v13805_v13, 0.0 }
0x1e75   :  { %10949 = vmatprep.mubr.msk.f32.mxu0 %vm130_vm3, %v16969_v9 }
0x1e76   :  { %10950 = vmatmul.mubr.msk.f32.gmra.mrb[58].mxu0 %vm130_vm3, %v16968_v17 }
0x1f26   :  { %v13825_v45 = vpop.f32.mrb[44].mxu0 }
0x1f27   :  { %v13828_v27 = vadd.f32 %v13825_v45, %v9907_v39  ;;  %v13830_v63 = vpop.f32.mrb[45].mxu0 }
0x1f28   :  { %v13833_v28 = vadd.f32 %v9907_v39, %v13830_v63 }
0x1f29   :  { %v4322_v29 = vsel %vm130_vm3, %v13828_v27, 0.0 }
0x1f2a   :  { %4323 = vadd.xlane.f32.xlu1 %v4322_v29  ;;  %v4319_v1 = vsel %vm130_vm3, %v13833_v28, 0.0 }
0x1f2b   :  { %4320 = vadd.xlane.f32.xlu0 %v4319_v1 }
0x1f31   :  { %v13839_v25 = vpop.f32.mrb[46].mxu0 }
0x1f32   :  { %v13842_v22 = vadd.f32 %v13839_v25, %v9907_v39  ;;  %v13844_v42 = vpop.f32.mrb[47].mxu0 }
0x1f33   :  { %v13847_v33 = vadd.f32 %v9907_v39, %v13844_v42 }
0x1f34   :  { %v4328_v18 = vsel %vm130_vm3, %v13842_v22, 0.0 }
0x1f35   :  { %4329 = vadd.xlane.f32.xlu1 %v4328_v18  ;;  %v4325_v29 = vsel %vm130_vm3, %v13847_v33, 0.0  ;;  %v13853_v17 = vpop.f32.mrb[48].mxu0 }
0x1f36   :  { %4326 = vadd.xlane.f32.xlu0 %v4325_v29  ;;  %v13856_v1 = vadd.f32 %v13853_v17, %v9907_v39  ;;  %v13858_v9 = vpop.f32.mrb[49].mxu0 }
0x1f37   :  { %v13861_v11 = vadd.f32 %v9907_v39, %v13858_v9 }
0x1f38   :  { %v4334_v32 = vsel %vm130_vm3, %v13856_v1, 0.0 }
0x1f39   :  { %4335 = vadd.xlane.f32.xlu1 %v4334_v32  ;;  %v13865_v4 = vpop.f32.mrb[50].mxu0  ;;  %v4331_v18 = vsel %vm130_vm3, %v13861_v11, 0.0 }
0x1f3a   :  { %v13870_v59 = vadd.f32 %v13865_v4, %v9907_v39  ;;  %4332 = vadd.xlane.f32.xlu0 %v4331_v18  ;;  %v13872_v29 = vpop.f32.mrb[51].mxu0 }
0x1f3b   :  { %v13875_v23 = vadd.f32 %v9907_v39, %v13872_v29 }
0x1f3c   :  { %v4340_v60 = vsel %vm130_vm3, %v13870_v59, 0.0 }
0x1f3d   :  { %4341 = vadd.xlane.f32.xlu1 %v4340_v60  ;;  %v13879_v49 = vpop.f32.mrb[52].mxu0  ;;  %v4337_v32 = vsel %vm130_vm3, %v13875_v23, 0.0 }
0x1f3e   :  { %v13884_v38 = vadd.f32 %v13879_v49, %v9907_v39  ;;  %4338 = vadd.xlane.f32.xlu0 %v4337_v32  ;;  %v13886_v35 = vpop.f32.mrb[53].mxu0 }
0x1f3f   :  { %v13889_v18 = vadd.f32 %v9907_v39, %v13886_v35 }
0x1f40   :  { %v4346_v12 = vsel %vm130_vm3, %v13884_v38, 0.0 }
0x1f41   :  { %4347 = vadd.xlane.f32.xlu1 %v4346_v12  ;;  %v13893_v14 = vpop.f32.mrb[54].mxu0  ;;  %v4343_v60 = vsel %vm130_vm3, %v13889_v18, 0.0 }
0x1f42   :  { %v13898_v19 = vadd.f32 %v13893_v14, %v9907_v39  ;;  %4344 = vadd.xlane.f32.xlu0 %v4343_v60  ;;  %v13900_v56 = vpop.f32.mrb[55].mxu0 }
0x1f43   :  { %v13903_v32 = vadd.f32 %v9907_v39, %v13900_v56 }
0x1f44   :  { %v4352_v37 = vsel %vm130_vm3, %v13898_v19, 0.0 }
0x1f45   :  { %4353 = vadd.xlane.f32.xlu1 %v4352_v37  ;;  %v13907_v41 = vpop.f32.mrb[56].mxu0  ;;  %v4349_v12 = vsel %vm130_vm3, %v13903_v32, 0.0 }
0x1f46   :  { %v13912_v8 = vadd.f32 %v13907_v41, %v9907_v39  ;;  %4350 = vadd.xlane.f32.xlu0 %v4349_v12  ;;  %v13914_v57 = vpop.f32.mrb[57].mxu0 }
0x1f47   :  { %v13917_v60 = vadd.f32 %v9907_v39, %v13914_v57 }
0x1f48   :  { %v4358_v30 = vsel %vm130_vm3, %v13912_v8, 0.0 }
0x1f49   :  { %4359 = vadd.xlane.f32.xlu1 %v4358_v30  ;;  %v13921_v3 = vpop.f32.mrb[58].mxu0  ;;  %v4355_v37 = vsel %vm130_vm3, %v13917_v60, 0.0 }
0x1f4a   :  { %v13926_v51 = vadd.f32 %v13921_v3, %v9907_v39  ;;  %4356 = vadd.xlane.f32.xlu0 %v4355_v37  ;;  %v13928_v43 = vpop.f32.mrb[59].mxu0 }
0x1f4b   :  { %v13931_v12 = vadd.f32 %v9907_v39, %v13928_v43 }
0x1f4c   :  { %v4364_v31 = vsel %vm130_vm3, %v13926_v51, 0.0 }
0x1f4d   :  { %4365 = vadd.xlane.f32.xlu1 %v4364_v31  ;;  %v4361_v30 = vsel %vm130_vm3, %v13931_v12, 0.0 }
0x1f4e   :  { %4362 = vadd.xlane.f32.xlu0 %v4361_v30 }
0x1fb7   :  { %v4324_v39 = vpop.xlane.xlu1 %4323 }
0x1fb8   :  { %v4368_v37 = vmul.f32 0.03125, %v4324_v39  ;;  %v4321_v2 = vpop.xlane.xlu0 %4320 }
0x1fb9   :  { %v4367_v55 = vmul.f32 0.03125, %v4321_v2 }
0x1fba   :  { %v13943_v31 = vsub.f32 %v13828_v27, %v4368_v37 }
0x1fbb   :  { %v13946_v62 = vsub.f32 %v13833_v28, %v4367_v55 }
0x1fbc   :  { %v4400_v26 = vmul.f32 %v13943_v31, %v13943_v31 }
0x1fbd   :  { %v4399_v21 = vmul.f32 %v13946_v62, %v13946_v62 }
0x1fbe   :  { %v4418_v30 = vsel %vm130_vm3, %v4400_v26, 0.0 }
0x1fbf   :  { %4419 = vadd.xlane.f32.xlu1 %v4418_v30  ;;  %v4415_v46 = vsel %vm130_vm3, %v4399_v21, 0.0 }
0x1fc0   :  { %4416 = vadd.xlane.f32.xlu0 %v4415_v46 }
0x1fc2   :  { %v4330_v39 = vpop.xlane.xlu1 %4329 }
0x1fc3   :  { %v4370_v2 = vmul.f32 0.03125, %v4330_v39  ;;  %v4327_v13 = vpop.xlane.xlu0 %4326 }
0x1fc4   :  { %v4369_v27 = vmul.f32 0.03125, %v4327_v13 }
0x1fc5   :  { %v13955_v37 = vsub.f32 %v13842_v22, %v4370_v2 }
0x1fc6   :  { %v13958_v55 = vsub.f32 %v13847_v33, %v4369_v27  ;;  %v4336_v28 = vpop.xlane.xlu1 %4335 }
0x1fc7   :  { %v4402_v5 = vmul.f32 %v13955_v37, %v13955_v37  ;;  %v4372_v0 = vmul.f32 0.03125, %v4336_v28  ;;  %v4333_v26 = vpop.xlane.xlu0 %4332 }
0x1fc8   :  { %v4401_v21 = vmul.f32 %v13958_v55, %v13958_v55  ;;  %v4371_v46 = vmul.f32 0.03125, %v4333_v26 }
0x1fc9   :  { %v4424_v30 = vsel %vm130_vm3, %v4402_v5, 0.0  ;;  %v13966_v13 = vsub.f32 %v13856_v1, %v4372_v0 }
0x1fca   :  { %4425 = vadd.xlane.f32.xlu1 %v4424_v30  ;;  %v4421_v22 = vsel %vm130_vm3, %v4401_v21, 0.0  ;;  %v13970_v33 = vsub.f32 %v13861_v11, %v4371_v46  ;;  %v4342_v39 = vpop.xlane.xlu1 %4341 }
0x1fcb   :  { %4422 = vadd.xlane.f32.xlu0 %v4421_v22  ;;  %v4374_v2 = vmul.f32 0.03125, %v4342_v39  ;;  %v4339_v27 = vpop.xlane.xlu0 %4338  ;;  %v4404_v28 = vmul.f32 %v13966_v13, %v13966_v13 }
0x1fcc   :  { %v4373_v48 = vmul.f32 0.03125, %v4339_v27  ;;  %v4403_v5 = vmul.f32 %v13970_v33, %v13970_v33 }
0x1fcd   :  { %v13977_v0 = vsub.f32 %v13870_v59, %v4374_v2  ;;  %v4430_v1 = vsel %vm130_vm3, %v4404_v28, 0.0 }
0x1fce   :  { %v13981_v26 = vsub.f32 %v13875_v23, %v4373_v48  ;;  %v4348_v11 = vpop.xlane.xlu1 %4347  ;;  %4431 = vadd.xlane.f32.xlu1 %v4430_v1  ;;  %v4427_v21 = vsel %vm130_vm3, %v4403_v5, 0.0 }
0x1fcf   :  { %v4376_v46 = vmul.f32 0.03125, %v4348_v11  ;;  %4428 = vadd.xlane.f32.xlu0 %v4427_v21  ;;  %v4345_v30 = vpop.xlane.xlu0 %4344  ;;  %v4406_v22 = vmul.f32 %v13977_v0, %v13977_v0 }
0x1fd0   :  { %v4375_v39 = vmul.f32 0.03125, %v4345_v30  ;;  %v4405_v59 = vmul.f32 %v13981_v26, %v13981_v26 }
0x1fd1   :  { %v13989_v2 = vsub.f32 %v13884_v38, %v4376_v46  ;;  %v4436_v23 = vsel %vm130_vm3, %v4406_v22, 0.0 }
0x1fd2   :  { %v13993_v48 = vsub.f32 %v13889_v18, %v4375_v39  ;;  %v4354_v27 = vpop.xlane.xlu1 %4353  ;;  %4437 = vadd.xlane.f32.xlu1 %v4436_v23  ;;  %v4433_v28 = vsel %vm130_vm3, %v4405_v59, 0.0 }
0x1fd3   :  { %v4378_v5 = vmul.f32 0.03125, %v4354_v27  ;;  %4434 = vadd.xlane.f32.xlu0 %v4433_v28  ;;  %v4351_v1 = vpop.xlane.xlu0 %4350  ;;  %v4408_v11 = vmul.f32 %v13989_v2, %v13989_v2 }
0x1fd4   :  { %v4377_v21 = vmul.f32 0.03125, %v4351_v1  ;;  %v4407_v38 = vmul.f32 %v13993_v48, %v13993_v48 }
0x1fd5   :  { %v14001_v46 = vsub.f32 %v13898_v19, %v4378_v5  ;;  %v4442_v18 = vsel %vm130_vm3, %v4408_v11, 0.0 }
0x1fd6   :  { %v14005_v30 = vsub.f32 %v13903_v32, %v4377_v21  ;;  %v4360_v22 = vpop.xlane.xlu1 %4359  ;;  %4443 = vadd.xlane.f32.xlu1 %v4442_v18  ;;  %v4439_v39 = vsel %vm130_vm3, %v4407_v38, 0.0 }
0x1fd7   :  { %v4380_v59 = vmul.f32 0.03125, %v4360_v22  ;;  %4440 = vadd.xlane.f32.xlu0 %v4439_v39  ;;  %v4357_v23 = vpop.xlane.xlu0 %4356  ;;  %v4410_v27 = vmul.f32 %v14001_v46, %v14001_v46 }
0x1fd8   :  { %v4379_v28 = vmul.f32 0.03125, %v4357_v23  ;;  %v4409_v19 = vmul.f32 %v14005_v30, %v14005_v30  ;;  %v4611_v23 = vld [vmem:[#allocation4 + $0x70] sm:$0xff] }
0x1fd9   :  { %v14013_v5 = vsub.f32 %v13912_v8, %v4380_v59  ;;  %v4448_v32 = vsel %vm130_vm3, %v4410_v27, 0.0  ;;  %v4610_v59 = vld [vmem:[#allocation4 + $0x68] sm:$0xff] }
0x1fda   :  { %v14017_v1 = vsub.f32 %v13917_v60, %v4379_v28  ;;  %4449 = vadd.xlane.f32.xlu1 %v4448_v32  ;;  %v4366_v11 = vpop.xlane.xlu1 %4365  ;;  %v4445_v21 = vsel %vm130_vm3, %v4409_v19, 0.0  ;;  %v14028_v28 = vpack.c.bf16 %v4611_v23, %v4610_v59 }
0x1fdb   :  { %v4382_v38 = vmul.f32 0.03125, %v4366_v11  ;;  %4446 = vadd.xlane.f32.xlu0 %v4445_v21  ;;  %v4363_v18 = vpop.xlane.xlu0 %4362  ;;  %v4412_v22 = vmul.f32 %v14013_v5, %v14013_v5 }
0x1fdc   :  { %v4381_v39 = vmul.f32 0.03125, %v4363_v18  ;;  %v4411_v8 = vmul.f32 %v14017_v1, %v14017_v1  ;;  %17043 = vst [vmem:[#allocation31_spill] sm:$0xff] %v14028_v28  ;;  %11419 = vmatprep.subr.bf16.mxu1 %v14028_v28 }
0x1fdd   :  { %v14025_v27 = vsub.f32 %v13926_v51, %v4382_v38  ;;  %v4454_v60 = vsel %vm130_vm3, %v4412_v22, 0.0  ;;  %11421 = vmatpush3.bf16.msra.mxu1 %v14028_v28  ;;  %v9910_v38 = vld [vmem:[#allocation4 + $0x48] ss:$0 sm:$0xff] }
0x1fde   :  { %v14031_v19 = vsub.f32 %v13931_v12, %v4381_v39  ;;  %4455 = vadd.xlane.f32.xlu1 %v4454_v60  ;;  %v4451_v32 = vsel %vm130_vm3, %v4411_v8, 0.0  ;;  %11431 = vmatprep.subr.bf16.mxu1 %v13665_v20 }
0x1fdf   :  { %4452 = vadd.xlane.f32.xlu0 %v4451_v32  ;;  %v4414_v11 = vmul.f32 %v14025_v27, %v14025_v27 }
0x1fe0   :  { %v4413_v51 = vmul.f32 %v14031_v19, %v14031_v19 }
0x1fe1   :  { %v4460_v21 = vsel %vm130_vm3, %v4414_v11, 0.0 }
0x1fe2   :  { %4461 = vadd.xlane.f32.xlu1 %v4460_v21  ;;  %v4457_v12 = vsel %vm130_vm3, %v4413_v51, 0.0 }
0x1fe3   :  { %4458 = vadd.xlane.f32.xlu0 %v4457_v12  ;;  %v14044_v12 = vld [vmem:[#allocation4 + $0x88] ss:$0 sm:$0xff] }
0x1ff9   :  { %4589 = vrot.lane.b32.xlu0 %v9910_v38, %s12287_s1 }
0x204c   :  { %v4420_v18 = vpop.xlane.xlu1 %4419 }
0x204d   :  { %v4464_v22 = vmul.f32 0.03125, %v4420_v18  ;;  %v4417_v39 = vpop.xlane.xlu0 %4416 }
0x204e   :  { %v4463_v8 = vmul.f32 0.03125, %v4417_v39 }
0x204f   :  { %v4480_v59 = vadd.f32 1e-05, %v4464_v22 }
0x2050   :  { %v4479_v23 = vadd.f32 1e-05, %v4463_v8  ;;  %v14047_v8 = vld [vmem:[#allocation4 + $0x90] ss:$0 sm:$0xff] }
0x2051   :  { %11697 = vrsqrt.f32 %v4480_v59 }
0x2052   :  { %11699 = vrsqrt.f32 %v4479_v23 }
0x2057   :  { %v4426_v60 = vpop.xlane.xlu1 %4425 }
0x2058   :  { %v4466_v32 = vmul.f32 0.03125, %v4426_v60  ;;  %v4423_v11 = vpop.xlane.xlu0 %4422 }
0x2059   :  { %v4465_v28 = vmul.f32 0.03125, %v4423_v11 }
0x205a   :  { %v4482_v21 = vadd.f32 1e-05, %v4466_v32 }
0x205b   :  { %v11698_v15 = vpop.eup %11697  ;;  %v4481_v51 = vadd.f32 1e-05, %v4465_v28  ;;  %v4432_v18 = vpop.xlane.xlu1 %4431 }
0x205c   :  { %v11700_v16 = vpop.eup %11699  ;;  %v4512_v38 = vmul.f32 %v11698_v15, %v13943_v31  ;;  %11701 = vrsqrt.f32 %v4482_v21  ;;  %v4468_v39 = vmul.f32 0.03125, %v4432_v18  ;;  %v4429_v22 = vpop.xlane.xlu0 %4428 }
0x205d   :  { %11703 = vrsqrt.f32 %v4481_v51  ;;  %v4511_v59 = vmul.f32 %v11700_v16, %v13946_v62  ;;  %v4467_v23 = vmul.f32 0.03125, %v4429_v22 }
0x205e   :  { %v4532_v60 = vmul.f32 %v14044_v12, %v4512_v38  ;;  %v4484_v32 = vadd.f32 1e-05, %v4468_v39 }
0x205f   :  { %v4531_v28 = vmul.f32 %v14044_v12, %v4511_v59  ;;  %v4483_v11 = vadd.f32 1e-05, %v4467_v23  ;;  %v4438_v6 = vpop.xlane.xlu1 %4437 }
0x2060   :  { %v4552_v50 = vadd.f32 %v14047_v8, %v4532_v60  ;;  %11705 = vrsqrt.f32 %v4484_v32  ;;  %v4470_v15 = vmul.f32 0.03125, %v4438_v6  ;;  %v4435_v31 = vpop.xlane.xlu0 %4434 }
0x2061   :  { %v4551_v21 = vadd.f32 %v14047_v8, %v4531_v28  ;;  %11707 = vrsqrt.f32 %v4483_v11  ;;  %v4469_v51 = vmul.f32 0.03125, %v4435_v31 }
0x2062   :  { %v4486_v18 = vadd.f32 1e-05, %v4470_v15  ;;  %v4568_v22 = vmax.f32 %v4552_v50, 0.0 }
0x2063   :  { %v4567_v52 = vmax.f32 %v4551_v21, 0.0  ;;  %v4485_v16 = vadd.f32 1e-05, %v4469_v51  ;;  %v4444_v62 = vpop.xlane.xlu1 %4443 }
0x2064   :  { %11709 = vrsqrt.f32 %v4486_v18  ;;  %v4472_v38 = vmul.f32 0.03125, %v4444_v62  ;;  %v4441_v39 = vpop.xlane.xlu0 %4440 }
0x2065   :  { %10960 = vmatprep.mubr.msk.f32.mxu1 %vm130_vm3, %v4567_v52  ;;  %11711 = vrsqrt.f32 %v4485_v16  ;;  %v4471_v23 = vmul.f32 0.03125, %v4441_v39 }
0x2066   :  { %v11702_v59 = vpop.eup %11701  ;;  %10961 = vmatmul.mubr.msk.f32.vlgmr.msra.gmra.mrb[56].mxu1 %vm130_vm3, %v4568_v22  ;;  %v4488_v60 = vadd.f32 1e-05, %v4472_v38 }
0x2067   :  { %v11704_v6 = vpop.eup %11703  ;;  %v4514_v32 = vmul.f32 %v11702_v59, %v13955_v37  ;;  %11433 = vmatpush3.bf16.msra.mxu1 %v13665_v20  ;;  %v4487_v28 = vadd.f32 1e-05, %v4471_v23  ;;  %v4450_v11 = vpop.xlane.xlu1 %4449 }
0x2068   :  { %v4513_v50 = vmul.f32 %v11704_v6, %v13958_v55  ;;  %11435 = vmatprep.subr.bf16.mxu1 %v13669_v40  ;;  %11713 = vrsqrt.f32 %v4488_v60  ;;  %v4474_v15 = vmul.f32 0.03125, %v4450_v11  ;;  %v4447_v52 = vpop.xlane.xlu0 %4446 }
0x2069   :  { %v4534_v31 = vmul.f32 %v14044_v12, %v4514_v32  ;;  %11715 = vrsqrt.f32 %v4487_v28  ;;  %v4473_v21 = vmul.f32 0.03125, %v4447_v52 }
0x206a   :  { %v4533_v51 = vmul.f32 %v14044_v12, %v4513_v50  ;;  %v11706_v18 = vpop.eup %11705  ;;  %v4490_v16 = vadd.f32 1e-05, %v4474_v15 }
0x206b   :  { %v4554_v37 = vadd.f32 %v14047_v8, %v4534_v31  ;;  %11437 = vmatpush3.bf16.msra.mxu1 %v13669_v40  ;;  %v11708_v62 = vpop.eup %11707  ;;  %v4489_v22 = vadd.f32 1e-05, %v4473_v21  ;;  %v4456_v55 = vpop.xlane.xlu1 %4455  ;;  %v4516_v39 = vmul.f32 %v11706_v18, %v13966_v13 }
0x206c   :  { %v4553_v38 = vadd.f32 %v14047_v8, %v4533_v51  ;;  %11447 = vmatprep.subr.bf16.mxu1 %v12991_v34  ;;  %11717 = vrsqrt.f32 %v4490_v16  ;;  %v4476_v59 = vmul.f32 0.03125, %v4456_v55  ;;  %v4453_v23 = vpop.xlane.xlu0 %4452  ;;  %v4515_v6 = vmul.f32 %v11708_v62, %v13970_v33 }
0x206d   :  { %11719 = vrsqrt.f32 %v4489_v22  ;;  %v4475_v60 = vmul.f32 0.03125, %v4453_v23  ;;  %v4536_v28 = vmul.f32 %v14044_v12, %v4516_v39  ;;  %v4570_v15 = vmax.f32 %v4554_v37, 0.0 }
0x206e   :  { %v4569_v32 = vmax.f32 %v4553_v38, 0.0  ;;  %v11710_v11 = vpop.eup %11709  ;;  %v4492_v50 = vadd.f32 1e-05, %v4476_v59  ;;  %v4535_v52 = vmul.f32 %v14044_v12, %v4515_v6 }
0x206f   :  { %v11712_v31 = vpop.eup %11711  ;;  %v4491_v21 = vadd.f32 1e-05, %v4475_v60  ;;  %v4462_v13 = vpop.xlane.xlu1 %4461  ;;  %v4556_v51 = vadd.f32 %v14047_v8, %v4536_v28  ;;  %v4518_v18 = vmul.f32 %v11710_v11, %v13977_v0 }
0x2070   :  { %10963 = vmatprep.mubr.msk.f32.mxu1 %vm130_vm3, %v4569_v32  ;;  %11721 = vrsqrt.f32 %v4492_v50  ;;  %v4478_v33 = vmul.f32 0.03125, %v4462_v13  ;;  %v4459_v16 = vpop.xlane.xlu0 %4458  ;;  %v4555_v62 = vadd.f32 %v14047_v8, %v4535_v52  ;;  %v4517_v37 = vmul.f32 %v11712_v31, %v13981_v26 }
0x2071   :  { %10964 = vmatmul.mubr.msk.f32.gmra.mrb[58].mxu1 %vm130_vm3, %v4570_v15  ;;  %11723 = vrsqrt.f32 %v4491_v21  ;;  %v4477_v22 = vmul.f32 0.03125, %v4459_v16  ;;  %v4538_v55 = vmul.f32 %v14044_v12, %v4518_v18  ;;  %v4572_v60 = vmax.f32 %v4556_v51, 0.0 }
0x2072   :  { %v11714_v38 = vpop.eup %11713  ;;  %v4494_v39 = vadd.f32 1e-05, %v4478_v33  ;;  %v4571_v59 = vmax.f32 %v4555_v62, 0.0  ;;  %v4537_v23 = vmul.f32 %v14044_v12, %v4517_v37 }
0x2073   :  { %v11716_v6 = vpop.eup %11715  ;;  %v4493_v0 = vadd.f32 1e-05, %v4477_v22  ;;  %v4558_v32 = vadd.f32 %v14047_v8, %v4538_v55  ;;  %v4520_v28 = vmul.f32 %v11714_v38, %v13989_v2 }
0x2074   :  { %11725 = vrsqrt.f32 %v4494_v39  ;;  %10966 = vmatprep.mubr.msk.f32.mxu1 %vm130_vm3, %v4571_v59  ;;  %v14081_v26 = vpop.permute.xlu0 %4589  ;;  %v4557_v11 = vadd.f32 %v14047_v8, %v4537_v23  ;;  %v4519_v50 = vmul.f32 %v11716_v6, %v13993_v48 }
0x2075   :  { %11727 = vrsqrt.f32 %v4493_v0  ;;  %10967 = vmatmul.mubr.msk.f32.gmra.mrb[60].mxu1 %vm130_vm3, %v4572_v60  ;;  %v14088_v15 = vadd.f32 %v13839_v25, %v14081_v26  ;;  %v14092_v52 = vadd.f32 %v14081_v26, %v13830_v63  ;;  %v4574_v48 = vmax.f32 %v4558_v32, 0.0 }
0x2076   :  { %v11718_v2 = vpop.eup %11717  ;;  %v4573_v31 = vmax.f32 %v4557_v11, 0.0  ;;  %v4539_v21 = vmul.f32 %v14044_v12, %v4519_v50  ;;  %v4540_v25 = vmul.f32 %v14044_v12, %v4520_v28  ;;  %v14107_v33 = vadd.f32 %v13853_v17, %v14081_v26 }
0x2077   :  { %v11720_v13 = vpop.eup %11719  ;;  %4864 = vrot.lane.b32.xlu0 %v14088_v15, %s12288_s22  ;;  %4858 = vrot.lane.b32.xlu1 %v14092_v52, %s12288_s22  ;;  %v4522_v18 = vmul.f32 %v11718_v2, %v14001_v46  ;;  %v4593_v16 = vadd.f32 %v13825_v45, %v14081_v26  ;;  %v4599_v23 = vadd.f32 %v13865_v4, %v14081_v26 }
0x2078   :  { %10969 = vmatprep.mubr.msk.f32.mxu1 %vm130_vm3, %v4573_v31  ;;  %v4559_v63 = vadd.f32 %v14047_v8, %v4539_v21  ;;  %v4521_v51 = vmul.f32 %v11720_v13, %v14005_v30  ;;  %v4560_v62 = vadd.f32 %v14047_v8, %v4540_v25  ;;  %v4594_v6 = vadd.f32 %v14081_v26, %v13844_v42 }
0x2079   :  { %10970 = vmatmul.mubr.msk.f32.gmra.mrb[62].mxu1 %vm130_vm3, %v4574_v48  ;;  %v4542_v38 = vmul.f32 %v14044_v12, %v4522_v18  ;;  %v4601_v2 = vadd.f32 %v13879_v49, %v14081_v26  ;;  %v4596_v31 = vadd.f32 %v14081_v26, %v13858_v9  ;;  %v4603_v49 = vadd.f32 %v13893_v14, %v14081_v26 }
0x207a   :  { %v11722_v37 = vpop.eup %11721  ;;  %v4575_v22 = vmax.f32 %v4559_v63, 0.0  ;;  %v4541_v55 = vmul.f32 %v14044_v12, %v4521_v51  ;;  %v4576_v46 = vmax.f32 %v4560_v62, 0.0  ;;  %v4598_v9 = vadd.f32 %v14081_v26, %v13872_v29  ;;  %v14196_v62 = vld [vmem:[#allocation4 + $0x50] ss:$0 sm:$0xff] }
0x207b   :  { %v11724_v30 = vpop.eup %11723  ;;  %4868 = vrot.lane.b32.xlu0 %v14107_v33, %s12288_s22  ;;  %4860 = vrot.lane.b32.xlu1 %v4593_v16, %s12288_s22  ;;  %v4524_v17 = vmul.f32 %v11722_v37, %v14013_v5  ;;  %v4562_v39 = vadd.f32 %v14047_v8, %v4542_v38  ;;  %v4600_v51 = vadd.f32 %v14081_v26, %v13886_v35 }
0x207c   :  { %10972 = vmatprep.mubr.msk.f32.mxu1 %vm130_vm3, %v4575_v22  ;;  %v4561_v45 = vadd.f32 %v14047_v8, %v4541_v55  ;;  %v4523_v59 = vmul.f32 %v11724_v30, %v14017_v1  ;;  %v4602_v14 = vadd.f32 %v14081_v26, %v13900_v56  ;;  %v4604_v29 = vadd.f32 %v14081_v26, %v13914_v57 }
0x207d   :  { %10973 = vmatmul.mubr.msk.f32.gmra.mrb[64].mxu1 %vm130_vm3, %v4576_v46  ;;  %v4544_v0 = vmul.f32 %v14044_v12, %v4524_v17  ;;  %v4578_v1 = vmax.f32 %v4562_v39, 0.0  ;;  %v4607_v56 = vadd.f32 %v13921_v3, %v14081_v26 }
0x207e   :  { %v11726_v60 = vpop.eup %11725  ;;  %v4577_v5 = vmax.f32 %v4561_v45, 0.0  ;;  %v4543_v32 = vmul.f32 %v14044_v12, %v4523_v59 }
0x207f   :  { %v11728_v28 = vpop.eup %11727  ;;  %4872 = vrot.lane.b32.xlu0 %v4599_v23, %s12288_s22  ;;  %4862 = vrot.lane.b32.xlu1 %v4594_v6, %s12288_s22  ;;  %v4564_v11 = vadd.f32 %v14047_v8, %v4544_v0  ;;  %v4526_v50 = vmul.f32 %v11726_v60, %v14025_v27 }
0x2080   :  { %10975 = vmatprep.mubr.msk.f32.mxu1 %vm130_vm3, %v4577_v5  ;;  %v4563_v4 = vadd.f32 %v14047_v8, %v4543_v32  ;;  %v4525_v42 = vmul.f32 %v11728_v28, %v14031_v19 }
0x2081   :  { %10976 = vmatmul.mubr.msk.f32.gmra.mrb[66].mxu1 %vm130_vm3, %v4578_v1  ;;  %v4546_v21 = vmul.f32 %v14044_v12, %v4526_v50  ;;  %v4580_v27 = vmax.f32 %v4564_v11, 0.0 }
0x2082   :  { %v4579_v13 = vmax.f32 %v4563_v4, 0.0  ;;  %v4545_v48 = vmul.f32 %v14044_v12, %v4525_v42 }
0x2083   :  { %4876 = vrot.lane.b32.xlu0 %v4601_v2, %s12288_s22  ;;  %4866 = vrot.lane.b32.xlu1 %v4596_v31, %s12288_s22  ;;  %v4566_v19 = vadd.f32 %v14047_v8, %v4546_v21 }
0x2084   :  { %10978 = vmatprep.mubr.msk.f32.mxu1 %vm130_vm3, %v4579_v13  ;;  %v4565_v25 = vadd.f32 %v14047_v8, %v4545_v48  ;;  %v4605_v8 = vadd.f32 %v13907_v41, %v14081_v26  ;;  %v4606_v41 = vadd.f32 %v14081_v26, %v13928_v43 }
0x2085   :  { %10979 = vmatmul.mubr.msk.f32.gmra.mrb[68].mxu1 %vm130_vm3, %v4580_v27  ;;  %v4582_v63 = vmax.f32 %v4566_v19, 0.0 }
0x2086   :  { %v4581_v12 = vmax.f32 %v4565_v25, 0.0 }
0x2087   :  { %4880 = vrot.lane.b32.xlu0 %v4603_v49, %s12288_s22  ;;  %4870 = vrot.lane.b32.xlu1 %v4598_v9, %s12288_s22 }
0x2088   :  { %10981 = vmatprep.mubr.msk.f32.mxu1 %vm130_vm3, %v4581_v12 }
0x2089   :  { %10982 = vmatmul.mubr.msk.f32.gmra.mrb[70].mxu1 %vm130_vm3, %v4582_v63 }
0x208b   :  { %4884 = vrot.lane.b32.xlu0 %v4605_v8, %s12288_s22  ;;  %4874 = vrot.lane.b32.xlu1 %v4600_v51, %s12288_s22 }
0x208f   :  { %5018 = vrot.lane.b32.xlu0 %v14092_v52, %s12287_s1  ;;  %4878 = vrot.lane.b32.xlu1 %v4602_v14, %s12288_s22 }
0x2093   :  { %5020 = vrot.lane.b32.xlu0 %v4593_v16, %s12287_s1  ;;  %4882 = vrot.lane.b32.xlu1 %v4604_v29, %s12288_s22 }
0x2097   :  { %5024 = vrot.lane.b32.xlu0 %v14088_v15, %s12287_s1  ;;  %4886 = vrot.lane.b32.xlu1 %v4606_v41, %s12288_s22 }
0x209b   :  { %5028 = vrot.lane.b32.xlu0 %v14107_v33, %s12287_s1  ;;  %4888 = vrot.lane.b32.xlu1 %v4607_v56, %s12288_s22 }
0x209f   :  { %5032 = vrot.lane.b32.xlu0 %v4599_v23, %s12287_s1  ;;  %5022 = vrot.lane.b32.xlu1 %v4594_v6, %s12287_s1 }
0x20a3   :  { %5036 = vrot.lane.b32.xlu0 %v4601_v2, %s12287_s1  ;;  %5026 = vrot.lane.b32.xlu1 %v4596_v31, %s12287_s1 }
0x20a7   :  { %5040 = vrot.lane.b32.xlu0 %v4603_v49, %s12287_s1  ;;  %5030 = vrot.lane.b32.xlu1 %v4598_v9, %s12287_s1 }
0x20ab   :  { %5044 = vrot.lane.b32.xlu0 %v4605_v8, %s12287_s1  ;;  %5034 = vrot.lane.b32.xlu1 %v4600_v51, %s12287_s1 }
0x20af   :  { %5048 = vrot.lane.b32.xlu0 %v4607_v56, %s12287_s1  ;;  %5038 = vrot.lane.b32.xlu1 %v4602_v14, %s12287_s1 }
0x20b3   :  { %5042 = vrot.lane.b32.xlu1 %v4604_v29, %s12287_s1 }
0x20b7   :  { %5046 = vrot.lane.b32.xlu1 %v4606_v41, %s12287_s1 }
0x20e9   :  { %v4859_v43 = vpop.permute.xlu1 %4858  ;;  %v4865_v57 = vpop.permute.xlu0 %4864 }
0x20ed   :  { %v4861_v3 = vpop.permute.xlu1 %4860  ;;  %v4869_v15 = vpop.permute.xlu0 %4868 }
0x20f1   :  { %v4863_v35 = vpop.permute.xlu1 %4862  ;;  %v4873_v18 = vpop.permute.xlu0 %4872 }
0x20f5   :  { %v4867_v52 = vpop.permute.xlu1 %4866  ;;  %v14199_v55 = vpop.permute.xlu0 %4876 }
0x20f9   :  { %v14194_v33 = vpop.permute.xlu1 %4870  ;;  %v14212_v23 = vpop.permute.xlu0 %4880 }
0x20fd   :  { %v14202_v30 = vpop.permute.xlu1 %4874  ;;  %v14218_v1 = vpop.permute.xlu0 %4884 }
0x2101   :  { %v14214_v0 = vpop.permute.xlu1 %4878  ;;  %v5019_v12 = vpop.permute.xlu0 %5018 }
0x2105   :  { %v14223_v50 = vpop.permute.xlu1 %4882 }
0x2109   :  { %v14238_v14 = vpop.permute.xlu1 %4886 }
0x2139   :  { %v10962_v16 = vpop.f32.mrb[56].mxu1 }
0x213a   :  { %v4806_v37 = vadd.f32 %v10962_v16, %v13322_v61  ;;  %v4726_v22 = vpop.f32.mrb[57].mxu1 }
0x213b   :  { %v4805_v38 = vadd.f32 %v4726_v22, %v13324_v44 }
0x213c   :  { %v14205_v46 = vadd.f32 %v14196_v62, %v4806_v37 }
0x213d   :  { %v14208_v17 = vadd.f32 %v14196_v62, %v4805_v38 }
0x213e   :  { %v4907_v45 = vadd.f32 %v4861_v3, %v14205_v46 }
0x213f   :  { %v4906_v39 = vadd.f32 %v4859_v43, %v14208_v17 }
0x2140   :  { %v9929_v59 = vmul.f32 -1.442695, %v4907_v45 }
0x2141   :  { %v9928_v6 = vmul.f32 -1.442695, %v4906_v39 }
0x2142   :  { %11729 = vpow2.f32 %v9929_v59  ;;  %v5021_v59 = vpop.permute.xlu0 %5020 }
0x2143   :  { %11731 = vpow2.f32 %v9928_v6 }
0x2144   :  { %v10965_v60 = vpop.f32.mrb[58].mxu1 }
0x2145   :  { %v4808_v5 = vadd.f32 %v10965_v60, %v13326_v54  ;;  %v4736_v32 = vpop.f32.mrb[59].mxu1  ;;  %v14255_v60 = vpop.permute.xlu1 %4888 }
0x2146   :  { %v4807_v28 = vadd.f32 %v4736_v32, %v13328_v7 }
0x2147   :  { %v14221_v11 = vadd.f32 %v14196_v62, %v4808_v5 }
0x2148   :  { %v14226_v4 = vadd.f32 %v14196_v62, %v4807_v28  ;;  %v10968_v2 = vpop.f32.mrb[60].mxu1 }
0x2149   :  { %v4909_v42 = vadd.f32 %v4865_v57, %v14221_v11  ;;  %v4810_v21 = vadd.f32 %v10968_v2, %v13322_v61  ;;  %v4746_v13 = vpop.f32.mrb[61].mxu1 }
0x214a   :  { %v4908_v31 = vadd.f32 %v4863_v35, %v14226_v4  ;;  %v4809_v27 = vadd.f32 %v4746_v13, %v13324_v44 }
0x214b   :  { %v9931_v48 = vmul.f32 -1.442695, %v4909_v42  ;;  %v14233_v49 = vadd.f32 %v14196_v62, %v4810_v21 }
0x214c   :  { %v11730_v19 = vpop.eup %11729  ;;  %v9930_v25 = vmul.f32 -1.442695, %v4908_v31  ;;  %v14236_v8 = vadd.f32 %v14196_v62, %v4809_v27  ;;  %v10971_v51 = vpop.f32.mrb[62].mxu1 }
0x214d   :  { %v11732_v9 = vpop.eup %11731  ;;  %v4971_v63 = vadd.f32 1.0, %v11730_v19  ;;  %11733 = vpow2.f32 %v9931_v48  ;;  %v4911_v41 = vadd.f32 %v4869_v15, %v14233_v49  ;;  %v4812_v56 = vadd.f32 %v10971_v51, %v13326_v54  ;;  %v4756_v43 = vpop.f32.mrb[63].mxu1 }
0x214e   :  { %v4970_v29 = vadd.f32 1.0, %v11732_v9  ;;  %11735 = vpow2.f32 %v9930_v25  ;;  %v4910_v3 = vadd.f32 %v4867_v52, %v14236_v8  ;;  %v4811_v57 = vadd.f32 %v4756_v43, %v13328_v7  ;;  %v5025_v51 = vpop.permute.xlu0 %5024 }
0x214f   :  { %11737 = vrcp.f32 %v4971_v63  ;;  %v9933_v35 = vmul.f32 -1.442695, %v4911_v41  ;;  %v14245_v16 = vadd.f32 %v14196_v62, %v4812_v56 }
0x2150   :  { %11739 = vrcp.f32 %v4970_v29  ;;  %v9932_v37 = vmul.f32 -1.442695, %v4910_v3  ;;  %v14248_v22 = vadd.f32 %v14196_v62, %v4811_v57  ;;  %v10974_v38 = vpop.f32.mrb[64].mxu1 }
0x2151   :  { %11741 = vpow2.f32 %v9933_v35  ;;  %v4913_v15 = vadd.f32 %v4873_v18, %v14245_v16  ;;  %v4814_v45 = vadd.f32 %v10974_v38, %v13322_v61  ;;  %v4766_v39 = vpop.f32.mrb[65].mxu1 }
0x2152   :  { %11743 = vpow2.f32 %v9932_v37  ;;  %v4912_v52 = vadd.f32 %v14194_v33, %v14248_v22  ;;  %v4813_v6 = vadd.f32 %v4766_v39, %v13324_v44 }
0x2153   :  { %v9935_v5 = vmul.f32 -1.442695, %v4913_v15  ;;  %v14258_v32 = vadd.f32 %v14196_v62, %v4814_v45 }
0x2154   :  { %v9934_v28 = vmul.f32 -1.442695, %v4912_v52  ;;  %v14261_v42 = vadd.f32 %v14196_v62, %v4813_v6  ;;  %v10977_v18 = vpop.f32.mrb[66].mxu1 }
0x2155   :  { %11745 = vpow2.f32 %v9935_v5  ;;  %v4915_v2 = vadd.f32 %v14199_v55, %v14258_v32  ;;  %v4816_v31 = vadd.f32 %v10977_v18, %v13326_v54  ;;  %v4776_v33 = vpop.f32.mrb[67].mxu1 }
0x2156   :  { %11747 = vpow2.f32 %v9934_v28  ;;  %v4914_v13 = vadd.f32 %v14202_v30, %v14261_v42  ;;  %v4815_v48 = vadd.f32 %v4776_v33, %v13328_v7  ;;  %v5023_v30 = vpop.permute.xlu1 %5022 }
0x2157   :  { %v11734_v21 = vpop.eup %11733  ;;  %v9937_v25 = vmul.f32 -1.442695, %v4915_v2  ;;  %v14270_v9 = vadd.f32 %v14196_v62, %v4816_v31  ;;  %v5029_v2 = vpop.permute.xlu0 %5028 }
0x2158   :  { %v11736_v27 = vpop.eup %11735  ;;  %v4973_v19 = vadd.f32 1.0, %v11734_v21  ;;  %v9936_v29 = vmul.f32 -1.442695, %v4914_v13  ;;  %v14275_v41 = vadd.f32 %v14196_v62, %v4815_v48  ;;  %v10980_v56 = vpop.f32.mrb[68].mxu1 }
0x2159   :  { %v14272_v63 = vpop.eup %11737  ;;  %v4972_v55 = vadd.f32 1.0, %v11736_v27  ;;  %v4917_v3 = vadd.f32 %v14212_v23, %v14270_v9  ;;  %v4818_v57 = vadd.f32 %v10980_v56, %v13322_v61  ;;  %v4786_v35 = vpop.f32.mrb[69].mxu1 }
0x215a   :  { %v14277_v43 = vpop.eup %11739  ;;  %11749 = vrcp.f32 %v4973_v19  ;;  %v5067_v37 = vmul.f32 %v14272_v63, %v5021_v59  ;;  %v4916_v38 = vadd.f32 %v14214_v0, %v14275_v41  ;;  %v4817_v15 = vadd.f32 %v4786_v35, %v13324_v44  ;;  %v5027_v13 = vpop.permute.xlu1 %5026 }
0x215b   :  { %11751 = vrcp.f32 %v4972_v55  ;;  %v5066_v45 = vmul.f32 %v14277_v43, %v5019_v12  ;;  %v11742_v39 = vpop.eup %11741  ;;  %v9939_v52 = vmul.f32 -1.442695, %v4917_v3  ;;  %v14288_v6 = vadd.f32 %v14196_v62, %v4818_v57  ;;  %v5033_v57 = vpop.permute.xlu0 %5032 }
0x215c   :  { %11753 = vpow2.f32 %v9937_v25  ;;  %5100 = vrot.lane.b32.xlu0 %v5067_v37, %s12289_s23  ;;  %v11744_v61 = vpop.eup %11743  ;;  %v4975_v23 = vadd.f32 1.0, %v11742_v39  ;;  %v9938_v59 = vmul.f32 -1.442695, %v4916_v38  ;;  %v14292_v5 = vadd.f32 %v14196_v62, %v4817_v15  ;;  %v10983_v0 = vpop.f32.mrb[70].mxu1 }
0x215d   :  { %11755 = vpow2.f32 %v9936_v29  ;;  %5098 = vrot.lane.b32.xlu1 %v5066_v45, %s12289_s23  ;;  %v4974_v44 = vadd.f32 1.0, %v11744_v61  ;;  %v4919_v12 = vadd.f32 %v14218_v1, %v14288_v6  ;;  %v4820_v28 = vadd.f32 %v10983_v0, %v13326_v54  ;;  %v4796_v18 = vpop.f32.mrb[71].mxu1 }
0x215e   :  { %11757 = vpow2.f32 %v9939_v52  ;;  %v4918_v31 = vadd.f32 %v14223_v50, %v14292_v5  ;;  %v4819_v33 = vadd.f32 %v4796_v18, %v13328_v7  ;;  %v5031_v38 = vpop.permute.xlu1 %5030 }
0x215f   :  { %11759 = vrcp.f32 %v4975_v23  ;;  %v11746_v21 = vpop.eup %11745  ;;  %v9941_v48 = vmul.f32 -1.442695, %v4919_v12  ;;  %v14302_v27 = vadd.f32 %v14196_v62, %v4820_v28 }
0x2160   :  { %11761 = vrcp.f32 %v4974_v44  ;;  %v11748_v19 = vpop.eup %11747  ;;  %v4977_v25 = vadd.f32 1.0, %v11746_v21  ;;  %v9940_v1 = vmul.f32 -1.442695, %v4918_v31  ;;  %v14305_v54 = vadd.f32 %v14196_v62, %v4819_v33 }
0x2161   :  { %11763 = vpow2.f32 %v9938_v59  ;;  %v4976_v55 = vadd.f32 1.0, %v11748_v19  ;;  %v4921_v50 = vadd.f32 %v14255_v60, %v14302_v27 }
0x2162   :  { %11765 = vpow2.f32 %v9941_v48  ;;  %v4920_v7 = vadd.f32 %v14238_v14, %v14305_v54  ;;  %v5035_v12 = vpop.permute.xlu1 %5034 }
0x2163   :  { %11767 = vrcp.f32 %v4977_v25  ;;  %v9943_v56 = vmul.f32 -1.442695, %v4921_v50 }
0x2164   :  { %v14311_v29 = vpop.eup %11749  ;;  %11769 = vrcp.f32 %v4976_v55  ;;  %v9942_v35 = vmul.f32 -1.442695, %v4920_v7 }
0x2165   :  { %v14313_v3 = vpop.eup %11751  ;;  %11771 = vpow2.f32 %v9940_v1  ;;  %v5069_v62 = vmul.f32 %v14311_v29, %v5025_v51 }
0x2166   :  { %v11754_v37 = vpop.eup %11753  ;;  %11773 = vpow2.f32 %v9943_v56  ;;  %v5068_v60 = vmul.f32 %v14313_v3, %v5023_v30  ;;  %v5037_v30 = vpop.permute.xlu0 %5036 }
0x2167   :  { %v11756_v15 = vpop.eup %11755  ;;  %v4979_v45 = vadd.f32 1.0, %v11754_v37  ;;  %11775 = vpow2.f32 %v9942_v35  ;;  %5104 = vrot.lane.b32.xlu0 %v5069_v62, %s12289_s23  ;;  %v5039_v50 = vpop.permute.xlu1 %5038 }
0x2168   :  { %v11758_v14 = vpop.eup %11757  ;;  %v4978_v39 = vadd.f32 1.0, %v11756_v15  ;;  %5102 = vrot.lane.b32.xlu1 %v5068_v60, %s12289_s23 }
0x2169   :  { %v14319_v52 = vpop.eup %11759  ;;  %11777 = vrcp.f32 %v4979_v45  ;;  %v4981_v61 = vadd.f32 1.0, %v11758_v14 }
0x216a   :  { %v14321_v23 = vpop.eup %11761  ;;  %11779 = vrcp.f32 %v4978_v39  ;;  %v5071_v51 = vmul.f32 %v14319_v52, %v5029_v2  ;;  %v5041_v1 = vpop.permute.xlu0 %5040 }
0x216b   :  { %v11764_v59 = vpop.eup %11763  ;;  %11781 = vrcp.f32 %v4981_v61  ;;  %v5070_v0 = vmul.f32 %v14321_v23, %v5027_v13  ;;  %v5043_v45 = vpop.permute.xlu1 %5042 }
0x216c   :  { %v11766_v44 = vpop.eup %11765  ;;  %v4980_v28 = vadd.f32 1.0, %v11764_v59  ;;  %5108 = vrot.lane.b32.xlu0 %v5071_v51, %s12289_s23 }
0x216d   :  { %v14326_v18 = vpop.eup %11767  ;;  %v4983_v31 = vadd.f32 1.0, %v11766_v44  ;;  %5106 = vrot.lane.b32.xlu1 %v5070_v0, %s12289_s23 }
0x216e   :  { %v14329_v33 = vpop.eup %11769  ;;  %11783 = vrcp.f32 %v4980_v28  ;;  %v5073_v2 = vmul.f32 %v14326_v18, %v5033_v57  ;;  %v5045_v60 = vpop.permute.xlu0 %5044 }
0x216f   :  { %v11772_v21 = vpop.eup %11771  ;;  %11785 = vrcp.f32 %v4983_v31  ;;  %v5072_v48 = vmul.f32 %v14329_v33, %v5031_v38 }
0x2170   :  { %v11774_v13 = vpop.eup %11773  ;;  %v4982_v19 = vadd.f32 1.0, %v11772_v21  ;;  %5112 = vrot.lane.b32.xlu0 %v5073_v2, %s12289_s23  ;;  %v17044_v2 = vmax.f32 %v13686_v53, 0.0  ;;  %v17045_v21 = vmax.f32 %v13683_v10, 0.0  ;;  %v17049_v53 = vmax.f32 %v13717_v47, 0.0 }
0x2171   :  { %v11776_v25 = vpop.eup %11775  ;;  %v4985_v55 = vadd.f32 1.0, %v11774_v13  ;;  %5110 = vrot.lane.b32.xlu1 %v5072_v48, %s12289_s23  ;;  %v17046_v48 = vmax.f32 %v13710_v36, 0.0  ;;  %v17047_v13 = vmax.f32 %v13704_v24, 0.0 }
0x2172   :  { %11787 = vrcp.f32 %v4982_v19  ;;  %v4984_v7 = vadd.f32 1.0, %v11776_v25  ;;  %v17048_v19 = vmax.f32 %v13729_v58, 0.0  ;;  %v17050_v25 = vld [vmem:[#allocation20_spill] sm:$0xff] }
0x2173   :  { %v14335_v56 = vpop.eup %11777  ;;  %11789 = vrcp.f32 %v4985_v55  ;;  %v17051_v10 = vmax.f32 %v17050_v25, 0.0  ;;  %v17054_v55 = vld [vmem:[#allocation23_spill] sm:$0xff] }
0x2174   :  { %v14337_v57 = vpop.eup %11779  ;;  %11791 = vrcp.f32 %v4984_v7  ;;  %v5075_v35 = vmul.f32 %v14335_v56, %v5037_v30  ;;  %v5049_v30 = vpop.permute.xlu0 %5048  ;;  %v17055_v24 = vmax.f32 %v17054_v55, 0.0  ;;  %v17058_v7 = vld [vmem:[#allocation25_spill] sm:$0xff] }
0x2175   :  { %v14340_v62 = vpop.eup %11781  ;;  %v5074_v37 = vmul.f32 %v14337_v57, %v5035_v12  ;;  %v5047_v12 = vpop.permute.xlu1 %5046  ;;  %v17059_v47 = vmax.f32 %v17058_v7, 0.0 }
0x2176   :  { %5116 = vrot.lane.b32.xlu0 %v5075_v35, %s12289_s23  ;;  %v5077_v38 = vmul.f32 %v14340_v62, %v5041_v1  ;;  %v17052_v1 = vld [vmem:[#allocation21_spill] sm:$0xff]  ;;  %v17060_v35 = vld [vmem:[#allocation24_spill] sm:$0xff] }
0x2177   :  { %5114 = vrot.lane.b32.xlu1 %v5074_v37, %s12289_s23  ;;  %v17053_v36 = vmax.f32 %v17052_v1, 0.0  ;;  %v17061_v37 = vmax.f32 %v17060_v35, 0.0 }
0x2178   :  { %v14346_v15 = vpop.eup %11783 }
0x2179   :  { %v14348_v14 = vpop.eup %11785  ;;  %v5076_v39 = vmul.f32 %v14346_v15, %v5039_v50  ;;  %v17056_v50 = vld [vmem:[#allocation22_spill] sm:$0xff] }
0x217a   :  { %5120 = vrot.lane.b32.xlu0 %v5077_v38, %s12289_s23  ;;  %v5079_v61 = vmul.f32 %v14348_v14, %v5045_v60  ;;  %v17057_v58 = vmax.f32 %v17056_v50, 0.0  ;;  %v17062_v38 = vld [vmem:[#allocation26_spill] sm:$0xff] }
0x217b   :  { %5118 = vrot.lane.b32.xlu1 %v5076_v39, %s12289_s23  ;;  %v17063_v60 = vmax.f32 %v17062_v38, 0.0 }
0x217c   :  { %v14354_v51 = vpop.eup %11787 }
0x217d   :  { %v14356_v59 = vpop.eup %11789  ;;  %v5078_v0 = vmul.f32 %v14354_v51, %v5043_v45  ;;  %v17064_v45 = vld [vmem:[#allocation27_spill] sm:$0xff] }
0x217e   :  { %v14359_v44 = vpop.eup %11791  ;;  %5124 = vrot.lane.b32.xlu0 %v5079_v61, %s12289_s23  ;;  %v5081_v28 = vmul.f32 %v14356_v59, %v5049_v30  ;;  %v17065_v39 = vmax.f32 %v17064_v45, 0.0  ;;  %v17066_v61 = vld [vmem:[#allocation28_spill] sm:$0xff] }
0x217f   :  { %5122 = vrot.lane.b32.xlu1 %v5078_v0, %s12289_s23  ;;  %v5080_v31 = vmul.f32 %v14359_v44, %v5047_v12  ;;  %v17067_v30 = vmax.f32 %v17066_v61, 0.0  ;;  %v17068_v0 = vld [vmem:[#allocation29_spill] sm:$0xff] }
0x2180   :  { %v17069_v12 = vmax.f32 %v17068_v0, 0.0 }
0x2182   :  { %5128 = vrot.lane.b32.xlu0 %v5081_v28, %s12289_s23 }
0x2183   :  { %5126 = vrot.lane.b32.xlu1 %v5080_v31, %s12289_s23 }
0x2186   :  { %5274 = vrot.lane.b32.xlu0 %v17044_v2, %s12287_s1 }
0x218a   :  { %5276 = vrot.lane.b32.xlu0 %v17045_v21, %s12287_s1 }
0x218e   :  { %5278 = vrot.lane.b32.xlu0 %v17046_v48, %s12287_s1 }
0x2192   :  { %5280 = vrot.lane.b32.xlu0 %v17047_v13, %s12287_s1 }
0x2196   :  { %5282 = vrot.lane.b32.xlu0 %v17048_v19, %s12287_s1 }
0x219a   :  { %5284 = vrot.lane.b32.xlu0 %v17049_v53, %s12287_s1 }
0x219e   :  { %5286 = vrot.lane.b32.xlu0 %v17051_v10, %s12287_s1 }
0x21a2   :  { %5288 = vrot.lane.b32.xlu0 %v17053_v36, %s12287_s1 }
0x21a6   :  { %5290 = vrot.lane.b32.xlu0 %v17055_v24, %s12287_s1 }
0x21aa   :  { %5292 = vrot.lane.b32.xlu0 %v17057_v58, %s12287_s1 }
0x21ae   :  { %5294 = vrot.lane.b32.xlu0 %v17059_v47, %s12287_s1 }
0x21b2   :  { %5296 = vrot.lane.b32.xlu0 %v17061_v37, %s12287_s1 }
0x21b6   :  { %5298 = vrot.lane.b32.xlu0 %v17063_v60, %s12287_s1 }
0x21ba   :  { %5300 = vrot.lane.b32.xlu0 %v17065_v39, %s12287_s1 }
0x21be   :  { %5302 = vrot.lane.b32.xlu0 %v17067_v30, %s12287_s1 }
0x21c2   :  { %5304 = vrot.lane.b32.xlu0 %v17069_v12, %s12287_s1 }
0x21ce   :  { %v5101_v28 = vpop.permute.xlu0 %5100 }
0x21cf   :  { %v5147_v31 = vadd.f32 %v5101_v28, %v14205_v46  ;;  %v5099_v2 = vpop.permute.xlu1 %5098 }
0x21d0   :  { %v5146_v21 = vadd.f32 %v5099_v2, %v14208_v17 }
0x21d1   :  { %11793 = vtanh.f32 %v5147_v31 }
0x21d2   :  { %11795 = vtanh.f32 %v5146_v21 }
0x21d9   :  { %v5105_v48 = vpop.permute.xlu0 %5104 }
0x21da   :  { %v5149_v13 = vadd.f32 %v5105_v48, %v14221_v11  ;;  %v5103_v19 = vpop.permute.xlu1 %5102 }
0x21db   :  { %v11794_v53 = vpop.eup %11793  ;;  %v5148_v25 = vadd.f32 %v5103_v19, %v14226_v4 }
0x21dc   :  { %11797 = vtanh.f32 %v5149_v13  ;;  %5212 = vrot.lane.b32.xlu1 %v11794_v53, %s12288_s22  ;;  %v11796_v1 = vpop.eup %11795 }
0x21dd   :  { %11799 = vtanh.f32 %v5148_v25 }
0x21de   :  { %v5109_v10 = vpop.permute.xlu0 %5108 }
0x21df   :  { %v5151_v46 = vadd.f32 %v5109_v10, %v14233_v49  ;;  %v5107_v36 = vpop.permute.xlu1 %5106 }
0x21e0   :  { %5210 = vrot.lane.b32.xlu1 %v11796_v1, %s12288_s22  ;;  %v5150_v17 = vadd.f32 %v5107_v36, %v14236_v8 }
0x21e1   :  { %11801 = vtanh.f32 %v5151_v46 }
0x21e2   :  { %v5113_v55 = vpop.permute.xlu0 %5112  ;;  %11803 = vtanh.f32 %v5150_v17 }
0x21e3   :  { %v5153_v4 = vadd.f32 %v5113_v55, %v14245_v16  ;;  %v5111_v24 = vpop.permute.xlu1 %5110 }
0x21e4   :  { %v5152_v49 = vadd.f32 %v5111_v24, %v14248_v22 }
0x21e5   :  { %11805 = vtanh.f32 %v5153_v4 }
0x21e6   :  { %v11798_v11 = vpop.eup %11797  ;;  %11807 = vtanh.f32 %v5152_v49 }
0x21e7   :  { %5216 = vrot.lane.b32.xlu1 %v11798_v11, %s12288_s22  ;;  %v11800_v50 = vpop.eup %11799  ;;  %v5178_v11 = vsub.f32 1.0, %v14277_v43 }
0x21e8   :  { %v5117_v58 = vpop.permute.xlu0 %5116 }
0x21e9   :  { %v5155_v8 = vadd.f32 %v5117_v58, %v14258_v32  ;;  %v5115_v47 = vpop.permute.xlu1 %5114 }
0x21ea   :  { %v5154_v16 = vadd.f32 %v5115_v47, %v14261_v42 }
0x21eb   :  { %5214 = vrot.lane.b32.xlu1 %v11800_v50, %s12288_s22  ;;  %v11802_v7 = vpop.eup %11801  ;;  %11809 = vtanh.f32 %v5155_v8 }
0x21ec   :  { %v11804_v35 = vpop.eup %11803  ;;  %v5121_v37 = vpop.permute.xlu0 %5120  ;;  %11811 = vtanh.f32 %v5154_v16 }
0x21ed   :  { %v5157_v22 = vadd.f32 %v5121_v37, %v14270_v9  ;;  %v5119_v60 = vpop.permute.xlu1 %5118 }
0x21ee   :  { %v5156_v32 = vadd.f32 %v5119_v60, %v14275_v41 }
0x21ef   :  { %5220 = vrot.lane.b32.xlu1 %v11802_v7, %s12288_s22  ;;  %v11806_v38 = vpop.eup %11805  ;;  %11813 = vtanh.f32 %v5157_v22 }
0x21f0   :  { %v11808_v45 = vpop.eup %11807  ;;  %v5125_v39 = vpop.permute.xlu0 %5124  ;;  %11815 = vtanh.f32 %v5156_v32 }
0x21f1   :  { %v5123_v30 = vpop.permute.xlu1 %5122  ;;  %v5159_v42 = vadd.f32 %v5125_v39, %v14288_v6 }
0x21f2   :  { %v5158_v9 = vadd.f32 %v5123_v30, %v14292_v5 }
0x21f3   :  { %5218 = vrot.lane.b32.xlu1 %v11804_v35, %s12288_s22  ;;  %11817 = vtanh.f32 %v5159_v42 }
0x21f4   :  { %11819 = vtanh.f32 %v5158_v9  ;;  %v5129_v31 = vpop.permute.xlu0 %5128 }
0x21f5   :  { %v11810_v61 = vpop.eup %11809  ;;  %v5127_v12 = vpop.permute.xlu1 %5126  ;;  %v5161_v21 = vadd.f32 %v5129_v31, %v14302_v27  ;;  %v5179_v27 = vsub.f32 1.0, %v14272_v63 }
0x21f6   :  { %v11812_v0 = vpop.eup %11811  ;;  %v5160_v41 = vadd.f32 %v5127_v12, %v14305_v54 }
0x21f7   :  { %5224 = vrot.lane.b32.xlu1 %v11806_v38, %s12288_s22 }
0x21f8   :  { %11821 = vtanh.f32 %v5160_v41  ;;  %v5275_v54 = vpop.permute.xlu0 %5274 }
0x21f9   :  { %v11814_v28 = vpop.eup %11813  ;;  %11823 = vtanh.f32 %v5161_v21  ;;  %v5322_v24 = vmul.f32 %v14277_v43, %v5275_v54  ;;  %v5180_v43 = vsub.f32 1.0, %v14313_v3 }
0x21fa   :  { %v11816_v2 = vpop.eup %11815 }
0x21fb   :  { %5222 = vrot.lane.b32.xlu1 %v11808_v45, %s12288_s22  ;;  %v5183_v45 = vsub.f32 1.0, %v14319_v52 }
0x21fc   :  { %v5277_v19 = vpop.permute.xlu0 %5276 }
0x21fd   :  { %v11818_v6 = vpop.eup %11817  ;;  %v5323_v46 = vmul.f32 %v14272_v63, %v5277_v19  ;;  %v5181_v63 = vsub.f32 1.0, %v14311_v29 }
0x21fe   :  { %v11820_v48 = vpop.eup %11819 }
0x21ff   :  { %5228 = vrot.lane.b32.xlu1 %v11810_v61, %s12288_s22 }
0x2200   :  { %v5279_v53 = vpop.permute.xlu0 %5278 }
0x2201   :  { %v5324_v38 = vmul.f32 %v14313_v3, %v5279_v53  ;;  %v5182_v3 = vsub.f32 1.0, %v14321_v23 }
0x2202   :  { %v11822_v5 = vpop.eup %11821 }
0x2203   :  { %5226 = vrot.lane.b32.xlu1 %v11812_v0, %s12288_s22  ;;  %v11824_v13 = vpop.eup %11823 }
0x2204   :  { %v5281_v25 = vpop.permute.xlu0 %5280 }
0x2205   :  { %v5325_v8 = vmul.f32 %v14311_v29, %v5281_v25 }
0x2207   :  { %5232 = vrot.lane.b32.xlu1 %v11814_v28, %s12288_s22 }
0x2208   :  { %v5283_v10 = vpop.permute.xlu0 %5282 }
0x2209   :  { %v5326_v0 = vmul.f32 %v14321_v23, %v5283_v10  ;;  %v5184_v23 = vsub.f32 1.0, %v14329_v33 }
0x220b   :  { %5230 = vrot.lane.b32.xlu1 %v11816_v2, %s12288_s22 }
0x220c   :  { %v5285_v36 = vpop.permute.xlu0 %5284 }
0x220d   :  { %v5327_v29 = vmul.f32 %v14319_v52, %v5285_v36  ;;  %v5185_v52 = vsub.f32 1.0, %v14326_v18 }
0x220f   :  { %5236 = vrot.lane.b32.xlu1 %v11818_v6, %s12288_s22 }
0x2210   :  { %v5287_v49 = vpop.permute.xlu0 %5286 }
0x2213   :  { %5234 = vrot.lane.b32.xlu1 %v11820_v48, %s12288_s22 }
0x2214   :  { %v5289_v35 = vpop.permute.xlu0 %5288 }
0x2215   :  { %v5329_v31 = vmul.f32 %v14326_v18, %v5289_v35  ;;  %v5187_v18 = vsub.f32 1.0, %v14335_v56 }
0x2217   :  { %5238 = vrot.lane.b32.xlu1 %v11822_v5, %s12288_s22  ;;  %v5328_v5 = vmul.f32 %v14329_v33, %v5287_v49  ;;  %v5186_v33 = vsub.f32 1.0, %v14337_v57 }
0x2218   :  { %v5291_v32 = vpop.permute.xlu0 %5290 }
0x221b   :  { %5240 = vrot.lane.b32.xlu1 %v11824_v13, %s12288_s22 }
0x221c   :  { %v5293_v12 = vpop.permute.xlu0 %5292 }
0x221d   :  { %v5331_v53 = vmul.f32 %v14335_v56, %v5293_v12  ;;  %v5189_v56 = vsub.f32 1.0, %v14340_v62 }
0x2220   :  { %v5295_v6 = vpop.permute.xlu0 %5294 }
0x2224   :  { %v5297_v10 = vpop.permute.xlu0 %5296 }
0x224e   :  { %v5213_v1 = vpop.permute.xlu1 %5212 }
0x224f   :  { %v5259_v17 = vmul.f32 %v5213_v1, %v5179_v27 }
0x2251   :  { %v14449_v55 = vadd.f32 %v5323_v46, %v5259_v17  ;;  %v5330_v46 = vmul.f32 %v14337_v57, %v5291_v32  ;;  %v5188_v57 = vsub.f32 1.0, %v14346_v15 }
0x2252   :  { %v5211_v4 = vpop.permute.xlu1 %5210 }
0x2253   :  { %v5258_v50 = vmul.f32 %v5211_v4, %v5178_v11  ;;  %5372 = vrot.lane.b32.xlu0 %v14449_v55, %s12288_s22  ;;  %v5299_v11 = vpop.permute.xlu0 %5298 }
0x2255   :  { %v14455_v58 = vadd.f32 %v5322_v24, %v5258_v50  ;;  %v5333_v24 = vmul.f32 %v14340_v62, %v5297_v10  ;;  %v5191_v62 = vsub.f32 1.0, %v14348_v14 }
0x2257   :  { %5370 = vrot.lane.b32.xlu1 %v14455_v58, %s12288_s22 }
0x2259   :  { %v5217_v7 = vpop.permute.xlu1 %5216 }
0x225a   :  { %v5261_v47 = vmul.f32 %v5217_v7, %v5181_v63  ;;  %v5332_v7 = vmul.f32 %v14346_v15, %v5295_v6  ;;  %v5190_v15 = vsub.f32 1.0, %v14354_v51  ;;  %v17071_v6 = vld [vmem:[#allocation31_spill] sm:$0xff] }
0x225c   :  { %v14461_v16 = vadd.f32 %v5325_v8, %v5261_v47  ;;  %v5301_v47 = vpop.permute.xlu0 %5300 }
0x225d   :  { %v5215_v37 = vpop.permute.xlu1 %5214 }
0x225e   :  { %v5260_v22 = vmul.f32 %v5215_v37, %v5180_v43  ;;  %5376 = vrot.lane.b32.xlu0 %v14461_v16, %s12288_s22  ;;  %v5335_v37 = vmul.f32 %v14348_v14, %v5301_v47  ;;  %v5192_v14 = vsub.f32 1.0, %v14359_v44 }
0x2260   :  { %v14467_v60 = vadd.f32 %v5324_v38, %v5260_v22 }
0x2261   :  { %v5221_v39 = vpop.permute.xlu1 %5220 }
0x2262   :  { %v5263_v61 = vmul.f32 %v5221_v39, %v5183_v45  ;;  %5374 = vrot.lane.b32.xlu1 %v14467_v60, %s12288_s22  ;;  %v5303_v45 = vpop.permute.xlu0 %5302  ;;  %v5334_v39 = vmul.f32 %v14354_v51, %v5299_v11  ;;  %v5193_v51 = vsub.f32 1.0, %v14356_v59 }
0x2264   :  { %v14473_v30 = vadd.f32 %v5327_v29, %v5263_v61 }
0x2265   :  { %v5219_v42 = vpop.permute.xlu1 %5218 }
0x2266   :  { %v5262_v9 = vmul.f32 %v5219_v42, %v5182_v3  ;;  %5380 = vrot.lane.b32.xlu0 %v14473_v30, %s12288_s22  ;;  %v5336_v42 = vmul.f32 %v14359_v44, %v5303_v45 }
0x2268   :  { %v14479_v28 = vadd.f32 %v5326_v0, %v5262_v9  ;;  %v5305_v9 = vpop.permute.xlu0 %5304 }
0x2269   :  { %v5225_v41 = vpop.permute.xlu1 %5224 }
0x226a   :  { %v5265_v2 = vmul.f32 %v5225_v41, %v5185_v52  ;;  %5378 = vrot.lane.b32.xlu1 %v14479_v28, %s12288_s22  ;;  %v5337_v41 = vmul.f32 %v14356_v59, %v5305_v9  ;;  %v17070_v59 = vld [vmem:[#allocation30_spill] sm:$0xff] }
0x226c   :  { %v14485_v21 = vadd.f32 %v5329_v31, %v5265_v2 }
0x226d   :  { %v5223_v48 = vpop.permute.xlu1 %5222 }
0x226e   :  { %v5264_v13 = vmul.f32 %v5223_v48, %v5184_v23  ;;  %5384 = vrot.lane.b32.xlu0 %v14485_v21, %s12288_s22  ;;  %v17072_v48 = vld [vmem:[#allocation7_spill] sm:$0xff] }
0x2270   :  { %v14491_v54 = vadd.f32 %v5328_v5, %v5264_v13 }
0x2271   :  { %v5229_v19 = vpop.permute.xlu1 %5228 }
0x2272   :  { %v5267_v25 = vmul.f32 %v5229_v19, %v5187_v18  ;;  %5382 = vrot.lane.b32.xlu1 %v14491_v54, %s12288_s22 }
0x2274   :  { %v14497_v27 = vadd.f32 %v5331_v53, %v5267_v25 }
0x2275   :  { %v5227_v1 = vpop.permute.xlu1 %5226 }
0x2276   :  { %v5266_v36 = vmul.f32 %v5227_v1, %v5186_v33  ;;  %5388 = vrot.lane.b32.xlu0 %v14497_v27, %s12288_s22 }
0x2278   :  { %v14503_v17 = vadd.f32 %v5330_v46, %v5266_v36 }
0x2279   :  { %v5233_v4 = vpop.permute.xlu1 %5232 }
0x227a   :  { %v5269_v50 = vmul.f32 %v5233_v4, %v5189_v56  ;;  %5386 = vrot.lane.b32.xlu1 %v14503_v17, %s12288_s22 }
0x227c   :  { %v14509_v49 = vadd.f32 %v5333_v24, %v5269_v50 }
0x227d   :  { %v5231_v63 = vpop.permute.xlu1 %5230 }
0x227e   :  { %v5268_v8 = vmul.f32 %v5231_v63, %v5188_v57  ;;  %5392 = vrot.lane.b32.xlu0 %v14509_v49, %s12288_s22  ;;  %v14585_v57 = vld [vmem:[#allocation4 + $0x328] ss:$0 sm:$0xff] }
0x2280   :  { %v14515_v35 = vadd.f32 %v5332_v7, %v5268_v8  ;;  %v14588_v7 = vld [vmem:[#allocation4 + $0x80] ss:$0 sm:$0xff] }
0x2281   :  { %v5237_v43 = vpop.permute.xlu1 %5236 }
0x2282   :  { %v5271_v38 = vmul.f32 %v5237_v43, %v5191_v62  ;;  %5390 = vrot.lane.b32.xlu1 %v14515_v35, %s12288_s22 }
0x2284   :  { %v14521_v22 = vadd.f32 %v5335_v37, %v5271_v38 }
0x2285   :  { %v5235_v32 = vpop.permute.xlu1 %5234 }
0x2286   :  { %v5270_v29 = vmul.f32 %v5235_v32, %v5190_v15  ;;  %5396 = vrot.lane.b32.xlu0 %v14521_v22, %s12288_s22 }
0x2288   :  { %v14527_v61 = vadd.f32 %v5334_v39, %v5270_v29 }
0x2289   :  { %v5239_v3 = vpop.permute.xlu1 %5238 }
0x228a   :  { %v5272_v0 = vmul.f32 %v5239_v3, %v5192_v14  ;;  %5394 = vrot.lane.b32.xlu1 %v14527_v61, %s12288_s22 }
0x228c   :  { %v14533_v12 = vadd.f32 %v5336_v42, %v5272_v0 }
0x228d   :  { %v5241_v52 = vpop.permute.xlu1 %5240 }
0x228e   :  { %v5273_v31 = vmul.f32 %v5241_v52, %v5193_v51  ;;  %5398 = vrot.lane.b32.xlu1 %v14533_v12, %s12288_s22 }
0x2290   :  { %v14539_v2 = vadd.f32 %v5337_v41, %v5273_v31 }
0x2292   :  { %5400 = vrot.lane.b32.xlu0 %v14539_v2, %s12288_s22 }
0x22c5   :  { %v5373_v23 = vpop.permute.xlu0 %5372 }
0x22c9   :  { %v5371_v44 = vpop.permute.xlu1 %5370 }
0x22ca   :  { %10992 = vmatprep.mubr.msk.f32.mxu0 %vm130_vm3, %v5371_v44  ;;  %11024 = vmatprep.mubr.msk.f32.mxu1 %vm130_vm3, %v5371_v44 }
0x22cb   :  { %10993 = vmatmul.mubr.msk.f32.vlgmr.msra.gmra.mrb[60].mxu0 %vm130_vm3, %v5373_v23  ;;  %11025 = vmatmul.mubr.msk.f32.vlgmr.msra.gmra.mrb[72].mxu1 %vm130_vm3, %v5373_v23 }
0x22cc   :  { %11441 = vmatpush3.bf16.msra.mxu0 %v17070_v59  ;;  %11449 = vmatpush3.bf16.msra.mxu1 %v12991_v34 }
0x22cd   :  { %11443 = vmatprep.subr.bf16.mxu0 %v17071_v6  ;;  %11451 = vmatprep.subr.bf16.mxu1 %v17072_v48 }
0x22d0   :  { %11445 = vmatpush3.bf16.msra.mxu0 %v17071_v6  ;;  %11453 = vmatpush3.bf16.msra.mxu1 %v17072_v48  ;;  %v5377_v13 = vpop.permute.xlu0 %5376 }
0x22d1   :  { %11455 = vmatprep.subr.bf16.mxu0 %v13665_v20  ;;  %11463 = vmatprep.subr.bf16.mxu1 %v17070_v59 }
0x22d4   :  { %v5375_v5 = vpop.permute.xlu1 %5374 }
0x22d5   :  { %10995 = vmatprep.mubr.msk.f32.mxu0 %vm130_vm3, %v5375_v5  ;;  %11027 = vmatprep.mubr.msk.f32.mxu1 %vm130_vm3, %v5375_v5 }
0x22d6   :  { %10996 = vmatmul.mubr.msk.f32.gmra.mrb[62].mxu0 %vm130_vm3, %v5377_v13  ;;  %11028 = vmatmul.mubr.msk.f32.gmra.mrb[74].mxu1 %vm130_vm3, %v5377_v13 }
0x22d8   :  { %v5381_v19 = vpop.permute.xlu0 %5380 }
0x22dc   :  { %v5379_v18 = vpop.permute.xlu1 %5378 }
0x22dd   :  { %10998 = vmatprep.mubr.msk.f32.mxu0 %vm130_vm3, %v5379_v18  ;;  %11030 = vmatprep.mubr.msk.f32.mxu1 %vm130_vm3, %v5379_v18 }
0x22de   :  { %10999 = vmatmul.mubr.msk.f32.gmra.mrb[64].mxu0 %vm130_vm3, %v5381_v19  ;;  %11031 = vmatmul.mubr.msk.f32.gmra.mrb[76].mxu1 %vm130_vm3, %v5381_v19 }
0x22e0   :  { %v5385_v25 = vpop.permute.xlu0 %5384 }
0x22e4   :  { %v5383_v53 = vpop.permute.xlu1 %5382 }
0x22e5   :  { %11001 = vmatprep.mubr.msk.f32.mxu0 %vm130_vm3, %v5383_v53  ;;  %11033 = vmatprep.mubr.msk.f32.mxu1 %vm130_vm3, %v5383_v53 }
0x22e6   :  { %11002 = vmatmul.mubr.msk.f32.gmra.mrb[66].mxu0 %vm130_vm3, %v5385_v25  ;;  %11034 = vmatmul.mubr.msk.f32.gmra.mrb[78].mxu1 %vm130_vm3, %v5385_v25 }
0x22e8   :  { %v5389_v33 = vpop.permute.xlu0 %5388 }
0x22ec   :  { %v5387_v10 = vpop.permute.xlu1 %5386 }
0x22ed   :  { %11004 = vmatprep.mubr.msk.f32.mxu0 %vm130_vm3, %v5387_v10  ;;  %11036 = vmatprep.mubr.msk.f32.mxu1 %vm130_vm3, %v5387_v10 }
0x22ee   :  { %11005 = vmatmul.mubr.msk.f32.gmra.mrb[68].mxu0 %vm130_vm3, %v5389_v33  ;;  %11037 = vmatmul.mubr.msk.f32.gmra.mrb[80].mxu1 %vm130_vm3, %v5389_v33 }
0x22f0   :  { %v5393_v46 = vpop.permute.xlu0 %5392 }
0x22f4   :  { %v5391_v1 = vpop.permute.xlu1 %5390 }
0x22f5   :  { %11007 = vmatprep.mubr.msk.f32.mxu0 %vm130_vm3, %v5391_v1  ;;  %11039 = vmatprep.mubr.msk.f32.mxu1 %vm130_vm3, %v5391_v1 }
0x22f6   :  { %11008 = vmatmul.mubr.msk.f32.gmra.mrb[70].mxu0 %vm130_vm3, %v5393_v46  ;;  %11040 = vmatmul.mubr.msk.f32.gmra.mrb[82].mxu1 %vm130_vm3, %v5393_v46 }
0x22f8   :  { %v5397_v56 = vpop.permute.xlu0 %5396 }
0x22fc   :  { %v5395_v36 = vpop.permute.xlu1 %5394 }
0x22fd   :  { %11010 = vmatprep.mubr.msk.f32.mxu0 %vm130_vm3, %v5395_v36  ;;  %11042 = vmatprep.mubr.msk.f32.mxu1 %vm130_vm3, %v5395_v36 }
0x22fe   :  { %11011 = vmatmul.mubr.msk.f32.gmra.mrb[72].mxu0 %vm130_vm3, %v5397_v56  ;;  %11043 = vmatmul.mubr.msk.f32.gmra.mrb[84].mxu1 %vm130_vm3, %v5397_v56 }
0x2300   :  { %v5399_v11 = vpop.permute.xlu1 %5398 }
0x2301   :  { %11013 = vmatprep.mubr.msk.f32.mxu0 %vm130_vm3, %v5399_v11  ;;  %11045 = vmatprep.mubr.msk.f32.mxu1 %vm130_vm3, %v5399_v11 }
0x2304   :  { %v5401_v4 = vpop.permute.xlu0 %5400 }
0x2305   :  { %11014 = vmatmul.mubr.msk.f32.gmra.mrb[74].mxu0 %vm130_vm3, %v5401_v4  ;;  %11046 = vmatmul.mubr.msk.f32.gmra.mrb[86].mxu1 %vm130_vm3, %v5401_v4 }
0x239e   :  { %v10994_v24 = vpop.f32.mrb[60].mxu0  ;;  %v14583_v50 = vpop.f32.mrb[72].mxu1 }
0x239f   :  { %v5506_v63 = vadd.f32 %v14585_v57, %v10994_v24  ;;  %v14592_v8 = vadd.f32 %v14588_v7, %v14583_v50  ;;  %v5500_v47 = vpop.f32.mrb[61].mxu0  ;;  %v14594_v62 = vpop.f32.mrb[73].mxu1 }
0x23a0   :  { %v5501_v43 = vadd.f32 %v14585_v57, %v5500_v47  ;;  %v14599_v37 = vadd.f32 %v14588_v7, %v14594_v62 }
0x23a1   :  { %9638 = vst.msk [vmem:[%s16967_s4 + $0x8] sm:$0xff] %vm9620_vm9, %v5506_v63  ;;  %v5743_v38 = vsel %vm130_vm3, %v14592_v8, 0.0 }
0x23a2   :  { %9637 = vst.msk [vmem:[%s16967_s4] sm:$0xff] %vm9620_vm9, %v5501_v43  ;;  %5744 = vadd.xlane.f32.xlu0 %v5743_v38  ;;  %v5740_v15 = vsel %vm130_vm3, %v14599_v37, 0.0 }
0x23a3   :  { %5741 = vadd.xlane.f32.xlu1 %v5740_v15 }
0x23a9   :  { %v10997_v45 = vpop.f32.mrb[62].mxu0  ;;  %v14613_v32 = vpop.f32.mrb[74].mxu1 }
0x23aa   :  { %v5516_v39 = vadd.f32 %v14585_v57, %v10997_v45  ;;  %v5510_v29 = vpop.f32.mrb[63].mxu0  ;;  %v14616_v14 = vpop.f32.mrb[75].mxu1  ;;  %v14629_v0 = vadd.f32 %v14588_v7, %v14613_v32 }
0x23ab   :  { %v5511_v3 = vadd.f32 %v14585_v57, %v5510_v29  ;;  %v14621_v42 = vadd.f32 %v14588_v7, %v14616_v14 }
0x23ac   :  { %9640 = vst.msk [vmem:[%s16967_s4 + $0x18] sm:$0xff] %vm9620_vm9, %v5516_v39  ;;  %v5749_v41 = vsel %vm130_vm3, %v14629_v0, 0.0 }
0x23ad   :  { %9639 = vst.msk [vmem:[%s16967_s4 + $0x10] sm:$0xff] %vm9620_vm9, %v5511_v3  ;;  %v5746_v9 = vsel %vm130_vm3, %v14621_v42, 0.0 }
0x23ae   :  { %5747 = vadd.xlane.f32.xlu0 %v5746_v9 }
0x23b1   :  { %v11000_v51 = vpop.f32.mrb[64].mxu0  ;;  %v14637_v52 = vpop.f32.mrb[76].mxu1 }
0x23b2   :  { %v5526_v31 = vadd.f32 %v14585_v57, %v11000_v51  ;;  %v14644_v44 = vadd.f32 %v14588_v7, %v14637_v52  ;;  %5750 = vadd.xlane.f32.xlu0 %v5749_v41  ;;  %v5520_v23 = vpop.f32.mrb[65].mxu0  ;;  %v14646_v5 = vpop.f32.mrb[77].mxu1 }
0x23b3   :  { %v5521_v13 = vadd.f32 %v14585_v57, %v5520_v23  ;;  %v14651_v18 = vadd.f32 %v14588_v7, %v14646_v5 }
0x23b4   :  { %9642 = vst.msk [vmem:[%s16967_s4 + $0x28] sm:$0xff] %vm9620_vm9, %v5526_v31  ;;  %v5755_v19 = vsel %vm130_vm3, %v14644_v44, 0.0 }
0x23b5   :  { %9641 = vst.msk [vmem:[%s16967_s4 + $0x20] sm:$0xff] %vm9620_vm9, %v5521_v13  ;;  %v5752_v53 = vsel %vm130_vm3, %v14651_v18, 0.0 }
0x23b6   :  { %5756 = vadd.xlane.f32.xlu0 %v5755_v19  ;;  %5753 = vadd.xlane.f32.xlu1 %v5752_v53 }
0x23b9   :  { %v11003_v25 = vpop.f32.mrb[66].mxu0  ;;  %v14665_v10 = vpop.f32.mrb[78].mxu1 }
0x23ba   :  { %v5536_v33 = vadd.f32 %v14585_v57, %v11003_v25  ;;  %v14670_v1 = vadd.f32 %v14588_v7, %v14665_v10  ;;  %v5530_v46 = vpop.f32.mrb[67].mxu0  ;;  %v14672_v36 = vpop.f32.mrb[79].mxu1 }
0x23bb   :  { %v5531_v56 = vadd.f32 %v14585_v57, %v5530_v46  ;;  %v14677_v11 = vadd.f32 %v14588_v7, %v14672_v36 }
0x23bc   :  { %9644 = vst.msk [vmem:[%s16967_s4 + $0x38] sm:$0xff] %vm9620_vm9, %v5536_v33  ;;  %v5761_v4 = vsel %vm130_vm3, %v14670_v1, 0.0 }
0x23bd   :  { %9643 = vst.msk [vmem:[%s16967_s4 + $0x30] sm:$0xff] %vm9620_vm9, %v5531_v56  ;;  %5762 = vadd.xlane.f32.xlu0 %v5761_v4  ;;  %v5758_v24 = vsel %vm130_vm3, %v14677_v11, 0.0 }
0x23be   :  { %5759 = vadd.xlane.f32.xlu1 %v5758_v24 }
0x23c1   :  { %v11006_v63 = vpop.f32.mrb[68].mxu0  ;;  %v14691_v47 = vpop.f32.mrb[80].mxu1 }
0x23c2   :  { %v5546_v43 = vadd.f32 %v14585_v57, %v11006_v63  ;;  %v14696_v38 = vadd.f32 %v14588_v7, %v14691_v47  ;;  %v5540_v15 = vpop.f32.mrb[69].mxu0  ;;  %v14698_v45 = vpop.f32.mrb[81].mxu1 }
0x23c3   :  { %v5541_v39 = vadd.f32 %v14585_v57, %v5540_v15  ;;  %v14703_v29 = vadd.f32 %v14588_v7, %v14698_v45 }
0x23c4   :  { %9646 = vst.msk [vmem:[%s16967_s4 + $0x48] sm:$0xff] %vm9620_vm9, %v5546_v43  ;;  %v5767_v3 = vsel %vm130_vm3, %v14696_v38, 0.0 }
0x23c5   :  { %9645 = vst.msk [vmem:[%s16967_s4 + $0x40] sm:$0xff] %vm9620_vm9, %v5541_v39  ;;  %5768 = vadd.xlane.f32.xlu0 %v5767_v3  ;;  %v5764_v9 = vsel %vm130_vm3, %v14703_v29, 0.0 }
0x23c6   :  { %5765 = vadd.xlane.f32.xlu1 %v5764_v9 }
0x23c9   :  { %v11009_v51 = vpop.f32.mrb[70].mxu0  ;;  %v14717_v41 = vpop.f32.mrb[82].mxu1 }
0x23ca   :  { %v5556_v31 = vadd.f32 %v14585_v57, %v11009_v51  ;;  %v14722_v23 = vadd.f32 %v14588_v7, %v14717_v41  ;;  %v5550_v13 = vpop.f32.mrb[71].mxu0  ;;  %v14724_v19 = vpop.f32.mrb[83].mxu1 }
0x23cb   :  { %v5551_v53 = vadd.f32 %v14585_v57, %v5550_v13  ;;  %v14729_v25 = vadd.f32 %v14588_v7, %v14724_v19 }
0x23cc   :  { %9648 = vst.msk [vmem:[%s16967_s4 + $0x58] sm:$0xff] %vm9620_vm9, %v5556_v31  ;;  %v5773_v33 = vsel %vm130_vm3, %v14722_v23, 0.0 }
0x23cd   :  { %9647 = vst.msk [vmem:[%s16967_s4 + $0x50] sm:$0xff] %vm9620_vm9, %v5551_v53  ;;  %5774 = vadd.xlane.f32.xlu0 %v5773_v33  ;;  %v5770_v46 = vsel %vm130_vm3, %v14729_v25, 0.0 }
0x23ce   :  { %5771 = vadd.xlane.f32.xlu1 %v5770_v46 }
0x23d1   :  { %v11012_v56 = vpop.f32.mrb[72].mxu0  ;;  %v14743_v4 = vpop.f32.mrb[84].mxu1 }
0x23d2   :  { %v5566_v24 = vadd.f32 %v14585_v57, %v11012_v56  ;;  %v14748_v63 = vadd.f32 %v14588_v7, %v14743_v4  ;;  %v5560_v43 = vpop.f32.mrb[73].mxu0  ;;  %v14750_v15 = vpop.f32.mrb[85].mxu1 }
0x23d3   :  { %v5561_v39 = vadd.f32 %v14585_v57, %v5560_v43  ;;  %v14755_v3 = vadd.f32 %v14588_v7, %v14750_v15 }
0x23d4   :  { %9650 = vst.msk [vmem:[%s16967_s4 + $0x68] sm:$0xff] %vm9620_vm9, %v5566_v24  ;;  %v5779_v9 = vsel %vm130_vm3, %v14748_v63, 0.0 }
0x23d5   :  { %9649 = vst.msk [vmem:[%s16967_s4 + $0x60] sm:$0xff] %vm9620_vm9, %v5561_v39  ;;  %5780 = vadd.xlane.f32.xlu0 %v5779_v9  ;;  %v5776_v51 = vsel %vm130_vm3, %v14755_v3, 0.0 }
0x23d6   :  { %5777 = vadd.xlane.f32.xlu1 %v5776_v51 }
0x23d8   :  { %v11015_v31 = vpop.f32.mrb[74].mxu0  ;;  %v14769_v13 = vpop.f32.mrb[86].mxu1 }
0x23d9   :  { %v5576_v53 = vadd.f32 %v14585_v57, %v11015_v31  ;;  %v14774_v33 = vadd.f32 %v14588_v7, %v14769_v13  ;;  %v5570_v46 = vpop.f32.mrb[75].mxu0  ;;  %v14776_v56 = vpop.f32.mrb[87].mxu1 }
0x23da   :  { %v5571_v24 = vadd.f32 %v14585_v57, %v5570_v46  ;;  %v14781_v43 = vadd.f32 %v14588_v7, %v14776_v56 }
0x23db   :  { %9652 = vst.msk [vmem:[%s16967_s4 + $0x78] sm:$0xff] %vm9620_vm9, %v5576_v53  ;;  %v5785_v39 = vsel %vm130_vm3, %v14774_v33, 0.0 }
0x23dc   :  { %9651 = vst.msk [vmem:[%s16967_s4 + $0x70] sm:$0xff] %vm9620_vm9, %v5571_v24  ;;  %5786 = vadd.xlane.f32.xlu0 %v5785_v39  ;;  %v5782_v57 = vsel %vm130_vm3, %v14781_v43, 0.0 }
0x23dd   :  { %5783 = vadd.xlane.f32.xlu1 %v5782_v57 }
0x242f   :  { %v5745_v7 = vpop.xlane.xlu0 %5744 }
0x2430   :  { %v5789_v9 = vmul.f32 0.03125, %v5745_v7  ;;  %v5742_v51 = vpop.xlane.xlu1 %5741 }
0x2431   :  { %v5788_v31 = vmul.f32 0.03125, %v5742_v51 }
0x2432   :  { %v14796_v46 = vsub.f32 %v14592_v8, %v5789_v9 }
0x2433   :  { %v14799_v53 = vsub.f32 %v14599_v37, %v5788_v31 }
0x2434   :  { %v5821_v48 = vmul.f32 %v14796_v46, %v14796_v46 }
0x2435   :  { %v5820_v24 = vmul.f32 %v14799_v53, %v14799_v53 }
0x2436   :  { %v5839_v39 = vsel %vm130_vm3, %v5821_v48, 0.0 }
0x2437   :  { %5840 = vadd.xlane.f32.xlu0 %v5839_v39  ;;  %v5836_v57 = vsel %vm130_vm3, %v5820_v24, 0.0 }
0x2438   :  { %5837 = vadd.xlane.f32.xlu1 %v5836_v57 }
0x243b   :  { %v5748_v7 = vpop.xlane.xlu0 %5747 }
0x243c   :  { %v5790_v51 = vmul.f32 0.03125, %v5748_v7 }
0x243e   :  { %v14808_v8 = vsub.f32 %v14621_v42, %v5790_v51 }
0x243f   :  { %v5751_v9 = vpop.xlane.xlu0 %5750 }
0x2440   :  { %v5791_v37 = vmul.f32 0.03125, %v5751_v9  ;;  %v5822_v31 = vmul.f32 %v14808_v8, %v14808_v8 }
0x2442   :  { %v14813_v6 = vsub.f32 %v14629_v0, %v5791_v37  ;;  %v5842_v59 = vsel %vm130_vm3, %v5822_v31, 0.0 }
0x2443   :  { %v5757_v48 = vpop.xlane.xlu0 %5756  ;;  %5843 = vadd.xlane.f32.xlu1 %v5842_v59  ;;  %v5754_v39 = vpop.xlane.xlu1 %5753 }
0x2444   :  { %v5793_v24 = vmul.f32 0.03125, %v5757_v48  ;;  %v5792_v57 = vmul.f32 0.03125, %v5754_v39  ;;  %v5823_v7 = vmul.f32 %v14813_v6, %v14813_v6 }
0x2446   :  { %v14819_v42 = vsub.f32 %v14644_v44, %v5793_v24  ;;  %v14822_v51 = vsub.f32 %v14651_v18, %v5792_v57  ;;  %v5845_v9 = vsel %vm130_vm3, %v5823_v7, 0.0 }
0x2447   :  { %5846 = vadd.xlane.f32.xlu0 %v5845_v9 }
0x2448   :  { %v5825_v0 = vmul.f32 %v14819_v42, %v14819_v42  ;;  %v5824_v59 = vmul.f32 %v14822_v51, %v14822_v51 }
0x244a   :  { %v5763_v37 = vpop.xlane.xlu0 %5762  ;;  %v5851_v31 = vsel %vm130_vm3, %v5825_v0, 0.0  ;;  %v5848_v48 = vsel %vm130_vm3, %v5824_v59, 0.0 }
0x244b   :  { %v5795_v39 = vmul.f32 0.03125, %v5763_v37  ;;  %5852 = vadd.xlane.f32.xlu0 %v5851_v31  ;;  %5849 = vadd.xlane.f32.xlu1 %v5848_v48  ;;  %v5760_v44 = vpop.xlane.xlu1 %5759 }
0x244c   :  { %v5794_v18 = vmul.f32 0.03125, %v5760_v44 }
0x244d   :  { %v14832_v24 = vsub.f32 %v14670_v1, %v5795_v39 }
0x244e   :  { %v14835_v57 = vsub.f32 %v14677_v11, %v5794_v18 }
0x244f   :  { %v5827_v7 = vmul.f32 %v14832_v24, %v14832_v24 }
0x2450   :  { %v5826_v9 = vmul.f32 %v14835_v57, %v14835_v57 }
0x2451   :  { %v5857_v0 = vsel %vm130_vm3, %v5827_v7, 0.0 }
0x2452   :  { %v5769_v59 = vpop.xlane.xlu0 %5768  ;;  %5858 = vadd.xlane.f32.xlu0 %v5857_v0  ;;  %v5854_v37 = vsel %vm130_vm3, %v5826_v9, 0.0 }
0x2453   :  { %v5797_v31 = vmul.f32 0.03125, %v5769_v59  ;;  %5855 = vadd.xlane.f32.xlu1 %v5854_v37  ;;  %v5766_v48 = vpop.xlane.xlu1 %5765 }
0x2454   :  { %v5796_v1 = vmul.f32 0.03125, %v5766_v48 }
0x2455   :  { %v14844_v39 = vsub.f32 %v14696_v38, %v5797_v31 }
0x2456   :  { %v14847_v11 = vsub.f32 %v14703_v29, %v5796_v1 }
0x2457   :  { %v5829_v44 = vmul.f32 %v14844_v39, %v14844_v39 }
0x2458   :  { %v5828_v18 = vmul.f32 %v14847_v11, %v14847_v11 }
0x2459   :  { %v5863_v7 = vsel %vm130_vm3, %v5829_v44, 0.0 }
0x245a   :  { %v5775_v0 = vpop.xlane.xlu0 %5774  ;;  %5864 = vadd.xlane.f32.xlu0 %v5863_v7  ;;  %v5860_v9 = vsel %vm130_vm3, %v5828_v18, 0.0 }
0x245b   :  { %v5799_v59 = vmul.f32 0.03125, %v5775_v0  ;;  %5861 = vadd.xlane.f32.xlu1 %v5860_v9  ;;  %v5772_v37 = vpop.xlane.xlu1 %5771 }
0x245c   :  { %v5798_v38 = vmul.f32 0.03125, %v5772_v37 }
0x245d   :  { %v14856_v31 = vsub.f32 %v14722_v23, %v5799_v59 }
0x245e   :  { %v14859_v29 = vsub.f32 %v14729_v25, %v5798_v38 }
0x245f   :  { %v5831_v48 = vmul.f32 %v14856_v31, %v14856_v31 }
0x2460   :  { %v5830_v1 = vmul.f32 %v14859_v29, %v14859_v29 }
0x2461   :  { %v5869_v44 = vsel %vm130_vm3, %v5831_v48, 0.0 }
0x2462   :  { %v5781_v7 = vpop.xlane.xlu0 %5780  ;;  %5870 = vadd.xlane.f32.xlu0 %v5869_v44  ;;  %v5866_v18 = vsel %vm130_vm3, %v5830_v1, 0.0 }
0x2463   :  { %v5801_v0 = vmul.f32 0.03125, %v5781_v7  ;;  %5867 = vadd.xlane.f32.xlu1 %v5866_v18  ;;  %v5778_v9 = vpop.xlane.xlu1 %5777 }
0x2464   :  { %v5800_v23 = vmul.f32 0.03125, %v5778_v9 }
0x2465   :  { %v14868_v59 = vsub.f32 %v14748_v63, %v5801_v0 }
0x2466   :  { %v14871_v25 = vsub.f32 %v14755_v3, %v5800_v23 }
0x2467   :  { %v5833_v37 = vmul.f32 %v14868_v59, %v14868_v59 }
0x2468   :  { %v5832_v38 = vmul.f32 %v14871_v25, %v14871_v25 }
0x2469   :  { %v5787_v48 = vpop.xlane.xlu0 %5786  ;;  %v5875_v44 = vsel %vm130_vm3, %v5833_v37, 0.0 }
0x246a   :  { %v5803_v1 = vmul.f32 0.03125, %v5787_v48  ;;  %5876 = vadd.xlane.f32.xlu0 %v5875_v44  ;;  %v5784_v7 = vpop.xlane.xlu1 %5783  ;;  %v5872_v18 = vsel %vm130_vm3, %v5832_v38, 0.0  ;;  %v5996_v38 = vadd.f32 %v14594_v62, %v14081_v26  ;;  %v5999_v44 = vadd.f32 %v14613_v32, %v14081_v26 }
0x246b   :  { %v5802_v9 = vmul.f32 0.03125, %v5784_v7  ;;  %5873 = vadd.xlane.f32.xlu1 %v5872_v18  ;;  %v6003_v62 = vadd.f32 %v14665_v10, %v14081_v26  ;;  %v6002_v32 = vadd.f32 %v14672_v36, %v14081_v26  ;;  %v6006_v10 = vadd.f32 %v14724_v19, %v14081_v26 }
0x246c   :  { %v14880_v63 = vsub.f32 %v14774_v33, %v5803_v1  ;;  %v5997_v33 = vadd.f32 %v14583_v50, %v14081_v26  ;;  %v6001_v1 = vadd.f32 %v14637_v52, %v14081_v26  ;;  %v6000_v50 = vadd.f32 %v14646_v5, %v14081_v26 }
0x246d   :  { %v14883_v3 = vsub.f32 %v14781_v43, %v5802_v9  ;;  %v5998_v43 = vadd.f32 %v14616_v14, %v14081_v26  ;;  %v6005_v14 = vadd.f32 %v14691_v47, %v14081_v26  ;;  %v6004_v52 = vadd.f32 %v14698_v45, %v14081_v26 }
0x246e   :  { %v5835_v0 = vmul.f32 %v14880_v63, %v14880_v63  ;;  %v6007_v5 = vadd.f32 %v14717_v41, %v14081_v26  ;;  %v6009_v36 = vadd.f32 %v14743_v4, %v14081_v26  ;;  %v6008_v47 = vadd.f32 %v14750_v15, %v14081_v26 }
0x246f   :  { %v5834_v23 = vmul.f32 %v14883_v3, %v14883_v3  ;;  %v6010_v45 = vadd.f32 %v14776_v56, %v14081_v26  ;;  %v6011_v41 = vadd.f32 %v14769_v13, %v14081_v26 }
0x2470   :  { %v5881_v37 = vsel %vm130_vm3, %v5835_v0, 0.0 }
0x2471   :  { %5882 = vadd.xlane.f32.xlu0 %v5881_v37  ;;  %v5878_v48 = vsel %vm130_vm3, %v5834_v23, 0.0 }
0x2472   :  { %5879 = vadd.xlane.f32.xlu1 %v5878_v48 }
0x2483   :  { %6253 = vrot.lane.b32.xlu1 %v5996_v38, %s12288_s22 }
0x2487   :  { %6255 = vrot.lane.b32.xlu0 %v5997_v33, %s12288_s22  ;;  %6257 = vrot.lane.b32.xlu1 %v5998_v43, %s12288_s22 }
0x248b   :  { %6263 = vrot.lane.b32.xlu0 %v6001_v1, %s12288_s22  ;;  %6259 = vrot.lane.b32.xlu1 %v5999_v44, %s12288_s22 }
0x248f   :  { %6267 = vrot.lane.b32.xlu0 %v6003_v62, %s12288_s22  ;;  %6261 = vrot.lane.b32.xlu1 %v6000_v50, %s12288_s22 }
0x2493   :  { %6271 = vrot.lane.b32.xlu0 %v6005_v14, %s12288_s22  ;;  %6265 = vrot.lane.b32.xlu1 %v6002_v32, %s12288_s22 }
0x2497   :  { %6275 = vrot.lane.b32.xlu0 %v6007_v5, %s12288_s22  ;;  %6269 = vrot.lane.b32.xlu1 %v6004_v52, %s12288_s22 }
0x249b   :  { %6279 = vrot.lane.b32.xlu0 %v6009_v36, %s12288_s22  ;;  %6273 = vrot.lane.b32.xlu1 %v6006_v10, %s12288_s22 }
0x249f   :  { %6413 = vrot.lane.b32.xlu0 %v5996_v38, %s12287_s1  ;;  %6277 = vrot.lane.b32.xlu1 %v6008_v47, %s12288_s22 }
0x24a3   :  { %6415 = vrot.lane.b32.xlu0 %v5997_v33, %s12287_s1  ;;  %6281 = vrot.lane.b32.xlu1 %v6010_v45, %s12288_s22 }
0x24a7   :  { %6419 = vrot.lane.b32.xlu0 %v5999_v44, %s12287_s1  ;;  %6283 = vrot.lane.b32.xlu1 %v6011_v41, %s12288_s22  ;;  %v14957_v44 = vld [vmem:[#allocation4 + $0x88] ss:$0 sm:$0xff] }
0x24ab   :  { %6423 = vrot.lane.b32.xlu0 %v6001_v1, %s12287_s1  ;;  %6417 = vrot.lane.b32.xlu1 %v5998_v43, %s12287_s1 }
0x24af   :  { %6427 = vrot.lane.b32.xlu0 %v6003_v62, %s12287_s1  ;;  %6421 = vrot.lane.b32.xlu1 %v6000_v50, %s12287_s1 }
0x24b3   :  { %6431 = vrot.lane.b32.xlu0 %v6005_v14, %s12287_s1  ;;  %6425 = vrot.lane.b32.xlu1 %v6002_v32, %s12287_s1 }
0x24b7   :  { %6435 = vrot.lane.b32.xlu0 %v6007_v5, %s12287_s1  ;;  %6429 = vrot.lane.b32.xlu1 %v6004_v52, %s12287_s1  ;;  %v14961_v52 = vld [vmem:[#allocation4 + $0x90] ss:$0 sm:$0xff] }
0x24bb   :  { %6439 = vrot.lane.b32.xlu0 %v6009_v36, %s12287_s1  ;;  %6433 = vrot.lane.b32.xlu1 %v6006_v10, %s12287_s1 }
0x24bf   :  { %6443 = vrot.lane.b32.xlu0 %v6011_v41, %s12287_s1  ;;  %6437 = vrot.lane.b32.xlu1 %v6008_v47, %s12287_s1 }
0x24c3   :  { %6441 = vrot.lane.b32.xlu1 %v6010_v45, %s12287_s1 }
0x24c4   :  { %v5841_v19 = vpop.xlane.xlu0 %5840 }
0x24c5   :  { %v5885_v4 = vmul.f32 0.03125, %v5841_v19  ;;  %v5838_v15 = vpop.xlane.xlu1 %5837 }
0x24c6   :  { %v5884_v13 = vmul.f32 0.03125, %v5838_v15 }
0x24c7   :  { %v5901_v56 = vadd.f32 1e-05, %v5885_v4 }
0x24c8   :  { %v5900_v7 = vadd.f32 1e-05, %v5884_v13 }
0x24c9   :  { %11825 = vrsqrt.f32 %v5901_v56 }
0x24ca   :  { %11827 = vrsqrt.f32 %v5900_v7 }
0x24d0   :  { %v5844_v18 = vpop.xlane.xlu1 %5843 }
0x24d1   :  { %v5886_v9 = vmul.f32 0.03125, %v5844_v18 }
0x24d3   :  { %v11826_v0 = vpop.eup %11825  ;;  %v5902_v23 = vadd.f32 1e-05, %v5886_v9 }
0x24d4   :  { %v11828_v37 = vpop.eup %11827  ;;  %v5933_v48 = vmul.f32 %v11826_v0, %v14796_v46  ;;  %v5847_v38 = vpop.xlane.xlu0 %5846 }
0x24d5   :  { %11829 = vrsqrt.f32 %v5902_v23  ;;  %v5887_v33 = vmul.f32 0.03125, %v5847_v38  ;;  %v5932_v43 = vmul.f32 %v11828_v37, %v14799_v53 }
0x24d6   :  { %v5949_v1 = vmul.f32 %v14957_v44, %v5933_v48 }
0x24d7   :  { %v5903_v50 = vadd.f32 1e-05, %v5887_v33  ;;  %v5948_v62 = vmul.f32 %v14957_v44, %v5932_v43 }
0x24d8   :  { %v5853_v32 = vpop.xlane.xlu0 %5852  ;;  %v5850_v14 = vpop.xlane.xlu1 %5849  ;;  %v5965_v5 = vadd.f32 %v14961_v52, %v5949_v1 }
0x24d9   :  { %11831 = vrsqrt.f32 %v5903_v50  ;;  %v5889_v46 = vmul.f32 0.03125, %v5853_v32  ;;  %v5888_v10 = vmul.f32 0.03125, %v5850_v14  ;;  %v5964_v36 = vadd.f32 %v14961_v52, %v5948_v62 }
0x24da   :  { %v5981_v41 = vmax.f32 %v5965_v5, 0.0 }
0x24db   :  { %v5905_v47 = vadd.f32 1e-05, %v5889_v46  ;;  %v5904_v53 = vadd.f32 1e-05, %v5888_v10  ;;  %v5980_v45 = vmax.f32 %v5964_v36, 0.0 }
0x24dd   :  { %11833 = vrsqrt.f32 %v5905_v47  ;;  %11056 = vmatprep.mubr.msk.f32.mxu0 %vm130_vm3, %v5980_v45 }
0x24de   :  { %11835 = vrsqrt.f32 %v5904_v53  ;;  %11057 = vmatmul.mubr.msk.f32.vlgmr.msra.gmra.mrb[76].mxu0 %vm130_vm3, %v5981_v41 }
0x24df   :  { %v11830_v19 = vpop.eup %11829  ;;  %v5859_v4 = vpop.xlane.xlu0 %5858  ;;  %11457 = vmatpush3.bf16.msra.mxu0 %v13665_v20 }
0x24e0   :  { %v5891_v15 = vmul.f32 0.03125, %v5859_v4  ;;  %v5856_v13 = vpop.xlane.xlu1 %5855  ;;  %v5934_v56 = vmul.f32 %v11830_v19, %v14808_v8  ;;  %11459 = vmatprep.subr.bf16.mxu0 %v13669_v40 }
0x24e1   :  { %v5890_v7 = vmul.f32 0.03125, %v5856_v13 }
0x24e2   :  { %v5907_v18 = vadd.f32 1e-05, %v5891_v15  ;;  %v5950_v9 = vmul.f32 %v14957_v44, %v5934_v56 }
0x24e3   :  { %v11832_v0 = vpop.eup %11831  ;;  %v5906_v23 = vadd.f32 1e-05, %v5890_v7  ;;  %11461 = vmatpush3.bf16.msra.mxu0 %v13669_v40 }
0x24e4   :  { %11837 = vrsqrt.f32 %v5907_v18  ;;  %v5966_v37 = vadd.f32 %v14961_v52, %v5950_v9  ;;  %v5935_v48 = vmul.f32 %v11832_v0, %v14813_v6  ;;  %11471 = vmatprep.subr.bf16.mxu0 %v12991_v34 }
0x24e5   :  { %11839 = vrsqrt.f32 %v5906_v23 }
0x24e6   :  { %v5982_v38 = vmax.f32 %v5966_v37, 0.0  ;;  %v5951_v8 = vmul.f32 %v14957_v44, %v5935_v48 }
0x24e7   :  { %v11834_v33 = vpop.eup %11833  ;;  %v5865_v43 = vpop.xlane.xlu0 %5864 }
0x24e8   :  { %v11836_v1 = vpop.eup %11835  ;;  %v5893_v50 = vmul.f32 0.03125, %v5865_v43  ;;  %11059 = vmatprep.mubr.msk.f32.mxu0 %vm130_vm3, %v5982_v38  ;;  %v5862_v62 = vpop.xlane.xlu1 %5861  ;;  %v5967_v32 = vadd.f32 %v14961_v52, %v5951_v8  ;;  %v5937_v14 = vmul.f32 %v11834_v33, %v14819_v42 }
0x24e9   :  { %v5892_v5 = vmul.f32 0.03125, %v5862_v62  ;;  %v5936_v6 = vmul.f32 %v11836_v1, %v14822_v51 }
0x24ea   :  { %v5909_v46 = vadd.f32 1e-05, %v5893_v50  ;;  %v5983_v10 = vmax.f32 %v5967_v32, 0.0  ;;  %v5953_v36 = vmul.f32 %v14957_v44, %v5937_v14 }
0x24eb   :  { %v5908_v47 = vadd.f32 1e-05, %v5892_v5  ;;  %v5952_v53 = vmul.f32 %v14957_v44, %v5936_v6 }
0x24ec   :  { %11841 = vrsqrt.f32 %v5909_v46  ;;  %11060 = vmatmul.mubr.msk.f32.gmra.mrb[78].mxu0 %vm130_vm3, %v5983_v10  ;;  %v5969_v45 = vadd.f32 %v14961_v52, %v5953_v36 }
0x24ed   :  { %11843 = vrsqrt.f32 %v5908_v47  ;;  %v5968_v41 = vadd.f32 %v14961_v52, %v5952_v53 }
0x24ee   :  { %v11838_v19 = vpop.eup %11837  ;;  %v5985_v42 = vmax.f32 %v5969_v45, 0.0 }
0x24ef   :  { %v11840_v4 = vpop.eup %11839  ;;  %v5871_v15 = vpop.xlane.xlu0 %5870  ;;  %v5984_v51 = vmax.f32 %v5968_v41, 0.0  ;;  %v5939_v13 = vmul.f32 %v11838_v19, %v14832_v24 }
0x24f0   :  { %v5895_v56 = vmul.f32 0.03125, %v5871_v15  ;;  %v5868_v7 = vpop.xlane.xlu1 %5867  ;;  %v5938_v18 = vmul.f32 %v11840_v4, %v14835_v57 }
0x24f1   :  { %11062 = vmatprep.mubr.msk.f32.mxu0 %vm130_vm3, %v5984_v51  ;;  %v5894_v9 = vmul.f32 0.03125, %v5868_v7  ;;  %v5955_v0 = vmul.f32 %v14957_v44, %v5939_v13 }
0x24f2   :  { %v5911_v23 = vadd.f32 1e-05, %v5895_v56  ;;  %11063 = vmatmul.mubr.msk.f32.gmra.mrb[80].mxu0 %vm130_vm3, %v5985_v42  ;;  %v5954_v37 = vmul.f32 %v14957_v44, %v5938_v18 }
0x24f3   :  { %v5910_v48 = vadd.f32 1e-05, %v5894_v9  ;;  %v5971_v38 = vadd.f32 %v14961_v52, %v5955_v0 }
0x24f4   :  { %11845 = vrsqrt.f32 %v5911_v23  ;;  %v5970_v24 = vadd.f32 %v14961_v52, %v5954_v37 }
0x24f5   :  { %11847 = vrsqrt.f32 %v5910_v48  ;;  %v5987_v1 = vmax.f32 %v5971_v38, 0.0 }
0x24f6   :  { %v11842_v8 = vpop.eup %11841  ;;  %v5986_v33 = vmax.f32 %v5970_v24, 0.0 }
0x24f7   :  { %v11844_v57 = vpop.eup %11843  ;;  %v5877_v43 = vpop.xlane.xlu0 %5876  ;;  %v5941_v50 = vmul.f32 %v11842_v8, %v14844_v39 }
0x24f8   :  { %v5897_v62 = vmul.f32 0.03125, %v5877_v43  ;;  %11065 = vmatprep.mubr.msk.f32.mxu0 %vm130_vm3, %v5986_v33  ;;  %v5874_v32 = vpop.xlane.xlu1 %5873  ;;  %v5940_v14 = vmul.f32 %v11844_v57, %v14847_v11 }
0x24f9   :  { %v5896_v5 = vmul.f32 0.03125, %v5874_v32  ;;  %11066 = vmatmul.mubr.msk.f32.gmra.mrb[82].mxu0 %vm130_vm3, %v5987_v1  ;;  %v5957_v6 = vmul.f32 %v14957_v44, %v5941_v50 }
0x24fa   :  { %v5913_v46 = vadd.f32 1e-05, %v5897_v62  ;;  %v5956_v10 = vmul.f32 %v14957_v44, %v5940_v14 }
0x24fb   :  { %v5912_v36 = vadd.f32 1e-05, %v5896_v5  ;;  %v5973_v47 = vadd.f32 %v14961_v52, %v5957_v6 }
0x24fc   :  { %11849 = vrsqrt.f32 %v5913_v46  ;;  %v5972_v39 = vadd.f32 %v14961_v52, %v5956_v10 }
0x24fd   :  { %11851 = vrsqrt.f32 %v5912_v36  ;;  %v5989_v4 = vmax.f32 %v5973_v47, 0.0 }
0x24fe   :  { %v11846_v53 = vpop.eup %11845  ;;  %v5883_v45 = vpop.xlane.xlu0 %5882  ;;  %v5988_v41 = vmax.f32 %v5972_v39, 0.0 }
0x24ff   :  { %v11848_v19 = vpop.eup %11847  ;;  %v5899_v11 = vmul.f32 0.03125, %v5883_v45  ;;  %v5880_v42 = vpop.xlane.xlu1 %5879  ;;  %v5943_v15 = vmul.f32 %v11846_v53, %v14856_v31 }
0x2500   :  { %v5898_v51 = vmul.f32 0.03125, %v5880_v42  ;;  %11068 = vmatprep.mubr.msk.f32.mxu0 %vm130_vm3, %v5988_v41  ;;  %v5942_v13 = vmul.f32 %v11848_v19, %v14859_v29  ;;  %v17073_v41 = vld [vmem:[#allocation8_spill] sm:$0xff]  ;;  %v17074_v42 = vld [vmem:[#allocation9_spill] sm:$0xff] }
0x2501   :  { %v5915_v56 = vadd.f32 1e-05, %v5899_v11  ;;  %11069 = vmatmul.mubr.msk.f32.gmra.mrb[84].mxu0 %vm130_vm3, %v5989_v4  ;;  %v5959_v7 = vmul.f32 %v14957_v44, %v5943_v15  ;;  %v15029_v15 = vld [vmem:[#allocation4 + $0x50] ss:$0 sm:$0xff] }
0x2502   :  { %v5914_v18 = vadd.f32 1e-05, %v5898_v51  ;;  %v5958_v9 = vmul.f32 %v14957_v44, %v5942_v13 }
0x2503   :  { %11853 = vrsqrt.f32 %v5915_v56  ;;  %v5975_v0 = vadd.f32 %v14961_v52, %v5959_v7 }
0x2504   :  { %11855 = vrsqrt.f32 %v5914_v18  ;;  %v5974_v23 = vadd.f32 %v14961_v52, %v5958_v9 }
0x2505   :  { %v5991_v38 = vmax.f32 %v5975_v0, 0.0 }
0x2506   :  { %v11850_v31 = vpop.eup %11849  ;;  %v5990_v37 = vmax.f32 %v5974_v23, 0.0 }
0x2507   :  { %v11852_v48 = vpop.eup %11851  ;;  %v5945_v29 = vmul.f32 %v11850_v31, %v14868_v59 }
0x2508   :  { %11071 = vmatprep.mubr.msk.f32.mxu0 %vm130_vm3, %v5990_v37  ;;  %v5944_v24 = vmul.f32 %v11852_v48, %v14871_v25  ;;  %v17075_v48 = vld [vmem:[#allocation10_spill] sm:$0xff] }
0x2509   :  { %11072 = vmatmul.mubr.msk.f32.gmra.mrb[86].mxu0 %vm130_vm3, %v5991_v38  ;;  %v5961_v8 = vmul.f32 %v14957_v44, %v5945_v29 }
0x250a   :  { %v5960_v33 = vmul.f32 %v14957_v44, %v5944_v24  ;;  %v17076_v24 = vld [vmem:[#allocation11_spill] sm:$0xff] }
0x250b   :  { %v5977_v57 = vadd.f32 %v14961_v52, %v5961_v8 }
0x250c   :  { %v5976_v43 = vadd.f32 %v14961_v52, %v5960_v33 }
0x250d   :  { %v11854_v1 = vpop.eup %11853  ;;  %v5993_v59 = vmax.f32 %v5977_v57, 0.0 }
0x250e   :  { %v11856_v50 = vpop.eup %11855  ;;  %v5992_v62 = vmax.f32 %v5976_v43, 0.0  ;;  %v5947_v32 = vmul.f32 %v11854_v1, %v14880_v63  ;;  %v6254_v63 = vpop.permute.xlu1 %6253 }
0x250f   :  { %v5946_v14 = vmul.f32 %v11856_v50, %v14883_v3  ;;  %v6256_v3 = vpop.permute.xlu0 %6255 }
0x2510   :  { %11074 = vmatprep.mubr.msk.f32.mxu0 %vm130_vm3, %v5992_v62  ;;  %v5963_v25 = vmul.f32 %v14957_v44, %v5947_v32 }
0x2511   :  { %11075 = vmatmul.mubr.msk.f32.gmra.mrb[88].mxu0 %vm130_vm3, %v5993_v59  ;;  %v5962_v5 = vmul.f32 %v14957_v44, %v5946_v14 }
0x2512   :  { %v5979_v6 = vadd.f32 %v14961_v52, %v5963_v25  ;;  %v6258_v47 = vpop.permute.xlu1 %6257 }
0x2513   :  { %v5978_v46 = vadd.f32 %v14961_v52, %v5962_v5  ;;  %v6264_v39 = vpop.permute.xlu0 %6263 }
0x2514   :  { %v5995_v36 = vmax.f32 %v5979_v6, 0.0 }
0x2515   :  { %v5994_v10 = vmax.f32 %v5978_v46, 0.0 }
0x2516   :  { %v6260_v53 = vpop.permute.xlu1 %6259 }
0x2517   :  { %11077 = vmatprep.mubr.msk.f32.mxu0 %vm130_vm3, %v5994_v10  ;;  %v6268_v44 = vpop.permute.xlu0 %6267 }
0x2518   :  { %11078 = vmatmul.mubr.msk.f32.gmra.mrb[90].mxu0 %vm130_vm3, %v5995_v36 }
0x251a   :  { %v6262_v13 = vpop.permute.xlu1 %6261 }
0x251b   :  { %v15039_v9 = vpop.permute.xlu0 %6271 }
0x251e   :  { %v6266_v23 = vpop.permute.xlu1 %6265 }
0x251f   :  { %v15041_v31 = vpop.permute.xlu0 %6275 }
0x2522   :  { %v15045_v33 = vpop.permute.xlu1 %6269 }
0x2523   :  { %v15054_v32 = vpop.permute.xlu0 %6279 }
0x25b1   :  { %v11058_v45 = vpop.f32.mrb[76].mxu0 }
0x25b2   :  { %v6206_v19 = vadd.f32 %v11058_v45, %v17073_v41  ;;  %v6126_v11 = vpop.f32.mrb[77].mxu0 }
0x25b3   :  { %v6205_v4 = vadd.f32 %v6126_v11, %v17074_v42 }
0x25b4   :  { %v15032_v52 = vadd.f32 %v15029_v15, %v6206_v19  ;;  %v6414_v19 = vpop.permute.xlu0 %6413 }
0x25b5   :  { %v15035_v51 = vadd.f32 %v15029_v15, %v6205_v4 }
0x25b6   :  { %v6302_v56 = vadd.f32 %v6256_v3, %v15032_v52  ;;  %v15059_v3 = vpop.permute.xlu1 %6273 }
0x25b7   :  { %v6301_v7 = vadd.f32 %v6254_v63, %v15035_v51 }
0x25b8   :  { %v9993_v18 = vmul.f32 -1.442695, %v6302_v56 }
0x25b9   :  { %v9992_v0 = vmul.f32 -1.442695, %v6301_v7 }
0x25ba   :  { %11857 = vpow2.f32 %v9993_v18 }
0x25bb   :  { %11859 = vpow2.f32 %v9992_v0 }
0x25bf   :  { %v11061_v37 = vpop.f32.mrb[78].mxu0 }
0x25c0   :  { %v6208_v38 = vadd.f32 %v11061_v37, %v17075_v48  ;;  %v6136_v29 = vpop.f32.mrb[79].mxu0  ;;  %v15070_v37 = vpop.permute.xlu1 %6277 }
0x25c1   :  { %v6207_v8 = vadd.f32 %v6136_v29, %v17076_v24 }
0x25c2   :  { %v15048_v57 = vadd.f32 %v15029_v15, %v6208_v38 }
0x25c3   :  { %v15051_v43 = vadd.f32 %v15029_v15, %v6207_v8 }
0x25c4   :  { %v11858_v1 = vpop.eup %11857  ;;  %v6304_v50 = vadd.f32 %v6260_v53, %v15048_v57 }
0x25c5   :  { %v11860_v62 = vpop.eup %11859  ;;  %v6366_v59 = vadd.f32 1.0, %v11858_v1  ;;  %v6303_v14 = vadd.f32 %v6258_v47, %v15051_v43  ;;  %v11064_v25 = vpop.f32.mrb[80].mxu0 }
0x25c6   :  { %v6365_v5 = vadd.f32 1.0, %v11860_v62  ;;  %v9995_v6 = vmul.f32 -1.442695, %v6304_v50  ;;  %v6210_v46 = vadd.f32 %v11064_v25, %v17073_v41  ;;  %v6146_v10 = vpop.f32.mrb[81].mxu0 }
0x25c7   :  { %11861 = vrcp.f32 %v6366_v59  ;;  %v9994_v36 = vmul.f32 -1.442695, %v6303_v14  ;;  %v6209_v63 = vadd.f32 %v6146_v10, %v17074_v42 }
0x25c8   :  { %11863 = vrcp.f32 %v6365_v5  ;;  %v15062_v53 = vadd.f32 %v15029_v15, %v6210_v46  ;;  %v15087_v46 = vpop.permute.xlu1 %6281 }
0x25c9   :  { %11865 = vpow2.f32 %v9995_v6  ;;  %v15065_v45 = vadd.f32 %v15029_v15, %v6209_v63 }
0x25ca   :  { %11867 = vpow2.f32 %v9994_v36  ;;  %v6306_v47 = vadd.f32 %v6264_v39, %v15062_v53 }
0x25cb   :  { %v6305_v11 = vadd.f32 %v6262_v13, %v15065_v45  ;;  %v6416_v13 = vpop.permute.xlu0 %6415 }
0x25cc   :  { %v9997_v4 = vmul.f32 -1.442695, %v6306_v47  ;;  %v11067_v56 = vpop.f32.mrb[82].mxu0 }
0x25cd   :  { %v9996_v7 = vmul.f32 -1.442695, %v6305_v11  ;;  %v6212_v18 = vadd.f32 %v11067_v56, %v17075_v48  ;;  %v6156_v0 = vpop.f32.mrb[83].mxu0 }
0x25ce   :  { %11869 = vpow2.f32 %v9997_v4  ;;  %v6211_v38 = vadd.f32 %v6156_v0, %v17076_v24 }
0x25cf   :  { %11871 = vpow2.f32 %v9996_v7  ;;  %v15074_v29 = vadd.f32 %v15029_v15, %v6212_v18 }
0x25d0   :  { %v15077_v39 = vadd.f32 %v15029_v15, %v6211_v38  ;;  %v15101_v38 = vpop.permute.xlu1 %6283 }
0x25d1   :  { %v15079_v8 = vpop.eup %11861  ;;  %v6308_v1 = vadd.f32 %v6268_v44, %v15074_v29 }
0x25d2   :  { %v15082_v50 = vpop.eup %11863  ;;  %v6307_v62 = vadd.f32 %v6266_v23, %v15077_v39  ;;  %v6462_v59 = vmul.f32 %v15079_v8, %v6416_v13 }
0x25d3   :  { %v11866_v14 = vpop.eup %11865  ;;  %v9999_v25 = vmul.f32 -1.442695, %v6308_v1  ;;  %v6461_v5 = vmul.f32 %v15082_v50, %v6414_v19 }
0x25d4   :  { %v11868_v6 = vpop.eup %11867  ;;  %v6368_v10 = vadd.f32 1.0, %v11866_v14  ;;  %v9998_v36 = vmul.f32 -1.442695, %v6307_v62  ;;  %v11070_v63 = vpop.f32.mrb[84].mxu0  ;;  %6495 = vrot.lane.b32.xlu0 %v6462_v59, %s12289_s23 }
0x25d5   :  { %v6367_v47 = vadd.f32 1.0, %v11868_v6  ;;  %11873 = vpow2.f32 %v9999_v25  ;;  %v6214_v44 = vadd.f32 %v11070_v63, %v17073_v41  ;;  %v6166_v11 = vpop.f32.mrb[85].mxu0  ;;  %6493 = vrot.lane.b32.xlu1 %v6461_v5, %s12289_s23 }
0x25d6   :  { %11875 = vrcp.f32 %v6368_v10  ;;  %v6213_v23 = vadd.f32 %v6166_v11, %v17074_v42 }
0x25d7   :  { %11877 = vrcp.f32 %v6367_v47  ;;  %v15094_v19 = vadd.f32 %v15029_v15, %v6214_v44 }
0x25d8   :  { %v11870_v4 = vpop.eup %11869  ;;  %11879 = vpow2.f32 %v9998_v36  ;;  %v15097_v56 = vadd.f32 %v15029_v15, %v6213_v23 }
0x25d9   :  { %v11872_v7 = vpop.eup %11871  ;;  %v6370_v18 = vadd.f32 1.0, %v11870_v4  ;;  %v6310_v0 = vadd.f32 %v15039_v9, %v15094_v19  ;;  %v6420_v9 = vpop.permute.xlu0 %6419 }
0x25da   :  { %v6369_v13 = vadd.f32 1.0, %v11872_v7  ;;  %v6309_v1 = vadd.f32 %v15045_v33, %v15097_v56  ;;  %v6418_v33 = vpop.permute.xlu1 %6417 }
0x25db   :  { %11881 = vrcp.f32 %v6370_v18  ;;  %v10001_v62 = vmul.f32 -1.442695, %v6310_v0 }
0x25dc   :  { %11883 = vrcp.f32 %v6369_v13  ;;  %v10000_v59 = vmul.f32 -1.442695, %v6309_v1  ;;  %v11073_v14 = vpop.f32.mrb[86].mxu0 }
0x25dd   :  { %11885 = vpow2.f32 %v10001_v62  ;;  %v6216_v25 = vadd.f32 %v11073_v14, %v17075_v48  ;;  %v6176_v5 = vpop.f32.mrb[87].mxu0 }
0x25de   :  { %11887 = vpow2.f32 %v10000_v59  ;;  %v6215_v6 = vadd.f32 %v6176_v5, %v17076_v24 }
0x25df   :  { %v11874_v10 = vpop.eup %11873  ;;  %v15108_v36 = vadd.f32 %v15029_v15, %v6216_v25 }
0x25e0   :  { %v15110_v63 = vpop.eup %11875  ;;  %v6372_v47 = vadd.f32 1.0, %v11874_v10  ;;  %v15113_v44 = vadd.f32 %v15029_v15, %v6215_v6 }
0x25e1   :  { %v15115_v11 = vpop.eup %11877  ;;  %v6312_v23 = vadd.f32 %v15041_v31, %v15108_v36  ;;  %v6464_v4 = vmul.f32 %v15110_v63, %v6420_v9  ;;  %v6424_v31 = vpop.permute.xlu0 %6423 }
0x25e2   :  { %v11880_v7 = vpop.eup %11879  ;;  %11889 = vrcp.f32 %v6372_v47  ;;  %v6311_v18 = vadd.f32 %v15059_v3, %v15113_v44  ;;  %v6463_v0 = vmul.f32 %v15115_v11, %v6418_v33  ;;  %v6422_v3 = vpop.permute.xlu1 %6421 }
0x25e3   :  { %v6371_v13 = vadd.f32 1.0, %v11880_v7  ;;  %v10003_v1 = vmul.f32 -1.442695, %v6312_v23  ;;  %6499 = vrot.lane.b32.xlu0 %v6464_v4, %s12289_s23 }
0x25e4   :  { %v10002_v62 = vmul.f32 -1.442695, %v6311_v18  ;;  %6497 = vrot.lane.b32.xlu1 %v6463_v0, %s12289_s23  ;;  %v11076_v59 = vpop.f32.mrb[88].mxu0 }
0x25e5   :  { %v15125_v14 = vpop.eup %11881  ;;  %11891 = vrcp.f32 %v6371_v13  ;;  %v6218_v25 = vadd.f32 %v11076_v59, %v17073_v41  ;;  %v6186_v5 = vpop.f32.mrb[89].mxu0 }
0x25e6   :  { %v15128_v6 = vpop.eup %11883  ;;  %11893 = vpow2.f32 %v10003_v1  ;;  %v6217_v10 = vadd.f32 %v6186_v5, %v17074_v42  ;;  %v6466_v9 = vmul.f32 %v15125_v14, %v6424_v31  ;;  %v6428_v59 = vpop.permute.xlu0 %6427 }
0x25e7   :  { %v11886_v33 = vpop.eup %11885  ;;  %11895 = vpow2.f32 %v10002_v62  ;;  %v15133_v47 = vadd.f32 %v15029_v15, %v6218_v25  ;;  %v6465_v23 = vmul.f32 %v15128_v6, %v6422_v3 }
0x25e8   :  { %v11888_v4 = vpop.eup %11887  ;;  %v6374_v7 = vadd.f32 1.0, %v11886_v33  ;;  %v15137_v41 = vadd.f32 %v15029_v15, %v6217_v10  ;;  %6503 = vrot.lane.b32.xlu0 %v6466_v9, %s12289_s23  ;;  %v6426_v9 = vpop.permute.xlu1 %6425 }
0x25e9   :  { %v6373_v18 = vadd.f32 1.0, %v11888_v4  ;;  %v6314_v42 = vadd.f32 %v15054_v32, %v15133_v47  ;;  %6501 = vrot.lane.b32.xlu1 %v6465_v23, %s12289_s23 }
0x25ea   :  { %11897 = vrcp.f32 %v6374_v7  ;;  %v6313_v0 = vadd.f32 %v15070_v37, %v15137_v41 }
0x25eb   :  { %11899 = vrcp.f32 %v6373_v18  ;;  %v10005_v13 = vmul.f32 -1.442695, %v6314_v42  ;;  %v11079_v1 = vpop.f32.mrb[90].mxu0 }
0x25ec   :  { %v15145_v62 = vpop.eup %11889  ;;  %v10004_v31 = vmul.f32 -1.442695, %v6313_v0  ;;  %v6220_v25 = vadd.f32 %v11079_v1, %v17075_v48  ;;  %v6196_v5 = vpop.f32.mrb[91].mxu0 }
0x25ed   :  { %11901 = vpow2.f32 %v10005_v13  ;;  %v6219_v3 = vadd.f32 %v6196_v5, %v17076_v24  ;;  %v6468_v32 = vmul.f32 %v15145_v62, %v6428_v59  ;;  %v6432_v1 = vpop.permute.xlu0 %6431 }
0x25ee   :  { %11903 = vpow2.f32 %v10004_v31  ;;  %v15151_v10 = vadd.f32 %v15029_v15, %v6220_v25 }
0x25ef   :  { %v15153_v37 = vpop.eup %11891  ;;  %v15156_v33 = vadd.f32 %v15029_v15, %v6219_v3  ;;  %6507 = vrot.lane.b32.xlu0 %v6468_v32, %s12289_s23 }
0x25f0   :  { %v11894_v23 = vpop.eup %11893  ;;  %v6316_v48 = vadd.f32 %v15101_v38, %v15151_v10  ;;  %v6467_v24 = vmul.f32 %v15153_v37, %v6426_v9  ;;  %v6430_v38 = vpop.permute.xlu1 %6429 }
0x25f1   :  { %v11896_v4 = vpop.eup %11895  ;;  %v6376_v7 = vadd.f32 1.0, %v11894_v23  ;;  %v6315_v18 = vadd.f32 %v15087_v46, %v15156_v33  ;;  %v6436_v23 = vpop.permute.xlu0 %6435 }
0x25f2   :  { %v6375_v42 = vadd.f32 1.0, %v11896_v4  ;;  %v10007_v0 = vmul.f32 -1.442695, %v6316_v48  ;;  %6505 = vrot.lane.b32.xlu1 %v6467_v24, %s12289_s23 }
0x25f3   :  { %11905 = vrcp.f32 %v6376_v7  ;;  %v10006_v15 = vmul.f32 -1.442695, %v6315_v18 }
0x25f4   :  { %v15165_v13 = vpop.eup %11897  ;;  %11907 = vrcp.f32 %v6375_v42  ;;  %v6434_v24 = vpop.permute.xlu1 %6433 }
0x25f5   :  { %v15167_v59 = vpop.eup %11899  ;;  %11909 = vpow2.f32 %v10007_v0  ;;  %v6470_v31 = vmul.f32 %v15165_v13, %v6432_v1 }
0x25f6   :  { %11911 = vpow2.f32 %v10006_v15  ;;  %v6469_v25 = vmul.f32 %v15167_v59, %v6430_v38  ;;  %v6440_v38 = vpop.permute.xlu0 %6439 }
0x25f7   :  { %v11902_v46 = vpop.eup %11901  ;;  %6511 = vrot.lane.b32.xlu0 %v6470_v31, %s12289_s23 }
0x25f8   :  { %v11904_v5 = vpop.eup %11903  ;;  %v6378_v3 = vadd.f32 1.0, %v11902_v46  ;;  %6509 = vrot.lane.b32.xlu1 %v6469_v25, %s12289_s23  ;;  %v6438_v25 = vpop.permute.xlu1 %6437 }
0x25f9   :  { %v6377_v32 = vadd.f32 1.0, %v11904_v5 }
0x25fa   :  { %11913 = vrcp.f32 %v6378_v3 }
0x25fb   :  { %11915 = vrcp.f32 %v6377_v32  ;;  %v6444_v32 = vpop.permute.xlu0 %6443 }
0x25fd   :  { %v15173_v9 = vpop.eup %11905 }
0x25fe   :  { %v15175_v48 = vpop.eup %11907  ;;  %v6472_v4 = vmul.f32 %v15173_v9, %v6436_v23 }
0x25ff   :  { %v11910_v7 = vpop.eup %11909  ;;  %v6471_v18 = vmul.f32 %v15175_v48, %v6434_v24  ;;  %v6442_v24 = vpop.permute.xlu1 %6441 }
0x2600   :  { %v11912_v42 = vpop.eup %11911  ;;  %v6380_v0 = vadd.f32 1.0, %v11910_v7  ;;  %6515 = vrot.lane.b32.xlu0 %v6472_v4, %s12289_s23 }
0x2601   :  { %v6379_v15 = vadd.f32 1.0, %v11912_v42  ;;  %6513 = vrot.lane.b32.xlu1 %v6471_v18, %s12289_s23 }
0x2602   :  { %11917 = vrcp.f32 %v6380_v0 }
0x2603   :  { %11919 = vrcp.f32 %v6379_v15 }
0x2604   :  { %v15181_v1 = vpop.eup %11913 }
0x2605   :  { %v15183_v31 = vpop.eup %11915  ;;  %v6474_v46 = vmul.f32 %v15181_v1, %v6440_v38 }
0x2606   :  { %v6473_v5 = vmul.f32 %v15183_v31, %v6438_v25 }
0x2607   :  { %6519 = vrot.lane.b32.xlu0 %v6474_v46, %s12289_s23 }
0x2608   :  { %6517 = vrot.lane.b32.xlu1 %v6473_v5, %s12289_s23 }
0x260c   :  { %v15189_v3 = vpop.eup %11917 }
0x260d   :  { %v15191_v23 = vpop.eup %11919  ;;  %v6476_v4 = vmul.f32 %v15189_v3, %v6444_v32 }
0x260e   :  { %v6475_v7 = vmul.f32 %v15191_v23, %v6442_v24 }
0x260f   :  { %6523 = vrot.lane.b32.xlu0 %v6476_v4, %s12289_s23 }
0x2610   :  { %6521 = vrot.lane.b32.xlu1 %v6475_v7, %s12289_s23 }
0x2646   :  { %v6496_v18 = vpop.permute.xlu0 %6495 }
0x2647   :  { %v6542_v42 = vadd.f32 %v6496_v18, %v15032_v52  ;;  %v6494_v0 = vpop.permute.xlu1 %6493 }
0x2648   :  { %v6541_v15 = vadd.f32 %v6494_v0, %v15035_v51 }
0x2649   :  { %11921 = vtanh.f32 %v6542_v42 }
0x264a   :  { %11923 = vtanh.f32 %v6541_v15 }
0x2653   :  { %v11922_v38 = vpop.eup %11921 }
0x2654   :  { %v11924_v25 = vpop.eup %11923  ;;  %6607 = vrot.lane.b32.xlu0 %v11922_v38, %s12288_s22 }
0x2655   :  { %v6500_v46 = vpop.permute.xlu0 %6499  ;;  %6605 = vrot.lane.b32.xlu1 %v11924_v25, %s12288_s22 }
0x2656   :  { %v6544_v5 = vadd.f32 %v6500_v46, %v15048_v57  ;;  %v6498_v32 = vpop.permute.xlu1 %6497 }
0x2657   :  { %v6543_v24 = vadd.f32 %v6498_v32, %v15051_v43 }
0x2658   :  { %11925 = vtanh.f32 %v6544_v5 }
0x2659   :  { %11927 = vtanh.f32 %v6543_v24 }
0x265a   :  { %v6504_v52 = vpop.permute.xlu0 %6503 }
0x265b   :  { %v6546_v4 = vadd.f32 %v6504_v52, %v15062_v53  ;;  %v6502_v51 = vpop.permute.xlu1 %6501 }
0x265c   :  { %v6545_v7 = vadd.f32 %v6502_v51, %v15065_v45 }
0x265d   :  { %11929 = vtanh.f32 %v6546_v4 }
0x265e   :  { %11931 = vtanh.f32 %v6545_v7 }
0x2661   :  { %v6508_v18 = vpop.permute.xlu0 %6507 }
0x2662   :  { %v11926_v42 = vpop.eup %11925  ;;  %v6548_v0 = vadd.f32 %v6508_v18, %v15074_v29 }
0x2663   :  { %v11928_v15 = vpop.eup %11927  ;;  %6611 = vrot.lane.b32.xlu0 %v11926_v42, %s12288_s22 }
0x2664   :  { %11933 = vtanh.f32 %v6548_v0  ;;  %v6506_v57 = vpop.permute.xlu1 %6505  ;;  %6609 = vrot.lane.b32.xlu1 %v11928_v15, %s12288_s22 }
0x2665   :  { %v6547_v43 = vadd.f32 %v6506_v57, %v15077_v39 }
0x2667   :  { %v11930_v38 = vpop.eup %11929  ;;  %11935 = vtanh.f32 %v6547_v43 }
0x2668   :  { %v11932_v53 = vpop.eup %11931  ;;  %6615 = vrot.lane.b32.xlu0 %v11930_v38, %s12288_s22 }
0x2669   :  { %6613 = vrot.lane.b32.xlu1 %v11932_v53, %s12288_s22  ;;  %v6512_v45 = vpop.permute.xlu0 %6511 }
0x266a   :  { %v6550_v25 = vadd.f32 %v6512_v45, %v15094_v19  ;;  %v6510_v29 = vpop.permute.xlu1 %6509  ;;  %v6574_v45 = vsub.f32 1.0, %v15079_v8 }
0x266b   :  { %v6549_v46 = vadd.f32 %v6510_v29, %v15097_v56 }
0x266c   :  { %11937 = vtanh.f32 %v6550_v25  ;;  %v6573_v25 = vsub.f32 1.0, %v15082_v50 }
0x266d   :  { %11939 = vtanh.f32 %v6549_v46 }
0x266e   :  { %v11934_v5 = vpop.eup %11933 }
0x266f   :  { %6619 = vrot.lane.b32.xlu0 %v11934_v5, %s12288_s22  ;;  %v6669_v5 = vmul.f32 %v15082_v50, %v14455_v58 }
0x2671   :  { %v11936_v32 = vpop.eup %11935 }
0x2672   :  { %6617 = vrot.lane.b32.xlu1 %v11936_v32, %s12288_s22  ;;  %v6516_v39 = vpop.permute.xlu0 %6515 }
0x2673   :  { %v6552_v24 = vadd.f32 %v6516_v39, %v15108_v36  ;;  %v6514_v52 = vpop.permute.xlu1 %6513 }
0x2674   :  { %v6551_v4 = vadd.f32 %v6514_v52, %v15113_v44  ;;  %v6576_v52 = vsub.f32 1.0, %v15110_v63 }
0x2675   :  { %11941 = vtanh.f32 %v6552_v24 }
0x2676   :  { %v11938_v51 = vpop.eup %11937  ;;  %11943 = vtanh.f32 %v6551_v4 }
0x2677   :  { %v11940_v19 = vpop.eup %11939  ;;  %6623 = vrot.lane.b32.xlu0 %v11938_v51, %s12288_s22  ;;  %v6671_v51 = vmul.f32 %v15115_v11, %v14467_v60 }
0x2678   :  { %6621 = vrot.lane.b32.xlu1 %v11940_v19, %s12288_s22 }
0x2679   :  { %v6520_v56 = vpop.permute.xlu0 %6519 }
0x267a   :  { %v6554_v7 = vadd.f32 %v6520_v56, %v15133_v47  ;;  %v6518_v18 = vpop.permute.xlu1 %6517 }
0x267b   :  { %v6553_v42 = vadd.f32 %v6518_v18, %v15137_v41  ;;  %v6578_v18 = vsub.f32 1.0, %v15125_v14 }
0x267c   :  { %11945 = vtanh.f32 %v6554_v7 }
0x267d   :  { %11947 = vtanh.f32 %v6553_v42 }
0x267f   :  { %v11942_v36 = vpop.eup %11941 }
0x2680   :  { %v11944_v0 = vpop.eup %11943  ;;  %6627 = vrot.lane.b32.xlu0 %v11942_v36, %s12288_s22  ;;  %v6577_v36 = vsub.f32 1.0, %v15128_v6 }
0x2681   :  { %v6524_v44 = vpop.permute.xlu0 %6523  ;;  %6625 = vrot.lane.b32.xlu1 %v11944_v0, %s12288_s22 }
0x2682   :  { %v6556_v15 = vadd.f32 %v6524_v44, %v15151_v10  ;;  %v6522_v57 = vpop.permute.xlu1 %6521 }
0x2683   :  { %v6555_v43 = vadd.f32 %v6522_v57, %v15156_v33  ;;  %v6670_v33 = vmul.f32 %v15079_v8, %v14449_v55  ;;  %v6575_v55 = vsub.f32 1.0, %v15115_v11  ;;  %v6672_v8 = vmul.f32 %v15110_v63, %v14461_v16 }
0x2684   :  { %11949 = vtanh.f32 %v6556_v15  ;;  %v6674_v16 = vmul.f32 %v15125_v14, %v14473_v30  ;;  %v6673_v11 = vmul.f32 %v15128_v6, %v14479_v28  ;;  %v6580_v30 = vsub.f32 1.0, %v15145_v62 }
0x2685   :  { %11951 = vtanh.f32 %v6555_v43  ;;  %v6676_v57 = vmul.f32 %v15145_v62, %v14485_v21  ;;  %v6579_v28 = vsub.f32 1.0, %v15153_v37  ;;  %v6581_v62 = vsub.f32 1.0, %v15167_v59 }
0x2686   :  { %v11946_v47 = vpop.eup %11945 }
0x2687   :  { %v11948_v38 = vpop.eup %11947  ;;  %6631 = vrot.lane.b32.xlu0 %v11946_v47, %s12288_s22 }
0x2688   :  { %6629 = vrot.lane.b32.xlu1 %v11948_v38, %s12288_s22  ;;  %v6675_v38 = vmul.f32 %v15153_v37, %v14491_v54  ;;  %v6677_v54 = vmul.f32 %v15167_v59, %v14503_v17 }
0x268e   :  { %v11950_v41 = vpop.eup %11949 }
0x268f   :  { %v11952_v53 = vpop.eup %11951  ;;  %6635 = vrot.lane.b32.xlu0 %v11950_v41, %s12288_s22 }
0x2690   :  { %6633 = vrot.lane.b32.xlu1 %v11952_v53, %s12288_s22 }
0x26c6   :  { %v6608_v10 = vpop.permute.xlu0 %6607 }
0x26c7   :  { %v6654_v29 = vmul.f32 %v6608_v10, %v6574_v45  ;;  %v6606_v46 = vpop.permute.xlu1 %6605  ;;  %v6582_v45 = vsub.f32 1.0, %v15165_v13  ;;  %v6678_v10 = vmul.f32 %v15165_v13, %v14497_v27  ;;  %v6583_v27 = vsub.f32 1.0, %v15175_v48 }
0x26c8   :  { %v6653_v32 = vmul.f32 %v6606_v46, %v6573_v25  ;;  %v6680_v13 = vmul.f32 %v15173_v9, %v14509_v49  ;;  %v6585_v49 = vsub.f32 1.0, %v15183_v31 }
0x26c9   :  { %v15235_v39 = vadd.f32 %v6670_v33, %v6654_v29 }
0x26ca   :  { %v15237_v24 = vadd.f32 %v6669_v5, %v6653_v32  ;;  %v6584_v5 = vsub.f32 1.0, %v15173_v9  ;;  %v6682_v9 = vmul.f32 %v15181_v1, %v14521_v22  ;;  %v6587_v22 = vsub.f32 1.0, %v15191_v23 }
0x26cb   :  { %6719 = vrot.lane.b32.xlu0 %v15235_v39, %s12288_s22 }
0x26cc   :  { %6717 = vrot.lane.b32.xlu1 %v15237_v24, %s12288_s22 }
0x26d5   :  { %v6612_v4 = vpop.permute.xlu0 %6611 }
0x26d6   :  { %v6656_v58 = vmul.f32 %v6612_v4, %v6576_v52  ;;  %v6610_v50 = vpop.permute.xlu1 %6609  ;;  %v6679_v52 = vmul.f32 %v15175_v48, %v14515_v35 }
0x26d7   :  { %v6655_v19 = vmul.f32 %v6610_v50, %v6575_v55 }
0x26d8   :  { %v15249_v56 = vadd.f32 %v6672_v8, %v6656_v58  ;;  %v6586_v58 = vsub.f32 1.0, %v15181_v1  ;;  %v6684_v1 = vmul.f32 %v15189_v3, %v14539_v2  ;;  %v17079_v2 = vld [vmem:[#allocation31_spill] sm:$0xff] }
0x26d9   :  { %v15251_v7 = vadd.f32 %v6671_v51, %v6655_v19  ;;  %v6681_v51 = vmul.f32 %v15183_v31, %v14527_v61 }
0x26da   :  { %6723 = vrot.lane.b32.xlu0 %v15249_v56, %s12288_s22  ;;  %v6616_v42 = vpop.permute.xlu0 %6615 }
0x26db   :  { %v6658_v63 = vmul.f32 %v6616_v42, %v6578_v18  ;;  %6721 = vrot.lane.b32.xlu1 %v15251_v7, %s12288_s22  ;;  %v6614_v60 = vpop.permute.xlu1 %6613 }
0x26dc   :  { %v6657_v0 = vmul.f32 %v6614_v60, %v6577_v36  ;;  %v6588_v36 = vsub.f32 1.0, %v15189_v3  ;;  %v17080_v3 = vld [vmem:[#allocation7_spill] sm:$0xff] }
0x26dd   :  { %v15263_v44 = vadd.f32 %v6674_v16, %v6658_v63  ;;  %v6683_v63 = vmul.f32 %v15191_v23, %v14533_v12  ;;  %v17078_v12 = vld [vmem:[#allocation30_spill] sm:$0xff] }
0x26de   :  { %v15265_v15 = vadd.f32 %v6673_v11, %v6657_v0 }
0x26df   :  { %6727 = vrot.lane.b32.xlu0 %v15263_v44, %s12288_s22 }
0x26e0   :  { %6725 = vrot.lane.b32.xlu1 %v15265_v15, %s12288_s22 }
0x26e1   :  { %v6620_v14 = vpop.permute.xlu0 %6619 }
0x26e2   :  { %v6660_v43 = vmul.f32 %v6620_v14, %v6580_v30 }
0x26e4   :  { %v15275_v6 = vadd.f32 %v6676_v57, %v6660_v43  ;;  %v6618_v47 = vpop.permute.xlu1 %6617 }
0x26e5   :  { %v6659_v41 = vmul.f32 %v6618_v47, %v6579_v28 }
0x26e6   :  { %6731 = vrot.lane.b32.xlu0 %v15275_v6, %s12288_s22 }
0x26e7   :  { %v15281_v53 = vadd.f32 %v6675_v38, %v6659_v41 }
0x26e9   :  { %6729 = vrot.lane.b32.xlu1 %v15281_v53, %s12288_s22  ;;  %v6624_v21 = vpop.permute.xlu0 %6623 }
0x26ea   :  { %v6662_v25 = vmul.f32 %v6624_v21, %v6582_v45  ;;  %v6622_v33 = vpop.permute.xlu1 %6621 }
0x26eb   :  { %v6661_v37 = vmul.f32 %v6622_v33, %v6581_v62 }
0x26ec   :  { %v15291_v29 = vadd.f32 %v6678_v10, %v6662_v25 }
0x26ed   :  { %v15293_v46 = vadd.f32 %v6677_v54, %v6661_v37 }
0x26ee   :  { %6735 = vrot.lane.b32.xlu0 %v15291_v29, %s12288_s22 }
0x26ef   :  { %6733 = vrot.lane.b32.xlu1 %v15293_v46, %s12288_s22 }
0x26f2   :  { %v6628_v32 = vpop.permute.xlu0 %6627 }
0x26f3   :  { %v6664_v17 = vmul.f32 %v6628_v32, %v6584_v5  ;;  %v6626_v59 = vpop.permute.xlu1 %6625  ;;  %v15383_v32 = vld [vmem:[#allocation4 + $0x328] ss:$0 sm:$0xff] }
0x26f4   :  { %v6663_v4 = vmul.f32 %v6626_v59, %v6583_v27 }
0x26f5   :  { %v15305_v55 = vadd.f32 %v6680_v13, %v6664_v17  ;;  %v15386_v13 = vld [vmem:[#allocation4 + $0x80] ss:$0 sm:$0xff] }
0x26f6   :  { %v15307_v8 = vadd.f32 %v6679_v52, %v6663_v4 }
0x26f7   :  { %6739 = vrot.lane.b32.xlu0 %v15305_v55, %s12288_s22 }
0x26f8   :  { %6737 = vrot.lane.b32.xlu1 %v15307_v8, %s12288_s22 }
0x26f9   :  { %v6632_v50 = vpop.permute.xlu0 %6631 }
0x26fa   :  { %v6666_v35 = vmul.f32 %v6632_v50, %v6586_v58  ;;  %v6630_v48 = vpop.permute.xlu1 %6629 }
0x26fb   :  { %v6665_v19 = vmul.f32 %v6630_v48, %v6585_v49 }
0x26fc   :  { %v15319_v18 = vadd.f32 %v6682_v9, %v6666_v35 }
0x26fd   :  { %v15321_v42 = vadd.f32 %v6681_v51, %v6665_v19 }
0x26fe   :  { %6743 = vrot.lane.b32.xlu0 %v15319_v18, %s12288_s22 }
0x26ff   :  { %6741 = vrot.lane.b32.xlu1 %v15321_v42, %s12288_s22 }
0x2701   :  { %v6636_v16 = vpop.permute.xlu0 %6635 }
0x2702   :  { %v6668_v61 = vmul.f32 %v6636_v16, %v6588_v36  ;;  %v6634_v31 = vpop.permute.xlu1 %6633 }
0x2703   :  { %v6667_v60 = vmul.f32 %v6634_v31, %v6587_v22 }
0x2704   :  { %v15333_v11 = vadd.f32 %v6684_v1, %v6668_v61 }
0x2705   :  { %v15335_v0 = vadd.f32 %v6683_v63, %v6667_v60 }
0x2706   :  { %6747 = vrot.lane.b32.xlu0 %v15333_v11, %s12288_s22 }
0x2707   :  { %17077 = vst [vmem:[#allocation20_spill] sm:$0xff] %v15335_v0  ;;  %6745 = vrot.lane.b32.xlu1 %v15335_v0, %s12288_s22 }
0x273d   :  { %v6720_v14 = vpop.permute.xlu0 %6719 }
0x273e   :  { %v6718_v30 = vpop.permute.xlu1 %6717 }
0x273f   :  { %11088 = vmatprep.mubr.msk.f32.mxu1 %vm130_vm3, %v6718_v30  ;;  %11120 = vmatprep.mubr.msk.f32.mxu0 %vm130_vm3, %v6718_v30 }
0x2740   :  { %11089 = vmatmul.mubr.msk.f32.vlgmr.msra.gmra.mrb[88].mxu1 %vm130_vm3, %v6720_v14  ;;  %11121 = vmatmul.mubr.msk.f32.vlgmr.msra.gmra.mrb[92].mxu0 %vm130_vm3, %v6720_v14 }
0x2741   :  { %11465 = vmatpush3.bf16.msra.mxu1 %v17078_v12  ;;  %11473 = vmatpush3.bf16.msra.mxu0 %v12991_v34 }
0x2742   :  { %11467 = vmatprep.subr.bf16.mxu1 %v17079_v2  ;;  %11475 = vmatprep.subr.bf16.mxu0 %v17080_v3 }
0x2745   :  { %11469 = vmatpush3.bf16.msra.mxu1 %v17079_v2  ;;  %11477 = vmatpush3.bf16.msra.mxu0 %v17080_v3 }
0x2746   :  { %11479 = vmatprep.subr.bf16.mxu1 %v13665_v20  ;;  %11487 = vmatprep.subr.bf16.mxu0 %v17078_v12 }
0x274c   :  { %v6724_v23 = vpop.permute.xlu0 %6723 }
0x274d   :  { %v6722_v57 = vpop.permute.xlu1 %6721 }
0x274e   :  { %11091 = vmatprep.mubr.msk.f32.mxu1 %vm130_vm3, %v6722_v57  ;;  %11123 = vmatprep.mubr.msk.f32.mxu0 %vm130_vm3, %v6722_v57 }
0x274f   :  { %11092 = vmatmul.mubr.msk.f32.gmra.mrb[90].mxu1 %vm130_vm3, %v6724_v23  ;;  %11124 = vmatmul.mubr.msk.f32.gmra.mrb[94].mxu0 %vm130_vm3, %v6724_v23 }
0x2751   :  { %v6728_v28 = vpop.permute.xlu0 %6727 }
0x2752   :  { %v6726_v43 = vpop.permute.xlu1 %6725 }
0x2753   :  { %11094 = vmatprep.mubr.msk.f32.mxu1 %vm130_vm3, %v6726_v43  ;;  %11126 = vmatprep.mubr.msk.f32.mxu0 %vm130_vm3, %v6726_v43 }
0x2754   :  { %11095 = vmatmul.mubr.msk.f32.gmra.mrb[92].mxu1 %vm130_vm3, %v6728_v28  ;;  %11127 = vmatmul.mubr.msk.f32.gmra.mrb[96].mxu0 %vm130_vm3, %v6728_v28 }
0x2758   :  { %v6732_v38 = vpop.permute.xlu0 %6731 }
0x275b   :  { %v6730_v47 = vpop.permute.xlu1 %6729 }
0x275c   :  { %11097 = vmatprep.mubr.msk.f32.mxu1 %vm130_vm3, %v6730_v47  ;;  %11129 = vmatprep.mubr.msk.f32.mxu0 %vm130_vm3, %v6730_v47 }
0x275d   :  { %11098 = vmatmul.mubr.msk.f32.gmra.mrb[94].mxu1 %vm130_vm3, %v6732_v38  ;;  %11130 = vmatmul.mubr.msk.f32.gmra.mrb[98].mxu0 %vm130_vm3, %v6732_v38 }
0x2760   :  { %v6736_v45 = vpop.permute.xlu0 %6735 }
0x2761   :  { %v6734_v41 = vpop.permute.xlu1 %6733 }
0x2762   :  { %11100 = vmatprep.mubr.msk.f32.mxu1 %vm130_vm3, %v6734_v41  ;;  %11132 = vmatprep.mubr.msk.f32.mxu0 %vm130_vm3, %v6734_v41 }
0x2763   :  { %11101 = vmatmul.mubr.msk.f32.gmra.mrb[96].mxu1 %vm130_vm3, %v6736_v45  ;;  %11133 = vmatmul.mubr.msk.f32.gmra.mrb[100].mxu0 %vm130_vm3, %v6736_v45 }
0x2769   :  { %v6740_v62 = vpop.permute.xlu0 %6739 }
0x276a   :  { %v6738_v21 = vpop.permute.xlu1 %6737 }
0x276b   :  { %11103 = vmatprep.mubr.msk.f32.mxu1 %vm130_vm3, %v6738_v21  ;;  %11135 = vmatprep.mubr.msk.f32.mxu0 %vm130_vm3, %v6738_v21 }
0x276c   :  { %11104 = vmatmul.mubr.msk.f32.gmra.mrb[98].mxu1 %vm130_vm3, %v6740_v62  ;;  %11136 = vmatmul.mubr.msk.f32.gmra.mrb[102].mxu0 %vm130_vm3, %v6740_v62 }
0x2770   :  { %v6744_v25 = vpop.permute.xlu0 %6743 }
0x2771   :  { %v6742_v10 = vpop.permute.xlu1 %6741 }
0x2772   :  { %11106 = vmatprep.mubr.msk.f32.mxu1 %vm130_vm3, %v6742_v10  ;;  %11138 = vmatprep.mubr.msk.f32.mxu0 %vm130_vm3, %v6742_v10 }
0x2773   :  { %11107 = vmatmul.mubr.msk.f32.gmra.mrb[100].mxu1 %vm130_vm3, %v6744_v25  ;;  %11139 = vmatmul.mubr.msk.f32.gmra.mrb[104].mxu0 %vm130_vm3, %v6744_v25 }
0x2778   :  { %v6748_v54 = vpop.permute.xlu0 %6747 }
0x2779   :  { %v6746_v33 = vpop.permute.xlu1 %6745 }
0x277a   :  { %11109 = vmatprep.mubr.msk.f32.mxu1 %vm130_vm3, %v6746_v33  ;;  %11141 = vmatprep.mubr.msk.f32.mxu0 %vm130_vm3, %v6746_v33 }
0x277b   :  { %11110 = vmatmul.mubr.msk.f32.gmra.mrb[102].mxu1 %vm130_vm3, %v6748_v54  ;;  %11142 = vmatmul.mubr.msk.f32.gmra.mrb[106].mxu0 %vm130_vm3, %v6748_v54 }
0x2813   :  { %v11090_v37 = vpop.f32.mrb[88].mxu1  ;;  %v15381_v5 = vpop.f32.mrb[92].mxu0 }
0x2814   :  { %v6853_v27 = vadd.f32 %v15383_v32, %v11090_v37  ;;  %v15390_v17 = vadd.f32 %v15386_v13, %v15381_v5  ;;  %v6847_v59 = vpop.f32.mrb[89].mxu1  ;;  %v15392_v52 = vpop.f32.mrb[93].mxu0 }
0x2815   :  { %v6848_v4 = vadd.f32 %v15383_v32, %v6847_v59  ;;  %v15397_v58 = vadd.f32 %v15386_v13, %v15392_v52 }
0x2816   :  { %9654 = vst.msk [vmem:[%s16967_s4 + $0x88] sm:$0xff] %vm9620_vm9, %v6853_v27  ;;  %v7090_v50 = vsel %vm130_vm3, %v15390_v17, 0.0 }
0x2817   :  { %9653 = vst.msk [vmem:[%s16967_s4 + $0x80] sm:$0xff] %vm9620_vm9, %v6848_v4  ;;  %7091 = vadd.xlane.f32.xlu0 %v7090_v50  ;;  %v7087_v49 = vsel %vm130_vm3, %v15397_v58, 0.0 }
0x2818   :  { %7088 = vadd.xlane.f32.xlu1 %v7087_v49 }
0x2822   :  { %v11093_v9 = vpop.f32.mrb[90].mxu1  ;;  %v15411_v35 = vpop.f32.mrb[94].mxu0 }
0x2823   :  { %v6863_v48 = vadd.f32 %v15383_v32, %v11093_v9  ;;  %v6857_v51 = vpop.f32.mrb[91].mxu1  ;;  %v15414_v19 = vpop.f32.mrb[95].mxu0  ;;  %v15427_v22 = vadd.f32 %v15386_v13, %v15411_v35 }
0x2824   :  { %v6858_v36 = vadd.f32 %v15383_v32, %v6857_v51  ;;  %v15419_v16 = vadd.f32 %v15386_v13, %v15414_v19 }
0x2825   :  { %9656 = vst.msk [vmem:[%s16967_s4 + $0x98] sm:$0xff] %vm9620_vm9, %v6863_v48  ;;  %v7096_v43 = vsel %vm130_vm3, %v15427_v22, 0.0 }
0x2826   :  { %9655 = vst.msk [vmem:[%s16967_s4 + $0x90] sm:$0xff] %vm9620_vm9, %v6858_v36  ;;  %v7093_v1 = vsel %vm130_vm3, %v15419_v16, 0.0 }
0x2827   :  { %7094 = vadd.xlane.f32.xlu0 %v7093_v1  ;;  %v11096_v61 = vpop.f32.mrb[92].mxu1  ;;  %v15435_v31 = vpop.f32.mrb[96].mxu0 }
0x2828   :  { %v6873_v63 = vadd.f32 %v15383_v32, %v11096_v61  ;;  %v6867_v60 = vpop.f32.mrb[93].mxu1  ;;  %v15438_v30 = vpop.f32.mrb[97].mxu0  ;;  %v15451_v57 = vadd.f32 %v15386_v13, %v15435_v31 }
0x2829   :  { %v6868_v14 = vadd.f32 %v15383_v32, %v6867_v60  ;;  %v15443_v23 = vadd.f32 %v15386_v13, %v15438_v30 }
0x282a   :  { %9658 = vst.msk [vmem:[%s16967_s4 + $0xa8] sm:$0xff] %vm9620_vm9, %v6873_v63  ;;  %v7102_v47 = vsel %vm130_vm3, %v15451_v57, 0.0 }
0x282b   :  { %9657 = vst.msk [vmem:[%s16967_s4 + $0xa0] sm:$0xff] %vm9620_vm9, %v6868_v14  ;;  %7097 = vadd.xlane.f32.xlu0 %v7096_v43  ;;  %v7099_v28 = vsel %vm130_vm3, %v15443_v23, 0.0 }
0x282c   :  { %7100 = vadd.xlane.f32.xlu1 %v7099_v28 }
0x282f   :  { %7103 = vadd.xlane.f32.xlu0 %v7102_v47 }
0x2830   :  { %v11099_v38 = vpop.f32.mrb[94].mxu1  ;;  %v15463_v41 = vpop.f32.mrb[98].mxu0 }
0x2831   :  { %v6883_v45 = vadd.f32 %v15383_v32, %v11099_v38  ;;  %v15468_v21 = vadd.f32 %v15386_v13, %v15463_v41  ;;  %v6877_v62 = vpop.f32.mrb[95].mxu1  ;;  %v15470_v10 = vpop.f32.mrb[99].mxu0 }
0x2832   :  { %v6878_v25 = vadd.f32 %v15383_v32, %v6877_v62  ;;  %v15475_v33 = vadd.f32 %v15386_v13, %v15470_v10 }
0x2833   :  { %9660 = vst.msk [vmem:[%s16967_s4 + $0xb8] sm:$0xff] %vm9620_vm9, %v6883_v45  ;;  %v7108_v54 = vsel %vm130_vm3, %v15468_v21, 0.0 }
0x2834   :  { %9659 = vst.msk [vmem:[%s16967_s4 + $0xb0] sm:$0xff] %vm9620_vm9, %v6878_v25  ;;  %7109 = vadd.xlane.f32.xlu0 %v7108_v54  ;;  %v7105_v37 = vsel %vm130_vm3, %v15475_v33, 0.0 }
0x2835   :  { %7106 = vadd.xlane.f32.xlu1 %v7105_v37 }
0x2836   :  { %v11102_v27 = vpop.f32.mrb[96].mxu1  ;;  %v15489_v59 = vpop.f32.mrb[100].mxu0 }
0x2837   :  { %v6893_v4 = vadd.f32 %v15383_v32, %v11102_v27  ;;  %v15494_v50 = vadd.f32 %v15386_v13, %v15489_v59  ;;  %v6887_v49 = vpop.f32.mrb[97].mxu1  ;;  %v15496_v9 = vpop.f32.mrb[101].mxu0 }
0x2838   :  { %v6888_v48 = vadd.f32 %v15383_v32, %v6887_v49  ;;  %v15501_v51 = vadd.f32 %v15386_v13, %v15496_v9 }
0x2839   :  { %9662 = vst.msk [vmem:[%s16967_s4 + $0xc8] sm:$0xff] %vm9620_vm9, %v6893_v4  ;;  %v7114_v36 = vsel %vm130_vm3, %v15494_v50, 0.0 }
0x283a   :  { %9661 = vst.msk [vmem:[%s16967_s4 + $0xc0] sm:$0xff] %vm9620_vm9, %v6888_v48  ;;  %7115 = vadd.xlane.f32.xlu0 %v7114_v36  ;;  %v7111_v1 = vsel %vm130_vm3, %v15501_v51, 0.0 }
0x283b   :  { %7112 = vadd.xlane.f32.xlu1 %v7111_v1 }
0x283f   :  { %v11105_v61 = vpop.f32.mrb[98].mxu1  ;;  %v15515_v63 = vpop.f32.mrb[102].mxu0 }
0x2840   :  { %v6903_v60 = vadd.f32 %v15383_v32, %v11105_v61  ;;  %v15520_v14 = vadd.f32 %v15386_v13, %v15515_v63  ;;  %v6897_v43 = vpop.f32.mrb[99].mxu1  ;;  %v15522_v28 = vpop.f32.mrb[103].mxu0 }
0x2841   :  { %v6898_v47 = vadd.f32 %v15383_v32, %v6897_v43  ;;  %v15527_v38 = vadd.f32 %v15386_v13, %v15522_v28 }
0x2842   :  { %9664 = vst.msk [vmem:[%s16967_s4 + $0xd8] sm:$0xff] %vm9620_vm9, %v6903_v60  ;;  %v7120_v45 = vsel %vm130_vm3, %v15520_v14, 0.0 }
0x2843   :  { %9663 = vst.msk [vmem:[%s16967_s4 + $0xd0] sm:$0xff] %vm9620_vm9, %v6898_v47  ;;  %7121 = vadd.xlane.f32.xlu0 %v7120_v45  ;;  %v7117_v62 = vsel %vm130_vm3, %v15527_v38, 0.0 }
0x2844   :  { %7118 = vadd.xlane.f32.xlu1 %v7117_v62 }
0x2846   :  { %v11108_v25 = vpop.f32.mrb[100].mxu1  ;;  %v15541_v54 = vpop.f32.mrb[104].mxu0 }
0x2847   :  { %v6913_v37 = vadd.f32 %v15383_v32, %v11108_v25  ;;  %v15546_v27 = vadd.f32 %v15386_v13, %v15541_v54  ;;  %v6907_v4 = vpop.f32.mrb[101].mxu1  ;;  %v15548_v49 = vpop.f32.mrb[105].mxu0 }
0x2848   :  { %v6908_v48 = vadd.f32 %v15383_v32, %v6907_v4  ;;  %v15553_v36 = vadd.f32 %v15386_v13, %v15548_v49 }
0x2849   :  { %9666 = vst.msk [vmem:[%s16967_s4 + $0xe8] sm:$0xff] %vm9620_vm9, %v6913_v37  ;;  %v7126_v1 = vsel %vm130_vm3, %v15546_v27, 0.0 }
0x284a   :  { %9665 = vst.msk [vmem:[%s16967_s4 + $0xe0] sm:$0xff] %vm9620_vm9, %v6908_v48  ;;  %7127 = vadd.xlane.f32.xlu0 %v7126_v1  ;;  %v7123_v61 = vsel %vm130_vm3, %v15553_v36, 0.0 }
0x284b   :  { %7124 = vadd.xlane.f32.xlu1 %v7123_v61 }
0x284e   :  { %v11111_v60 = vpop.f32.mrb[102].mxu1  ;;  %v15567_v43 = vpop.f32.mrb[106].mxu0 }
0x284f   :  { %v6923_v47 = vadd.f32 %v15383_v32, %v11111_v60  ;;  %v15572_v45 = vadd.f32 %v15386_v13, %v15567_v43  ;;  %v6917_v62 = vpop.f32.mrb[103].mxu1  ;;  %v15574_v25 = vpop.f32.mrb[107].mxu0 }
0x2850   :  { %v6918_v37 = vadd.f32 %v15383_v32, %v6917_v62  ;;  %v15579_v4 = vadd.f32 %v15386_v13, %v15574_v25 }
0x2851   :  { %9668 = vst.msk [vmem:[%s16967_s4 + $0xf8] sm:$0xff] %vm9620_vm9, %v6923_v47  ;;  %v7132_v48 = vsel %vm130_vm3, %v15572_v45, 0.0 }
0x2852   :  { %9667 = vst.msk [vmem:[%s16967_s4 + $0xf0] sm:$0xff] %vm9620_vm9, %v6918_v37  ;;  %7133 = vadd.xlane.f32.xlu0 %v7132_v48  ;;  %v7129_v32 = vsel %vm130_vm3, %v15579_v4, 0.0 }
0x2853   :  { %7130 = vadd.xlane.f32.xlu1 %v7129_v32 }
0x28a4   :  { %v7092_v13 = vpop.xlane.xlu0 %7091 }
0x28a5   :  { %v7136_v1 = vmul.f32 0.03125, %v7092_v13  ;;  %v7089_v61 = vpop.xlane.xlu1 %7088 }
0x28a6   :  { %v7135_v60 = vmul.f32 0.03125, %v7089_v61 }
0x28a7   :  { %v15594_v62 = vsub.f32 %v15390_v17, %v7136_v1 }
0x28a8   :  { %v15597_v47 = vsub.f32 %v15397_v58, %v7135_v60 }
0x28a9   :  { %v7168_v3 = vmul.f32 %v15594_v62, %v15594_v62 }
0x28aa   :  { %v7167_v37 = vmul.f32 %v15597_v47, %v15597_v47 }
0x28ab   :  { %v7186_v48 = vsel %vm130_vm3, %v7168_v3, 0.0 }
0x28ac   :  { %7187 = vadd.xlane.f32.xlu0 %v7186_v48  ;;  %v7183_v32 = vsel %vm130_vm3, %v7167_v37, 0.0 }
0x28ad   :  { %7184 = vadd.xlane.f32.xlu1 %v7183_v32 }
0x28b4   :  { %v7095_v13 = vpop.xlane.xlu0 %7094 }
0x28b5   :  { %v7137_v61 = vmul.f32 0.03125, %v7095_v13 }
0x28b7   :  { %v15606_v17 = vsub.f32 %v15419_v16, %v7137_v61 }
0x28b8   :  { %v7098_v1 = vpop.xlane.xlu0 %7097 }
0x28b9   :  { %v7138_v58 = vmul.f32 0.03125, %v7098_v1  ;;  %v7101_v60 = vpop.xlane.xlu1 %7100  ;;  %v7169_v2 = vmul.f32 %v15606_v17, %v15606_v17 }
0x28ba   :  { %v7139_v12 = vmul.f32 0.03125, %v7101_v60 }
0x28bb   :  { %v15611_v0 = vsub.f32 %v15427_v22, %v7138_v58  ;;  %v7189_v3 = vsel %vm130_vm3, %v7169_v2, 0.0 }
0x28bc   :  { %v15615_v37 = vsub.f32 %v15443_v23, %v7139_v12  ;;  %v7104_v48 = vpop.xlane.xlu0 %7103  ;;  %7190 = vadd.xlane.f32.xlu1 %v7189_v3 }
0x28bd   :  { %v7140_v32 = vmul.f32 0.03125, %v7104_v48  ;;  %v7170_v16 = vmul.f32 %v15611_v0, %v15611_v0 }
0x28be   :  { %v7171_v13 = vmul.f32 %v15615_v37, %v15615_v37 }
0x28bf   :  { %v15622_v61 = vsub.f32 %v15451_v57, %v7140_v32  ;;  %v7192_v22 = vsel %vm130_vm3, %v7170_v16, 0.0 }
0x28c0   :  { %7193 = vadd.xlane.f32.xlu0 %v7192_v22  ;;  %v7195_v2 = vsel %vm130_vm3, %v7171_v13, 0.0 }
0x28c1   :  { %v7110_v1 = vpop.xlane.xlu0 %7109  ;;  %7196 = vadd.xlane.f32.xlu1 %v7195_v2  ;;  %v7172_v12 = vmul.f32 %v15622_v61, %v15622_v61 }
0x28c2   :  { %v7142_v23 = vmul.f32 0.03125, %v7110_v1  ;;  %v7107_v58 = vpop.xlane.xlu1 %7106 }
0x28c3   :  { %v7141_v60 = vmul.f32 0.03125, %v7107_v58  ;;  %v7198_v3 = vsel %vm130_vm3, %v7172_v12, 0.0 }
0x28c4   :  { %v15630_v48 = vsub.f32 %v15468_v21, %v7142_v23  ;;  %7199 = vadd.xlane.f32.xlu0 %v7198_v3 }
0x28c5   :  { %v15633_v57 = vsub.f32 %v15475_v33, %v7141_v60 }
0x28c6   :  { %v7174_v32 = vmul.f32 %v15630_v48, %v15630_v48 }
0x28c7   :  { %v7116_v16 = vpop.xlane.xlu0 %7115  ;;  %v7173_v13 = vmul.f32 %v15633_v57, %v15633_v57 }
0x28c8   :  { %v7144_v22 = vmul.f32 0.03125, %v7116_v16  ;;  %v7204_v2 = vsel %vm130_vm3, %v7174_v32, 0.0  ;;  %v7113_v1 = vpop.xlane.xlu1 %7112 }
0x28c9   :  { %7205 = vadd.xlane.f32.xlu0 %v7204_v2  ;;  %v7201_v12 = vsel %vm130_vm3, %v7173_v13, 0.0  ;;  %v7143_v21 = vmul.f32 0.03125, %v7113_v1 }
0x28ca   :  { %v15642_v23 = vsub.f32 %v15494_v50, %v7144_v22  ;;  %7202 = vadd.xlane.f32.xlu1 %v7201_v12 }
0x28cb   :  { %v15645_v33 = vsub.f32 %v15501_v51, %v7143_v21 }
0x28cc   :  { %v7176_v58 = vmul.f32 %v15642_v23, %v15642_v23 }
0x28cd   :  { %v7175_v60 = vmul.f32 %v15645_v33, %v15645_v33 }
0x28ce   :  { %v7210_v3 = vsel %vm130_vm3, %v7176_v58, 0.0 }
0x28cf   :  { %7211 = vadd.xlane.f32.xlu0 %v7210_v3  ;;  %v7207_v32 = vsel %vm130_vm3, %v7175_v60, 0.0 }
0x28d0   :  { %v7122_v16 = vpop.xlane.xlu0 %7121  ;;  %7208 = vadd.xlane.f32.xlu1 %v7207_v32 }
0x28d1   :  { %v7146_v13 = vmul.f32 0.03125, %v7122_v16  ;;  %v7119_v50 = vpop.xlane.xlu1 %7118 }
0x28d2   :  { %v7145_v22 = vmul.f32 0.03125, %v7119_v50 }
0x28d3   :  { %v15654_v2 = vsub.f32 %v15520_v14, %v7146_v13 }
0x28d4   :  { %v15657_v51 = vsub.f32 %v15527_v38, %v7145_v22 }
0x28d5   :  { %v7178_v1 = vmul.f32 %v15654_v2, %v15654_v2 }
0x28d6   :  { %v7177_v12 = vmul.f32 %v15657_v51, %v15657_v51 }
0x28d7   :  { %v7128_v21 = vpop.xlane.xlu0 %7127  ;;  %v7216_v58 = vsel %vm130_vm3, %v7178_v1, 0.0 }
0x28d8   :  { %v7148_v60 = vmul.f32 0.03125, %v7128_v21  ;;  %7217 = vadd.xlane.f32.xlu0 %v7216_v58  ;;  %v7213_v3 = vsel %vm130_vm3, %v7177_v12, 0.0  ;;  %v7125_v32 = vpop.xlane.xlu1 %7124 }
0x28d9   :  { %7214 = vadd.xlane.f32.xlu1 %v7213_v3  ;;  %v7147_v14 = vmul.f32 0.03125, %v7125_v32 }
0x28da   :  { %v15666_v16 = vsub.f32 %v15546_v27, %v7148_v60 }
0x28db   :  { %v15669_v38 = vsub.f32 %v15553_v36, %v7147_v14 }
0x28dc   :  { %v7180_v13 = vmul.f32 %v15666_v16, %v15666_v16 }
0x28dd   :  { %v7179_v50 = vmul.f32 %v15669_v38, %v15669_v38 }
0x28de   :  { %v7222_v22 = vsel %vm130_vm3, %v7180_v13, 0.0 }
0x28df   :  { %v7134_v1 = vpop.xlane.xlu0 %7133  ;;  %7223 = vadd.xlane.f32.xlu0 %v7222_v22  ;;  %v7219_v12 = vsel %vm130_vm3, %v7179_v50, 0.0  ;;  %v7343_v50 = vadd.f32 %v15392_v52, %v14081_v26  ;;  %v7346_v22 = vadd.f32 %v15411_v35, %v14081_v26  ;;  %v7350_v52 = vadd.f32 %v15463_v41, %v14081_v26 }
0x28e0   :  { %v7150_v21 = vmul.f32 0.03125, %v7134_v1  ;;  %v7131_v58 = vpop.xlane.xlu1 %7130  ;;  %7220 = vadd.xlane.f32.xlu1 %v7219_v12  ;;  %v7348_v1 = vadd.f32 %v15435_v31, %v14081_v26  ;;  %v7349_v35 = vadd.f32 %v15470_v10, %v14081_v26  ;;  %v7351_v31 = vadd.f32 %v15496_v9, %v14081_v26 }
0x28e1   :  { %v7149_v27 = vmul.f32 0.03125, %v7131_v58  ;;  %v7353_v41 = vadd.f32 %v15522_v28, %v14081_v26  ;;  %v7356_v10 = vadd.f32 %v15541_v54, %v14081_v26  ;;  %v7357_v9 = vadd.f32 %v15574_v25, %v14081_v26 }
0x28e2   :  { %v15678_v60 = vsub.f32 %v15572_v45, %v7150_v21  ;;  %v7344_v45 = vadd.f32 %v15381_v5, %v14081_v26  ;;  %v7347_v5 = vadd.f32 %v15438_v30, %v14081_v26  ;;  %v7354_v30 = vadd.f32 %v15515_v63, %v14081_v26 }
0x28e3   :  { %v15681_v36 = vsub.f32 %v15579_v4, %v7149_v27  ;;  %v7345_v4 = vadd.f32 %v15414_v19, %v14081_v26  ;;  %v7352_v19 = vadd.f32 %v15489_v59, %v14081_v26  ;;  %v7355_v59 = vadd.f32 %v15548_v49, %v14081_v26 }
0x28e4   :  { %v7182_v3 = vmul.f32 %v15678_v60, %v15678_v60  ;;  %v7358_v63 = vadd.f32 %v15567_v43, %v14081_v26 }
0x28e5   :  { %v7181_v32 = vmul.f32 %v15681_v36, %v15681_v36 }
0x28e6   :  { %v7228_v14 = vsel %vm130_vm3, %v7182_v3, 0.0 }
0x28e7   :  { %7229 = vadd.xlane.f32.xlu0 %v7228_v14  ;;  %v7225_v13 = vsel %vm130_vm3, %v7181_v32, 0.0 }
0x28e8   :  { %7226 = vadd.xlane.f32.xlu1 %v7225_v13  ;;  %v15755_v13 = vld [vmem:[#allocation4 + $0x88] ss:$0 sm:$0xff] }
0x28f9   :  { %7600 = vrot.lane.b32.xlu1 %v7343_v50, %s12288_s22 }
0x28fd   :  { %7602 = vrot.lane.b32.xlu0 %v7344_v45, %s12288_s22  ;;  %7604 = vrot.lane.b32.xlu1 %v7345_v4, %s12288_s22 }
0x2901   :  { %7610 = vrot.lane.b32.xlu0 %v7348_v1, %s12288_s22  ;;  %7606 = vrot.lane.b32.xlu1 %v7346_v22, %s12288_s22 }
0x2905   :  { %7614 = vrot.lane.b32.xlu0 %v7350_v52, %s12288_s22  ;;  %7608 = vrot.lane.b32.xlu1 %v7347_v5, %s12288_s22 }
0x2909   :  { %7618 = vrot.lane.b32.xlu0 %v7352_v19, %s12288_s22  ;;  %7612 = vrot.lane.b32.xlu1 %v7349_v35, %s12288_s22 }
0x290d   :  { %7622 = vrot.lane.b32.xlu0 %v7354_v30, %s12288_s22  ;;  %7616 = vrot.lane.b32.xlu1 %v7351_v31, %s12288_s22 }
0x2911   :  { %7626 = vrot.lane.b32.xlu0 %v7356_v10, %s12288_s22  ;;  %7620 = vrot.lane.b32.xlu1 %v7353_v41, %s12288_s22 }
0x2915   :  { %7760 = vrot.lane.b32.xlu0 %v7343_v50, %s12287_s1  ;;  %7624 = vrot.lane.b32.xlu1 %v7355_v59, %s12288_s22 }
0x2919   :  { %7762 = vrot.lane.b32.xlu0 %v7344_v45, %s12287_s1  ;;  %7628 = vrot.lane.b32.xlu1 %v7357_v9, %s12288_s22 }
0x291d   :  { %7766 = vrot.lane.b32.xlu0 %v7346_v22, %s12287_s1  ;;  %7630 = vrot.lane.b32.xlu1 %v7358_v63, %s12288_s22 }
0x2921   :  { %7770 = vrot.lane.b32.xlu0 %v7348_v1, %s12287_s1  ;;  %7764 = vrot.lane.b32.xlu1 %v7345_v4, %s12287_s1  ;;  %v15759_v1 = vld [vmem:[#allocation4 + $0x90] ss:$0 sm:$0xff] }
0x2925   :  { %7774 = vrot.lane.b32.xlu0 %v7350_v52, %s12287_s1  ;;  %7768 = vrot.lane.b32.xlu1 %v7347_v5, %s12287_s1 }
0x2929   :  { %7778 = vrot.lane.b32.xlu0 %v7352_v19, %s12287_s1  ;;  %7772 = vrot.lane.b32.xlu1 %v7349_v35, %s12287_s1 }
0x292d   :  { %7782 = vrot.lane.b32.xlu0 %v7354_v30, %s12287_s1  ;;  %7776 = vrot.lane.b32.xlu1 %v7351_v31, %s12287_s1 }
0x2931   :  { %7786 = vrot.lane.b32.xlu0 %v7356_v10, %s12287_s1  ;;  %7780 = vrot.lane.b32.xlu1 %v7353_v41, %s12287_s1 }
0x2935   :  { %7790 = vrot.lane.b32.xlu0 %v7358_v63, %s12287_s1  ;;  %7784 = vrot.lane.b32.xlu1 %v7355_v59, %s12287_s1 }
0x2939   :  { %7788 = vrot.lane.b32.xlu1 %v7357_v9, %s12287_s1  ;;  %v7188_v28 = vpop.xlane.xlu0 %7187 }
0x293a   :  { %v7232_v54 = vmul.f32 0.03125, %v7188_v28  ;;  %v7185_v49 = vpop.xlane.xlu1 %7184 }
0x293b   :  { %v7231_v43 = vmul.f32 0.03125, %v7185_v49 }
0x293c   :  { %v7248_v25 = vadd.f32 1e-05, %v7232_v54 }
0x293d   :  { %v7247_v12 = vadd.f32 1e-05, %v7231_v43 }
0x293e   :  { %11953 = vrsqrt.f32 %v7248_v25 }
0x293f   :  { %11955 = vrsqrt.f32 %v7247_v12 }
0x2948   :  { %v11954_v21 = vpop.eup %11953 }
0x2949   :  { %v11956_v58 = vpop.eup %11955  ;;  %v7280_v27 = vmul.f32 %v11954_v21, %v15594_v62  ;;  %v7191_v3 = vpop.xlane.xlu1 %7190 }
0x294a   :  { %v7233_v32 = vmul.f32 0.03125, %v7191_v3  ;;  %v7279_v14 = vmul.f32 %v11956_v58, %v15597_v47 }
0x294b   :  { %v7296_v50 = vmul.f32 %v15755_v13, %v7280_v27 }
0x294c   :  { %v7249_v45 = vadd.f32 1e-05, %v7233_v32  ;;  %v7295_v4 = vmul.f32 %v15755_v13, %v7279_v14 }
0x294d   :  { %v7194_v22 = vpop.xlane.xlu0 %7193  ;;  %v7312_v5 = vadd.f32 %v15759_v1, %v7296_v50 }
0x294e   :  { %11957 = vrsqrt.f32 %v7249_v45  ;;  %v7234_v52 = vmul.f32 0.03125, %v7194_v22  ;;  %v7197_v35 = vpop.xlane.xlu1 %7196  ;;  %v7311_v62 = vadd.f32 %v15759_v1, %v7295_v4 }
0x294f   :  { %v7235_v19 = vmul.f32 0.03125, %v7197_v35  ;;  %v7328_v10 = vmax.f32 %v7312_v5, 0.0 }
0x2950   :  { %v7250_v31 = vadd.f32 1e-05, %v7234_v52  ;;  %v7327_v47 = vmax.f32 %v7311_v62, 0.0 }
0x2951   :  { %v7251_v30 = vadd.f32 1e-05, %v7235_v19  ;;  %v7200_v41 = vpop.xlane.xlu0 %7199 }
0x2952   :  { %11959 = vrsqrt.f32 %v7250_v31  ;;  %v7236_v59 = vmul.f32 0.03125, %v7200_v41  ;;  %11152 = vmatprep.mubr.msk.f32.mxu1 %vm130_vm3, %v7327_v47 }
0x2953   :  { %11961 = vrsqrt.f32 %v7251_v30  ;;  %11153 = vmatmul.mubr.msk.f32.vlgmr.msra.gmra.mrb[104].mxu1 %vm130_vm3, %v7328_v10 }
0x2954   :  { %v7252_v9 = vadd.f32 1e-05, %v7236_v59  ;;  %11481 = vmatpush3.bf16.msra.mxu1 %v13665_v20 }
0x2955   :  { %11483 = vmatprep.subr.bf16.mxu1 %v13669_v40 }
0x2956   :  { %11963 = vrsqrt.f32 %v7252_v9  ;;  %v7206_v63 = vpop.xlane.xlu0 %7205 }
0x2957   :  { %v7238_v28 = vmul.f32 0.03125, %v7206_v63  ;;  %v7203_v54 = vpop.xlane.xlu1 %7202 }
0x2958   :  { %v11958_v49 = vpop.eup %11957  ;;  %v7237_v43 = vmul.f32 0.03125, %v7203_v54  ;;  %11485 = vmatpush3.bf16.msra.mxu1 %v13669_v40 }
0x2959   :  { %v7254_v25 = vadd.f32 1e-05, %v7238_v28  ;;  %v7281_v12 = vmul.f32 %v11958_v49, %v15606_v17  ;;  %11495 = vmatprep.subr.bf16.mxu1 %v12991_v34 }
0x295a   :  { %v7253_v21 = vadd.f32 1e-05, %v7237_v43 }
0x295b   :  { %11965 = vrsqrt.f32 %v7254_v25  ;;  %v7297_v58 = vmul.f32 %v15755_v13, %v7281_v12 }
0x295c   :  { %v11960_v20 = vpop.eup %11959  ;;  %11967 = vrsqrt.f32 %v7253_v21  ;;  %v7212_v27 = vpop.xlane.xlu0 %7211 }
0x295d   :  { %v11962_v3 = vpop.eup %11961  ;;  %v7240_v32 = vmul.f32 0.03125, %v7212_v27  ;;  %v7209_v14 = vpop.xlane.xlu1 %7208  ;;  %v7313_v50 = vadd.f32 %v15759_v1, %v7297_v58  ;;  %v7282_v45 = vmul.f32 %v11960_v20, %v15611_v0 }
0x295e   :  { %v7239_v40 = vmul.f32 0.03125, %v7209_v14  ;;  %v7283_v4 = vmul.f32 %v11962_v3, %v15615_v37 }
0x295f   :  { %v7256_v17 = vadd.f32 1e-05, %v7240_v32  ;;  %v7329_v22 = vmax.f32 %v7313_v50, 0.0  ;;  %v7298_v5 = vmul.f32 %v15755_v13, %v7282_v45 }
0x2960   :  { %v11964_v52 = vpop.eup %11963  ;;  %v7255_v35 = vadd.f32 1e-05, %v7239_v40  ;;  %v7299_v62 = vmul.f32 %v15755_v13, %v7283_v4 }
0x2961   :  { %11969 = vrsqrt.f32 %v7256_v17  ;;  %11155 = vmatprep.mubr.msk.f32.mxu1 %vm130_vm3, %v7329_v22  ;;  %v7314_v19 = vadd.f32 %v15759_v1, %v7298_v5  ;;  %v7284_v31 = vmul.f32 %v11964_v52, %v15622_v61 }
0x2962   :  { %11971 = vrsqrt.f32 %v7255_v35  ;;  %v7315_v0 = vadd.f32 %v15759_v1, %v7299_v62 }
0x2963   :  { %v7330_v47 = vmax.f32 %v7314_v19, 0.0  ;;  %v7300_v37 = vmul.f32 %v15755_v13, %v7284_v31 }
0x2964   :  { %v7331_v30 = vmax.f32 %v7315_v0, 0.0 }
0x2965   :  { %v11966_v41 = vpop.eup %11965  ;;  %v7218_v10 = vpop.xlane.xlu0 %7217  ;;  %11156 = vmatmul.mubr.msk.f32.gmra.mrb[106].mxu1 %vm130_vm3, %v7330_v47  ;;  %v7316_v59 = vadd.f32 %v15759_v1, %v7300_v37 }
0x2966   :  { %v11968_v9 = vpop.eup %11967  ;;  %v7242_v63 = vmul.f32 0.03125, %v7218_v10  ;;  %11158 = vmatprep.mubr.msk.f32.mxu1 %vm130_vm3, %v7331_v30  ;;  %v7215_v28 = vpop.xlane.xlu1 %7214  ;;  %v7286_v61 = vmul.f32 %v11966_v41, %v15630_v48 }
0x2967   :  { %v7241_v54 = vmul.f32 0.03125, %v7215_v28  ;;  %v7332_v49 = vmax.f32 %v7316_v59, 0.0  ;;  %v7285_v43 = vmul.f32 %v11968_v9, %v15633_v57 }
0x2968   :  { %v7258_v25 = vadd.f32 1e-05, %v7242_v63  ;;  %v7302_v12 = vmul.f32 %v15755_v13, %v7286_v61 }
0x2969   :  { %v7257_v21 = vadd.f32 1e-05, %v7241_v54  ;;  %11159 = vmatmul.mubr.msk.f32.gmra.mrb[108].mxu1 %vm130_vm3, %v7332_v49  ;;  %v7301_v58 = vmul.f32 %v15755_v13, %v7285_v43 }
0x296a   :  { %11973 = vrsqrt.f32 %v7258_v25  ;;  %v7318_v20 = vadd.f32 %v15759_v1, %v7302_v12 }
0x296b   :  { %v11970_v27 = vpop.eup %11969  ;;  %11975 = vrsqrt.f32 %v7257_v21  ;;  %v7317_v3 = vadd.f32 %v15759_v1, %v7301_v58 }
0x296c   :  { %v11972_v48 = vpop.eup %11971  ;;  %v7224_v32 = vpop.xlane.xlu0 %7223  ;;  %v7288_v14 = vmul.f32 %v11970_v27, %v15642_v23  ;;  %v7334_v17 = vmax.f32 %v7318_v20, 0.0 }
0x296d   :  { %v7244_v57 = vmul.f32 0.03125, %v7224_v32  ;;  %v7333_v50 = vmax.f32 %v7317_v3, 0.0  ;;  %v7221_v45 = vpop.xlane.xlu1 %7220  ;;  %v7287_v40 = vmul.f32 %v11972_v48, %v15645_v33 }
0x296e   :  { %v7243_v4 = vmul.f32 0.03125, %v7221_v45  ;;  %v7304_v22 = vmul.f32 %v15755_v13, %v7288_v14 }
0x296f   :  { %v7260_v5 = vadd.f32 1e-05, %v7244_v57  ;;  %11161 = vmatprep.mubr.msk.f32.mxu1 %vm130_vm3, %v7333_v50  ;;  %v7303_v52 = vmul.f32 %v15755_v13, %v7287_v40 }
0x2970   :  { %v7259_v35 = vadd.f32 1e-05, %v7243_v4  ;;  %11162 = vmatmul.mubr.msk.f32.gmra.mrb[110].mxu1 %vm130_vm3, %v7334_v17  ;;  %v7320_v62 = vadd.f32 %v15759_v1, %v7304_v22 }
0x2971   :  { %11977 = vrsqrt.f32 %v7260_v5  ;;  %v7319_v23 = vadd.f32 %v15759_v1, %v7303_v52 }
0x2972   :  { %11979 = vrsqrt.f32 %v7259_v35  ;;  %v7336_v0 = vmax.f32 %v7320_v62, 0.0 }
0x2973   :  { %v7335_v19 = vmax.f32 %v7319_v23, 0.0  ;;  %v17081_v23 = vld [vmem:[#allocation12_spill] sm:$0xff] }
0x2974   :  { %v11974_v33 = vpop.eup %11973  ;;  %v7230_v31 = vpop.xlane.xlu0 %7229 }
0x2975   :  { %v11976_v47 = vpop.eup %11975  ;;  %v7246_v37 = vmul.f32 0.03125, %v7230_v31  ;;  %v7227_v30 = vpop.xlane.xlu1 %7226  ;;  %11164 = vmatprep.mubr.msk.f32.mxu1 %vm130_vm3, %v7335_v19  ;;  %v7290_v41 = vmul.f32 %v11974_v33, %v15654_v2  ;;  %v17082_v31 = vld [vmem:[#allocation13_spill] sm:$0xff] }
0x2976   :  { %v7245_v10 = vmul.f32 0.03125, %v7227_v30  ;;  %11165 = vmatmul.mubr.msk.f32.gmra.mrb[112].mxu1 %vm130_vm3, %v7336_v0  ;;  %v7289_v59 = vmul.f32 %v11976_v47, %v15657_v51  ;;  %v15827_v47 = vld [vmem:[#allocation4 + $0x50] ss:$0 sm:$0xff] }
0x2977   :  { %v7262_v9 = vadd.f32 1e-05, %v7246_v37  ;;  %v7306_v63 = vmul.f32 %v15755_v13, %v7290_v41 }
0x2978   :  { %v7261_v28 = vadd.f32 1e-05, %v7245_v10  ;;  %v7305_v61 = vmul.f32 %v15755_v13, %v7289_v59  ;;  %v7603_v5 = vpop.permute.xlu0 %7602 }
0x2979   :  { %11981 = vrsqrt.f32 %v7262_v9  ;;  %v7322_v54 = vadd.f32 %v15759_v1, %v7306_v63 }
0x297a   :  { %11983 = vrsqrt.f32 %v7261_v28  ;;  %v7321_v49 = vadd.f32 %v15759_v1, %v7305_v61 }
0x297b   :  { %v11978_v43 = vpop.eup %11977  ;;  %v7338_v21 = vmax.f32 %v7322_v54, 0.0 }
0x297c   :  { %v11980_v25 = vpop.eup %11979  ;;  %v7337_v2 = vmax.f32 %v7321_v49, 0.0  ;;  %v7292_v12 = vmul.f32 %v11978_v43, %v15666_v16 }
0x297d   :  { %v7291_v51 = vmul.f32 %v11980_v25, %v15669_v38  ;;  %v17083_v25 = vld [vmem:[#allocation14_spill] sm:$0xff] }
0x297e   :  { %11167 = vmatprep.mubr.msk.f32.mxu1 %vm130_vm3, %v7337_v2  ;;  %v7308_v58 = vmul.f32 %v15755_v13, %v7292_v12 }
0x297f   :  { %11168 = vmatmul.mubr.msk.f32.gmra.mrb[114].mxu1 %vm130_vm3, %v7338_v21  ;;  %v7307_v20 = vmul.f32 %v15755_v13, %v7291_v51 }
0x2980   :  { %v7324_v27 = vadd.f32 %v15759_v1, %v7308_v58 }
0x2981   :  { %v7323_v3 = vadd.f32 %v15759_v1, %v7307_v20  ;;  %v17084_v20 = vld [vmem:[#allocation15_spill] sm:$0xff] }
0x2982   :  { %v7340_v57 = vmax.f32 %v7324_v27, 0.0 }
0x2983   :  { %v11982_v48 = vpop.eup %11981  ;;  %v7339_v32 = vmax.f32 %v7323_v3, 0.0 }
0x2984   :  { %v11984_v14 = vpop.eup %11983  ;;  %v7294_v16 = vmul.f32 %v11982_v48, %v15678_v60  ;;  %v7601_v60 = vpop.permute.xlu1 %7600 }
0x2985   :  { %11170 = vmatprep.mubr.msk.f32.mxu1 %vm130_vm3, %v7339_v32  ;;  %v7293_v38 = vmul.f32 %v11984_v14, %v15681_v36  ;;  %v7611_v36 = vpop.permute.xlu0 %7610 }
0x2986   :  { %11171 = vmatmul.mubr.msk.f32.gmra.mrb[116].mxu1 %vm130_vm3, %v7340_v57  ;;  %v7310_v50 = vmul.f32 %v15755_v13, %v7294_v16 }
0x2987   :  { %v7309_v45 = vmul.f32 %v15755_v13, %v7293_v38 }
0x2988   :  { %v7326_v40 = vadd.f32 %v15759_v1, %v7310_v50  ;;  %v7605_v52 = vpop.permute.xlu1 %7604 }
0x2989   :  { %v7325_v4 = vadd.f32 %v15759_v1, %v7309_v45  ;;  %v7615_v13 = vpop.permute.xlu0 %7614 }
0x298a   :  { %v7342_v22 = vmax.f32 %v7326_v40, 0.0 }
0x298b   :  { %v7341_v17 = vmax.f32 %v7325_v4, 0.0 }
0x298c   :  { %v7607_v62 = vpop.permute.xlu1 %7606 }
0x298d   :  { %11173 = vmatprep.mubr.msk.f32.mxu1 %vm130_vm3, %v7341_v17  ;;  %v15837_v9 = vpop.permute.xlu0 %7618 }
0x298e   :  { %11174 = vmatmul.mubr.msk.f32.gmra.mrb[118].mxu1 %vm130_vm3, %v7342_v22 }
0x2990   :  { %v7609_v10 = vpop.permute.xlu1 %7608 }
0x2991   :  { %v15839_v61 = vpop.permute.xlu0 %7622 }
0x2994   :  { %v7613_v28 = vpop.permute.xlu1 %7612 }
0x2995   :  { %v15844_v51 = vpop.permute.xlu0 %7626 }
0x2998   :  { %v15841_v43 = vpop.permute.xlu1 %7616 }
0x2999   :  { %v7761_v22 = vpop.permute.xlu0 %7760 }
0x299c   :  { %v15857_v40 = vpop.permute.xlu1 %7620 }
0x2a26   :  { %v11154_v35 = vpop.f32.mrb[104].mxu1 }
0x2a27   :  { %v7553_v19 = vadd.f32 %v11154_v35, %v17081_v23  ;;  %v7473_v33 = vpop.f32.mrb[105].mxu1 }
0x2a28   :  { %v7552_v0 = vadd.f32 %v7473_v33, %v17082_v31 }
0x2a29   :  { %v15830_v1 = vadd.f32 %v15827_v47, %v7553_v19 }
0x2a2a   :  { %v15833_v37 = vadd.f32 %v15827_v47, %v7552_v0 }
0x2a2b   :  { %v7649_v30 = vadd.f32 %v7603_v5, %v15830_v1 }
0x2a2c   :  { %v7648_v41 = vadd.f32 %v7601_v60, %v15833_v37 }
0x2a2d   :  { %v10057_v59 = vmul.f32 -1.442695, %v7649_v30 }
0x2a2e   :  { %v10056_v63 = vmul.f32 -1.442695, %v7648_v41  ;;  %v15868_v41 = vpop.permute.xlu1 %7624 }
0x2a2f   :  { %11985 = vpow2.f32 %v10057_v59 }
0x2a30   :  { %11987 = vpow2.f32 %v10056_v63 }
0x2a38   :  { %v11157_v54 = vpop.f32.mrb[106].mxu1 }
0x2a39   :  { %v11986_v49 = vpop.eup %11985  ;;  %v7555_v2 = vadd.f32 %v11157_v54, %v17083_v25  ;;  %v7483_v12 = vpop.f32.mrb[107].mxu1 }
0x2a3a   :  { %v11988_v21 = vpop.eup %11987  ;;  %v7713_v58 = vadd.f32 1.0, %v11986_v49  ;;  %v7554_v27 = vadd.f32 %v7483_v12, %v17084_v20  ;;  %v7763_v54 = vpop.permute.xlu0 %7762 }
0x2a3b   :  { %v7712_v3 = vadd.f32 1.0, %v11988_v21  ;;  %v15848_v48 = vadd.f32 %v15827_v47, %v7555_v2 }
0x2a3c   :  { %11989 = vrcp.f32 %v7713_v58  ;;  %v15851_v32 = vadd.f32 %v15827_v47, %v7554_v27  ;;  %v11160_v14 = vpop.f32.mrb[108].mxu1 }
0x2a3d   :  { %11991 = vrcp.f32 %v7712_v3  ;;  %v7651_v57 = vadd.f32 %v7607_v62, %v15848_v48  ;;  %v7557_v16 = vadd.f32 %v11160_v14, %v17081_v23  ;;  %v7493_v38 = vpop.f32.mrb[109].mxu1 }
0x2a3e   :  { %v7650_v50 = vadd.f32 %v7605_v52, %v15851_v32  ;;  %v7556_v45 = vadd.f32 %v7493_v38, %v17082_v31  ;;  %v15888_v38 = vpop.permute.xlu1 %7628 }
0x2a3f   :  { %v10059_v4 = vmul.f32 -1.442695, %v7651_v57  ;;  %v15860_v17 = vadd.f32 %v15827_v47, %v7557_v16 }
0x2a40   :  { %v10058_v60 = vmul.f32 -1.442695, %v7650_v50  ;;  %v15863_v5 = vadd.f32 %v15827_v47, %v7556_v45 }
0x2a41   :  { %11993 = vpow2.f32 %v10059_v4  ;;  %v7653_v35 = vadd.f32 %v7611_v36, %v15860_v17 }
0x2a42   :  { %11995 = vpow2.f32 %v10058_v60  ;;  %v7652_v62 = vadd.f32 %v7609_v10, %v15863_v5 }
0x2a43   :  { %v10061_v52 = vmul.f32 -1.442695, %v7653_v35  ;;  %v11163_v19 = vpop.f32.mrb[110].mxu1 }
0x2a44   :  { %v10060_v33 = vmul.f32 -1.442695, %v7652_v62  ;;  %v7559_v0 = vadd.f32 %v11163_v19, %v17083_v25  ;;  %v7503_v30 = vpop.f32.mrb[111].mxu1 }
0x2a45   :  { %11997 = vpow2.f32 %v10061_v52  ;;  %v7558_v59 = vadd.f32 %v7503_v30, %v17084_v20  ;;  %v15901_v30 = vpop.permute.xlu1 %7630 }
0x2a46   :  { %v15871_v63 = vpop.eup %11989  ;;  %11999 = vpow2.f32 %v10060_v33  ;;  %v15874_v36 = vadd.f32 %v15827_v47, %v7559_v0 }
0x2a47   :  { %v15876_v49 = vpop.eup %11991  ;;  %v15879_v10 = vadd.f32 %v15827_v47, %v7558_v59  ;;  %v7809_v2 = vmul.f32 %v15871_v63, %v7763_v54 }
0x2a48   :  { %v7655_v12 = vadd.f32 %v7615_v13, %v15874_v36  ;;  %v7808_v21 = vmul.f32 %v15876_v49, %v7761_v22 }
0x2a49   :  { %v7654_v58 = vadd.f32 %v7613_v28, %v15879_v10  ;;  %v11166_v27 = vpop.f32.mrb[112].mxu1  ;;  %7842 = vrot.lane.b32.xlu0 %v7809_v2, %s12289_s23 }
0x2a4a   :  { %v10063_v3 = vmul.f32 -1.442695, %v7655_v12  ;;  %v7561_v14 = vadd.f32 %v11166_v27, %v17081_v23  ;;  %v7513_v57 = vpop.f32.mrb[113].mxu1  ;;  %7840 = vrot.lane.b32.xlu1 %v7808_v21, %s12289_s23  ;;  %v7767_v27 = vpop.permute.xlu0 %7766 }
0x2a4b   :  { %v11994_v16 = vpop.eup %11993  ;;  %v10062_v50 = vmul.f32 -1.442695, %v7654_v58  ;;  %v7560_v45 = vadd.f32 %v7513_v57, %v17082_v31  ;;  %v7765_v57 = vpop.permute.xlu1 %7764 }
0x2a4c   :  { %v11996_v13 = vpop.eup %11995  ;;  %v7715_v4 = vadd.f32 1.0, %v11994_v16  ;;  %12001 = vpow2.f32 %v10063_v3  ;;  %v15892_v28 = vadd.f32 %v15827_v47, %v7561_v14 }
0x2a4d   :  { %v7714_v22 = vadd.f32 1.0, %v11996_v13  ;;  %12003 = vpow2.f32 %v10062_v50  ;;  %v15895_v60 = vadd.f32 %v15827_v47, %v7560_v45 }
0x2a4e   :  { %12005 = vrcp.f32 %v7715_v4  ;;  %v7657_v35 = vadd.f32 %v15837_v9, %v15892_v28 }
0x2a4f   :  { %v11998_v62 = vpop.eup %11997  ;;  %12007 = vrcp.f32 %v7714_v22  ;;  %v7656_v52 = vadd.f32 %v15841_v43, %v15895_v60 }
0x2a50   :  { %v12000_v19 = vpop.eup %11999  ;;  %v7717_v33 = vadd.f32 1.0, %v11998_v62  ;;  %v10065_v0 = vmul.f32 -1.442695, %v7657_v35 }
0x2a51   :  { %v7716_v59 = vadd.f32 1.0, %v12000_v19  ;;  %v10064_v54 = vmul.f32 -1.442695, %v7656_v52 }
0x2a52   :  { %12009 = vrcp.f32 %v7717_v33  ;;  %v11169_v2 = vpop.f32.mrb[114].mxu1 }
0x2a53   :  { %12011 = vrcp.f32 %v7716_v59  ;;  %v7563_v12 = vadd.f32 %v11169_v2, %v17083_v25  ;;  %v7523_v21 = vpop.f32.mrb[115].mxu1 }
0x2a54   :  { %12013 = vpow2.f32 %v10065_v0  ;;  %v7562_v9 = vadd.f32 %v7523_v21, %v17084_v20 }
0x2a55   :  { %12015 = vpow2.f32 %v10064_v54  ;;  %v15906_v58 = vadd.f32 %v15827_v47, %v7563_v12  ;;  %v7771_v54 = vpop.permute.xlu0 %7770 }
0x2a56   :  { %v12002_v43 = vpop.eup %12001  ;;  %v15909_v3 = vadd.f32 %v15827_v47, %v7562_v9 }
0x2a57   :  { %v12004_v14 = vpop.eup %12003  ;;  %v7719_v16 = vadd.f32 1.0, %v12002_v43  ;;  %v7659_v50 = vadd.f32 %v15839_v61, %v15906_v58 }
0x2a58   :  { %v15913_v45 = vpop.eup %12005  ;;  %v7718_v13 = vadd.f32 1.0, %v12004_v14  ;;  %v7658_v4 = vadd.f32 %v15857_v40, %v15909_v3 }
0x2a59   :  { %v15917_v22 = vpop.eup %12007  ;;  %12017 = vrcp.f32 %v7719_v16  ;;  %v10067_v35 = vmul.f32 -1.442695, %v7659_v50  ;;  %v11172_v62 = vpop.f32.mrb[116].mxu1  ;;  %v7811_v52 = vmul.f32 %v15913_v45, %v7767_v27 }
0x2a5a   :  { %12019 = vrcp.f32 %v7718_v13  ;;  %v10066_v19 = vmul.f32 -1.442695, %v7658_v4  ;;  %v7565_v33 = vadd.f32 %v11172_v62, %v17081_v23  ;;  %v7533_v0 = vpop.f32.mrb[117].mxu1  ;;  %v7810_v61 = vmul.f32 %v15917_v22, %v7765_v57  ;;  %v7769_v23 = vpop.permute.xlu1 %7768 }
0x2a5b   :  { %12021 = vpow2.f32 %v10067_v35  ;;  %v7564_v59 = vadd.f32 %v7533_v0, %v17082_v31  ;;  %7846 = vrot.lane.b32.xlu0 %v7811_v52, %s12289_s23 }
0x2a5c   :  { %v15924_v40 = vpop.eup %12009  ;;  %12023 = vpow2.f32 %v10066_v19  ;;  %v15927_v2 = vadd.f32 %v15827_v47, %v7565_v33  ;;  %7844 = vrot.lane.b32.xlu1 %v7810_v61, %s12289_s23  ;;  %v7775_v19 = vpop.permute.xlu0 %7774 }
0x2a5d   :  { %v15930_v12 = vpop.eup %12011  ;;  %v15933_v21 = vadd.f32 %v15827_v47, %v7564_v59  ;;  %v7813_v9 = vmul.f32 %v15924_v40, %v7771_v54 }
0x2a5e   :  { %v12014_v31 = vpop.eup %12013  ;;  %v7661_v43 = vadd.f32 %v15844_v51, %v15927_v2  ;;  %v7812_v27 = vmul.f32 %v15930_v12, %v7769_v23  ;;  %v7773_v0 = vpop.permute.xlu1 %7772 }
0x2a5f   :  { %v12016_v14 = vpop.eup %12015  ;;  %v7721_v57 = vadd.f32 1.0, %v12014_v31  ;;  %v7660_v16 = vadd.f32 %v15868_v41, %v15933_v21  ;;  %7850 = vrot.lane.b32.xlu0 %v7813_v9, %s12289_s23 }
0x2a60   :  { %v7720_v50 = vadd.f32 1.0, %v12016_v14  ;;  %v10069_v13 = vmul.f32 -1.442695, %v7661_v43  ;;  %7848 = vrot.lane.b32.xlu1 %v7812_v27, %s12289_s23 }
0x2a61   :  { %12025 = vrcp.f32 %v7721_v57  ;;  %v10068_v4 = vmul.f32 -1.442695, %v7660_v16  ;;  %v11175_v35 = vpop.f32.mrb[118].mxu1  ;;  %v7779_v16 = vpop.permute.xlu0 %7778 }
0x2a62   :  { %12027 = vrcp.f32 %v7720_v50  ;;  %v7567_v62 = vadd.f32 %v11175_v35, %v17083_v25  ;;  %v7543_v51 = vpop.f32.mrb[119].mxu1 }
0x2a63   :  { %v15944_v52 = vpop.eup %12017  ;;  %12029 = vpow2.f32 %v10069_v13  ;;  %v7566_v33 = vadd.f32 %v7543_v51, %v17084_v20 }
0x2a64   :  { %v15947_v41 = vpop.eup %12019  ;;  %12031 = vpow2.f32 %v10068_v4  ;;  %v15950_v61 = vadd.f32 %v15827_v47, %v7567_v62  ;;  %v7815_v59 = vmul.f32 %v15944_v52, %v7775_v19 }
0x2a65   :  { %v12022_v54 = vpop.eup %12021  ;;  %v15954_v23 = vadd.f32 %v15827_v47, %v7566_v33  ;;  %v7814_v25 = vmul.f32 %v15947_v41, %v7773_v0  ;;  %v7783_v33 = vpop.permute.xlu0 %7782 }
0x2a66   :  { %v12024_v9 = vpop.eup %12023  ;;  %v7723_v31 = vadd.f32 1.0, %v12022_v54  ;;  %v7663_v20 = vadd.f32 %v15901_v30, %v15950_v61  ;;  %7854 = vrot.lane.b32.xlu0 %v7815_v59, %s12289_s23  ;;  %v7777_v30 = vpop.permute.xlu1 %7776 }
0x2a67   :  { %v7722_v43 = vadd.f32 1.0, %v12024_v9  ;;  %v7662_v27 = vadd.f32 %v15888_v38, %v15954_v23  ;;  %7852 = vrot.lane.b32.xlu1 %v7814_v25, %s12289_s23 }
0x2a68   :  { %12033 = vrcp.f32 %v7723_v31  ;;  %v10071_v14 = vmul.f32 -1.442695, %v7663_v20 }
0x2a69   :  { %12035 = vrcp.f32 %v7722_v43  ;;  %v10070_v47 = vmul.f32 -1.442695, %v7662_v27 }
0x2a6a   :  { %12037 = vpow2.f32 %v10071_v14  ;;  %v7781_v59 = vpop.permute.xlu1 %7780  ;;  %v7787_v14 = vpop.permute.xlu0 %7786 }
0x2a6b   :  { %v15963_v57 = vpop.eup %12025  ;;  %12039 = vpow2.f32 %v10070_v47 }
0x2a6c   :  { %v15965_v50 = vpop.eup %12027  ;;  %v7817_v13 = vmul.f32 %v15963_v57, %v7779_v16 }
0x2a6d   :  { %v12030_v4 = vpop.eup %12029  ;;  %v7816_v35 = vmul.f32 %v15965_v50, %v7777_v30 }
0x2a6e   :  { %v12032_v38 = vpop.eup %12031  ;;  %v7725_v62 = vadd.f32 1.0, %v12030_v4  ;;  %7858 = vrot.lane.b32.xlu0 %v7817_v13, %s12289_s23  ;;  %v7785_v16 = vpop.permute.xlu1 %7784 }
0x2a6f   :  { %v7724_v51 = vadd.f32 1.0, %v12032_v38  ;;  %7856 = vrot.lane.b32.xlu1 %v7816_v35, %s12289_s23  ;;  %v7791_v35 = vpop.permute.xlu0 %7790 }
0x2a70   :  { %12041 = vrcp.f32 %v7725_v62 }
0x2a71   :  { %12043 = vrcp.f32 %v7724_v51 }
0x2a72   :  { %v15971_v19 = vpop.eup %12033  ;;  %v7789_v62 = vpop.permute.xlu1 %7788 }
0x2a73   :  { %v15973_v0 = vpop.eup %12035  ;;  %v7819_v54 = vmul.f32 %v15971_v19, %v7783_v33 }
0x2a74   :  { %v12038_v25 = vpop.eup %12037  ;;  %v7818_v9 = vmul.f32 %v15973_v0, %v7781_v59 }
0x2a75   :  { %v12040_v31 = vpop.eup %12039  ;;  %v7727_v20 = vadd.f32 1.0, %v12038_v25  ;;  %7862 = vrot.lane.b32.xlu0 %v7819_v54, %s12289_s23 }
0x2a76   :  { %v7726_v43 = vadd.f32 1.0, %v12040_v31  ;;  %7860 = vrot.lane.b32.xlu1 %v7818_v9, %s12289_s23 }
0x2a77   :  { %12045 = vrcp.f32 %v7727_v20 }
0x2a78   :  { %12047 = vrcp.f32 %v7726_v43 }
0x2a7a   :  { %v15979_v27 = vpop.eup %12041 }
0x2a7b   :  { %v15981_v47 = vpop.eup %12043  ;;  %v7821_v30 = vmul.f32 %v15979_v27, %v7787_v14 }
0x2a7c   :  { %v7820_v13 = vmul.f32 %v15981_v47, %v7785_v16 }
0x2a7d   :  { %7866 = vrot.lane.b32.xlu0 %v7821_v30, %s12289_s23 }
0x2a7e   :  { %7864 = vrot.lane.b32.xlu1 %v7820_v13, %s12289_s23 }
0x2a81   :  { %v15987_v4 = vpop.eup %12045 }
0x2a82   :  { %v15989_v38 = vpop.eup %12047  ;;  %v7823_v51 = vmul.f32 %v15987_v4, %v7791_v35 }
0x2a83   :  { %v7822_v33 = vmul.f32 %v15989_v38, %v7789_v62 }
0x2a84   :  { %7870 = vrot.lane.b32.xlu0 %v7823_v51, %s12289_s23 }
0x2a85   :  { %7868 = vrot.lane.b32.xlu1 %v7822_v33, %s12289_s23 }
0x2abb   :  { %v7843_v59 = vpop.permute.xlu0 %7842 }
0x2abc   :  { %v7889_v54 = vadd.f32 %v7843_v59, %v15830_v1  ;;  %v7841_v25 = vpop.permute.xlu1 %7840 }
0x2abd   :  { %v7888_v9 = vadd.f32 %v7841_v25, %v15833_v37 }
0x2abe   :  { %12049 = vtanh.f32 %v7889_v54 }
0x2abf   :  { %12051 = vtanh.f32 %v7888_v9 }
0x2ac8   :  { %v12050_v31 = vpop.eup %12049 }
0x2ac9   :  { %v12052_v20 = vpop.eup %12051  ;;  %7954 = vrot.lane.b32.xlu0 %v12050_v31, %s12288_s22 }
0x2aca   :  { %7952 = vrot.lane.b32.xlu1 %v12052_v20, %s12288_s22 }
0x2acd   :  { %v7847_v43 = vpop.permute.xlu0 %7846 }
0x2ace   :  { %v7891_v14 = vadd.f32 %v7847_v43, %v15848_v48  ;;  %v7845_v16 = vpop.permute.xlu1 %7844 }
0x2acf   :  { %v7890_v30 = vadd.f32 %v7845_v16, %v15851_v32 }
0x2ad0   :  { %12053 = vtanh.f32 %v7891_v14 }
0x2ad1   :  { %12055 = vtanh.f32 %v7890_v30  ;;  %v7851_v1 = vpop.permute.xlu0 %7850 }
0x2ad2   :  { %v7893_v13 = vadd.f32 %v7851_v1, %v15860_v17  ;;  %v7849_v37 = vpop.permute.xlu1 %7848 }
0x2ad3   :  { %v7892_v35 = vadd.f32 %v7849_v37, %v15863_v5 }
0x2ad4   :  { %12057 = vtanh.f32 %v7893_v13 }
0x2ad5   :  { %12059 = vtanh.f32 %v7892_v35 }
0x2ad8   :  { %v7855_v62 = vpop.permute.xlu0 %7854 }
0x2ad9   :  { %v7895_v51 = vadd.f32 %v7855_v62, %v15874_v36  ;;  %v7853_v33 = vpop.permute.xlu1 %7852 }
0x2ada   :  { %v12054_v59 = vpop.eup %12053  ;;  %v7894_v48 = vadd.f32 %v7853_v33, %v15879_v10 }
0x2adb   :  { %v12056_v54 = vpop.eup %12055  ;;  %12061 = vtanh.f32 %v7895_v51  ;;  %7958 = vrot.lane.b32.xlu0 %v12054_v59, %s12288_s22 }
0x2adc   :  { %12063 = vtanh.f32 %v7894_v48  ;;  %7956 = vrot.lane.b32.xlu1 %v12056_v54, %s12288_s22  ;;  %v7921_v54 = vsub.f32 1.0, %v15871_v63 }
0x2ade   :  { %v12058_v32 = vpop.eup %12057 }
0x2adf   :  { %v12060_v17 = vpop.eup %12059  ;;  %7962 = vrot.lane.b32.xlu0 %v12058_v32, %s12288_s22  ;;  %v7920_v32 = vsub.f32 1.0, %v15876_v49 }
0x2ae0   :  { %v7859_v5 = vpop.permute.xlu0 %7858  ;;  %7960 = vrot.lane.b32.xlu1 %v12060_v17, %s12288_s22 }
0x2ae1   :  { %v7897_v36 = vadd.f32 %v7859_v5, %v15892_v28  ;;  %v7857_v25 = vpop.permute.xlu1 %7856 }
0x2ae2   :  { %v7896_v9 = vadd.f32 %v7857_v25, %v15895_v60 }
0x2ae3   :  { %12065 = vtanh.f32 %v7897_v36  ;;  %v8016_v36 = vmul.f32 %v15876_v49, %v15237_v24 }
0x2ae4   :  { %12067 = vtanh.f32 %v7896_v9 }
0x2ae5   :  { %v12062_v10 = vpop.eup %12061 }
0x2ae6   :  { %v12064_v31 = vpop.eup %12063  ;;  %7966 = vrot.lane.b32.xlu0 %v12062_v10, %s12288_s22 }
0x2ae7   :  { %7964 = vrot.lane.b32.xlu1 %v12064_v31, %s12288_s22  ;;  %v7863_v20 = vpop.permute.xlu0 %7862  ;;  %v7923_v31 = vsub.f32 1.0, %v15913_v45 }
0x2ae8   :  { %v7899_v43 = vadd.f32 %v7863_v20, %v15906_v58  ;;  %v7861_v14 = vpop.permute.xlu1 %7860 }
0x2ae9   :  { %v7898_v16 = vadd.f32 %v7861_v14, %v15909_v3 }
0x2aea   :  { %12069 = vtanh.f32 %v7899_v43  ;;  %v8018_v43 = vmul.f32 %v15917_v22, %v15251_v7  ;;  %v8020_v7 = vmul.f32 %v15930_v12, %v15265_v15  ;;  %v8023_v15 = vmul.f32 %v15944_v52, %v15275_v6 }
0x2aeb   :  { %12071 = vtanh.f32 %v7898_v16  ;;  %v7928_v6 = vsub.f32 1.0, %v15965_v50 }
0x2aed   :  { %v12066_v28 = vpop.eup %12065 }
0x2aee   :  { %v12068_v30 = vpop.eup %12067  ;;  %7970 = vrot.lane.b32.xlu0 %v12066_v28, %s12288_s22  ;;  %v7925_v28 = vsub.f32 1.0, %v15924_v40 }
0x2aef   :  { %7968 = vrot.lane.b32.xlu1 %v12068_v30, %s12288_s22  ;;  %v7867_v60 = vpop.permute.xlu0 %7866 }
0x2af0   :  { %v7901_v1 = vadd.f32 %v7867_v60, %v15927_v2  ;;  %v7865_v13 = vpop.permute.xlu1 %7864 }
0x2af1   :  { %v7900_v37 = vadd.f32 %v7865_v13, %v15933_v21  ;;  %v8021_v13 = vmul.f32 %v15924_v40, %v15263_v44  ;;  %v7927_v44 = vsub.f32 1.0, %v15944_v52  ;;  %v8025_v52 = vmul.f32 %v15963_v57, %v15291_v29 }
0x2af2   :  { %12073 = vtanh.f32 %v7901_v1  ;;  %v7924_v1 = vsub.f32 1.0, %v15930_v12  ;;  %v7930_v29 = vsub.f32 1.0, %v15973_v0 }
0x2af3   :  { %12075 = vtanh.f32 %v7900_v37 }
0x2af4   :  { %v12070_v58 = vpop.eup %12069 }
0x2af5   :  { %v12072_v35 = vpop.eup %12071  ;;  %7974 = vrot.lane.b32.xlu0 %v12070_v58, %s12288_s22 }
0x2af6   :  { %v7871_v3 = vpop.permute.xlu0 %7870  ;;  %7972 = vrot.lane.b32.xlu1 %v12072_v35, %s12288_s22  ;;  %v7926_v35 = vsub.f32 1.0, %v15947_v41 }
0x2af7   :  { %v7903_v62 = vadd.f32 %v7871_v3, %v15950_v61  ;;  %v7869_v51 = vpop.permute.xlu1 %7868 }
0x2af8   :  { %v7902_v33 = vadd.f32 %v7869_v51, %v15954_v23  ;;  %v8017_v23 = vmul.f32 %v15871_v63, %v15235_v39  ;;  %v7922_v39 = vsub.f32 1.0, %v15917_v22  ;;  %v8019_v63 = vmul.f32 %v15913_v45, %v15249_v56 }
0x2af9   :  { %12077 = vtanh.f32 %v7903_v62  ;;  %v8022_v62 = vmul.f32 %v15947_v41, %v15281_v53 }
0x2afa   :  { %12079 = vtanh.f32 %v7902_v33 }
0x2afc   :  { %v12074_v2 = vpop.eup %12073 }
0x2afd   :  { %v12076_v59 = vpop.eup %12075  ;;  %7978 = vrot.lane.b32.xlu0 %v12074_v2, %s12288_s22 }
0x2afe   :  { %7976 = vrot.lane.b32.xlu1 %v12076_v59, %s12288_s22  ;;  %v7929_v59 = vsub.f32 1.0, %v15963_v57  ;;  %v8027_v57 = vmul.f32 %v15971_v19, %v15305_v55  ;;  %v7932_v55 = vsub.f32 1.0, %v15981_v47 }
0x2b03   :  { %v12078_v21 = vpop.eup %12077 }
0x2b04   :  { %v12080_v48 = vpop.eup %12079  ;;  %7982 = vrot.lane.b32.xlu0 %v12078_v21, %s12288_s22 }
0x2b05   :  { %7980 = vrot.lane.b32.xlu1 %v12080_v48, %s12288_s22  ;;  %v8024_v48 = vmul.f32 %v15965_v50, %v15293_v46 }
0x2b3b   :  { %v7955_v61 = vpop.permute.xlu0 %7954 }
0x2b3c   :  { %v8001_v17 = vmul.f32 %v7955_v61, %v7921_v54  ;;  %v7953_v5 = vpop.permute.xlu1 %7952 }
0x2b3d   :  { %v8000_v25 = vmul.f32 %v7953_v5, %v7920_v32  ;;  %v8026_v5 = vmul.f32 %v15973_v0, %v15307_v8 }
0x2b3e   :  { %v16033_v9 = vadd.f32 %v8017_v23, %v8001_v17  ;;  %v7931_v23 = vsub.f32 1.0, %v15971_v19  ;;  %v8029_v19 = vmul.f32 %v15979_v27, %v15319_v18  ;;  %v7934_v18 = vsub.f32 1.0, %v15989_v38 }
0x2b3f   :  { %v16035_v10 = vadd.f32 %v8016_v36, %v8000_v25 }
0x2b40   :  { %8066 = vrot.lane.b32.xlu0 %v16033_v9, %s12288_s22 }
0x2b41   :  { %8064 = vrot.lane.b32.xlu1 %v16035_v10, %s12288_s22 }
0x2b4d   :  { %v7959_v20 = vpop.permute.xlu0 %7958 }
0x2b4e   :  { %v8003_v24 = vmul.f32 %v7959_v20, %v7923_v31  ;;  %v7957_v49 = vpop.permute.xlu1 %7956  ;;  %v7933_v20 = vsub.f32 1.0, %v15979_v27  ;;  %v8031_v27 = vmul.f32 %v15987_v4, %v15333_v11  ;;  %v17086_v11 = vld [vmem:[#allocation30_spill] sm:$0xff] }
0x2b4f   :  { %v8002_v14 = vmul.f32 %v7957_v49, %v7922_v39 }
0x2b50   :  { %v16047_v16 = vadd.f32 %v8019_v63, %v8003_v24  ;;  %v8028_v63 = vmul.f32 %v15981_v47, %v15321_v42 }
0x2b51   :  { %v16050_v30 = vadd.f32 %v8018_v43, %v8002_v14  ;;  %v7963_v60 = vpop.permute.xlu0 %7962  ;;  %v7935_v14 = vsub.f32 1.0, %v15987_v4  ;;  %v17087_v4 = vld [vmem:[#allocation31_spill] sm:$0xff] }
0x2b52   :  { %v8005_v37 = vmul.f32 %v7963_v60, %v7925_v28  ;;  %8070 = vrot.lane.b32.xlu0 %v16047_v16, %s12288_s22  ;;  %v7961_v56 = vpop.permute.xlu1 %7960  ;;  %v17085_v60 = vld [vmem:[#allocation20_spill] sm:$0xff] }
0x2b53   :  { %v8004_v45 = vmul.f32 %v7961_v56, %v7924_v1  ;;  %8068 = vrot.lane.b32.xlu1 %v16050_v30, %s12288_s22  ;;  %v8030_v1 = vmul.f32 %v15989_v38, %v17085_v60  ;;  %v17088_v38 = vld [vmem:[#allocation7_spill] sm:$0xff] }
0x2b54   :  { %v16061_v22 = vadd.f32 %v8021_v13, %v8005_v37 }
0x2b55   :  { %v16063_v58 = vadd.f32 %v8020_v7, %v8004_v45 }
0x2b56   :  { %8074 = vrot.lane.b32.xlu0 %v16061_v22, %s12288_s22 }
0x2b57   :  { %8072 = vrot.lane.b32.xlu1 %v16063_v58, %s12288_s22 }
0x2b58   :  { %v7967_v40 = vpop.permute.xlu0 %7966 }
0x2b59   :  { %v8007_v12 = vmul.f32 %v7967_v40, %v7927_v44  ;;  %v7965_v3 = vpop.permute.xlu1 %7964 }
0x2b5a   :  { %v8006_v51 = vmul.f32 %v7965_v3, %v7926_v35 }
0x2b5b   :  { %v16075_v33 = vadd.f32 %v8023_v15, %v8007_v12 }
0x2b5c   :  { %v16077_v2 = vadd.f32 %v8022_v62, %v8006_v51 }
0x2b5d   :  { %8078 = vrot.lane.b32.xlu0 %v16075_v33, %s12288_s22 }
0x2b5e   :  { %8076 = vrot.lane.b32.xlu1 %v16077_v2, %s12288_s22 }
0x2b60   :  { %v7971_v21 = vpop.permute.xlu0 %7970 }
0x2b61   :  { %v8009_v53 = vmul.f32 %v7971_v21, %v7929_v59  ;;  %v7969_v41 = vpop.permute.xlu1 %7968 }
0x2b62   :  { %v8008_v54 = vmul.f32 %v7969_v41, %v7928_v6 }
0x2b63   :  { %v16089_v61 = vadd.f32 %v8025_v52, %v8009_v53 }
0x2b64   :  { %v16091_v32 = vadd.f32 %v8024_v48, %v8008_v54  ;;  %v16179_v54 = vld [vmem:[#allocation4 + $0x328] ss:$0 sm:$0xff] }
0x2b65   :  { %8082 = vrot.lane.b32.xlu0 %v16089_v61, %s12288_s22 }
0x2b66   :  { %8080 = vrot.lane.b32.xlu1 %v16091_v32, %s12288_s22 }
0x2b67   :  { %v7975_v17 = vpop.permute.xlu0 %7974 }
0x2b68   :  { %v8011_v46 = vmul.f32 %v7975_v17, %v7931_v23  ;;  %v7973_v50 = vpop.permute.xlu1 %7972  ;;  %v16182_v17 = vld [vmem:[#allocation4 + $0x80] ss:$0 sm:$0xff] }
0x2b69   :  { %v8010_v36 = vmul.f32 %v7973_v50, %v7930_v29 }
0x2b6a   :  { %v16103_v25 = vadd.f32 %v8027_v57, %v8011_v46 }
0x2b6b   :  { %v16105_v31 = vadd.f32 %v8026_v5, %v8010_v36 }
0x2b6c   :  { %8086 = vrot.lane.b32.xlu0 %v16103_v25, %s12288_s22 }
0x2b6d   :  { %8084 = vrot.lane.b32.xlu1 %v16105_v31, %s12288_s22 }
0x2b6f   :  { %v7979_v39 = vpop.permute.xlu0 %7978 }
0x2b70   :  { %v8013_v8 = vmul.f32 %v7979_v39, %v7933_v20  ;;  %v7977_v0 = vpop.permute.xlu1 %7976 }
0x2b71   :  { %v8012_v24 = vmul.f32 %v7977_v0, %v7932_v55 }
0x2b72   :  { %v16117_v49 = vadd.f32 %v8029_v19, %v8013_v8 }
0x2b73   :  { %v16119_v43 = vadd.f32 %v8028_v63, %v8012_v24 }
0x2b74   :  { %8090 = vrot.lane.b32.xlu0 %v16117_v49, %s12288_s22 }
0x2b75   :  { %8088 = vrot.lane.b32.xlu1 %v16119_v43, %s12288_s22 }
0x2b76   :  { %v7983_v28 = vpop.permute.xlu0 %7982 }
0x2b77   :  { %v8015_v42 = vmul.f32 %v7983_v28, %v7935_v14  ;;  %v7981_v47 = vpop.permute.xlu1 %7980 }
0x2b78   :  { %v8014_v13 = vmul.f32 %v7981_v47, %v7934_v18 }
0x2b79   :  { %v16131_v37 = vadd.f32 %v8031_v27, %v8015_v42 }
0x2b7a   :  { %v16133_v56 = vadd.f32 %v8030_v1, %v8014_v13 }
0x2b7b   :  { %8094 = vrot.lane.b32.xlu0 %v16131_v37, %s12288_s22 }
0x2b7c   :  { %8092 = vrot.lane.b32.xlu1 %v16133_v56, %s12288_s22 }
0x2bb2   :  { %v8067_v45 = vpop.permute.xlu0 %8066 }
0x2bb3   :  { %v8065_v7 = vpop.permute.xlu1 %8064 }
0x2bb4   :  { %11184 = vmatprep.mubr.msk.f32.mxu0 %vm130_vm3, %v8065_v7  ;;  %11216 = vmatprep.mubr.msk.f32.mxu1 %vm130_vm3, %v8065_v7 }
0x2bb5   :  { %11185 = vmatmul.mubr.msk.f32.vlgmr.msra.gmra.mrb[108].mxu0 %vm130_vm3, %v8067_v45  ;;  %11217 = vmatmul.mubr.msk.f32.vlgmr.msra.gmra.mrb[120].mxu1 %vm130_vm3, %v8067_v45 }
0x2bb6   :  { %11489 = vmatpush3.bf16.msra.mxu0 %v17086_v11  ;;  %11497 = vmatpush3.bf16.msra.mxu1 %v12991_v34 }
0x2bb7   :  { %11491 = vmatprep.subr.bf16.mxu0 %v17087_v4  ;;  %11499 = vmatprep.subr.bf16.mxu1 %v17088_v38 }
0x2bba   :  { %11493 = vmatpush3.bf16.msra.mxu0 %v17087_v4  ;;  %11501 = vmatpush3.bf16.msra.mxu1 %v17088_v38 }
0x2bc4   :  { %v8071_v44 = vpop.permute.xlu0 %8070 }
0x2bc5   :  { %v8069_v40 = vpop.permute.xlu1 %8068 }
0x2bc6   :  { %11187 = vmatprep.mubr.msk.f32.mxu0 %vm130_vm3, %v8069_v40  ;;  %11219 = vmatprep.mubr.msk.f32.mxu1 %vm130_vm3, %v8069_v40 }
0x2bc7   :  { %11188 = vmatmul.mubr.msk.f32.gmra.mrb[110].mxu0 %vm130_vm3, %v8071_v44  ;;  %11220 = vmatmul.mubr.msk.f32.gmra.mrb[122].mxu1 %vm130_vm3, %v8071_v44 }
0x2bc8   :  { %v8075_v34 = vpop.permute.xlu0 %8074 }
0x2bc9   :  { %v8073_v35 = vpop.permute.xlu1 %8072 }
0x2bca   :  { %11190 = vmatprep.mubr.msk.f32.mxu0 %vm130_vm3, %v8073_v35  ;;  %11222 = vmatprep.mubr.msk.f32.mxu1 %vm130_vm3, %v8073_v35 }
0x2bcb   :  { %11191 = vmatmul.mubr.msk.f32.gmra.mrb[112].mxu0 %vm130_vm3, %v8075_v34  ;;  %11223 = vmatmul.mubr.msk.f32.gmra.mrb[124].mxu1 %vm130_vm3, %v8075_v34 }
0x2bcf   :  { %v8079_v12 = vpop.permute.xlu0 %8078 }
0x2bd0   :  { %v8077_v15 = vpop.permute.xlu1 %8076 }
0x2bd1   :  { %11193 = vmatprep.mubr.msk.f32.mxu0 %vm130_vm3, %v8077_v15  ;;  %11225 = vmatprep.mubr.msk.f32.mxu1 %vm130_vm3, %v8077_v15 }
0x2bd2   :  { %11194 = vmatmul.mubr.msk.f32.gmra.mrb[114].mxu0 %vm130_vm3, %v8079_v12  ;;  %11226 = vmatmul.mubr.msk.f32.gmra.mrb[126].mxu1 %vm130_vm3, %v8079_v12 }
0x2bd7   :  { %v8083_v62 = vpop.permute.xlu0 %8082 }
0x2bd8   :  { %v8081_v3 = vpop.permute.xlu1 %8080 }
0x2bd9   :  { %11196 = vmatprep.mubr.msk.f32.mxu0 %vm130_vm3, %v8081_v3  ;;  %11228 = vmatprep.mubr.msk.f32.mxu1 %vm130_vm3, %v8081_v3 }
0x2bda   :  { %11197 = vmatmul.mubr.msk.f32.gmra.mrb[116].mxu0 %vm130_vm3, %v8083_v62  ;;  %11229 = vmatmul.mubr.msk.f32.gmra.mrb[128].mxu1 %vm130_vm3, %v8083_v62 }
0x2bde   :  { %v8087_v59 = vpop.permute.xlu0 %8086 }
0x2bdf   :  { %v8085_v51 = vpop.permute.xlu1 %8084 }
0x2be0   :  { %11199 = vmatprep.mubr.msk.f32.mxu0 %vm130_vm3, %v8085_v51  ;;  %11231 = vmatprep.mubr.msk.f32.mxu1 %vm130_vm3, %v8085_v51 }
0x2be1   :  { %11200 = vmatmul.mubr.msk.f32.gmra.mrb[118].mxu0 %vm130_vm3, %v8087_v59  ;;  %11232 = vmatmul.mubr.msk.f32.gmra.mrb[130].mxu1 %vm130_vm3, %v8087_v59 }
0x2be6   :  { %v8091_v6 = vpop.permute.xlu0 %8090 }
0x2be7   :  { %v8089_v21 = vpop.permute.xlu1 %8088 }
0x2be8   :  { %11202 = vmatprep.mubr.msk.f32.mxu0 %vm130_vm3, %v8089_v21  ;;  %11234 = vmatprep.mubr.msk.f32.mxu1 %vm130_vm3, %v8089_v21 }
0x2be9   :  { %11203 = vmatmul.mubr.msk.f32.gmra.mrb[120].mxu0 %vm130_vm3, %v8091_v6  ;;  %11235 = vmatmul.mubr.msk.f32.gmra.mrb[132].mxu1 %vm130_vm3, %v8091_v6 }
0x2bed   :  { %v8095_v53 = vpop.permute.xlu0 %8094 }
0x2bee   :  { %v8093_v52 = vpop.permute.xlu1 %8092 }
0x2bef   :  { %11205 = vmatprep.mubr.msk.f32.mxu0 %vm130_vm3, %v8093_v52  ;;  %11237 = vmatprep.mubr.msk.f32.mxu1 %vm130_vm3, %v8093_v52 }
0x2bf0   :  { %11206 = vmatmul.mubr.msk.f32.gmra.mrb[122].mxu0 %vm130_vm3, %v8095_v53  ;;  %11238 = vmatmul.mubr.msk.f32.gmra.mrb[134].mxu1 %vm130_vm3, %v8095_v53 }
0x2c88   :  { %v11186_v41 = vpop.f32.mrb[108].mxu0  ;;  %v16177_v48 = vpop.f32.mrb[120].mxu1 }
0x2c89   :  { %v8200_v23 = vadd.f32 %v16179_v54, %v11186_v41  ;;  %v16186_v29 = vadd.f32 %v16182_v17, %v16177_v48  ;;  %v8194_v57 = vpop.f32.mrb[109].mxu0  ;;  %v16188_v46 = vpop.f32.mrb[121].mxu1 }
0x2c8a   :  { %v8195_v50 = vadd.f32 %v16179_v54, %v8194_v57  ;;  %v16193_v5 = vadd.f32 %v16182_v17, %v16188_v46 }
0x2c8b   :  { %9670 = vst.msk [vmem:[%s16967_s4 + $0x108] sm:$0xff] %vm9620_vm9, %v8200_v23  ;;  %v8437_v36 = vsel %vm130_vm3, %v16186_v29, 0.0 }
0x2c8c   :  { %9669 = vst.msk [vmem:[%s16967_s4 + $0x100] sm:$0xff] %vm9620_vm9, %v8195_v50  ;;  %8438 = vadd.xlane.f32.xlu0 %v8437_v36  ;;  %v8434_v20 = vsel %vm130_vm3, %v16193_v5, 0.0 }
0x2c8d   :  { %8435 = vadd.xlane.f32.xlu1 %v8434_v20 }
0x2c9a   :  { %v11189_v39 = vpop.f32.mrb[110].mxu0  ;;  %v16207_v55 = vpop.f32.mrb[122].mxu1 }
0x2c9b   :  { %v8210_v19 = vadd.f32 %v16179_v54, %v11189_v39  ;;  %v8204_v8 = vpop.f32.mrb[111].mxu0  ;;  %v16210_v0 = vpop.f32.mrb[123].mxu1  ;;  %v16223_v14 = vadd.f32 %v16182_v17, %v16207_v55 }
0x2c9c   :  { %v8205_v63 = vadd.f32 %v16179_v54, %v8204_v8  ;;  %v16215_v24 = vadd.f32 %v16182_v17, %v16210_v0 }
0x2c9d   :  { %9672 = vst.msk [vmem:[%s16967_s4 + $0x118] sm:$0xff] %vm9620_vm9, %v8210_v19  ;;  %v8443_v45 = vsel %vm130_vm3, %v16223_v14, 0.0 }
0x2c9e   :  { %9671 = vst.msk [vmem:[%s16967_s4 + $0x110] sm:$0xff] %vm9620_vm9, %v8205_v63  ;;  %v11192_v28 = vpop.f32.mrb[112].mxu0  ;;  %v16229_v18 = vpop.f32.mrb[124].mxu1  ;;  %v8440_v27 = vsel %vm130_vm3, %v16215_v24, 0.0 }
0x2c9f   :  { %v8220_v42 = vadd.f32 %v16179_v54, %v11192_v28  ;;  %8441 = vadd.xlane.f32.xlu0 %v8440_v27  ;;  %v8214_v47 = vpop.f32.mrb[113].mxu0  ;;  %v16234_v60 = vpop.f32.mrb[125].mxu1  ;;  %v16247_v7 = vadd.f32 %v16182_v17, %v16229_v18 }
0x2ca0   :  { %v8215_v1 = vadd.f32 %v16179_v54, %v8214_v47  ;;  %v16239_v13 = vadd.f32 %v16182_v17, %v16234_v60 }
0x2ca1   :  { %9674 = vst.msk [vmem:[%s16967_s4 + $0x128] sm:$0xff] %vm9620_vm9, %v8220_v42  ;;  %v8449_v15 = vsel %vm130_vm3, %v16247_v7, 0.0 }
0x2ca2   :  { %9673 = vst.msk [vmem:[%s16967_s4 + $0x120] sm:$0xff] %vm9620_vm9, %v8215_v1  ;;  %v8446_v11 = vsel %vm130_vm3, %v16239_v13, 0.0 }
0x2ca3   :  { %8444 = vadd.xlane.f32.xlu0 %v8443_v45  ;;  %8447 = vadd.xlane.f32.xlu1 %v8446_v11 }
0x2ca5   :  { %v11195_v4 = vpop.f32.mrb[114].mxu0  ;;  %v16257_v38 = vpop.f32.mrb[126].mxu1 }
0x2ca6   :  { %v8230_v44 = vadd.f32 %v16179_v54, %v11195_v4  ;;  %v16262_v40 = vadd.f32 %v16182_v17, %v16257_v38  ;;  %v8224_v35 = vpop.f32.mrb[115].mxu0  ;;  %v16264_v34 = vpop.f32.mrb[127].mxu1 }
0x2ca7   :  { %v8225_v12 = vadd.f32 %v16179_v54, %v8224_v35  ;;  %v16271_v3 = vadd.f32 %v16182_v17, %v16264_v34  ;;  %8450 = vadd.xlane.f32.xlu0 %v8449_v15 }
0x2ca8   :  { %9676 = vst.msk [vmem:[%s16967_s4 + $0x138] sm:$0xff] %vm9620_vm9, %v8230_v44  ;;  %v8455_v51 = vsel %vm130_vm3, %v16262_v40, 0.0 }
0x2ca9   :  { %9675 = vst.msk [vmem:[%s16967_s4 + $0x130] sm:$0xff] %vm9620_vm9, %v8225_v12  ;;  %v8452_v62 = vsel %vm130_vm3, %v16271_v3, 0.0 }
0x2caa   :  { %8453 = vadd.xlane.f32.xlu1 %v8452_v62 }
0x2cab   :  { %8456 = vadd.xlane.f32.xlu0 %v8455_v51 }
0x2cad   :  { %v11198_v59 = vpop.f32.mrb[116].mxu0  ;;  %v16285_v21 = vpop.f32.mrb[128].mxu1 }
0x2cae   :  { %v8240_v6 = vadd.f32 %v16179_v54, %v11198_v59  ;;  %v16290_v52 = vadd.f32 %v16182_v17, %v16285_v21  ;;  %v8234_v53 = vpop.f32.mrb[117].mxu0  ;;  %v16292_v41 = vpop.f32.mrb[129].mxu1 }
0x2caf   :  { %v8235_v23 = vadd.f32 %v16179_v54, %v8234_v53  ;;  %v16297_v57 = vadd.f32 %v16182_v17, %v16292_v41 }
0x2cb0   :  { %9678 = vst.msk [vmem:[%s16967_s4 + $0x148] sm:$0xff] %vm9620_vm9, %v8240_v6  ;;  %v8461_v50 = vsel %vm130_vm3, %v16290_v52, 0.0 }
0x2cb1   :  { %9677 = vst.msk [vmem:[%s16967_s4 + $0x140] sm:$0xff] %vm9620_vm9, %v8235_v23  ;;  %8462 = vadd.xlane.f32.xlu0 %v8461_v50  ;;  %v8458_v36 = vsel %vm130_vm3, %v16297_v57, 0.0 }
0x2cb2   :  { %8459 = vadd.xlane.f32.xlu1 %v8458_v36 }
0x2cb4   :  { %v11201_v20 = vpop.f32.mrb[118].mxu0  ;;  %v16311_v39 = vpop.f32.mrb[130].mxu1 }
0x2cb5   :  { %v8250_v19 = vadd.f32 %v16179_v54, %v11201_v20  ;;  %v16316_v8 = vadd.f32 %v16182_v17, %v16311_v39  ;;  %v8244_v63 = vpop.f32.mrb[119].mxu0  ;;  %v16318_v28 = vpop.f32.mrb[131].mxu1 }
0x2cb6   :  { %v8245_v27 = vadd.f32 %v16179_v54, %v8244_v63  ;;  %v16323_v42 = vadd.f32 %v16182_v17, %v16318_v28 }
0x2cb7   :  { %9680 = vst.msk [vmem:[%s16967_s4 + $0x158] sm:$0xff] %vm9620_vm9, %v8250_v19  ;;  %v8467_v47 = vsel %vm130_vm3, %v16316_v8, 0.0 }
0x2cb8   :  { %9679 = vst.msk [vmem:[%s16967_s4 + $0x150] sm:$0xff] %vm9620_vm9, %v8245_v27  ;;  %8468 = vadd.xlane.f32.xlu0 %v8467_v47  ;;  %v8464_v1 = vsel %vm130_vm3, %v16323_v42, 0.0 }
0x2cb9   :  { %8465 = vadd.xlane.f32.xlu1 %v8464_v1 }
0x2cbc   :  { %v11204_v45 = vpop.f32.mrb[120].mxu0  ;;  %v16337_v11 = vpop.f32.mrb[132].mxu1 }
0x2cbd   :  { %v8260_v4 = vadd.f32 %v16179_v54, %v11204_v45  ;;  %v16342_v44 = vadd.f32 %v16182_v17, %v16337_v11  ;;  %v8254_v35 = vpop.f32.mrb[121].mxu0  ;;  %v16344_v15 = vpop.f32.mrb[133].mxu1 }
0x2cbe   :  { %v8255_v12 = vadd.f32 %v16179_v54, %v8254_v35  ;;  %v16349_v62 = vadd.f32 %v16182_v17, %v16344_v15 }
0x2cbf   :  { %9682 = vst.msk [vmem:[%s16967_s4 + $0x168] sm:$0xff] %vm9620_vm9, %v8260_v4  ;;  %v8473_v51 = vsel %vm130_vm3, %v16342_v44, 0.0 }
0x2cc0   :  { %9681 = vst.msk [vmem:[%s16967_s4 + $0x160] sm:$0xff] %vm9620_vm9, %v8255_v12  ;;  %8474 = vadd.xlane.f32.xlu0 %v8473_v51  ;;  %v8470_v59 = vsel %vm130_vm3, %v16349_v62, 0.0 }
0x2cc1   :  { %8471 = vadd.xlane.f32.xlu1 %v8470_v59 }
0x2cc3   :  { %v11207_v6 = vpop.f32.mrb[122].mxu0  ;;  %v16363_v53 = vpop.f32.mrb[134].mxu1 }
0x2cc4   :  { %v8270_v23 = vadd.f32 %v16179_v54, %v11207_v6  ;;  %v16368_v50 = vadd.f32 %v16182_v17, %v16363_v53  ;;  %v8264_v36 = vpop.f32.mrb[123].mxu0  ;;  %v16370_v20 = vpop.f32.mrb[135].mxu1 }
0x2cc5   :  { %v8265_v19 = vadd.f32 %v16179_v54, %v8264_v36  ;;  %v16375_v63 = vadd.f32 %v16182_v17, %v16370_v20 }
0x2cc6   :  { %9684 = vst.msk [vmem:[%s16967_s4 + $0x178] sm:$0xff] %vm9620_vm9, %v8270_v23  ;;  %v8479_v27 = vsel %vm130_vm3, %v16368_v50, 0.0 }
0x2cc7   :  { %9683 = vst.msk [vmem:[%s16967_s4 + $0x170] sm:$0xff] %vm9620_vm9, %v8265_v19  ;;  %8480 = vadd.xlane.f32.xlu0 %v8479_v27  ;;  %v8476_v54 = vsel %vm130_vm3, %v16375_v63, 0.0 }
0x2cc8   :  { %8477 = vadd.xlane.f32.xlu1 %v8476_v54 }
0x2d19   :  { %v8439_v17 = vpop.xlane.xlu0 %8438 }
0x2d1a   :  { %v8483_v47 = vmul.f32 0.03125, %v8439_v17  ;;  %v8436_v1 = vpop.xlane.xlu1 %8435 }
0x2d1b   :  { %v8482_v45 = vmul.f32 0.03125, %v8436_v1 }
0x2d1c   :  { %v16390_v4 = vsub.f32 %v16186_v29, %v8483_v47 }
0x2d1d   :  { %v16393_v35 = vsub.f32 %v16193_v5, %v8482_v45 }
0x2d1e   :  { %v8515_v12 = vmul.f32 %v16390_v4, %v16390_v4 }
0x2d1f   :  { %v8514_v51 = vmul.f32 %v16393_v35, %v16393_v35 }
0x2d20   :  { %v8533_v59 = vsel %vm130_vm3, %v8515_v12, 0.0 }
0x2d21   :  { %8534 = vadd.xlane.f32.xlu0 %v8533_v59  ;;  %v8530_v6 = vsel %vm130_vm3, %v8514_v51, 0.0 }
0x2d22   :  { %8531 = vadd.xlane.f32.xlu1 %v8530_v6 }
0x2d2c   :  { %v8442_v23 = vpop.xlane.xlu0 %8441 }
0x2d2d   :  { %v8484_v36 = vmul.f32 0.03125, %v8442_v23 }
0x2d2f   :  { %v16402_v29 = vsub.f32 %v16215_v24, %v8484_v36 }
0x2d30   :  { %v8445_v19 = vpop.xlane.xlu0 %8444  ;;  %v8448_v5 = vpop.xlane.xlu1 %8447 }
0x2d31   :  { %v8485_v27 = vmul.f32 0.03125, %v8445_v19  ;;  %v8486_v54 = vmul.f32 0.03125, %v8448_v5  ;;  %v8516_v17 = vmul.f32 %v16402_v29, %v16402_v29 }
0x2d33   :  { %v16407_v47 = vsub.f32 %v16223_v14, %v8485_v27  ;;  %v16410_v1 = vsub.f32 %v16239_v13, %v8486_v54  ;;  %v8536_v45 = vsel %vm130_vm3, %v8516_v17, 0.0 }
0x2d34   :  { %v8451_v12 = vpop.xlane.xlu0 %8450  ;;  %8537 = vadd.xlane.f32.xlu1 %v8536_v45 }
0x2d35   :  { %v8487_v51 = vmul.f32 0.03125, %v8451_v12  ;;  %v8517_v24 = vmul.f32 %v16407_v47, %v16407_v47  ;;  %v8518_v59 = vmul.f32 %v16410_v1, %v16410_v1 }
0x2d37   :  { %v16418_v6 = vsub.f32 %v16247_v7, %v8487_v51  ;;  %v8454_v23 = vpop.xlane.xlu1 %8453  ;;  %v8539_v14 = vsel %vm130_vm3, %v8517_v24, 0.0  ;;  %v8542_v13 = vsel %vm130_vm3, %v8518_v59, 0.0 }
0x2d38   :  { %v8488_v36 = vmul.f32 0.03125, %v8454_v23  ;;  %v8457_v19 = vpop.xlane.xlu0 %8456  ;;  %8540 = vadd.xlane.f32.xlu0 %v8539_v14  ;;  %8543 = vadd.xlane.f32.xlu1 %v8542_v13 }
0x2d39   :  { %v8489_v5 = vmul.f32 0.03125, %v8457_v19  ;;  %v8519_v27 = vmul.f32 %v16418_v6, %v16418_v6 }
0x2d3a   :  { %v16425_v54 = vsub.f32 %v16271_v3, %v8488_v36 }
0x2d3b   :  { %v16428_v17 = vsub.f32 %v16262_v40, %v8489_v5  ;;  %v8545_v7 = vsel %vm130_vm3, %v8519_v27, 0.0 }
0x2d3c   :  { %8546 = vadd.xlane.f32.xlu0 %v8545_v7  ;;  %v8520_v45 = vmul.f32 %v16425_v54, %v16425_v54 }
0x2d3d   :  { %v8521_v12 = vmul.f32 %v16428_v17, %v16428_v17 }
0x2d3e   :  { %v8463_v51 = vpop.xlane.xlu0 %8462  ;;  %v8548_v24 = vsel %vm130_vm3, %v8520_v45, 0.0 }
0x2d3f   :  { %v8491_v59 = vmul.f32 0.03125, %v8463_v51  ;;  %8549 = vadd.xlane.f32.xlu1 %v8548_v24  ;;  %v8460_v23 = vpop.xlane.xlu1 %8459  ;;  %v8551_v3 = vsel %vm130_vm3, %v8521_v12, 0.0 }
0x2d40   :  { %v8490_v14 = vmul.f32 0.03125, %v8460_v23  ;;  %8552 = vadd.xlane.f32.xlu0 %v8551_v3 }
0x2d41   :  { %v16438_v40 = vsub.f32 %v16290_v52, %v8491_v59 }
0x2d42   :  { %v16441_v13 = vsub.f32 %v16297_v57, %v8490_v14 }
0x2d43   :  { %v8523_v36 = vmul.f32 %v16438_v40, %v16438_v40 }
0x2d44   :  { %v8522_v19 = vmul.f32 %v16441_v13, %v16441_v13 }
0x2d45   :  { %v8469_v5 = vpop.xlane.xlu0 %8468  ;;  %v8557_v27 = vsel %vm130_vm3, %v8523_v36, 0.0 }
0x2d46   :  { %v8493_v7 = vmul.f32 0.03125, %v8469_v5  ;;  %8558 = vadd.xlane.f32.xlu0 %v8557_v27  ;;  %v8554_v45 = vsel %vm130_vm3, %v8522_v19, 0.0  ;;  %v8466_v12 = vpop.xlane.xlu1 %8465 }
0x2d47   :  { %8555 = vadd.xlane.f32.xlu1 %v8554_v45  ;;  %v8492_v52 = vmul.f32 0.03125, %v8466_v12 }
0x2d48   :  { %v16450_v51 = vsub.f32 %v16316_v8, %v8493_v7 }
0x2d49   :  { %v16453_v57 = vsub.f32 %v16323_v42, %v8492_v52 }
0x2d4a   :  { %v8525_v24 = vmul.f32 %v16450_v51, %v16450_v51 }
0x2d4b   :  { %v8524_v59 = vmul.f32 %v16453_v57, %v16453_v57 }
0x2d4c   :  { %v8563_v23 = vsel %vm130_vm3, %v8525_v24, 0.0 }
0x2d4d   :  { %v8475_v3 = vpop.xlane.xlu0 %8474  ;;  %8564 = vadd.xlane.f32.xlu0 %v8563_v23  ;;  %v8560_v14 = vsel %vm130_vm3, %v8524_v59, 0.0 }
0x2d4e   :  { %v8495_v36 = vmul.f32 0.03125, %v8475_v3  ;;  %8561 = vadd.xlane.f32.xlu1 %v8560_v14  ;;  %v8472_v19 = vpop.xlane.xlu1 %8471 }
0x2d4f   :  { %v8494_v8 = vmul.f32 0.03125, %v8472_v19 }
0x2d50   :  { %v16462_v5 = vsub.f32 %v16342_v44, %v8495_v36 }
0x2d51   :  { %v16465_v42 = vsub.f32 %v16349_v62, %v8494_v8  ;;  %v8690_v8 = vadd.f32 %v16188_v46, %v14081_v26  ;;  %v8697_v46 = vadd.f32 %v16257_v38, %v14081_v26  ;;  %v8700_v38 = vadd.f32 %v16318_v28, %v14081_v26 }
0x2d52   :  { %v8527_v27 = vmul.f32 %v16462_v5, %v16462_v5 }
0x2d53   :  { %v8526_v7 = vmul.f32 %v16465_v42, %v16465_v42 }
0x2d54   :  { %v8481_v45 = vpop.xlane.xlu0 %8480  ;;  %v8569_v12 = vsel %vm130_vm3, %v8527_v27, 0.0  ;;  %v8693_v27 = vadd.f32 %v16207_v55, %v14081_v26  ;;  %v8696_v55 = vadd.f32 %v16264_v34, %v14081_v26  ;;  %v8703_v34 = vadd.f32 %v16337_v11, %v14081_v26 }
0x2d55   :  { %v8497_v52 = vmul.f32 0.03125, %v8481_v45  ;;  %8570 = vadd.xlane.f32.xlu0 %v8569_v12  ;;  %v8478_v24 = vpop.xlane.xlu1 %8477  ;;  %v8566_v59 = vsel %vm130_vm3, %v8526_v7, 0.0  ;;  %v8695_v7 = vadd.f32 %v16229_v18, %v14081_v26  ;;  %v8698_v18 = vadd.f32 %v16292_v41, %v14081_v26 }
0x2d56   :  { %v8496_v23 = vmul.f32 0.03125, %v8478_v24  ;;  %8567 = vadd.xlane.f32.xlu1 %v8566_v59  ;;  %v8704_v41 = vadd.f32 %v16370_v20, %v14081_v26  ;;  %v16551_v59 = vld [vmem:[#allocation4 + $0x88] ss:$0 sm:$0xff] }
0x2d57   :  { %v16474_v44 = vsub.f32 %v16368_v50, %v8497_v52  ;;  %v8691_v50 = vadd.f32 %v16177_v48, %v14081_v26  ;;  %v8694_v48 = vadd.f32 %v16234_v60, %v14081_v26  ;;  %v8701_v60 = vadd.f32 %v16311_v39, %v14081_v26 }
0x2d58   :  { %v16477_v62 = vsub.f32 %v16375_v63, %v8496_v23  ;;  %v8692_v63 = vadd.f32 %v16210_v0, %v14081_v26  ;;  %v8699_v0 = vadd.f32 %v16285_v21, %v14081_v26  ;;  %v8702_v21 = vadd.f32 %v16344_v15, %v14081_v26 }
0x2d59   :  { %v8529_v3 = vmul.f32 %v16474_v44, %v16474_v44  ;;  %v8705_v39 = vadd.f32 %v16363_v53, %v14081_v26 }
0x2d5a   :  { %v8528_v14 = vmul.f32 %v16477_v62, %v16477_v62 }
0x2d5b   :  { %v8575_v36 = vsel %vm130_vm3, %v8529_v3, 0.0 }
0x2d5c   :  { %8576 = vadd.xlane.f32.xlu0 %v8575_v36  ;;  %v8572_v19 = vsel %vm130_vm3, %v8528_v14, 0.0 }
0x2d5d   :  { %8573 = vadd.xlane.f32.xlu1 %v8572_v19  ;;  %v16555_v19 = vld [vmem:[#allocation4 + $0x90] ss:$0 sm:$0xff] }
0x2d6e   :  { %8947 = vrot.lane.b32.xlu1 %v8690_v8, %s12288_s22 }
0x2d72   :  { %8949 = vrot.lane.b32.xlu0 %v8691_v50, %s12288_s22  ;;  %8951 = vrot.lane.b32.xlu1 %v8692_v63, %s12288_s22 }
0x2d76   :  { %8957 = vrot.lane.b32.xlu0 %v8695_v7, %s12288_s22  ;;  %8953 = vrot.lane.b32.xlu1 %v8693_v27, %s12288_s22 }
0x2d7a   :  { %8961 = vrot.lane.b32.xlu0 %v8697_v46, %s12288_s22  ;;  %8955 = vrot.lane.b32.xlu1 %v8694_v48, %s12288_s22 }
0x2d7e   :  { %8965 = vrot.lane.b32.xlu0 %v8699_v0, %s12288_s22  ;;  %8959 = vrot.lane.b32.xlu1 %v8696_v55, %s12288_s22 }
0x2d82   :  { %8969 = vrot.lane.b32.xlu0 %v8701_v60, %s12288_s22  ;;  %8963 = vrot.lane.b32.xlu1 %v8698_v18, %s12288_s22 }
0x2d86   :  { %8973 = vrot.lane.b32.xlu0 %v8703_v34, %s12288_s22  ;;  %8967 = vrot.lane.b32.xlu1 %v8700_v38, %s12288_s22 }
0x2d8a   :  { %9107 = vrot.lane.b32.xlu0 %v8690_v8, %s12287_s1  ;;  %8971 = vrot.lane.b32.xlu1 %v8702_v21, %s12288_s22 }
0x2d8e   :  { %9109 = vrot.lane.b32.xlu0 %v8691_v50, %s12287_s1  ;;  %8975 = vrot.lane.b32.xlu1 %v8704_v41, %s12288_s22 }
0x2d92   :  { %9113 = vrot.lane.b32.xlu0 %v8693_v27, %s12287_s1  ;;  %8977 = vrot.lane.b32.xlu1 %v8705_v39, %s12288_s22 }
0x2d96   :  { %9117 = vrot.lane.b32.xlu0 %v8695_v7, %s12287_s1  ;;  %9111 = vrot.lane.b32.xlu1 %v8692_v63, %s12287_s1 }
0x2d9a   :  { %9121 = vrot.lane.b32.xlu0 %v8697_v46, %s12287_s1  ;;  %9115 = vrot.lane.b32.xlu1 %v8694_v48, %s12287_s1 }
0x2d9e   :  { %9125 = vrot.lane.b32.xlu0 %v8699_v0, %s12287_s1  ;;  %9119 = vrot.lane.b32.xlu1 %v8696_v55, %s12287_s1 }
0x2da2   :  { %9129 = vrot.lane.b32.xlu0 %v8701_v60, %s12287_s1  ;;  %9123 = vrot.lane.b32.xlu1 %v8698_v18, %s12287_s1 }
0x2da6   :  { %9133 = vrot.lane.b32.xlu0 %v8703_v34, %s12287_s1  ;;  %9127 = vrot.lane.b32.xlu1 %v8700_v38, %s12287_s1 }
0x2daa   :  { %9137 = vrot.lane.b32.xlu0 %v8705_v39, %s12287_s1  ;;  %9131 = vrot.lane.b32.xlu1 %v8702_v21, %s12287_s1 }
0x2dae   :  { %9135 = vrot.lane.b32.xlu1 %v8704_v41, %s12287_s1  ;;  %v8535_v26 = vpop.xlane.xlu0 %8534 }
0x2daf   :  { %v8579_v28 = vmul.f32 0.03125, %v8535_v26  ;;  %v8532_v11 = vpop.xlane.xlu1 %8531 }
0x2db0   :  { %v8578_v15 = vmul.f32 0.03125, %v8532_v11 }
0x2db1   :  { %v8595_v53 = vadd.f32 1e-05, %v8579_v28 }
0x2db2   :  { %v8594_v20 = vadd.f32 1e-05, %v8578_v15 }
0x2db3   :  { %12081 = vrsqrt.f32 %v8595_v53 }
0x2db4   :  { %12083 = vrsqrt.f32 %v8594_v20 }
0x2dbd   :  { %v12082_v45 = vpop.eup %12081 }
0x2dbe   :  { %v12084_v12 = vpop.eup %12083  ;;  %v8627_v52 = vmul.f32 %v12082_v45, %v16390_v4 }
0x2dbf   :  { %v8626_v24 = vmul.f32 %v12084_v12, %v16393_v35 }
0x2dc0   :  { %v8643_v23 = vmul.f32 %v16551_v59, %v8627_v52 }
0x2dc1   :  { %v8538_v3 = vpop.xlane.xlu1 %8537  ;;  %v8642_v14 = vmul.f32 %v16551_v59, %v8626_v24 }
0x2dc2   :  { %v8580_v36 = vmul.f32 0.03125, %v8538_v3  ;;  %v8659_v8 = vadd.f32 %v16555_v19, %v8643_v23 }
0x2dc3   :  { %v8658_v50 = vadd.f32 %v16555_v19, %v8642_v14 }
0x2dc4   :  { %v8596_v63 = vadd.f32 1e-05, %v8580_v36  ;;  %v8675_v46 = vmax.f32 %v8659_v8, 0.0 }
0x2dc5   :  { %v8541_v27 = vpop.xlane.xlu0 %8540  ;;  %v8544_v7 = vpop.xlane.xlu1 %8543  ;;  %v8674_v4 = vmax.f32 %v8658_v50, 0.0 }
0x2dc6   :  { %12085 = vrsqrt.f32 %v8596_v63  ;;  %v8581_v35 = vmul.f32 0.03125, %v8541_v27  ;;  %v8582_v48 = vmul.f32 0.03125, %v8544_v7 }
0x2dc7   :  { %11248 = vmatprep.mubr.msk.f32.mxu0 %vm130_vm3, %v8674_v4 }
0x2dc8   :  { %v8597_v55 = vadd.f32 1e-05, %v8581_v35  ;;  %v8598_v0 = vadd.f32 1e-05, %v8582_v48  ;;  %11249 = vmatmul.mubr.msk.f32.vlgmr.msra.gmra.mrb[124].mxu0 %vm130_vm3, %v8675_v46 }
0x2dc9   :  { %v8547_v18 = vpop.xlane.xlu0 %8546 }
0x2dca   :  { %12087 = vrsqrt.f32 %v8597_v55  ;;  %v8583_v60 = vmul.f32 0.03125, %v8547_v18 }
0x2dcb   :  { %12089 = vrsqrt.f32 %v8598_v0 }
0x2dcc   :  { %v8599_v38 = vadd.f32 1e-05, %v8583_v60  ;;  %v8550_v34 = vpop.xlane.xlu1 %8549 }
0x2dcd   :  { %v8584_v21 = vmul.f32 0.03125, %v8550_v34  ;;  %v8553_v41 = vpop.xlane.xlu0 %8552 }
0x2dce   :  { %12091 = vrsqrt.f32 %v8599_v38  ;;  %v8585_v39 = vmul.f32 0.03125, %v8553_v41 }
0x2dcf   :  { %v8600_v26 = vadd.f32 1e-05, %v8584_v21 }
0x2dd0   :  { %v12086_v28 = vpop.eup %12085  ;;  %v8601_v11 = vadd.f32 1e-05, %v8585_v39 }
0x2dd1   :  { %12093 = vrsqrt.f32 %v8600_v26  ;;  %v8628_v15 = vmul.f32 %v12086_v28, %v16402_v29 }
0x2dd2   :  { %12095 = vrsqrt.f32 %v8601_v11 }
0x2dd3   :  { %v8559_v53 = vpop.xlane.xlu0 %8558  ;;  %v8644_v20 = vmul.f32 %v16551_v59, %v8628_v15 }
0x2dd4   :  { %v12088_v45 = vpop.eup %12087  ;;  %v8587_v12 = vmul.f32 0.03125, %v8559_v53  ;;  %v8556_v52 = vpop.xlane.xlu1 %8555 }
0x2dd5   :  { %v12090_v24 = vpop.eup %12089  ;;  %v8586_v23 = vmul.f32 0.03125, %v8556_v52  ;;  %v8660_v3 = vadd.f32 %v16555_v19, %v8644_v20  ;;  %v8629_v14 = vmul.f32 %v12088_v45, %v16407_v47 }
0x2dd6   :  { %v8603_v36 = vadd.f32 1e-05, %v8587_v12  ;;  %v8630_v8 = vmul.f32 %v12090_v24, %v16410_v1 }
0x2dd7   :  { %v8602_v50 = vadd.f32 1e-05, %v8586_v23  ;;  %v8676_v63 = vmax.f32 %v8660_v3, 0.0  ;;  %v8645_v29 = vmul.f32 %v16551_v59, %v8629_v14 }
0x2dd8   :  { %v12092_v27 = vpop.eup %12091  ;;  %12097 = vrsqrt.f32 %v8603_v36  ;;  %v8646_v7 = vmul.f32 %v16551_v59, %v8630_v8 }
0x2dd9   :  { %12099 = vrsqrt.f32 %v8602_v50  ;;  %11251 = vmatprep.mubr.msk.f32.mxu0 %vm130_vm3, %v8676_v63  ;;  %v8661_v4 = vadd.f32 %v16555_v19, %v8645_v29  ;;  %v8631_v35 = vmul.f32 %v12092_v27, %v16418_v6 }
0x2dda   :  { %v8565_v48 = vpop.xlane.xlu0 %8564  ;;  %v8662_v47 = vadd.f32 %v16555_v19, %v8646_v7 }
0x2ddb   :  { %v12094_v46 = vpop.eup %12093  ;;  %v8589_v1 = vmul.f32 0.03125, %v8565_v48  ;;  %v8562_v55 = vpop.xlane.xlu1 %8561  ;;  %v8677_v0 = vmax.f32 %v8661_v4, 0.0  ;;  %v8647_v18 = vmul.f32 %v16551_v59, %v8631_v35 }
0x2ddc   :  { %v12096_v60 = vpop.eup %12095  ;;  %v8588_v38 = vmul.f32 0.03125, %v8562_v55  ;;  %v8678_v34 = vmax.f32 %v8662_v47, 0.0  ;;  %v8632_v21 = vmul.f32 %v12094_v46, %v16425_v54 }
0x2ddd   :  { %v8605_v41 = vadd.f32 1e-05, %v8589_v1  ;;  %11252 = vmatmul.mubr.msk.f32.gmra.mrb[126].mxu0 %vm130_vm3, %v8677_v0  ;;  %v8663_v39 = vadd.f32 %v16555_v19, %v8647_v18  ;;  %v8633_v6 = vmul.f32 %v12096_v60, %v16428_v17 }
0x2dde   :  { %v8604_v26 = vadd.f32 1e-05, %v8588_v38  ;;  %11254 = vmatprep.mubr.msk.f32.mxu0 %vm130_vm3, %v8678_v34  ;;  %v8648_v28 = vmul.f32 %v16551_v59, %v8632_v21 }
0x2ddf   :  { %12101 = vrsqrt.f32 %v8605_v41  ;;  %v8679_v11 = vmax.f32 %v8663_v39, 0.0  ;;  %v8649_v15 = vmul.f32 %v16551_v59, %v8633_v6 }
0x2de0   :  { %12103 = vrsqrt.f32 %v8604_v26  ;;  %v8664_v53 = vadd.f32 %v16555_v19, %v8648_v28 }
0x2de1   :  { %11255 = vmatmul.mubr.msk.f32.gmra.mrb[128].mxu0 %vm130_vm3, %v8679_v11  ;;  %v8665_v54 = vadd.f32 %v16555_v19, %v8649_v15 }
0x2de2   :  { %v12098_v20 = vpop.eup %12097  ;;  %v8571_v45 = vpop.xlane.xlu0 %8570  ;;  %v8680_v12 = vmax.f32 %v8664_v53, 0.0 }
0x2de3   :  { %v12100_v17 = vpop.eup %12099  ;;  %v8591_v52 = vmul.f32 0.03125, %v8571_v45  ;;  %v8568_v24 = vpop.xlane.xlu1 %8567  ;;  %v8681_v23 = vmax.f32 %v8665_v54, 0.0  ;;  %v8635_v3 = vmul.f32 %v12098_v20, %v16438_v40 }
0x2de4   :  { %11257 = vmatprep.mubr.msk.f32.mxu0 %vm130_vm3, %v8680_v12  ;;  %v8590_v14 = vmul.f32 0.03125, %v8568_v24  ;;  %v8634_v36 = vmul.f32 %v12100_v17, %v16441_v13 }
0x2de5   :  { %v8607_v8 = vadd.f32 1e-05, %v8591_v52  ;;  %11258 = vmatmul.mubr.msk.f32.gmra.mrb[130].mxu0 %vm130_vm3, %v8681_v23  ;;  %v8651_v50 = vmul.f32 %v16551_v59, %v8635_v3 }
0x2de6   :  { %v8606_v63 = vadd.f32 1e-05, %v8590_v14  ;;  %v8650_v29 = vmul.f32 %v16551_v59, %v8634_v36 }
0x2de7   :  { %12105 = vrsqrt.f32 %v8607_v8  ;;  %v8667_v27 = vadd.f32 %v16555_v19, %v8651_v50 }
0x2de8   :  { %12107 = vrsqrt.f32 %v8606_v63  ;;  %v8666_v7 = vadd.f32 %v16555_v19, %v8650_v29 }
0x2de9   :  { %v12102_v40 = vpop.eup %12101  ;;  %v8577_v4 = vpop.xlane.xlu0 %8576  ;;  %v8683_v55 = vmax.f32 %v8667_v27, 0.0  ;;  %v17089_v27 = vld [vmem:[#allocation16_spill] sm:$0xff] }
0x2dea   :  { %v12104_v35 = vpop.eup %12103  ;;  %v8593_v48 = vmul.f32 0.03125, %v8577_v4  ;;  %v8574_v47 = vpop.xlane.xlu1 %8573  ;;  %v8682_v13 = vmax.f32 %v8666_v7, 0.0  ;;  %v8637_v46 = vmul.f32 %v12102_v40, %v16450_v51  ;;  %v17090_v4 = vld [vmem:[#allocation17_spill] sm:$0xff] }
0x2deb   :  { %v8592_v1 = vmul.f32 0.03125, %v8574_v47  ;;  %v8636_v0 = vmul.f32 %v12104_v35, %v16453_v57 }
0x2dec   :  { %v8609_v18 = vadd.f32 1e-05, %v8593_v48  ;;  %11260 = vmatprep.mubr.msk.f32.mxu0 %vm130_vm3, %v8682_v13  ;;  %v8653_v60 = vmul.f32 %v16551_v59, %v8637_v46  ;;  %v16619_v48 = vld [vmem:[#allocation4 + $0x50] ss:$0 sm:$0xff] }
0x2ded   :  { %v8608_v38 = vadd.f32 1e-05, %v8592_v1  ;;  %11261 = vmatmul.mubr.msk.f32.gmra.mrb[132].mxu0 %vm130_vm3, %v8683_v55  ;;  %v8652_v34 = vmul.f32 %v16551_v59, %v8636_v0 }
0x2dee   :  { %12109 = vrsqrt.f32 %v8609_v18  ;;  %v8669_v21 = vadd.f32 %v16555_v19, %v8653_v60 }
0x2def   :  { %12111 = vrsqrt.f32 %v8608_v38  ;;  %v8668_v51 = vadd.f32 %v16555_v19, %v8652_v34 }
0x2df0   :  { %v8685_v57 = vmax.f32 %v8669_v21, 0.0 }
0x2df1   :  { %v12106_v41 = vpop.eup %12105  ;;  %v8684_v39 = vmax.f32 %v8668_v51, 0.0 }
0x2df2   :  { %v12108_v6 = vpop.eup %12107  ;;  %v8639_v26 = vmul.f32 %v12106_v41, %v16462_v5 }
0x2df3   :  { %11263 = vmatprep.mubr.msk.f32.mxu0 %vm130_vm3, %v8684_v39  ;;  %v8638_v28 = vmul.f32 %v12108_v6, %v16465_v42 }
0x2df4   :  { %11264 = vmatmul.mubr.msk.f32.gmra.mrb[134].mxu0 %vm130_vm3, %v8685_v57  ;;  %v8655_v11 = vmul.f32 %v16551_v59, %v8639_v26  ;;  %v17091_v26 = vld [vmem:[#allocation18_spill] sm:$0xff] }
0x2df5   :  { %v8654_v15 = vmul.f32 %v16551_v59, %v8638_v28 }
0x2df6   :  { %v8671_v53 = vadd.f32 %v16555_v19, %v8655_v11 }
0x2df7   :  { %v8670_v54 = vadd.f32 %v16555_v19, %v8654_v15  ;;  %v17092_v15 = vld [vmem:[#allocation19_spill] sm:$0xff] }
0x2df8   :  { %v12110_v20 = vpop.eup %12109  ;;  %v8687_v5 = vmax.f32 %v8671_v53, 0.0 }
0x2df9   :  { %v12112_v45 = vpop.eup %12111  ;;  %v8686_v12 = vmax.f32 %v8670_v54, 0.0  ;;  %v8641_v17 = vmul.f32 %v12110_v20, %v16474_v44  ;;  %v8950_v44 = vpop.permute.xlu0 %8949 }
0x2dfa   :  { %v8640_v52 = vmul.f32 %v12112_v45, %v16477_v62  ;;  %v8948_v62 = vpop.permute.xlu1 %8947 }
0x2dfb   :  { %11266 = vmatprep.mubr.msk.f32.mxu0 %vm130_vm3, %v8686_v12  ;;  %v8657_v42 = vmul.f32 %v16551_v59, %v8641_v17 }
0x2dfc   :  { %11267 = vmatmul.mubr.msk.f32.gmra.mrb[136].mxu0 %vm130_vm3, %v8687_v5  ;;  %v8656_v24 = vmul.f32 %v16551_v59, %v8640_v52 }
0x2dfd   :  { %v8673_v23 = vadd.f32 %v16555_v19, %v8657_v42  ;;  %v8958_v8 = vpop.permute.xlu0 %8957 }
0x2dfe   :  { %v8672_v3 = vadd.f32 %v16555_v19, %v8656_v24  ;;  %v8952_v50 = vpop.permute.xlu1 %8951 }
0x2dff   :  { %v8689_v36 = vmax.f32 %v8673_v23, 0.0 }
0x2e00   :  { %v8688_v14 = vmax.f32 %v8672_v3, 0.0 }
0x2e01   :  { %v8962_v29 = vpop.permute.xlu0 %8961 }
0x2e02   :  { %11269 = vmatprep.mubr.msk.f32.mxu0 %vm130_vm3, %v8688_v14  ;;  %v8954_v59 = vpop.permute.xlu1 %8953 }
0x2e03   :  { %11270 = vmatmul.mubr.msk.f32.gmra.mrb[138].mxu0 %vm130_vm3, %v8689_v36 }
0x2e05   :  { %v16629_v1 = vpop.permute.xlu0 %8965 }
0x2e06   :  { %v8956_v0 = vpop.permute.xlu1 %8955 }
0x2e09   :  { %v16631_v60 = vpop.permute.xlu0 %8969 }
0x2e0a   :  { %v8960_v38 = vpop.permute.xlu1 %8959 }
0x2e0d   :  { %v16633_v21 = vpop.permute.xlu0 %8973 }
0x2e0e   :  { %v16635_v41 = vpop.permute.xlu1 %8963 }
0x2e11   :  { %v9108_v20 = vpop.permute.xlu0 %9107 }
0x2e12   :  { %v16645_v17 = vpop.permute.xlu1 %8967 }
0x2e9b   :  { %v11250_v63 = vpop.f32.mrb[124].mxu0 }
0x2e9c   :  { %v8900_v7 = vadd.f32 %v11250_v63, %v17089_v27  ;;  %v8820_v40 = vpop.f32.mrb[125].mxu0 }
0x2e9d   :  { %v8899_v35 = vadd.f32 %v8820_v40, %v17090_v4 }
0x2e9e   :  { %v16622_v19 = vadd.f32 %v16619_v48, %v8900_v7 }
0x2e9f   :  { %v16625_v47 = vadd.f32 %v16619_v48, %v8899_v35 }
0x2ea0   :  { %v8996_v13 = vadd.f32 %v8950_v44, %v16622_v19 }
0x2ea1   :  { %v8995_v46 = vadd.f32 %v8948_v62, %v16625_v47 }
0x2ea2   :  { %v10121_v55 = vmul.f32 -1.442695, %v8996_v13  ;;  %v9110_v13 = vpop.permute.xlu0 %9109 }
0x2ea3   :  { %v10120_v18 = vmul.f32 -1.442695, %v8995_v46  ;;  %v16663_v46 = vpop.permute.xlu1 %8971 }
0x2ea4   :  { %12113 = vpow2.f32 %v10121_v55 }
0x2ea5   :  { %12115 = vpow2.f32 %v10120_v18 }
0x2eae   :  { %v12114_v34 = vpop.eup %12113 }
0x2eaf   :  { %v12116_v51 = vpop.eup %12115  ;;  %v9060_v39 = vadd.f32 1.0, %v12114_v34 }
0x2eb0   :  { %v9059_v6 = vadd.f32 1.0, %v12116_v51  ;;  %v11253_v57 = vpop.f32.mrb[126].mxu0 }
0x2eb1   :  { %12117 = vrcp.f32 %v9060_v39  ;;  %v8902_v28 = vadd.f32 %v11253_v57, %v17091_v26  ;;  %v8830_v11 = vpop.f32.mrb[127].mxu0 }
0x2eb2   :  { %12119 = vrcp.f32 %v9059_v6  ;;  %v8901_v53 = vadd.f32 %v8830_v11, %v17092_v15 }
0x2eb3   :  { %v16640_v54 = vadd.f32 %v16619_v48, %v8902_v28 }
0x2eb4   :  { %v16643_v45 = vadd.f32 %v16619_v48, %v8901_v53  ;;  %v11256_v12 = vpop.f32.mrb[128].mxu0 }
0x2eb5   :  { %v8998_v5 = vadd.f32 %v8954_v59, %v16640_v54  ;;  %v8904_v52 = vadd.f32 %v11256_v12, %v17089_v27  ;;  %v8840_v42 = vpop.f32.mrb[129].mxu0  ;;  %v16679_v12 = vpop.permute.xlu1 %8975 }
0x2eb6   :  { %v8997_v24 = vadd.f32 %v8952_v50, %v16643_v45  ;;  %v8903_v23 = vadd.f32 %v8840_v42, %v17090_v4 }
0x2eb7   :  { %v10123_v3 = vmul.f32 -1.442695, %v8998_v5  ;;  %v16652_v14 = vadd.f32 %v16619_v48, %v8904_v52 }
0x2eb8   :  { %v10122_v36 = vmul.f32 -1.442695, %v8997_v24  ;;  %v16655_v44 = vadd.f32 %v16619_v48, %v8903_v23  ;;  %v11259_v62 = vpop.f32.mrb[130].mxu0 }
0x2eb9   :  { %12121 = vpow2.f32 %v10123_v3  ;;  %v9000_v63 = vadd.f32 %v8958_v8, %v16652_v14  ;;  %v8906_v7 = vadd.f32 %v11259_v62, %v17091_v26  ;;  %v8850_v40 = vpop.f32.mrb[131].mxu0 }
0x2eba   :  { %12123 = vpow2.f32 %v10122_v36  ;;  %v8999_v50 = vadd.f32 %v8956_v0, %v16655_v44  ;;  %v8905_v59 = vadd.f32 %v8850_v40, %v17092_v15 }
0x2ebb   :  { %v16661_v35 = vpop.eup %12117  ;;  %v10125_v55 = vmul.f32 -1.442695, %v9000_v63  ;;  %v16666_v18 = vadd.f32 %v16619_v48, %v8906_v7  ;;  %v16693_v7 = vpop.permute.xlu1 %8977 }
0x2ebc   :  { %v16668_v34 = vpop.eup %12119  ;;  %v10124_v8 = vmul.f32 -1.442695, %v8999_v50  ;;  %v16671_v51 = vadd.f32 %v16619_v48, %v8905_v59  ;;  %v9156_v39 = vmul.f32 %v16661_v35, %v9110_v13 }
0x2ebd   :  { %12125 = vpow2.f32 %v10125_v55  ;;  %v9002_v0 = vadd.f32 %v8962_v29, %v16666_v18  ;;  %v9155_v6 = vmul.f32 %v16668_v34, %v9108_v20 }
0x2ebe   :  { %12127 = vpow2.f32 %v10124_v8  ;;  %v9001_v57 = vadd.f32 %v8960_v38, %v16671_v51  ;;  %9189 = vrot.lane.b32.xlu0 %v9156_v39, %s12289_s23 }
0x2ebf   :  { %v10127_v28 = vmul.f32 -1.442695, %v9002_v0  ;;  %9187 = vrot.lane.b32.xlu1 %v9155_v6, %s12289_s23 }
0x2ec0   :  { %v10126_v11 = vmul.f32 -1.442695, %v9001_v57  ;;  %v11262_v53 = vpop.f32.mrb[132].mxu0 }
0x2ec1   :  { %12129 = vpow2.f32 %v10127_v28  ;;  %v8908_v5 = vadd.f32 %v11262_v53, %v17089_v27  ;;  %v8860_v52 = vpop.f32.mrb[133].mxu0 }
0x2ec2   :  { %12131 = vpow2.f32 %v10126_v11  ;;  %v8907_v29 = vadd.f32 %v8860_v52, %v17090_v4  ;;  %v9114_v11 = vpop.permute.xlu0 %9113  ;;  %v9112_v52 = vpop.permute.xlu1 %9111 }
0x2ec3   :  { %v12122_v20 = vpop.eup %12121  ;;  %v16684_v42 = vadd.f32 %v16619_v48, %v8908_v5 }
0x2ec4   :  { %v12124_v38 = vpop.eup %12123  ;;  %v9062_v24 = vadd.f32 1.0, %v12122_v20  ;;  %v16687_v23 = vadd.f32 %v16619_v48, %v8907_v29 }
0x2ec5   :  { %v9061_v3 = vadd.f32 1.0, %v12124_v38  ;;  %v9004_v36 = vadd.f32 %v16629_v1, %v16684_v42 }
0x2ec6   :  { %12133 = vrcp.f32 %v9062_v24  ;;  %v9003_v62 = vadd.f32 %v16635_v41, %v16687_v23 }
0x2ec7   :  { %v12126_v63 = vpop.eup %12125  ;;  %12135 = vrcp.f32 %v9061_v3  ;;  %v10129_v40 = vmul.f32 -1.442695, %v9004_v36  ;;  %v11265_v50 = vpop.f32.mrb[134].mxu0 }
0x2ec8   :  { %v12128_v59 = vpop.eup %12127  ;;  %v9064_v13 = vadd.f32 1.0, %v12126_v63  ;;  %v10128_v55 = vmul.f32 -1.442695, %v9003_v62  ;;  %v8910_v8 = vadd.f32 %v11265_v50, %v17091_v26  ;;  %v8870_v39 = vpop.f32.mrb[135].mxu0 }
0x2ec9   :  { %v9063_v0 = vadd.f32 1.0, %v12128_v59  ;;  %12137 = vpow2.f32 %v10129_v40  ;;  %v8909_v1 = vadd.f32 %v8870_v39, %v17092_v15  ;;  %v9118_v59 = vpop.permute.xlu0 %9117 }
0x2eca   :  { %12139 = vrcp.f32 %v9064_v13  ;;  %v16698_v6 = vadd.f32 %v16619_v48, %v8910_v8  ;;  %v9116_v8 = vpop.permute.xlu1 %9115 }
0x2ecb   :  { %v12130_v41 = vpop.eup %12129  ;;  %12141 = vrcp.f32 %v9063_v0  ;;  %v16701_v57 = vadd.f32 %v16619_v48, %v8909_v1 }
0x2ecc   :  { %v12132_v28 = vpop.eup %12131  ;;  %v9066_v53 = vadd.f32 1.0, %v12130_v41  ;;  %12143 = vpow2.f32 %v10128_v55  ;;  %v9006_v5 = vadd.f32 %v16631_v60, %v16698_v6 }
0x2ecd   :  { %v9065_v29 = vadd.f32 1.0, %v12132_v28  ;;  %v9005_v20 = vadd.f32 %v16645_v17, %v16701_v57 }
0x2ece   :  { %12145 = vrcp.f32 %v9066_v53  ;;  %v10131_v38 = vmul.f32 -1.442695, %v9006_v5 }
0x2ecf   :  { %12147 = vrcp.f32 %v9065_v29  ;;  %v10130_v24 = vmul.f32 -1.442695, %v9005_v20  ;;  %v11268_v3 = vpop.f32.mrb[136].mxu0 }
0x2ed0   :  { %v16707_v36 = vpop.eup %12133  ;;  %12149 = vpow2.f32 %v10131_v38  ;;  %v8912_v62 = vadd.f32 %v11268_v3, %v17089_v27  ;;  %v8880_v63 = vpop.f32.mrb[137].mxu0 }
0x2ed1   :  { %v16710_v40 = vpop.eup %12135  ;;  %12151 = vpow2.f32 %v10130_v24  ;;  %v8911_v60 = vadd.f32 %v8880_v63, %v17090_v4  ;;  %v9158_v50 = vmul.f32 %v16707_v36, %v9114_v11  ;;  %v9122_v3 = vpop.permute.xlu0 %9121 }
0x2ed2   :  { %v16715_v17 = vadd.f32 %v16619_v48, %v8912_v62  ;;  %v9157_v13 = vmul.f32 %v16710_v40, %v9112_v52  ;;  %v9120_v63 = vpop.permute.xlu1 %9119 }
0x2ed3   :  { %v12138_v55 = vpop.eup %12137  ;;  %v16719_v39 = vadd.f32 %v16619_v48, %v8911_v60  ;;  %9193 = vrot.lane.b32.xlu0 %v9158_v50, %s12289_s23 }
0x2ed4   :  { %v16722_v27 = vpop.eup %12139  ;;  %v9068_v0 = vadd.f32 1.0, %v12138_v55  ;;  %v9008_v4 = vadd.f32 %v16633_v21, %v16715_v17  ;;  %9191 = vrot.lane.b32.xlu1 %v9157_v13, %s12289_s23 }
0x2ed5   :  { %v16727_v1 = vpop.eup %12141  ;;  %v9007_v41 = vadd.f32 %v16663_v46, %v16719_v39  ;;  %v9160_v28 = vmul.f32 %v16722_v27, %v9118_v59 }
0x2ed6   :  { %v12144_v11 = vpop.eup %12143  ;;  %12153 = vrcp.f32 %v9068_v0  ;;  %v10133_v53 = vmul.f32 -1.442695, %v9008_v4  ;;  %v11271_v5 = vpop.f32.mrb[138].mxu0  ;;  %v9159_v52 = vmul.f32 %v16727_v1, %v9116_v8 }
0x2ed7   :  { %v9067_v29 = vadd.f32 1.0, %v12144_v11  ;;  %v10132_v20 = vmul.f32 -1.442695, %v9007_v41  ;;  %v8914_v38 = vadd.f32 %v11271_v5, %v17091_v26  ;;  %v8890_v21 = vpop.f32.mrb[139].mxu0  ;;  %9197 = vrot.lane.b32.xlu0 %v9160_v28, %s12289_s23  ;;  %v9126_v11 = vpop.permute.xlu0 %9125 }
0x2ed8   :  { %v16735_v24 = vpop.eup %12145  ;;  %12155 = vpow2.f32 %v10133_v53  ;;  %v8913_v46 = vadd.f32 %v8890_v21, %v17092_v15  ;;  %9195 = vrot.lane.b32.xlu1 %v9159_v52, %s12289_s23  ;;  %v9124_v5 = vpop.permute.xlu1 %9123 }
0x2ed9   :  { %v16739_v62 = vpop.eup %12147  ;;  %12157 = vrcp.f32 %v9067_v29  ;;  %v16742_v60 = vadd.f32 %v16619_v48, %v8914_v38  ;;  %v9162_v26 = vmul.f32 %v16735_v24, %v9122_v3 }
0x2eda   :  { %v12150_v50 = vpop.eup %12149  ;;  %12159 = vpow2.f32 %v10132_v20  ;;  %v16746_v59 = vadd.f32 %v16619_v48, %v8913_v46  ;;  %v9161_v13 = vmul.f32 %v16739_v62, %v9120_v63 }
0x2edb   :  { %v12152_v55 = vpop.eup %12151  ;;  %v9070_v15 = vadd.f32 1.0, %v12150_v50  ;;  %v9010_v8 = vadd.f32 %v16693_v7, %v16742_v60  ;;  %9201 = vrot.lane.b32.xlu0 %v9162_v26, %s12289_s23  ;;  %v9130_v3 = vpop.permute.xlu0 %9129 }
0x2edc   :  { %v9069_v0 = vadd.f32 1.0, %v12152_v55  ;;  %v9009_v4 = vadd.f32 %v16679_v12, %v16746_v59  ;;  %9199 = vrot.lane.b32.xlu1 %v9161_v13, %s12289_s23  ;;  %v9128_v63 = vpop.permute.xlu1 %9127 }
0x2edd   :  { %12161 = vrcp.f32 %v9070_v15  ;;  %v10135_v41 = vmul.f32 -1.442695, %v9010_v8 }
0x2ede   :  { %12163 = vrcp.f32 %v9069_v0  ;;  %v10134_v48 = vmul.f32 -1.442695, %v9009_v4 }
0x2edf   :  { %12165 = vpow2.f32 %v10135_v41  ;;  %v9134_v4 = vpop.permute.xlu0 %9133 }
0x2ee0   :  { %v16755_v28 = vpop.eup %12153  ;;  %12167 = vpow2.f32 %v10134_v48 }
0x2ee1   :  { %v9164_v53 = vmul.f32 %v16755_v28, %v9126_v11  ;;  %v9132_v11 = vpop.permute.xlu1 %9131 }
0x2ee2   :  { %v12156_v7 = vpop.eup %12155 }
0x2ee3   :  { %v16758_v52 = vpop.eup %12157  ;;  %v9072_v29 = vadd.f32 1.0, %v12156_v7  ;;  %9205 = vrot.lane.b32.xlu0 %v9164_v53, %s12289_s23 }
0x2ee4   :  { %v12160_v12 = vpop.eup %12159  ;;  %v9163_v20 = vmul.f32 %v16758_v52, %v9124_v5  ;;  %v9138_v5 = vpop.permute.xlu0 %9137 }
0x2ee5   :  { %12169 = vrcp.f32 %v9072_v29  ;;  %v9071_v38 = vadd.f32 1.0, %v12160_v12  ;;  %v9136_v12 = vpop.permute.xlu1 %9135 }
0x2ee6   :  { %9203 = vrot.lane.b32.xlu1 %v9163_v20, %s12289_s23 }
0x2ee7   :  { %v16763_v21 = vpop.eup %12161  ;;  %12171 = vrcp.f32 %v9071_v38 }
0x2ee8   :  { %v16765_v46 = vpop.eup %12163  ;;  %v9166_v26 = vmul.f32 %v16763_v21, %v9130_v3 }
0x2ee9   :  { %v12166_v50 = vpop.eup %12165  ;;  %v9165_v13 = vmul.f32 %v16765_v46, %v9128_v63 }
0x2eea   :  { %v12168_v55 = vpop.eup %12167  ;;  %v9074_v15 = vadd.f32 1.0, %v12166_v50  ;;  %9209 = vrot.lane.b32.xlu0 %v9166_v26, %s12289_s23 }
0x2eeb   :  { %v9073_v8 = vadd.f32 1.0, %v12168_v55  ;;  %9207 = vrot.lane.b32.xlu1 %v9165_v13, %s12289_s23 }
0x2eec   :  { %12173 = vrcp.f32 %v9074_v15 }
0x2eed   :  { %12175 = vrcp.f32 %v9073_v8 }
0x2eef   :  { %v16771_v0 = vpop.eup %12169 }
0x2ef0   :  { %v9168_v41 = vmul.f32 %v16771_v0, %v9134_v4 }
0x2ef1   :  { %v16774_v48 = vpop.eup %12171 }
0x2ef2   :  { %9213 = vrot.lane.b32.xlu0 %v9168_v41, %s12289_s23  ;;  %v9167_v53 = vmul.f32 %v16774_v48, %v9132_v11 }
0x2ef4   :  { %9211 = vrot.lane.b32.xlu1 %v9167_v53, %s12289_s23 }
0x2ef6   :  { %v16779_v7 = vpop.eup %12173 }
0x2ef7   :  { %v16781_v29 = vpop.eup %12175  ;;  %v9170_v20 = vmul.f32 %v16779_v7, %v9138_v5 }
0x2ef8   :  { %v9169_v38 = vmul.f32 %v16781_v29, %v9136_v12 }
0x2ef9   :  { %9217 = vrot.lane.b32.xlu0 %v9170_v20, %s12289_s23 }
0x2efa   :  { %9215 = vrot.lane.b32.xlu1 %v9169_v38, %s12289_s23 }
0x2f30   :  { %v9190_v3 = vpop.permute.xlu0 %9189 }
0x2f31   :  { %v9236_v63 = vadd.f32 %v9190_v3, %v16622_v19  ;;  %v9188_v26 = vpop.permute.xlu1 %9187 }
0x2f32   :  { %v9235_v50 = vadd.f32 %v9188_v26, %v16625_v47 }
0x2f33   :  { %12177 = vtanh.f32 %v9236_v63 }
0x2f34   :  { %12179 = vtanh.f32 %v9235_v50 }
0x2f3d   :  { %v12178_v13 = vpop.eup %12177 }
0x2f3e   :  { %v12180_v55 = vpop.eup %12179  ;;  %9301 = vrot.lane.b32.xlu0 %v12178_v13, %s12288_s22 }
0x2f3f   :  { %9299 = vrot.lane.b32.xlu1 %v12180_v55, %s12288_s22 }
0x2f45   :  { %v9194_v15 = vpop.permute.xlu0 %9193 }
0x2f46   :  { %v9238_v8 = vadd.f32 %v9194_v15, %v16640_v54  ;;  %v9192_v4 = vpop.permute.xlu1 %9191 }
0x2f47   :  { %v9237_v41 = vadd.f32 %v9192_v4, %v16643_v45 }
0x2f48   :  { %12181 = vtanh.f32 %v9238_v8 }
0x2f49   :  { %12183 = vtanh.f32 %v9237_v41  ;;  %v9198_v19 = vpop.permute.xlu0 %9197 }
0x2f4a   :  { %v9240_v11 = vadd.f32 %v9198_v19, %v16652_v14  ;;  %v9196_v47 = vpop.permute.xlu1 %9195 }
0x2f4b   :  { %v9239_v53 = vadd.f32 %v9196_v47, %v16655_v44 }
0x2f4c   :  { %12185 = vtanh.f32 %v9240_v11 }
0x2f4d   :  { %12187 = vtanh.f32 %v9239_v53  ;;  %v9202_v5 = vpop.permute.xlu0 %9201 }
0x2f4e   :  { %v9242_v12 = vadd.f32 %v9202_v5, %v16666_v18  ;;  %v9200_v20 = vpop.permute.xlu1 %9199 }
0x2f4f   :  { %v9241_v38 = vadd.f32 %v9200_v20, %v16671_v51 }
0x2f50   :  { %12189 = vtanh.f32 %v9242_v12 }
0x2f51   :  { %12191 = vtanh.f32 %v9241_v38 }
0x2f52   :  { %v12182_v54 = vpop.eup %12181 }
0x2f53   :  { %v12184_v45 = vpop.eup %12183  ;;  %9305 = vrot.lane.b32.xlu0 %v12182_v54, %s12288_s22  ;;  %v9268_v54 = vsub.f32 1.0, %v16661_v35 }
0x2f54   :  { %9303 = vrot.lane.b32.xlu1 %v12184_v45, %s12288_s22  ;;  %v9267_v45 = vsub.f32 1.0, %v16668_v34 }
0x2f55   :  { %v9206_v14 = vpop.permute.xlu0 %9205 }
0x2f56   :  { %v12186_v3 = vpop.eup %12185  ;;  %v9244_v44 = vadd.f32 %v9206_v14, %v16684_v42 }
0x2f57   :  { %v12188_v63 = vpop.eup %12187  ;;  %9309 = vrot.lane.b32.xlu0 %v12186_v3, %s12288_s22 }
0x2f58   :  { %12193 = vtanh.f32 %v9244_v44  ;;  %v9204_v18 = vpop.permute.xlu1 %9203  ;;  %9307 = vrot.lane.b32.xlu1 %v12188_v63, %s12288_s22  ;;  %v9363_v44 = vmul.f32 %v16668_v34, %v16035_v10  ;;  %v9365_v10 = vmul.f32 %v16710_v40, %v16050_v30 }
0x2f59   :  { %v9243_v51 = vadd.f32 %v9204_v18, %v16687_v23 }
0x2f5a   :  { %v12190_v26 = vpop.eup %12189 }
0x2f5b   :  { %v12192_v50 = vpop.eup %12191  ;;  %12195 = vtanh.f32 %v9243_v51  ;;  %9313 = vrot.lane.b32.xlu0 %v12190_v26, %s12288_s22  ;;  %v9270_v26 = vsub.f32 1.0, %v16707_v36 }
0x2f5c   :  { %v9210_v13 = vpop.permute.xlu0 %9209  ;;  %9311 = vrot.lane.b32.xlu1 %v12192_v50, %s12288_s22 }
0x2f5d   :  { %v9246_v55 = vadd.f32 %v9210_v13, %v16698_v6  ;;  %v9208_v42 = vpop.permute.xlu1 %9207  ;;  %v9269_v13 = vsub.f32 1.0, %v16710_v40  ;;  %v9274_v40 = vsub.f32 1.0, %v16735_v24 }
0x2f5e   :  { %v9245_v15 = vadd.f32 %v9208_v42, %v16701_v57 }
0x2f5f   :  { %12197 = vtanh.f32 %v9246_v55 }
0x2f60   :  { %12199 = vtanh.f32 %v9245_v15  ;;  %v9272_v15 = vsub.f32 1.0, %v16722_v27 }
0x2f62   :  { %v12194_v8 = vpop.eup %12193 }
0x2f63   :  { %9317 = vrot.lane.b32.xlu0 %v12194_v8, %s12288_s22 }
0x2f64   :  { %v9214_v4 = vpop.permute.xlu0 %9213 }
0x2f65   :  { %v12196_v23 = vpop.eup %12195  ;;  %v9248_v41 = vadd.f32 %v9214_v4, %v16715_v17 }
0x2f66   :  { %9315 = vrot.lane.b32.xlu1 %v12196_v23, %s12288_s22  ;;  %v9212_v19 = vpop.permute.xlu1 %9211  ;;  %v9271_v23 = vsub.f32 1.0, %v16727_v1 }
0x2f67   :  { %12201 = vtanh.f32 %v9248_v41  ;;  %v9247_v11 = vadd.f32 %v9212_v19, %v16719_v39  ;;  %v9368_v41 = vmul.f32 %v16722_v27, %v16061_v22  ;;  %v9370_v22 = vmul.f32 %v16735_v24, %v16075_v33 }
0x2f68   :  { %v9372_v33 = vmul.f32 %v16755_v28, %v16089_v61  ;;  %v9374_v61 = vmul.f32 %v16763_v21, %v16103_v25  ;;  %v9279_v25 = vsub.f32 1.0, %v16774_v48 }
0x2f69   :  { %v12198_v47 = vpop.eup %12197  ;;  %12203 = vtanh.f32 %v9247_v11 }
0x2f6a   :  { %v12200_v6 = vpop.eup %12199  ;;  %9321 = vrot.lane.b32.xlu0 %v12198_v47, %s12288_s22 }
0x2f6b   :  { %v9218_v57 = vpop.permute.xlu0 %9217  ;;  %9319 = vrot.lane.b32.xlu1 %v12200_v6, %s12288_s22 }
0x2f6c   :  { %v9250_v53 = vadd.f32 %v9218_v57, %v16742_v60  ;;  %v9216_v5 = vpop.permute.xlu1 %9215  ;;  %v9273_v57 = vsub.f32 1.0, %v16739_v62 }
0x2f6d   :  { %v9249_v12 = vadd.f32 %v9216_v5, %v16746_v59  ;;  %v9364_v59 = vmul.f32 %v16661_v35, %v16033_v9  ;;  %v9366_v9 = vmul.f32 %v16707_v36, %v16047_v16  ;;  %v9367_v36 = vmul.f32 %v16727_v1, %v16063_v58 }
0x2f6e   :  { %12205 = vtanh.f32 %v9250_v53  ;;  %v9369_v58 = vmul.f32 %v16739_v62, %v16077_v2  ;;  %v9371_v62 = vmul.f32 %v16758_v52, %v16091_v32 }
0x2f6f   :  { %12207 = vtanh.f32 %v9249_v12 }
0x2f71   :  { %v12202_v17 = vpop.eup %12201 }
0x2f72   :  { %9325 = vrot.lane.b32.xlu0 %v12202_v17, %s12288_s22  ;;  %v9276_v17 = vsub.f32 1.0, %v16755_v28 }
0x2f73   :  { %v12204_v20 = vpop.eup %12203 }
0x2f74   :  { %9323 = vrot.lane.b32.xlu1 %v12204_v20, %s12288_s22 }
0x2f78   :  { %v12206_v39 = vpop.eup %12205 }
0x2f79   :  { %v12208_v38 = vpop.eup %12207  ;;  %9329 = vrot.lane.b32.xlu0 %v12206_v39, %s12288_s22  ;;  %v9275_v39 = vsub.f32 1.0, %v16758_v52 }
0x2f7a   :  { %9327 = vrot.lane.b32.xlu1 %v12208_v38, %s12288_s22 }
0x2fb0   :  { %v9302_v60 = vpop.permute.xlu0 %9301 }
0x2fb1   :  { %v9348_v14 = vmul.f32 %v9302_v60, %v9268_v54  ;;  %v9300_v3 = vpop.permute.xlu1 %9299 }
0x2fb2   :  { %v9347_v63 = vmul.f32 %v9300_v3, %v9267_v45  ;;  %v9278_v45 = vsub.f32 1.0, %v16763_v21 }
0x2fb3   :  { %v9380_v18 = vadd.f32 %v9364_v59, %v9348_v14  ;;  %v9277_v14 = vsub.f32 1.0, %v16765_v46 }
0x2fb4   :  { %v9379_v51 = vadd.f32 %v9363_v44, %v9347_v63  ;;  %v9373_v44 = vmul.f32 %v16765_v46, %v16105_v31  ;;  %v9375_v31 = vmul.f32 %v16774_v48, %v16119_v43 }
0x2fb5   :  { %9413 = vrot.lane.b32.xlu0 %v9380_v18, %s12288_s22  ;;  %v9280_v18 = vsub.f32 1.0, %v16771_v0 }
0x2fb6   :  { %9411 = vrot.lane.b32.xlu1 %v9379_v51, %s12288_s22 }
0x2fc5   :  { %v9306_v50 = vpop.permute.xlu0 %9305 }
0x2fc6   :  { %v9350_v35 = vmul.f32 %v9306_v50, %v9270_v26  ;;  %v9304_v55 = vpop.permute.xlu1 %9303  ;;  %v9376_v26 = vmul.f32 %v16771_v0, %v16117_v49  ;;  %v9378_v49 = vmul.f32 %v16779_v7, %v16131_v37 }
0x2fc7   :  { %v9349_v34 = vmul.f32 %v9304_v55, %v9269_v13 }
0x2fc8   :  { %v9382_v42 = vadd.f32 %v9366_v9, %v9350_v35  ;;  %v9282_v35 = vsub.f32 1.0, %v16779_v7 }
0x2fc9   :  { %v9381_v8 = vadd.f32 %v9365_v10, %v9349_v34  ;;  %v9310_v4 = vpop.permute.xlu0 %9309  ;;  %v9281_v10 = vsub.f32 1.0, %v16781_v29 }
0x2fca   :  { %v9352_v19 = vmul.f32 %v9310_v4, %v9272_v15  ;;  %9417 = vrot.lane.b32.xlu0 %v9382_v42, %s12288_s22  ;;  %v9308_v16 = vpop.permute.xlu1 %9307  ;;  %v9377_v42 = vmul.f32 %v16781_v29, %v16133_v56 }
0x2fcb   :  { %v9351_v11 = vmul.f32 %v9308_v16, %v9271_v23  ;;  %9415 = vrot.lane.b32.xlu1 %v9381_v8, %s12288_s22 }
0x2fcc   :  { %v9384_v30 = vadd.f32 %v9368_v41, %v9352_v19 }
0x2fcd   :  { %v9383_v47 = vadd.f32 %v9367_v36, %v9351_v11  ;;  %v9314_v6 = vpop.permute.xlu0 %9313 }
0x2fce   :  { %v9354_v27 = vmul.f32 %v9314_v6, %v9274_v40  ;;  %9421 = vrot.lane.b32.xlu0 %v9384_v30, %s12288_s22  ;;  %v9312_v53 = vpop.permute.xlu1 %9311 }
0x2fcf   :  { %v9353_v1 = vmul.f32 %v9312_v53, %v9273_v57  ;;  %9419 = vrot.lane.b32.xlu1 %v9383_v47, %s12288_s22 }
0x2fd0   :  { %v9386_v5 = vadd.f32 %v9370_v22, %v9354_v27  ;;  %v12224_v22 = vld [vmem:[#allocation4 + $0x328] ss:$0 sm:$0xff] }
0x2fd1   :  { %v9385_v12 = vadd.f32 %v9369_v58, %v9353_v1 }
0x2fd2   :  { %9425 = vrot.lane.b32.xlu0 %v9386_v5, %s12288_s22 }
0x2fd3   :  { %9423 = vrot.lane.b32.xlu1 %v9385_v12, %s12288_s22 }
0x2fd5   :  { %v9318_v20 = vpop.permute.xlu0 %9317 }
0x2fd6   :  { %v9356_v24 = vmul.f32 %v9318_v20, %v9276_v17 }
0x2fd8   :  { %v9388_v38 = vadd.f32 %v9372_v33, %v9356_v24  ;;  %v9316_v2 = vpop.permute.xlu1 %9315 }
0x2fd9   :  { %v9355_v54 = vmul.f32 %v9316_v2, %v9275_v39 }
0x2fda   :  { %9429 = vrot.lane.b32.xlu0 %v9388_v38, %s12288_s22 }
0x2fdb   :  { %v9387_v60 = vadd.f32 %v9371_v62, %v9355_v54 }
0x2fdc   :  { %v9322_v59 = vpop.permute.xlu0 %9321 }
0x2fdd   :  { %9427 = vrot.lane.b32.xlu1 %v9387_v60, %s12288_s22  ;;  %v9358_v28 = vmul.f32 %v9322_v59, %v9278_v45  ;;  %v9320_v3 = vpop.permute.xlu1 %9319 }
0x2fde   :  { %v9357_v32 = vmul.f32 %v9320_v3, %v9277_v14 }
0x2fdf   :  { %v9390_v52 = vadd.f32 %v9374_v61, %v9358_v28 }
0x2fe0   :  { %v9389_v63 = vadd.f32 %v9373_v44, %v9357_v32 }
0x2fe1   :  { %9433 = vrot.lane.b32.xlu0 %v9390_v52, %s12288_s22 }
0x2fe2   :  { %9431 = vrot.lane.b32.xlu1 %v9389_v63, %s12288_s22 }
0x2fe4   :  { %v9326_v51 = vpop.permute.xlu0 %9325 }
0x2fe5   :  { %v9360_v50 = vmul.f32 %v9326_v51, %v9280_v18 }
0x2fe6   :  { %v9324_v21 = vpop.permute.xlu1 %9323 }
0x2fe7   :  { %v9392_v13 = vadd.f32 %v9376_v26, %v9360_v50  ;;  %v9359_v46 = vmul.f32 %v9324_v21, %v9279_v25 }
0x2fe9   :  { %v9391_v9 = vadd.f32 %v9375_v31, %v9359_v46  ;;  %9437 = vrot.lane.b32.xlu0 %v9392_v13, %s12288_s22 }
0x2feb   :  { %9435 = vrot.lane.b32.xlu1 %v9391_v9, %s12288_s22  ;;  %v9330_v55 = vpop.permute.xlu0 %9329 }
0x2fec   :  { %v9362_v0 = vmul.f32 %v9330_v55, %v9282_v35  ;;  %v9328_v34 = vpop.permute.xlu1 %9327 }
0x2fed   :  { %v9361_v43 = vmul.f32 %v9328_v34, %v9281_v10 }
0x2fee   :  { %v9394_v48 = vadd.f32 %v9378_v49, %v9362_v0 }
0x2fef   :  { %v9393_v15 = vadd.f32 %v9377_v42, %v9361_v43 }
0x2ff0   :  { %9441 = vrot.lane.b32.xlu0 %v9394_v48, %s12288_s22 }
0x2ff1   :  { %9439 = vrot.lane.b32.xlu1 %v9393_v15, %s12288_s22 }
0x3027   :  { %v9414_v4 = vpop.permute.xlu0 %9413 }
0x3028   :  { %v9412_v8 = vpop.permute.xlu1 %9411 }
0x3029   :  { %11280 = vmatprep.mubr.msk.f32.mxu1 %vm130_vm3, %v9412_v8 }
0x302a   :  { %11281 = vmatmul.mubr.msk.f32.vlgmr.msra.gmra.mrb[136].mxu1 %vm130_vm3, %v9414_v4 }
0x303c   :  { %v9418_v23 = vpop.permute.xlu0 %9417 }
0x303d   :  { %v9416_v37 = vpop.permute.xlu1 %9415 }
0x303e   :  { %11283 = vmatprep.mubr.msk.f32.mxu1 %vm130_vm3, %v9416_v37 }
0x303f   :  { %11284 = vmatmul.mubr.msk.f32.gmra.mrb[138].mxu1 %vm130_vm3, %v9418_v23 }
0x3040   :  { %v9422_v56 = vpop.permute.xlu0 %9421 }
0x3041   :  { %v9420_v7 = vpop.permute.xlu1 %9419 }
0x3042   :  { %11286 = vmatprep.mubr.msk.f32.mxu1 %vm130_vm3, %v9420_v7 }
0x3043   :  { %11287 = vmatmul.mubr.msk.f32.gmra.mrb[140].mxu1 %vm130_vm3, %v9422_v56 }
0x3044   :  { %v9426_v41 = vpop.permute.xlu0 %9425 }
0x3045   :  { %v9424_v29 = vpop.permute.xlu1 %9423 }
0x3046   :  { %11289 = vmatprep.mubr.msk.f32.mxu1 %vm130_vm3, %v9424_v29 }
0x3047   :  { %11290 = vmatmul.mubr.msk.f32.gmra.mrb[142].mxu1 %vm130_vm3, %v9426_v41 }
0x304c   :  { %v9430_v16 = vpop.permute.xlu0 %9429 }
0x304f   :  { %v9428_v19 = vpop.permute.xlu1 %9427 }
0x3050   :  { %11292 = vmatprep.mubr.msk.f32.mxu1 %vm130_vm3, %v9428_v19 }
0x3051   :  { %11293 = vmatmul.mubr.msk.f32.gmra.mrb[144].mxu1 %vm130_vm3, %v9430_v16 }
0x3053   :  { %v9434_v11 = vpop.permute.xlu0 %9433 }
0x3054   :  { %v9432_v36 = vpop.permute.xlu1 %9431 }
0x3055   :  { %11295 = vmatprep.mubr.msk.f32.mxu1 %vm130_vm3, %v9432_v36 }
0x3056   :  { %11296 = vmatmul.mubr.msk.f32.gmra.mrb[146].mxu1 %vm130_vm3, %v9434_v11 }
0x305b   :  { %v9438_v40 = vpop.permute.xlu0 %9437 }
0x305d   :  { %v9436_v30 = vpop.permute.xlu1 %9435 }
0x305e   :  { %11298 = vmatprep.mubr.msk.f32.mxu1 %vm130_vm3, %v9436_v30 }
0x305f   :  { %11299 = vmatmul.mubr.msk.f32.gmra.mrb[148].mxu1 %vm130_vm3, %v9438_v40 }
0x3062   :  { %v9442_v6 = vpop.permute.xlu0 %9441 }
0x3063   :  { %v9440_v47 = vpop.permute.xlu1 %9439 }
0x3064   :  { %11301 = vmatprep.mubr.msk.f32.mxu1 %vm130_vm3, %v9440_v47 }
0x3065   :  { %11302 = vmatmul.mubr.msk.f32.gmra.mrb[150].mxu1 %vm130_vm3, %v9442_v6 }
0x30fd   :  { %v11282_v57 = vpop.f32.mrb[136].mxu1 }
0x30fe   :  { %v9547_v27 = vadd.f32 %v12224_v22, %v11282_v57  ;;  %v9541_v53 = vpop.f32.mrb[137].mxu1 }
0x30ff   :  { %v9542_v58 = vadd.f32 %v12224_v22, %v9541_v53 }
0x3100   :  { %9686 = vst.msk [vmem:[%s16967_s4 + $0x188] sm:$0xff] %vm9620_vm9, %v9547_v27 }
0x3101   :  { %9685 = vst.msk [vmem:[%s16967_s4 + $0x180] sm:$0xff] %vm9620_vm9, %v9542_v58 }
0x3112   :  { %v11285_v1 = vpop.f32.mrb[138].mxu1 }
0x3113   :  { %v9557_v5 = vadd.f32 %v12224_v22, %v11285_v1  ;;  %v9551_v12 = vpop.f32.mrb[139].mxu1 }
0x3114   :  { %v9552_v17 = vadd.f32 %v12224_v22, %v9551_v12 }
0x3115   :  { %9688 = vst.msk [vmem:[%s16967_s4 + $0x198] sm:$0xff] %vm9620_vm9, %v9557_v5 }
0x3116   :  { %9687 = vst.msk [vmem:[%s16967_s4 + $0x190] sm:$0xff] %vm9620_vm9, %v9552_v17  ;;  %v11288_v20 = vpop.f32.mrb[140].mxu1 }
0x3117   :  { %v9567_v33 = vadd.f32 %v12224_v22, %v11288_v20  ;;  %v9561_v24 = vpop.f32.mrb[141].mxu1 }
0x3118   :  { %v9562_v39 = vadd.f32 %v12224_v22, %v9561_v24 }
0x3119   :  { %9690 = vst.msk [vmem:[%s16967_s4 + $0x1a8] sm:$0xff] %vm9620_vm9, %v9567_v33 }
0x311a   :  { %9689 = vst.msk [vmem:[%s16967_s4 + $0x1a0] sm:$0xff] %vm9620_vm9, %v9562_v39  ;;  %v11291_v38 = vpop.f32.mrb[142].mxu1 }
0x311b   :  { %v9577_v2 = vadd.f32 %v12224_v22, %v11291_v38  ;;  %v9571_v62 = vpop.f32.mrb[143].mxu1 }
0x311c   :  { %v9572_v54 = vadd.f32 %v12224_v22, %v9571_v62 }
0x311d   :  { %9692 = vst.msk [vmem:[%s16967_s4 + $0x1b8] sm:$0xff] %vm9620_vm9, %v9577_v2 }
0x311e   :  { %9691 = vst.msk [vmem:[%s16967_s4 + $0x1b0] sm:$0xff] %vm9620_vm9, %v9572_v54 }
0x3124   :  { %v11294_v60 = vpop.f32.mrb[144].mxu1 }
0x3125   :  { %v9587_v45 = vadd.f32 %v12224_v22, %v11294_v60  ;;  %v9581_v59 = vpop.f32.mrb[145].mxu1 }
0x3126   :  { %v9582_v14 = vadd.f32 %v12224_v22, %v9581_v59 }
0x3127   :  { %9694 = vst.msk [vmem:[%s16967_s4 + $0x1c8] sm:$0xff] %vm9620_vm9, %v9587_v45 }
0x3128   :  { %9693 = vst.msk [vmem:[%s16967_s4 + $0x1c0] sm:$0xff] %vm9620_vm9, %v9582_v14 }
0x3129   :  { %v11297_v61 = vpop.f32.mrb[146].mxu1 }
0x312a   :  { %v9597_v28 = vadd.f32 %v12224_v22, %v11297_v61  ;;  %v9591_v3 = vpop.f32.mrb[147].mxu1 }
0x312b   :  { %v9592_v44 = vadd.f32 %v12224_v22, %v9591_v3 }
0x312c   :  { %9696 = vst.msk [vmem:[%s16967_s4 + $0x1d8] sm:$0xff] %vm9620_vm9, %v9597_v28 }
0x312d   :  { %9695 = vst.msk [vmem:[%s16967_s4 + $0x1d0] sm:$0xff] %vm9620_vm9, %v9592_v44 }
0x3132   :  { %v11300_v32 = vpop.f32.mrb[148].mxu1 }
0x3133   :  { %v9607_v52 = vadd.f32 %v12224_v22, %v11300_v32  ;;  %v9601_v63 = vpop.f32.mrb[149].mxu1 }
0x3134   :  { %v9602_v18 = vadd.f32 %v12224_v22, %v9601_v63 }
0x3135   :  { %9698 = vst.msk [vmem:[%s16967_s4 + $0x1e8] sm:$0xff] %vm9620_vm9, %v9607_v52 }
0x3136   :  { %9697 = vst.msk [vmem:[%s16967_s4 + $0x1e0] sm:$0xff] %vm9620_vm9, %v9602_v18 }
0x3138   :  { %v11303_v51 = vpop.f32.mrb[150].mxu1 }
0x3139   :  { %v9617_v26 = vadd.f32 %v12224_v22, %v11303_v51  ;;  %v9611_v50 = vpop.f32.mrb[151].mxu1 }
0x313a   :  { %v9612_v25 = vadd.f32 %v12224_v22, %v9611_v50 }
0x313b   :  { %9700 = vst.msk [vmem:[%s16967_s4 + $0x1f8] sm:$0xff] %vm9620_vm9, %v9617_v26 }
0x313c   :  { %9699 = vst.msk [vmem:[%s16967_s4 + $0x1f0] sm:$0xff] %vm9620_vm9, %v9612_v25 }
0x313d   :  { %9709 = vsyncpa [#allocation5], 1 }

</bundles_post_ra>
